<compile_context>
chip_gen: v5e
topology: v5e:2x2
jax: 0.10.0
libtpu: 0.0.40
codegen_flags: <defaults>
</compile_context>

<pallas_src>
import math

import numpy as np
import jax
import jax.numpy as jnp
from jax import lax
from jax.experimental import pallas as pl
from jax.experimental.pallas import tpu as pltpu

KSIZE = 5


# ---------------------------------------------------------------------------
# host-side parameter packing
# ---------------------------------------------------------------------------
def _round8(n):
    return ((n + 7) // 8) * 8


def _taps(d, L, ksize=KSIZE):
    """(tap k, causal shift s) pairs whose receptive field reaches real data;
    taps with s >= L only see left padding and contribute exactly zero."""
    out = [(k, (ksize - 1 - k) * d) for k in range(ksize)]
    return [(k, s) for (k, s) in out if s < L]


class _WPack:
    """Vertically stacks same-width weight matrices into one bf16 slab."""

    def __init__(self, width):
        self.width = width
        self.chunks = []
        self.n = 0

    def add(self, mat):
        mat = np.asarray(mat, np.float32)
        r, c = mat.shape
        assert c == self.width and r % 8 == 0, (mat.shape, self.width)
        off = self.n
        rp = ((r + 15) // 16) * 16           # keep bf16 sublane-tile alignment
        if rp != r:
            mat = np.pad(mat, ((0, rp - r), (0, 0)))
        self.chunks.append(mat)
        self.n += rp
        return (off, r)

    def finalize(self):
        return jnp.asarray(np.concatenate(self.chunks, axis=0),
                           dtype=jnp.bfloat16)


class _BPack:
    """Packs (1, C<=128) bias / LN rows into one (n,128) f32 slab."""

    def __init__(self, width=128):
        self.width = width
        self.rows = []

    def add(self, row):
        row = np.asarray(row, np.float32).reshape(1, -1)
        c = row.shape[1]
        assert c <= self.width
        idx = len(self.rows)
        self.rows.append(np.pad(row, ((0, 0), (0, self.width - c))))
        return (idx, c)

    def finalize(self):
        return jnp.asarray(np.concatenate(self.rows, axis=0),
                           dtype=jnp.float32)


def _bdiag(a, b, rows_a=None, rows_b=None):
    a = np.asarray(a, np.float32)
    b = np.asarray(b, np.float32)
    ra = a.shape[0] if rows_a is None else rows_a
    rb = b.shape[0] if rows_b is None else rows_b
    out = np.zeros((ra + rb, a.shape[1] + b.shape[1]), np.float32)
    out[:a.shape[0], :a.shape[1]] = a
    out[ra:ra + b.shape[0], a.shape[1]:] = b
    return out


def pack_params(params, *, L, ksize=KSIZE):
    w128 = _WPack(128)
    w64 = _WPack(64)
    bias = _BPack(128)

    def np32(a):
        return np.asarray(a, np.float32)

    # ---- main temporal stack (512 -> 128 -> 128), tap-packed ---------------
    tm_meta = []
    for li, lyr in enumerate(params['temporal']):
        d = 2 ** li
        taps = _taps(d, L, ksize)
        shifts = [s for _, s in taps]
        w1 = np.concatenate([np32(lyr['w1'][k]) for k, _ in taps], axis=0)
        w2 = np.concatenate([np32(lyr['w2'][k]) for k, _ in taps], axis=0)
        m = {'shifts': shifts,
             'w1': w128.add(w1), 'b1': bias.add(lyr['b1']),
             'w2': w128.add(w2), 'b2': bias.add(lyr['b2']),
             'wd': None, 'bd': None}
        if 'wd' in lyr:
            m['wd'] = w128.add(np32(lyr['wd']))
            m['bd'] = bias.add(lyr['bd'])
        tm_meta.append(m)

    # ---- joint (lane-packed) aux stack: temporal1 || temporal2 -------------
    t1, t2 = params['temporal1'], params['temporal2']
    cin1 = np32(t1[0]['w1']).shape[1]
    cin2 = np32(t2[0]['w1']).shape[1]
    ra, rb = _round8(cin1), _round8(cin2)          # 128, 40
    aux_meta = []
    for li in range(len(t1)):
        d = 2 ** li
        taps = _taps(d, L, ksize)
        shifts = [s for _, s in taps]
        l1, l2 = t1[li], t2[li]
        ia, ib = (ra, rb) if li == 0 else (np32(l1['w1']).shape[1],
                                           np32(l2['w1']).shape[1])
        w1 = np.concatenate(
            [_bdiag(np32(l1['w1'][k]), np32(l2['w1'][k]), ia, ib)
             for k, _ in taps], axis=0)
        w2 = np.concatenate(
            [_bdiag(np32(l1['w2'][k]), np32(l2['w2'][k]))
             for k, _ in taps], axis=0)
        b1 = np.concatenate([np32(l1['b1']), np32(l2['b1'])], axis=1)
        b2 = np.concatenate([np32(l1['b2']), np32(l2['b2'])], axis=1)
        m = {'shifts': shifts,
             'w1': w64.add(w1), 'b1': bias.add(b1),
             'w2': w64.add(w2), 'b2': bias.add(b2),
             'wd': None, 'bd': None}
        assert ('wd' in l1) == ('wd' in l2)
        if 'wd' in l1:
            wd = _bdiag(np32(l1['wd']), np32(l2['wd']), ia, ib)
            bd = np.concatenate([np32(l1['bd']), np32(l2['bd'])], axis=1)
            m['wd'] = w64.add(wd)
            m['bd'] = bias.add(bd)
        aux_meta.append(m)

    # ---- fusion head (packed encoders, padded regressor) -------------------
    fu = params['fusion']
    wr = np32(fu['wr'])
    br = np32(fu['br'])
    fusion_meta = {
        'w_kqv0': w128.add(np.pad(np32(fu['w_kqv0']), ((0, 0), (0, 32)))),
        'b_kqv0': bias.add(np.pad(np32(fu['b_kqv0']), ((0, 0), (0, 32)))),
        'w_k12': w64.add(_bdiag(fu['we2'], fu['we3'])),
        'b_k12': bias.add(np.concatenate([np32(fu['be2']), np32(fu['be3'])],
                                         axis=1)),
        'w_qv12': w128.add(_bdiag(fu['w_qv1'], fu['w_qv2'])),
        'b_qv12': bias.add(np.concatenate([np32(fu['b_qv1']),
                                           np32(fu['b_qv2'])], axis=1)),
        'wr': w128.add(np.pad(wr, ((0, 0), (0, 128 - wr.shape[1])))),
        'br': bias.add(np.pad(br, ((0, 0), (0, 128 - br.shape[1])))),
        'ln_gamma': bias.add(np32(fu['ln_gamma']).reshape(1, -1)),
        'ln_beta': bias.add(np32(fu['ln_beta']).reshape(1, -1)),
    }

    return {
        'w512': jnp.asarray(np32(params['spatial_w']), dtype=jnp.bfloat16),
        'sb': jnp.asarray(np32(params['spatial_b'])),
        'bias': bias.finalize(),
        'w128': w128.finalize(),
        'w64': w64.finalize(),
        'meta': {'tm': tm_meta, 'aux': aux_meta, 'fusion': fusion_meta,
                 'aux_pad': (ra, rb), 'ksize': ksize},
    }


# ---------------------------------------------------------------------------
# the fused forward kernel
# ---------------------------------------------------------------------------
def make_kernel(meta, *, L, TR):
    tm_meta = meta['tm']
    aux_meta = meta['aux']
    fu = meta['fusion']

    def kernel(frames_ref, aux_ref, w512_ref, sb_ref, bias_ref,
               w128_ref, w64_ref, out_ref):
        # Row position inside its length-L sequence; row blocks contain whole
        # sequences, so this is grid-step independent.
        pos = lax.broadcasted_iota(jnp.int32, (TR, 1), 0) % L
        biases = bias_ref[...]                       # (n_bias, 128) f32

        def brow(ent):
            idx, width = ent
            return biases[idx:idx + 1, :width]

        def wslab(ref, ent):
            off, rows = ent
            return ref[off:off + rows, :]

        def mm(a, w):                                # bf16 x bf16 -> f32 MXU
            return jnp.dot(a.astype(jnp.bfloat16), w,
                           preferred_element_type=jnp.float32)

        def shifted_cat(x, shifts):
            # Build [shift_s0(x) | ... | x] so one deep-contraction matmul
            # replaces K per-tap matmuls + (R,R) shift matmuls.
            pieces = []
            for s in shifts:
                if s == 0:
                    pieces.append(x)
                else:
                    zpad = jnp.zeros((s, x.shape[1]), x.dtype)
                    sh = jnp.concatenate([zpad, x[:TR - s, :]], axis=0)
                    pieces.append(jnp.where(pos >= s, sh, 0.0))
            if len(pieces) == 1:
                return pieces[0]
            return jnp.concatenate(pieces, axis=1)

        def conv(x, wref, w_ent, b_ent, shifts):
            y = mm(shifted_cat(x, shifts), wslab(wref, w_ent)) + brow(b_ent)
            return jnp.maximum(y, 0.0)

        def tcn(x, wref, layers):
            for m in layers:
                h = conv(x, wref, m['w1'], m['b1'], m['shifts'])
                h = conv(h, wref, m['w2'], m['b2'], m['shifts'])
                if m['wd'] is not None:              # 1x1 downsample residual
                    res = mm(x, wslab(wref, m['wd'])) + brow(m['bd'])
                else:
                    res = x
                x = jnp.maximum(h + res, 0.0)
            return x

        # ---- spatial backbone stub: flattened frame -> embedding ----------
        feat = mm(frames_ref[...], w512_ref[...]) + sb_ref[...]

        # ---- temporal stacks (main + lane-packed joint aux) ----------------
        xf = tcn(feat, w128_ref, tm_meta)            # (TR, 128)
        aux = tcn(aux_ref[...], w64_ref, aux_meta)   # (TR, 64) = [stack1|stack2]

        # ---- fusion encoders: [K0|Q0|V0], [K1|K2], [Q1|V1|Q2|V2] -----------
        kqv0 = mm(xf, wslab(w128_ref, fu['w_kqv0'])) + brow(fu['b_kqv0'])
        k0, q0, v0 = kqv0[:, 0:32], kqv0[:, 32:64], kqv0[:, 64:96]
        k12 = mm(aux, wslab(w64_ref, fu['w_k12'])) + brow(fu['b_k12'])
        qv12 = mm(k12, wslab(w128_ref, fu['w_qv12'])) + brow(fu['b_qv12'])
        k1, k2 = k12[:, 0:32], k12[:, 32:64]
        q1, v1 = qv12[:, 0:32], qv12[:, 32:64]
        q2, v2 = qv12[:, 64:96], qv12[:, 96:128]

        # ---- 3-token attention (per row) -----------------------------------
        ks, qs, vs = (k0, k1, k2), (q0, q1, q2), (v0, v1, v2)
        inv_sqrt = 1.0 / math.sqrt(32.0)
        sc = [[jnp.sum(ks[i] * qs[j], axis=-1, keepdims=True) * inv_sqrt
               for j in range(3)] for i in range(3)]
        outs = []
        for i in range(3):
            mx = jnp.maximum(jnp.maximum(sc[i][0], sc[i][1]), sc[i][2])
            e = [jnp.exp(sc[i][j] - mx) for j in range(3)]
            inv_den = pl.reciprocal(e[0] + e[1] + e[2], approx=True)
            o = (e[0] * vs[0] + e[1] * vs[1] + e[2] * vs[2]) * inv_den
            outs.append(o + vs[i])                   # attention + V residual

        # ---- LayerNorm over the flattened (3, 32) token block per row ------
        tot = outs[0] + outs[1] + outs[2]
        mean = jnp.sum(tot, axis=-1, keepdims=True) * (1.0 / 96.0)
        var = (jnp.sum((outs[0] - mean) ** 2 + (outs[1] - mean) ** 2
                       + (outs[2] - mean) ** 2, axis=-1, keepdims=True)
               * (1.0 / 96.0))
        inv_std = lax.rsqrt(var + 1e-5)
        gamma = brow(fu['ln_gamma'])
        beta = brow(fu['ln_beta'])
        normed = [(outs[i] - mean) * inv_std * gamma[:, 32 * i:32 * i + 32]
                  + beta[:, 32 * i:32 * i + 32] for i in range(3)]

        # ---- regressor: lane-dense (TR,128) store (wr zero-padded) ---------
        cat = jnp.concatenate([xf, normed[0], normed[1], normed[2]], axis=1)
        out_ref[...] = mm(cat, wslab(w128_ref, fu['wr'])) + brow(fu['br'])

    return kernel


def fused_forward_pallas(frames, aux, pk, N, L):
    R = N * L
    meta = pk['meta']
    # Row tile = whole sequences, >=128 rows when the batch allows (MXU fill);
    # activations scale O(TR) so large batches stay inside VMEM on every chip.
    TR = min(R, max(L, (128 // L) * L))
    while R % TR:
        TR -= L
    if TR % 8 != 0 and TR != R:
        TR = R

    kernel = make_kernel(meta, L=L, TR=TR)
    F = frames.shape[1]
    A = aux.shape[1]

    return pl.pallas_call(
        kernel,
        out_shape=jax.ShapeDtypeStruct((R, 128), jnp.float32),
        grid=(R // TR,),
        in_specs=[
            pl.BlockSpec((TR, F), lambda i: (i, 0)),
            pl.BlockSpec((TR, A), lambda i: (i, 0)),
            pl.BlockSpec(pk['w512'].shape, lambda i: (0, 0)),
            pl.BlockSpec(pk['sb'].shape, lambda i: (0, 0)),
            pl.BlockSpec(pk['bias'].shape, lambda i: (0, 0)),
            pl.BlockSpec(pk['w128'].shape, lambda i: (0, 0)),
            pl.BlockSpec(pk['w64'].shape, lambda i: (0, 0)),
        ],
        out_specs=pl.BlockSpec((TR, 128), lambda i: (i, 0)),
        compiler_params=pltpu.CompilerParams(
            dimension_semantics=("parallel",),
            vmem_limit_bytes=32 * 1024 * 1024),
    )(frames, aux, pk['w512'], pk['sb'], pk['bias'], pk['w128'], pk['w64'])


# ---------------------------------------------------------------------------
# pure-JAX reference with identical semantics and matched matmul precision
# (operands rounded to bf16, f32 accumulation) so the tolerance check
# validates kernel / packing logic rather than mixed-precision drift.
# ---------------------------------------------------------------------------
def model_forward_ref(frames, x1r, x2r, params, N, L, ksize=KSIZE):
    hp = lax.Precision.HIGHEST
    R = N * L

    def bf(a):
        return a.astype(jnp.bfloat16)

    def lin(x, w, b):
        return jnp.dot(bf(x), bf(w), preferred_element_type=jnp.float32) + b

    def conv(xnlc, w, b, d, relu):
        K = w.shape[0]
        Lx = xnlc.shape[1]
        pad = (K - 1) * d
        xp = jnp.pad(xnlc, ((0, 0), (pad, 0), (0, 0)))
        out = sum(jnp.einsum('nlc,co->nlo', bf(xp[:, k * d:k * d + Lx, :]),
                             bf(w[k]), preferred_element_type=jnp.float32)
                  for k in range(K))
        out = out + b
        return jnp.maximum(out, 0.0) if relu else out

    def tcn(xnlc, layers):
        for i, lyr in enumerate(layers):
            d = 2 ** i
            h = conv(xnlc, lyr['w1'], lyr['b1'], d, True)
            h = conv(h, lyr['w2'], lyr['b2'], d, True)
            if 'wd' in lyr:
                res = jnp.einsum('nlc,co->nlo', bf(xnlc), bf(lyr['wd']),
                                 preferred_element_type=jnp.float32) + lyr['bd']
            else:
                res = xnlc
            xnlc = jnp.maximum(h + res, 0.0)
        return xnlc

    feat = lin(frames, params['spatial_w'], params['spatial_b'])
    xf = tcn(feat.reshape(N, L, -1), params['temporal']).reshape(R, -1)
    a1 = tcn(x1r.reshape(N, L, -1), params['temporal1']).reshape(R, -1)
    a2 = tcn(x2r.reshape(N, L, -1), params['temporal2']).reshape(R, -1)

    f = params['fusion']
    kqv0 = lin(xf, f['w_kqv0'], f['b_kqv0'])
    k0, q0, v0 = kqv0[:, :32], kqv0[:, 32:64], kqv0[:, 64:]
    k1 = lin(a1, f['we2'], f['be2'])
    qv1 = lin(k1, f['w_qv1'], f['b_qv1'])
    q1, v1 = qv1[:, :32], qv1[:, 32:]
    k2 = lin(a2, f['we3'], f['be3'])
    qv2 = lin(k2, f['w_qv2'], f['b_qv2'])
    q2, v2 = qv2[:, :32], qv2[:, 32:]

    Kt = jnp.stack((k0, k1, k2), axis=-2)
    Q = jnp.stack((q0, q1, q2), axis=-2)
    V = jnp.stack((v0, v1, v2), axis=-2)
    scores = jnp.einsum('rik,rjk->rij', Kt, Q, precision=hp) / math.sqrt(32.0)
    scores = jax.nn.softmax(scores, axis=-1)
    out = jnp.einsum('rij,rjk->rik', scores, V, precision=hp) + V
    mean = out.mean(axis=(-2, -1), keepdims=True)
    var = ((out - mean) ** 2).mean(axis=(-2, -1), keepdims=True)
    out = (out - mean) * lax.rsqrt(var + 1e-5) * f['ln_gamma'] + f['ln_beta']
    cat = jnp.concatenate([xf, out.reshape(R, -1)], axis=-1)
    return jnp.dot(bf(cat), bf(f['wr']),
                   preferred_element_type=jnp.float32) + f['br']


# ---------------------------------------------------------------------------
# full my_2d1ddy forward wrapper
# ---------------------------------------------------------------------------
def model_forward(x, x1, x2, params, packed=None, use_pallas=True):
    N, L, C, H, W = x.shape
    R = N * L
    frames = x.reshape(R, C * H * W)                 # channel-last rows
    x1r = x1.astype(jnp.float32).reshape(R, -1)      # (N*L, 128)
    x2r = x2.astype(jnp.float32).reshape(R, -1)      # (N*L, 39)
    if use_pallas:
        ra, rb = packed['meta']['aux_pad']
        aux = jnp.concatenate(
            [jnp.pad(x1r, ((0, 0), (0, ra - x1r.shape[1]))),
             jnp.pad(x2r, ((0, 0), (0, rb - x2r.shape[1])))], axis=1)
        out = fused_forward_pallas(frames, aux, packed, N, L)[:, :8]
    else:
        out = model_forward_ref(frames, x1r, x2r, params, N, L)
    return out.reshape(N, L, 8)


# ---------------------------------------------------------------------------
# deterministic parameter init (channel-last conv weights)
# ---------------------------------------------------------------------------
def init_params(key, c=3, h=16, w=16, embedding_dim=512, ksize=KSIZE):
    keys = iter(jax.random.split(key, 128))
    s = 0.05

    def rn(shape, scale=s):
        return jax.random.normal(next(keys), shape, jnp.float32) * scale

    def init_tcn(c_in, channels):
        layers = []
        prev = c_in
        for c_out in channels:
            lyr = {'w1': rn((ksize, prev, c_out)), 'b1': rn((1, c_out)),
                   'w2': rn((ksize, c_out, c_out)), 'b2': rn((1, c_out))}
            if prev != c_out:
                lyr['wd'] = rn((prev, c_out))
                lyr['bd'] = rn((1, c_out))
            layers.append(lyr)
            prev = c_out
        return layers

    return {
        'spatial_w': rn((c * h * w, embedding_dim)),
        'spatial_b': rn((1, embedding_dim)),
        # channels[-1] must be embedding_dim//4 = 128 (encoder1 / regressor)
        'temporal': init_tcn(embedding_dim, [128, 128]),
        'temporal1': init_tcn(128, [32, 32, 32, 32]),
        'temporal2': init_tcn(39, [32, 32, 32, 32]),
        'fusion': {
            'w_kqv0': rn((128, 96)), 'b_kqv0': rn((1, 96)),   # [enc1|Q1|V1]
            'we2': rn((32, 32)), 'be2': rn((1, 32)),
            'w_qv1': rn((32, 64)), 'b_qv1': rn((1, 64)),      # [Q2|V2]
            'we3': rn((32, 32)), 'be3': rn((1, 32)),
            'w_qv2': rn((32, 64)), 'b_qv2': rn((1, 64)),      # [Q3|V3]
            'ln_gamma': 1.0 + rn((3, 32), 0.1),
            'ln_beta': rn((3, 32), 0.1),
            'wr': rn((224, 8)), 'br': rn((1, 8)),
        },
    }


# ---------------------------------------------------------------------------
if __name__ == "__main__":
    key = jax.random.PRNGKey(0)
    kx, k1, k2, kp = jax.random.split(key, 4)

    N, L, C, H, W = 2, 8, 3, 16, 16
    x = jax.random.normal(kx, (N, L, C, H, W), jnp.float32)   # video frames
    x1 = jax.random.normal(k1, (N, L, 128), jnp.float32)      # aux feature 1
    x2 = jax.random.normal(k2, (N, L, 39), jnp.float32)       # aux feature 2
    params = init_params(kp, C, H, W)
    packed = pack_params(params, L=L)

    out = model_forward(x, x1, x2, params, packed=packed, use_pallas=True)
    out = jax.block_until_ready(out)
    ref = model_forward(x, x1, x2, params, use_pallas=False)
    ref = jax.block_until_ready(ref)

    assert out.shape == (N, L, 8), out.shape
    if not jnp.allclose(out, ref, atol=1e-2, rtol=1e-2):
        raise AssertionError(
            f"pallas/ref mismatch, max err {float(jnp.max(jnp.abs(out - ref)))}")
    print("KERNEL_OK")
</pallas_src>

<mosaic_0001>
module attributes {stable_mosaic.version = 11 : i64} {
  func.func @kernel(%arg0: i32, %arg1: memref<16x768xf32, #tpu.memory_space<vmem>>, %arg2: memref<16x168xf32, #tpu.memory_space<vmem>>, %arg3: memref<768x512xbf16, #tpu.memory_space<vmem>>, %arg4: memref<1x512xf32, #tpu.memory_space<vmem>>, %arg5: memref<20x128xf32, #tpu.memory_space<vmem>>, %arg6: memref<5152x128xbf16, #tpu.memory_space<vmem>>, %arg7: memref<2304x64xbf16, #tpu.memory_space<vmem>>, %arg8: memref<16x128xf32, #tpu.memory_space<vmem>>) attributes {dimension_semantics = [#tpu.dimension_semantics<parallel>], iteration_bounds = array<i64: 1>, scalar_prefetch = 0 : i64, scratch_operands = 0 : i64, tpu.core_type = #tpu.core_type<tc>, window_params = [{transform_indices = @transform_0, window_bounds = array<i64: 16, 768>}, {transform_indices = @transform_1, window_bounds = array<i64: 16, 168>}, {pipeline_mode = #tpu.pipeline_mode<synchronous>, transform_indices = @transform_2, window_bounds = array<i64: 768, 512>}, {pipeline_mode = #tpu.pipeline_mode<synchronous>, transform_indices = @transform_3, window_bounds = array<i64: 1, 512>}, {pipeline_mode = #tpu.pipeline_mode<synchronous>, transform_indices = @transform_4, window_bounds = array<i64: 20, 128>}, {pipeline_mode = #tpu.pipeline_mode<synchronous>, transform_indices = @transform_5, window_bounds = array<i64: 5152, 128>}, {pipeline_mode = #tpu.pipeline_mode<synchronous>, transform_indices = @transform_6, window_bounds = array<i64: 2304, 64>}, {transform_indices = @transform_7, window_bounds = array<i64: 16, 128>}]} {
    %0 = tpu.iota {dimensions = array<i32: 0>} : vector<16x1xi32>
    %c8_i32 = arith.constant 8 : i32
    %c0_i32 = arith.constant 0 : i32
    %1 = arith.cmpi eq, %c8_i32, %c0_i32 : i32
    %c1_i32 = arith.constant 1 : i32
    %2 = arith.select %1, %c1_i32, %c8_i32 : i32
    %3 = vector.broadcast %2 : i32 to vector<16x1xi32>
    %4 = arith.remsi %0, %3 : vector<16x1xi32>
    %c0_i32_0 = arith.constant 0 : i32
    %5 = vector.broadcast %c0_i32_0 : i32 to vector<16x1xi32>
    %6 = arith.cmpi ne, %4, %5 : vector<16x1xi32>
    %c0_i32_1 = arith.constant 0 : i32
    %7 = vector.broadcast %c0_i32_1 : i32 to vector<16x1xi32>
    %8 = arith.cmpi slt, %4, %7 : vector<16x1xi32>
    %c0_i32_2 = arith.constant 0 : i32
    %9 = arith.cmpi slt, %2, %c0_i32_2 : i32
    %10 = vector.broadcast %9 : i1 to vector<16x1xi1>
    %11 = vector.broadcast %10 : vector<16x1xi1> to vector<16x1xi1>
    %12 = arith.xori %8, %11 : vector<16x1xi1>
    %13 = arith.andi %12, %6 : vector<16x1xi1>
    %14 = vector.broadcast %2 : i32 to vector<16x1xi32>
    %15 = arith.addi %4, %14 : vector<16x1xi32>
    %16 = arith.select %13, %15, %4 : vector<16x1xi1>, vector<16x1xi32>
    %c0 = arith.constant 0 : index
    %c0_3 = arith.constant 0 : index
    %17 = vector.load %arg5[%c0, %c0_3] : memref<20x128xf32, #tpu.memory_space<vmem>>, vector<20x128xf32>
    %c0_4 = arith.constant 0 : index
    %c0_5 = arith.constant 0 : index
    %18 = vector.load %arg1[%c0_4, %c0_5] : memref<16x768xf32, #tpu.memory_space<vmem>>, vector<16x768xf32>
    %c0_6 = arith.constant 0 : index
    %c0_7 = arith.constant 0 : index
    %19 = vector.load %arg3[%c0_6, %c0_7] : memref<768x512xbf16, #tpu.memory_space<vmem>>, vector<768x512xbf16>
    %20 = arith.truncf %18 : vector<16x768xf32> to vector<16x768xbf16>
    %cst = arith.constant dense<0.000000e+00> : vector<16x512xf32>
    %21 = tpu.matmul %20, %19, %cst {dimension_numbers = #tpu.dot_dimension_numbers<[1], [0], [0], [1], [0, 0, 1, 1], [], []>} : vector<16x768xbf16>, vector<768x512xbf16>, vector<16x512xf32> -> vector<16x512xf32>
    %c0_8 = arith.constant 0 : index
    %c0_9 = arith.constant 0 : index
    %22 = vector.load %arg4[%c0_8, %c0_9] : memref<1x512xf32, #tpu.memory_space<vmem>>, vector<1x512xf32>
    %23 = vector.broadcast %22 : vector<1x512xf32> to vector<16x512xf32>
    %24 = arith.addf %21, %23 : vector<16x512xf32>
    %cst_10 = arith.constant 0.000000e+00 : f32
    %25 = vector.broadcast %cst_10 : f32 to vector<4x512xf32>
    %26 = vector.extract_strided_slice %24 {offsets = [0, 0], sizes = [12, 512], strides = [1, 1]} : vector<16x512xf32> to vector<12x512xf32>
    %27 = tpu.concatenate %25, %26 in 0 : vector<4x512xf32>, vector<12x512xf32> -> vector<16x512xf32>
    %c4_i32 = arith.constant 4 : i32
    %28 = vector.broadcast %c4_i32 : i32 to vector<16x1xi32>
    %29 = arith.cmpi sge, %16, %28 : vector<16x1xi32>
    %cst_11 = arith.constant 0.000000e+00 : f32
    %30 = vector.shape_cast %29 : vector<16x1xi1> to vector<16x1xi1>
    %31 = vector.broadcast %30 : vector<16x1xi1> to vector<16x512xi1>
    %32 = vector.broadcast %cst_11 : f32 to vector<16x512xf32>
    %33 = arith.select %31, %27, %32 : vector<16x512xi1>, vector<16x512xf32>
    %cst_12 = arith.constant 0.000000e+00 : f32
    %34 = vector.broadcast %cst_12 : f32 to vector<3x512xf32>
    %35 = vector.extract_strided_slice %24 {offsets = [0, 0], sizes = [13, 512], strides = [1, 1]} : vector<16x512xf32> to vector<13x512xf32>
    %36 = tpu.concatenate %34, %35 in 0 : vector<3x512xf32>, vector<13x512xf32> -> vector<16x512xf32>
    %c3_i32 = arith.constant 3 : i32
    %37 = vector.broadcast %c3_i32 : i32 to vector<16x1xi32>
    %38 = arith.cmpi sge, %16, %37 : vector<16x1xi32>
    %cst_13 = arith.constant 0.000000e+00 : f32
    %39 = vector.shape_cast %38 : vector<16x1xi1> to vector<16x1xi1>
    %40 = vector.broadcast %39 : vector<16x1xi1> to vector<16x512xi1>
    %41 = vector.broadcast %cst_13 : f32 to vector<16x512xf32>
    %42 = arith.select %40, %36, %41 : vector<16x512xi1>, vector<16x512xf32>
    %cst_14 = arith.constant 0.000000e+00 : f32
    %43 = vector.broadcast %cst_14 : f32 to vector<2x512xf32>
    %44 = vector.extract_strided_slice %24 {offsets = [0, 0], sizes = [14, 512], strides = [1, 1]} : vector<16x512xf32> to vector<14x512xf32>
    %45 = tpu.concatenate %43, %44 in 0 : vector<2x512xf32>, vector<14x512xf32> -> vector<16x512xf32>
    %c2_i32 = arith.constant 2 : i32
    %46 = vector.broadcast %c2_i32 : i32 to vector<16x1xi32>
    %47 = arith.cmpi sge, %16, %46 : vector<16x1xi32>
    %cst_15 = arith.constant 0.000000e+00 : f32
    %48 = vector.shape_cast %47 : vector<16x1xi1> to vector<16x1xi1>
    %49 = vector.broadcast %48 : vector<16x1xi1> to vector<16x512xi1>
    %50 = vector.broadcast %cst_15 : f32 to vector<16x512xf32>
    %51 = arith.select %49, %45, %50 : vector<16x512xi1>, vector<16x512xf32>
    %cst_16 = arith.constant 0.000000e+00 : f32
    %52 = vector.broadcast %cst_16 : f32 to vector<1x512xf32>
    %53 = vector.extract_strided_slice %24 {offsets = [0, 0], sizes = [15, 512], strides = [1, 1]} : vector<16x512xf32> to vector<15x512xf32>
    %54 = tpu.concatenate %52, %53 in 0 : vector<1x512xf32>, vector<15x512xf32> -> vector<16x512xf32>
    %c1_i32_17 = arith.constant 1 : i32
    %55 = vector.broadcast %c1_i32_17 : i32 to vector<16x1xi32>
    %56 = arith.cmpi sge, %16, %55 : vector<16x1xi32>
    %cst_18 = arith.constant 0.000000e+00 : f32
    %57 = vector.shape_cast %56 : vector<16x1xi1> to vector<16x1xi1>
    %58 = vector.broadcast %57 : vector<16x1xi1> to vector<16x512xi1>
    %59 = vector.broadcast %cst_18 : f32 to vector<16x512xf32>
    %60 = arith.select %58, %54, %59 : vector<16x512xi1>, vector<16x512xf32>
    %61 = tpu.concatenate %33, %42, %51, %60, %24 in 1 : vector<16x512xf32>, vector<16x512xf32>, vector<16x512xf32>, vector<16x512xf32>, vector<16x512xf32> -> vector<16x2560xf32>
    %c0_19 = arith.constant 0 : index
    %c0_20 = arith.constant 0 : index
    %62 = vector.load %arg6[%c0_19, %c0_20] : memref<5152x128xbf16, #tpu.memory_space<vmem>>, vector<2560x128xbf16>
    %63 = arith.truncf %61 : vector<16x2560xf32> to vector<16x2560xbf16>
    %cst_21 = arith.constant dense<0.000000e+00> : vector<16x128xf32>
    %64 = tpu.matmul %63, %62, %cst_21 {dimension_numbers = #tpu.dot_dimension_numbers<[1], [0], [0], [1], [0, 0, 1, 1], [], []>} : vector<16x2560xbf16>, vector<2560x128xbf16>, vector<16x128xf32> -> vector<16x128xf32>
    %65 = vector.extract_strided_slice %17 {offsets = [0, 0], sizes = [1, 128], strides = [1, 1]} : vector<20x128xf32> to vector<1x128xf32>
    %66 = vector.broadcast %65 : vector<1x128xf32> to vector<16x128xf32>
    %67 = arith.addf %64, %66 : vector<16x128xf32>
    %cst_22 = arith.constant 0.000000e+00 : f32
    %68 = vector.broadcast %cst_22 : f32 to vector<16x128xf32>
    %69 = arith.maximumf %67, %68 : vector<16x128xf32>
    %cst_23 = arith.constant 0.000000e+00 : f32
    %70 = vector.broadcast %cst_23 : f32 to vector<4x128xf32>
    %71 = vector.extract_strided_slice %69 {offsets = [0, 0], sizes = [12, 128], strides = [1, 1]} : vector<16x128xf32> to vector<12x128xf32>
    %72 = tpu.concatenate %70, %71 in 0 : vector<4x128xf32>, vector<12x128xf32> -> vector<16x128xf32>
    %c4_i32_24 = arith.constant 4 : i32
    %73 = vector.broadcast %c4_i32_24 : i32 to vector<16x1xi32>
    %74 = arith.cmpi sge, %16, %73 : vector<16x1xi32>
    %cst_25 = arith.constant 0.000000e+00 : f32
    %75 = vector.shape_cast %74 : vector<16x1xi1> to vector<16x1xi1>
    %76 = vector.broadcast %75 : vector<16x1xi1> to vector<16x128xi1>
    %77 = vector.broadcast %cst_25 : f32 to vector<16x128xf32>
    %78 = arith.select %76, %72, %77 : vector<16x128xi1>, vector<16x128xf32>
    %cst_26 = arith.constant 0.000000e+00 : f32
    %79 = vector.broadcast %cst_26 : f32 to vector<3x128xf32>
    %80 = vector.extract_strided_slice %69 {offsets = [0, 0], sizes = [13, 128], strides = [1, 1]} : vector<16x128xf32> to vector<13x128xf32>
    %81 = tpu.concatenate %79, %80 in 0 : vector<3x128xf32>, vector<13x128xf32> -> vector<16x128xf32>
    %c3_i32_27 = arith.constant 3 : i32
    %82 = vector.broadcast %c3_i32_27 : i32 to vector<16x1xi32>
    %83 = arith.cmpi sge, %16, %82 : vector<16x1xi32>
    %cst_28 = arith.constant 0.000000e+00 : f32
    %84 = vector.shape_cast %83 : vector<16x1xi1> to vector<16x1xi1>
    %85 = vector.broadcast %84 : vector<16x1xi1> to vector<16x128xi1>
    %86 = vector.broadcast %cst_28 : f32 to vector<16x128xf32>
    %87 = arith.select %85, %81, %86 : vector<16x128xi1>, vector<16x128xf32>
    %cst_29 = arith.constant 0.000000e+00 : f32
    %88 = vector.broadcast %cst_29 : f32 to vector<2x128xf32>
    %89 = vector.extract_strided_slice %69 {offsets = [0, 0], sizes = [14, 128], strides = [1, 1]} : vector<16x128xf32> to vector<14x128xf32>
    %90 = tpu.concatenate %88, %89 in 0 : vector<2x128xf32>, vector<14x128xf32> -> vector<16x128xf32>
    %c2_i32_30 = arith.constant 2 : i32
    %91 = vector.broadcast %c2_i32_30 : i32 to vector<16x1xi32>
    %92 = arith.cmpi sge, %16, %91 : vector<16x1xi32>
    %cst_31 = arith.constant 0.000000e+00 : f32
    %93 = vector.shape_cast %92 : vector<16x1xi1> to vector<16x1xi1>
    %94 = vector.broadcast %93 : vector<16x1xi1> to vector<16x128xi1>
    %95 = vector.broadcast %cst_31 : f32 to vector<16x128xf32>
    %96 = arith.select %94, %90, %95 : vector<16x128xi1>, vector<16x128xf32>
    %cst_32 = arith.constant 0.000000e+00 : f32
    %97 = vector.broadcast %cst_32 : f32 to vector<1x128xf32>
    %98 = vector.extract_strided_slice %69 {offsets = [0, 0], sizes = [15, 128], strides = [1, 1]} : vector<16x128xf32> to vector<15x128xf32>
    %99 = tpu.concatenate %97, %98 in 0 : vector<1x128xf32>, vector<15x128xf32> -> vector<16x128xf32>
    %c1_i32_33 = arith.constant 1 : i32
    %100 = vector.broadcast %c1_i32_33 : i32 to vector<16x1xi32>
    %101 = arith.cmpi sge, %16, %100 : vector<16x1xi32>
    %cst_34 = arith.constant 0.000000e+00 : f32
    %102 = vector.shape_cast %101 : vector<16x1xi1> to vector<16x1xi1>
    %103 = vector.broadcast %102 : vector<16x1xi1> to vector<16x128xi1>
    %104 = vector.broadcast %cst_34 : f32 to vector<16x128xf32>
    %105 = arith.select %103, %99, %104 : vector<16x128xi1>, vector<16x128xf32>
    %106 = tpu.concatenate %78, %87, %96, %105, %69 in 1 : vector<16x128xf32>, vector<16x128xf32>, vector<16x128xf32>, vector<16x128xf32>, vector<16x128xf32> -> vector<16x640xf32>
    %c2560 = arith.constant 2560 : index
    %c0_35 = arith.constant 0 : index
    %107 = vector.load %arg6[%c2560, %c0_35] : memref<5152x128xbf16, #tpu.memory_space<vmem>>, vector<640x128xbf16>
    %108 = arith.truncf %106 : vector<16x640xf32> to vector<16x640xbf16>
    %cst_36 = arith.constant dense<0.000000e+00> : vector<16x128xf32>
    %109 = tpu.matmul %108, %107, %cst_36 {dimension_numbers = #tpu.dot_dimension_numbers<[1], [0], [0], [1], [0, 0, 1, 1], [], []>} : vector<16x640xbf16>, vector<640x128xbf16>, vector<16x128xf32> -> vector<16x128xf32>
    %110 = vector.extract_strided_slice %17 {offsets = [1, 0], sizes = [1, 128], strides = [1, 1]} : vector<20x128xf32> to vector<1x128xf32>
    %111 = vector.broadcast %110 : vector<1x128xf32> to vector<16x128xf32>
    %112 = arith.addf %109, %111 : vector<16x128xf32>
    %cst_37 = arith.constant 0.000000e+00 : f32
    %113 = vector.broadcast %cst_37 : f32 to vector<16x128xf32>
    %114 = arith.maximumf %112, %113 : vector<16x128xf32>
    %c3200 = arith.constant 3200 : index
    %c0_38 = arith.constant 0 : index
    %115 = vector.load %arg6[%c3200, %c0_38] : memref<5152x128xbf16, #tpu.memory_space<vmem>>, vector<512x128xbf16>
    %116 = arith.truncf %24 : vector<16x512xf32> to vector<16x512xbf16>
    %cst_39 = arith.constant dense<0.000000e+00> : vector<16x128xf32>
    %117 = tpu.matmul %116, %115, %cst_39 {dimension_numbers = #tpu.dot_dimension_numbers<[1], [0], [0], [1], [0, 0, 1, 1], [], []>} : vector<16x512xbf16>, vector<512x128xbf16>, vector<16x128xf32> -> vector<16x128xf32>
    %118 = vector.extract_strided_slice %17 {offsets = [2, 0], sizes = [1, 128], strides = [1, 1]} : vector<20x128xf32> to vector<1x128xf32>
    %119 = vector.broadcast %118 : vector<1x128xf32> to vector<16x128xf32>
    %120 = arith.addf %117, %119 : vector<16x128xf32>
    %121 = arith.addf %114, %120 : vector<16x128xf32>
    %cst_40 = arith.constant 0.000000e+00 : f32
    %122 = vector.broadcast %cst_40 : f32 to vector<16x128xf32>
    %123 = arith.maximumf %121, %122 : vector<16x128xf32>
    %cst_41 = arith.constant 0.000000e+00 : f32
    %124 = vector.broadcast %cst_41 : f32 to vector<6x128xf32>
    %125 = vector.extract_strided_slice %123 {offsets = [0, 0], sizes = [10, 128], strides = [1, 1]} : vector<16x128xf32> to vector<10x128xf32>
    %126 = tpu.concatenate %124, %125 in 0 : vector<6x128xf32>, vector<10x128xf32> -> vector<16x128xf32>
    %c6_i32 = arith.constant 6 : i32
    %127 = vector.broadcast %c6_i32 : i32 to vector<16x1xi32>
    %128 = arith.cmpi sge, %16, %127 : vector<16x1xi32>
    %cst_42 = arith.constant 0.000000e+00 : f32
    %129 = vector.shape_cast %128 : vector<16x1xi1> to vector<16x1xi1>
    %130 = vector.broadcast %129 : vector<16x1xi1> to vector<16x128xi1>
    %131 = vector.broadcast %cst_42 : f32 to vector<16x128xf32>
    %132 = arith.select %130, %126, %131 : vector<16x128xi1>, vector<16x128xf32>
    %cst_43 = arith.constant 0.000000e+00 : f32
    %133 = vector.broadcast %cst_43 : f32 to vector<4x128xf32>
    %134 = vector.extract_strided_slice %123 {offsets = [0, 0], sizes = [12, 128], strides = [1, 1]} : vector<16x128xf32> to vector<12x128xf32>
    %135 = tpu.concatenate %133, %134 in 0 : vector<4x128xf32>, vector<12x128xf32> -> vector<16x128xf32>
    %c4_i32_44 = arith.constant 4 : i32
    %136 = vector.broadcast %c4_i32_44 : i32 to vector<16x1xi32>
    %137 = arith.cmpi sge, %16, %136 : vector<16x1xi32>
    %cst_45 = arith.constant 0.000000e+00 : f32
    %138 = vector.shape_cast %137 : vector<16x1xi1> to vector<16x1xi1>
    %139 = vector.broadcast %138 : vector<16x1xi1> to vector<16x128xi1>
    %140 = vector.broadcast %cst_45 : f32 to vector<16x128xf32>
    %141 = arith.select %139, %135, %140 : vector<16x128xi1>, vector<16x128xf32>
    %cst_46 = arith.constant 0.000000e+00 : f32
    %142 = vector.broadcast %cst_46 : f32 to vector<2x128xf32>
    %143 = vector.extract_strided_slice %123 {offsets = [0, 0], sizes = [14, 128], strides = [1, 1]} : vector<16x128xf32> to vector<14x128xf32>
    %144 = tpu.concatenate %142, %143 in 0 : vector<2x128xf32>, vector<14x128xf32> -> vector<16x128xf32>
    %c2_i32_47 = arith.constant 2 : i32
    %145 = vector.broadcast %c2_i32_47 : i32 to vector<16x1xi32>
    %146 = arith.cmpi sge, %16, %145 : vector<16x1xi32>
    %cst_48 = arith.constant 0.000000e+00 : f32
    %147 = vector.shape_cast %146 : vector<16x1xi1> to vector<16x1xi1>
    %148 = vector.broadcast %147 : vector<16x1xi1> to vector<16x128xi1>
    %149 = vector.broadcast %cst_48 : f32 to vector<16x128xf32>
    %150 = arith.select %148, %144, %149 : vector<16x128xi1>, vector<16x128xf32>
    %151 = tpu.concatenate %132, %141, %150, %123 in 1 : vector<16x128xf32>, vector<16x128xf32>, vector<16x128xf32>, vector<16x128xf32> -> vector<16x512xf32>
    %c3712 = arith.constant 3712 : index
    %c0_49 = arith.constant 0 : index
    %152 = vector.load %arg6[%c3712, %c0_49] : memref<5152x128xbf16, #tpu.memory_space<vmem>>, vector<512x128xbf16>
    %153 = arith.truncf %151 : vector<16x512xf32> to vector<16x512xbf16>
    %cst_50 = arith.constant dense<0.000000e+00> : vector<16x128xf32>
    %154 = tpu.matmul %153, %152, %cst_50 {dimension_numbers = #tpu.dot_dimension_numbers<[1], [0], [0], [1], [0, 0, 1, 1], [], []>} : vector<16x512xbf16>, vector<512x128xbf16>, vector<16x128xf32> -> vector<16x128xf32>
    %155 = vector.extract_strided_slice %17 {offsets = [3, 0], sizes = [1, 128], strides = [1, 1]} : vector<20x128xf32> to vector<1x128xf32>
    %156 = vector.broadcast %155 : vector<1x128xf32> to vector<16x128xf32>
    %157 = arith.addf %154, %156 : vector<16x128xf32>
    %cst_51 = arith.constant 0.000000e+00 : f32
    %158 = vector.broadcast %cst_51 : f32 to vector<16x128xf32>
    %159 = arith.maximumf %157, %158 : vector<16x128xf32>
    %cst_52 = arith.constant 0.000000e+00 : f32
    %160 = vector.broadcast %cst_52 : f32 to vector<6x128xf32>
    %161 = vector.extract_strided_slice %159 {offsets = [0, 0], sizes = [10, 128], strides = [1, 1]} : vector<16x128xf32> to vector<10x128xf32>
    %162 = tpu.concatenate %160, %161 in 0 : vector<6x128xf32>, vector<10x128xf32> -> vector<16x128xf32>
    %c6_i32_53 = arith.constant 6 : i32
    %163 = vector.broadcast %c6_i32_53 : i32 to vector<16x1xi32>
    %164 = arith.cmpi sge, %16, %163 : vector<16x1xi32>
    %cst_54 = arith.constant 0.000000e+00 : f32
    %165 = vector.shape_cast %164 : vector<16x1xi1> to vector<16x1xi1>
    %166 = vector.broadcast %165 : vector<16x1xi1> to vector<16x128xi1>
    %167 = vector.broadcast %cst_54 : f32 to vector<16x128xf32>
    %168 = arith.select %166, %162, %167 : vector<16x128xi1>, vector<16x128xf32>
    %cst_55 = arith.constant 0.000000e+00 : f32
    %169 = vector.broadcast %cst_55 : f32 to vector<4x128xf32>
    %170 = vector.extract_strided_slice %159 {offsets = [0, 0], sizes = [12, 128], strides = [1, 1]} : vector<16x128xf32> to vector<12x128xf32>
    %171 = tpu.concatenate %169, %170 in 0 : vector<4x128xf32>, vector<12x128xf32> -> vector<16x128xf32>
    %c4_i32_56 = arith.constant 4 : i32
    %172 = vector.broadcast %c4_i32_56 : i32 to vector<16x1xi32>
    %173 = arith.cmpi sge, %16, %172 : vector<16x1xi32>
    %cst_57 = arith.constant 0.000000e+00 : f32
    %174 = vector.shape_cast %173 : vector<16x1xi1> to vector<16x1xi1>
    %175 = vector.broadcast %174 : vector<16x1xi1> to vector<16x128xi1>
    %176 = vector.broadcast %cst_57 : f32 to vector<16x128xf32>
    %177 = arith.select %175, %171, %176 : vector<16x128xi1>, vector<16x128xf32>
    %cst_58 = arith.constant 0.000000e+00 : f32
    %178 = vector.broadcast %cst_58 : f32 to vector<2x128xf32>
    %179 = vector.extract_strided_slice %159 {offsets = [0, 0], sizes = [14, 128], strides = [1, 1]} : vector<16x128xf32> to vector<14x128xf32>
    %180 = tpu.concatenate %178, %179 in 0 : vector<2x128xf32>, vector<14x128xf32> -> vector<16x128xf32>
    %c2_i32_59 = arith.constant 2 : i32
    %181 = vector.broadcast %c2_i32_59 : i32 to vector<16x1xi32>
    %182 = arith.cmpi sge, %16, %181 : vector<16x1xi32>
    %cst_60 = arith.constant 0.000000e+00 : f32
    %183 = vector.shape_cast %182 : vector<16x1xi1> to vector<16x1xi1>
    %184 = vector.broadcast %183 : vector<16x1xi1> to vector<16x128xi1>
    %185 = vector.broadcast %cst_60 : f32 to vector<16x128xf32>
    %186 = arith.select %184, %180, %185 : vector<16x128xi1>, vector<16x128xf32>
    %187 = tpu.concatenate %168, %177, %186, %159 in 1 : vector<16x128xf32>, vector<16x128xf32>, vector<16x128xf32>, vector<16x128xf32> -> vector<16x512xf32>
    %c4224 = arith.constant 4224 : index
    %c0_61 = arith.constant 0 : index
    %188 = vector.load %arg6[%c4224, %c0_61] : memref<5152x128xbf16, #tpu.memory_space<vmem>>, vector<512x128xbf16>
    %189 = arith.truncf %187 : vector<16x512xf32> to vector<16x512xbf16>
    %cst_62 = arith.constant dense<0.000000e+00> : vector<16x128xf32>
    %190 = tpu.matmul %189, %188, %cst_62 {dimension_numbers = #tpu.dot_dimension_numbers<[1], [0], [0], [1], [0, 0, 1, 1], [], []>} : vector<16x512xbf16>, vector<512x128xbf16>, vector<16x128xf32> -> vector<16x128xf32>
    %191 = vector.extract_strided_slice %17 {offsets = [4, 0], sizes = [1, 128], strides = [1, 1]} : vector<20x128xf32> to vector<1x128xf32>
    %192 = vector.broadcast %191 : vector<1x128xf32> to vector<16x128xf32>
    %193 = arith.addf %190, %192 : vector<16x128xf32>
    %cst_63 = arith.constant 0.000000e+00 : f32
    %194 = vector.broadcast %cst_63 : f32 to vector<16x128xf32>
    %195 = arith.maximumf %193, %194 : vector<16x128xf32>
    %196 = arith.addf %195, %123 : vector<16x128xf32>
    %cst_64 = arith.constant 0.000000e+00 : f32
    %197 = vector.broadcast %cst_64 : f32 to vector<16x128xf32>
    %198 = arith.maximumf %196, %197 : vector<16x128xf32>
    %c0_65 = arith.constant 0 : index
    %c0_66 = arith.constant 0 : index
    %199 = vector.load %arg2[%c0_65, %c0_66] : memref<16x168xf32, #tpu.memory_space<vmem>>, vector<16x168xf32>
    %cst_67 = arith.constant 0.000000e+00 : f32
    %200 = vector.broadcast %cst_67 : f32 to vector<4x168xf32>
    %201 = vector.extract_strided_slice %199 {offsets = [0, 0], sizes = [12, 168], strides = [1, 1]} : vector<16x168xf32> to vector<12x168xf32>
    %202 = tpu.concatenate %200, %201 in 0 : vector<4x168xf32>, vector<12x168xf32> -> vector<16x168xf32>
    %c4_i32_68 = arith.constant 4 : i32
    %203 = vector.broadcast %c4_i32_68 : i32 to vector<16x1xi32>
    %204 = arith.cmpi sge, %16, %203 : vector<16x1xi32>
    %cst_69 = arith.constant 0.000000e+00 : f32
    %205 = vector.shape_cast %204 : vector<16x1xi1> to vector<16x1xi1>
    %206 = vector.broadcast %205 : vector<16x1xi1> to vector<16x168xi1>
    %207 = vector.broadcast %cst_69 : f32 to vector<16x168xf32>
    %208 = arith.select %206, %202, %207 : vector<16x168xi1>, vector<16x168xf32>
    %cst_70 = arith.constant 0.000000e+00 : f32
    %209 = vector.broadcast %cst_70 : f32 to vector<3x168xf32>
    %210 = vector.extract_strided_slice %199 {offsets = [0, 0], sizes = [13, 168], strides = [1, 1]} : vector<16x168xf32> to vector<13x168xf32>
    %211 = tpu.concatenate %209, %210 in 0 : vector<3x168xf32>, vector<13x168xf32> -> vector<16x168xf32>
    %c3_i32_71 = arith.constant 3 : i32
    %212 = vector.broadcast %c3_i32_71 : i32 to vector<16x1xi32>
    %213 = arith.cmpi sge, %16, %212 : vector<16x1xi32>
    %cst_72 = arith.constant 0.000000e+00 : f32
    %214 = vector.shape_cast %213 : vector<16x1xi1> to vector<16x1xi1>
    %215 = vector.broadcast %214 : vector<16x1xi1> to vector<16x168xi1>
    %216 = vector.broadcast %cst_72 : f32 to vector<16x168xf32>
    %217 = arith.select %215, %211, %216 : vector<16x168xi1>, vector<16x168xf32>
    %cst_73 = arith.constant 0.000000e+00 : f32
    %218 = vector.broadcast %cst_73 : f32 to vector<2x168xf32>
    %219 = vector.extract_strided_slice %199 {offsets = [0, 0], sizes = [14, 168], strides = [1, 1]} : vector<16x168xf32> to vector<14x168xf32>
    %220 = tpu.concatenate %218, %219 in 0 : vector<2x168xf32>, vector<14x168xf32> -> vector<16x168xf32>
    %c2_i32_74 = arith.constant 2 : i32
    %221 = vector.broadcast %c2_i32_74 : i32 to vector<16x1xi32>
    %222 = arith.cmpi sge, %16, %221 : vector<16x1xi32>
    %cst_75 = arith.constant 0.000000e+00 : f32
    %223 = vector.shape_cast %222 : vector<16x1xi1> to vector<16x1xi1>
    %224 = vector.broadcast %223 : vector<16x1xi1> to vector<16x168xi1>
    %225 = vector.broadcast %cst_75 : f32 to vector<16x168xf32>
    %226 = arith.select %224, %220, %225 : vector<16x168xi1>, vector<16x168xf32>
    %cst_76 = arith.constant 0.000000e+00 : f32
    %227 = vector.broadcast %cst_76 : f32 to vector<1x168xf32>
    %228 = vector.extract_strided_slice %199 {offsets = [0, 0], sizes = [15, 168], strides = [1, 1]} : vector<16x168xf32> to vector<15x168xf32>
    %229 = tpu.concatenate %227, %228 in 0 : vector<1x168xf32>, vector<15x168xf32> -> vector<16x168xf32>
    %c1_i32_77 = arith.constant 1 : i32
    %230 = vector.broadcast %c1_i32_77 : i32 to vector<16x1xi32>
    %231 = arith.cmpi sge, %16, %230 : vector<16x1xi32>
    %cst_78 = arith.constant 0.000000e+00 : f32
    %232 = vector.shape_cast %231 : vector<16x1xi1> to vector<16x1xi1>
    %233 = vector.broadcast %232 : vector<16x1xi1> to vector<16x168xi1>
    %234 = vector.broadcast %cst_78 : f32 to vector<16x168xf32>
    %235 = arith.select %233, %229, %234 : vector<16x168xi1>, vector<16x168xf32>
    %236 = tpu.concatenate %208, %217, %226, %235, %199 in 1 : vector<16x168xf32>, vector<16x168xf32>, vector<16x168xf32>, vector<16x168xf32>, vector<16x168xf32> -> vector<16x840xf32>
    %c0_79 = arith.constant 0 : index
    %c0_80 = arith.constant 0 : index
    %237 = vector.load %arg7[%c0_79, %c0_80] : memref<2304x64xbf16, #tpu.memory_space<vmem>>, vector<840x64xbf16>
    %238 = arith.truncf %236 : vector<16x840xf32> to vector<16x840xbf16>
    %cst_81 = arith.constant dense<0.000000e+00> : vector<16x64xf32>
    %239 = tpu.matmul %238, %237, %cst_81 {dimension_numbers = #tpu.dot_dimension_numbers<[1], [0], [0], [1], [0, 0, 1, 1], [], []>} : vector<16x840xbf16>, vector<840x64xbf16>, vector<16x64xf32> -> vector<16x64xf32>
    %240 = vector.extract_strided_slice %17 {offsets = [5, 0], sizes = [1, 64], strides = [1, 1]} : vector<20x128xf32> to vector<1x64xf32>
    %241 = vector.broadcast %240 : vector<1x64xf32> to vector<16x64xf32>
    %242 = arith.addf %239, %241 : vector<16x64xf32>
    %cst_82 = arith.constant 0.000000e+00 : f32
    %243 = vector.broadcast %cst_82 : f32 to vector<16x64xf32>
    %244 = arith.maximumf %242, %243 : vector<16x64xf32>
    %cst_83 = arith.constant 0.000000e+00 : f32
    %245 = vector.broadcast %cst_83 : f32 to vector<4x64xf32>
    %246 = vector.extract_strided_slice %244 {offsets = [0, 0], sizes = [12, 64], strides = [1, 1]} : vector<16x64xf32> to vector<12x64xf32>
    %247 = tpu.concatenate %245, %246 in 0 : vector<4x64xf32>, vector<12x64xf32> -> vector<16x64xf32>
    %c4_i32_84 = arith.constant 4 : i32
    %248 = vector.broadcast %c4_i32_84 : i32 to vector<16x1xi32>
    %249 = arith.cmpi sge, %16, %248 : vector<16x1xi32>
    %cst_85 = arith.constant 0.000000e+00 : f32
    %250 = vector.shape_cast %249 : vector<16x1xi1> to vector<16x1xi1>
    %251 = vector.broadcast %250 : vector<16x1xi1> to vector<16x64xi1>
    %252 = vector.broadcast %cst_85 : f32 to vector<16x64xf32>
    %253 = arith.select %251, %247, %252 : vector<16x64xi1>, vector<16x64xf32>
    %cst_86 = arith.constant 0.000000e+00 : f32
    %254 = vector.broadcast %cst_86 : f32 to vector<3x64xf32>
    %255 = vector.extract_strided_slice %244 {offsets = [0, 0], sizes = [13, 64], strides = [1, 1]} : vector<16x64xf32> to vector<13x64xf32>
    %256 = tpu.concatenate %254, %255 in 0 : vector<3x64xf32>, vector<13x64xf32> -> vector<16x64xf32>
    %c3_i32_87 = arith.constant 3 : i32
    %257 = vector.broadcast %c3_i32_87 : i32 to vector<16x1xi32>
    %258 = arith.cmpi sge, %16, %257 : vector<16x1xi32>
    %cst_88 = arith.constant 0.000000e+00 : f32
    %259 = vector.shape_cast %258 : vector<16x1xi1> to vector<16x1xi1>
    %260 = vector.broadcast %259 : vector<16x1xi1> to vector<16x64xi1>
    %261 = vector.broadcast %cst_88 : f32 to vector<16x64xf32>
    %262 = arith.select %260, %256, %261 : vector<16x64xi1>, vector<16x64xf32>
    %cst_89 = arith.constant 0.000000e+00 : f32
    %263 = vector.broadcast %cst_89 : f32 to vector<2x64xf32>
    %264 = vector.extract_strided_slice %244 {offsets = [0, 0], sizes = [14, 64], strides = [1, 1]} : vector<16x64xf32> to vector<14x64xf32>
    %265 = tpu.concatenate %263, %264 in 0 : vector<2x64xf32>, vector<14x64xf32> -> vector<16x64xf32>
    %c2_i32_90 = arith.constant 2 : i32
    %266 = vector.broadcast %c2_i32_90 : i32 to vector<16x1xi32>
    %267 = arith.cmpi sge, %16, %266 : vector<16x1xi32>
    %cst_91 = arith.constant 0.000000e+00 : f32
    %268 = vector.shape_cast %267 : vector<16x1xi1> to vector<16x1xi1>
    %269 = vector.broadcast %268 : vector<16x1xi1> to vector<16x64xi1>
    %270 = vector.broadcast %cst_91 : f32 to vector<16x64xf32>
    %271 = arith.select %269, %265, %270 : vector<16x64xi1>, vector<16x64xf32>
    %cst_92 = arith.constant 0.000000e+00 : f32
    %272 = vector.broadcast %cst_92 : f32 to vector<1x64xf32>
    %273 = vector.extract_strided_slice %244 {offsets = [0, 0], sizes = [15, 64], strides = [1, 1]} : vector<16x64xf32> to vector<15x64xf32>
    %274 = tpu.concatenate %272, %273 in 0 : vector<1x64xf32>, vector<15x64xf32> -> vector<16x64xf32>
    %c1_i32_93 = arith.constant 1 : i32
    %275 = vector.broadcast %c1_i32_93 : i32 to vector<16x1xi32>
    %276 = arith.cmpi sge, %16, %275 : vector<16x1xi32>
    %cst_94 = arith.constant 0.000000e+00 : f32
    %277 = vector.shape_cast %276 : vector<16x1xi1> to vector<16x1xi1>
    %278 = vector.broadcast %277 : vector<16x1xi1> to vector<16x64xi1>
    %279 = vector.broadcast %cst_94 : f32 to vector<16x64xf32>
    %280 = arith.select %278, %274, %279 : vector<16x64xi1>, vector<16x64xf32>
    %281 = tpu.concatenate %253, %262, %271, %280, %244 in 1 : vector<16x64xf32>, vector<16x64xf32>, vector<16x64xf32>, vector<16x64xf32>, vector<16x64xf32> -> vector<16x320xf32>
    %c848 = arith.constant 848 : index
    %c0_95 = arith.constant 0 : index
    %282 = vector.load %arg7[%c848, %c0_95] : memref<2304x64xbf16, #tpu.memory_space<vmem>>, vector<320x64xbf16>
    %283 = arith.truncf %281 : vector<16x320xf32> to vector<16x320xbf16>
    %cst_96 = arith.constant dense<0.000000e+00> : vector<16x64xf32>
    %284 = tpu.matmul %283, %282, %cst_96 {dimension_numbers = #tpu.dot_dimension_numbers<[1], [0], [0], [1], [0, 0, 1, 1], [], []>} : vector<16x320xbf16>, vector<320x64xbf16>, vector<16x64xf32> -> vector<16x64xf32>
    %285 = vector.extract_strided_slice %17 {offsets = [6, 0], sizes = [1, 64], strides = [1, 1]} : vector<20x128xf32> to vector<1x64xf32>
    %286 = vector.broadcast %285 : vector<1x64xf32> to vector<16x64xf32>
    %287 = arith.addf %284, %286 : vector<16x64xf32>
    %cst_97 = arith.constant 0.000000e+00 : f32
    %288 = vector.broadcast %cst_97 : f32 to vector<16x64xf32>
    %289 = arith.maximumf %287, %288 : vector<16x64xf32>
    %c1168 = arith.constant 1168 : index
    %c0_98 = arith.constant 0 : index
    %290 = vector.load %arg7[%c1168, %c0_98] : memref<2304x64xbf16, #tpu.memory_space<vmem>>, vector<168x64xbf16>
    %291 = arith.truncf %199 : vector<16x168xf32> to vector<16x168xbf16>
    %cst_99 = arith.constant dense<0.000000e+00> : vector<16x64xf32>
    %292 = tpu.matmul %291, %290, %cst_99 {dimension_numbers = #tpu.dot_dimension_numbers<[1], [0], [0], [1], [0, 0, 1, 1], [], []>} : vector<16x168xbf16>, vector<168x64xbf16>, vector<16x64xf32> -> vector<16x64xf32>
    %293 = vector.extract_strided_slice %17 {offsets = [7, 0], sizes = [1, 64], strides = [1, 1]} : vector<20x128xf32> to vector<1x64xf32>
    %294 = vector.broadcast %293 : vector<1x64xf32> to vector<16x64xf32>
    %295 = arith.addf %292, %294 : vector<16x64xf32>
    %296 = arith.addf %289, %295 : vector<16x64xf32>
    %cst_100 = arith.constant 0.000000e+00 : f32
    %297 = vector.broadcast %cst_100 : f32 to vector<16x64xf32>
    %298 = arith.maximumf %296, %297 : vector<16x64xf32>
    %cst_101 = arith.constant 0.000000e+00 : f32
    %299 = vector.broadcast %cst_101 : f32 to vector<6x64xf32>
    %300 = vector.extract_strided_slice %298 {offsets = [0, 0], sizes = [10, 64], strides = [1, 1]} : vector<16x64xf32> to vector<10x64xf32>
    %301 = tpu.concatenate %299, %300 in 0 : vector<6x64xf32>, vector<10x64xf32> -> vector<16x64xf32>
    %c6_i32_102 = arith.constant 6 : i32
    %302 = vector.broadcast %c6_i32_102 : i32 to vector<16x1xi32>
    %303 = arith.cmpi sge, %16, %302 : vector<16x1xi32>
    %cst_103 = arith.constant 0.000000e+00 : f32
    %304 = vector.shape_cast %303 : vector<16x1xi1> to vector<16x1xi1>
    %305 = vector.broadcast %304 : vector<16x1xi1> to vector<16x64xi1>
    %306 = vector.broadcast %cst_103 : f32 to vector<16x64xf32>
    %307 = arith.select %305, %301, %306 : vector<16x64xi1>, vector<16x64xf32>
    %cst_104 = arith.constant 0.000000e+00 : f32
    %308 = vector.broadcast %cst_104 : f32 to vector<4x64xf32>
    %309 = vector.extract_strided_slice %298 {offsets = [0, 0], sizes = [12, 64], strides = [1, 1]} : vector<16x64xf32> to vector<12x64xf32>
    %310 = tpu.concatenate %308, %309 in 0 : vector<4x64xf32>, vector<12x64xf32> -> vector<16x64xf32>
    %c4_i32_105 = arith.constant 4 : i32
    %311 = vector.broadcast %c4_i32_105 : i32 to vector<16x1xi32>
    %312 = arith.cmpi sge, %16, %311 : vector<16x1xi32>
    %cst_106 = arith.constant 0.000000e+00 : f32
    %313 = vector.shape_cast %312 : vector<16x1xi1> to vector<16x1xi1>
    %314 = vector.broadcast %313 : vector<16x1xi1> to vector<16x64xi1>
    %315 = vector.broadcast %cst_106 : f32 to vector<16x64xf32>
    %316 = arith.select %314, %310, %315 : vector<16x64xi1>, vector<16x64xf32>
    %cst_107 = arith.constant 0.000000e+00 : f32
    %317 = vector.broadcast %cst_107 : f32 to vector<2x64xf32>
    %318 = vector.extract_strided_slice %298 {offsets = [0, 0], sizes = [14, 64], strides = [1, 1]} : vector<16x64xf32> to vector<14x64xf32>
    %319 = tpu.concatenate %317, %318 in 0 : vector<2x64xf32>, vector<14x64xf32> -> vector<16x64xf32>
    %c2_i32_108 = arith.constant 2 : i32
    %320 = vector.broadcast %c2_i32_108 : i32 to vector<16x1xi32>
    %321 = arith.cmpi sge, %16, %320 : vector<16x1xi32>
    %cst_109 = arith.constant 0.000000e+00 : f32
    %322 = vector.shape_cast %321 : vector<16x1xi1> to vector<16x1xi1>
    %323 = vector.broadcast %322 : vector<16x1xi1> to vector<16x64xi1>
    %324 = vector.broadcast %cst_109 : f32 to vector<16x64xf32>
    %325 = arith.select %323, %319, %324 : vector<16x64xi1>, vector<16x64xf32>
    %326 = tpu.concatenate %307, %316, %325, %298 in 1 : vector<16x64xf32>, vector<16x64xf32>, vector<16x64xf32>, vector<16x64xf32> -> vector<16x256xf32>
    %c1344 = arith.constant 1344 : index
    %c0_110 = arith.constant 0 : index
    %327 = vector.load %arg7[%c1344, %c0_110] : memref<2304x64xbf16, #tpu.memory_space<vmem>>, vector<256x64xbf16>
    %328 = arith.truncf %326 : vector<16x256xf32> to vector<16x256xbf16>
    %cst_111 = arith.constant dense<0.000000e+00> : vector<16x64xf32>
    %329 = tpu.matmul %328, %327, %cst_111 {dimension_numbers = #tpu.dot_dimension_numbers<[1], [0], [0], [1], [0, 0, 1, 1], [], []>} : vector<16x256xbf16>, vector<256x64xbf16>, vector<16x64xf32> -> vector<16x64xf32>
    %330 = vector.extract_strided_slice %17 {offsets = [8, 0], sizes = [1, 64], strides = [1, 1]} : vector<20x128xf32> to vector<1x64xf32>
    %331 = vector.broadcast %330 : vector<1x64xf32> to vector<16x64xf32>
    %332 = arith.addf %329, %331 : vector<16x64xf32>
    %cst_112 = arith.constant 0.000000e+00 : f32
    %333 = vector.broadcast %cst_112 : f32 to vector<16x64xf32>
    %334 = arith.maximumf %332, %333 : vector<16x64xf32>
    %cst_113 = arith.constant 0.000000e+00 : f32
    %335 = vector.broadcast %cst_113 : f32 to vector<6x64xf32>
    %336 = vector.extract_strided_slice %334 {offsets = [0, 0], sizes = [10, 64], strides = [1, 1]} : vector<16x64xf32> to vector<10x64xf32>
    %337 = tpu.concatenate %335, %336 in 0 : vector<6x64xf32>, vector<10x64xf32> -> vector<16x64xf32>
    %c6_i32_114 = arith.constant 6 : i32
    %338 = vector.broadcast %c6_i32_114 : i32 to vector<16x1xi32>
    %339 = arith.cmpi sge, %16, %338 : vector<16x1xi32>
    %cst_115 = arith.constant 0.000000e+00 : f32
    %340 = vector.shape_cast %339 : vector<16x1xi1> to vector<16x1xi1>
    %341 = vector.broadcast %340 : vector<16x1xi1> to vector<16x64xi1>
    %342 = vector.broadcast %cst_115 : f32 to vector<16x64xf32>
    %343 = arith.select %341, %337, %342 : vector<16x64xi1>, vector<16x64xf32>
    %cst_116 = arith.constant 0.000000e+00 : f32
    %344 = vector.broadcast %cst_116 : f32 to vector<4x64xf32>
    %345 = vector.extract_strided_slice %334 {offsets = [0, 0], sizes = [12, 64], strides = [1, 1]} : vector<16x64xf32> to vector<12x64xf32>
    %346 = tpu.concatenate %344, %345 in 0 : vector<4x64xf32>, vector<12x64xf32> -> vector<16x64xf32>
    %c4_i32_117 = arith.constant 4 : i32
    %347 = vector.broadcast %c4_i32_117 : i32 to vector<16x1xi32>
    %348 = arith.cmpi sge, %16, %347 : vector<16x1xi32>
    %cst_118 = arith.constant 0.000000e+00 : f32
    %349 = vector.shape_cast %348 : vector<16x1xi1> to vector<16x1xi1>
    %350 = vector.broadcast %349 : vector<16x1xi1> to vector<16x64xi1>
    %351 = vector.broadcast %cst_118 : f32 to vector<16x64xf32>
    %352 = arith.select %350, %346, %351 : vector<16x64xi1>, vector<16x64xf32>
    %cst_119 = arith.constant 0.000000e+00 : f32
    %353 = vector.broadcast %cst_119 : f32 to vector<2x64xf32>
    %354 = vector.extract_strided_slice %334 {offsets = [0, 0], sizes = [14, 64], strides = [1, 1]} : vector<16x64xf32> to vector<14x64xf32>
    %355 = tpu.concatenate %353, %354 in 0 : vector<2x64xf32>, vector<14x64xf32> -> vector<16x64xf32>
    %c2_i32_120 = arith.constant 2 : i32
    %356 = vector.broadcast %c2_i32_120 : i32 to vector<16x1xi32>
    %357 = arith.cmpi sge, %16, %356 : vector<16x1xi32>
    %cst_121 = arith.constant 0.000000e+00 : f32
    %358 = vector.shape_cast %357 : vector<16x1xi1> to vector<16x1xi1>
    %359 = vector.broadcast %358 : vector<16x1xi1> to vector<16x64xi1>
    %360 = vector.broadcast %cst_121 : f32 to vector<16x64xf32>
    %361 = arith.select %359, %355, %360 : vector<16x64xi1>, vector<16x64xf32>
    %362 = tpu.concatenate %343, %352, %361, %334 in 1 : vector<16x64xf32>, vector<16x64xf32>, vector<16x64xf32>, vector<16x64xf32> -> vector<16x256xf32>
    %c1600 = arith.constant 1600 : index
    %c0_122 = arith.constant 0 : index
    %363 = vector.load %arg7[%c1600, %c0_122] : memref<2304x64xbf16, #tpu.memory_space<vmem>>, vector<256x64xbf16>
    %364 = arith.truncf %362 : vector<16x256xf32> to vector<16x256xbf16>
    %cst_123 = arith.constant dense<0.000000e+00> : vector<16x64xf32>
    %365 = tpu.matmul %364, %363, %cst_123 {dimension_numbers = #tpu.dot_dimension_numbers<[1], [0], [0], [1], [0, 0, 1, 1], [], []>} : vector<16x256xbf16>, vector<256x64xbf16>, vector<16x64xf32> -> vector<16x64xf32>
    %366 = vector.extract_strided_slice %17 {offsets = [9, 0], sizes = [1, 64], strides = [1, 1]} : vector<20x128xf32> to vector<1x64xf32>
    %367 = vector.broadcast %366 : vector<1x64xf32> to vector<16x64xf32>
    %368 = arith.addf %365, %367 : vector<16x64xf32>
    %cst_124 = arith.constant 0.000000e+00 : f32
    %369 = vector.broadcast %cst_124 : f32 to vector<16x64xf32>
    %370 = arith.maximumf %368, %369 : vector<16x64xf32>
    %371 = arith.addf %370, %298 : vector<16x64xf32>
    %cst_125 = arith.constant 0.000000e+00 : f32
    %372 = vector.broadcast %cst_125 : f32 to vector<16x64xf32>
    %373 = arith.maximumf %371, %372 : vector<16x64xf32>
    %cst_126 = arith.constant 0.000000e+00 : f32
    %374 = vector.broadcast %cst_126 : f32 to vector<4x64xf32>
    %375 = vector.extract_strided_slice %373 {offsets = [0, 0], sizes = [12, 64], strides = [1, 1]} : vector<16x64xf32> to vector<12x64xf32>
    %376 = tpu.concatenate %374, %375 in 0 : vector<4x64xf32>, vector<12x64xf32> -> vector<16x64xf32>
    %c4_i32_127 = arith.constant 4 : i32
    %377 = vector.broadcast %c4_i32_127 : i32 to vector<16x1xi32>
    %378 = arith.cmpi sge, %16, %377 : vector<16x1xi32>
    %cst_128 = arith.constant 0.000000e+00 : f32
    %379 = vector.shape_cast %378 : vector<16x1xi1> to vector<16x1xi1>
    %380 = vector.broadcast %379 : vector<16x1xi1> to vector<16x64xi1>
    %381 = vector.broadcast %cst_128 : f32 to vector<16x64xf32>
    %382 = arith.select %380, %376, %381 : vector<16x64xi1>, vector<16x64xf32>
    %383 = tpu.concatenate %382, %373 in 1 : vector<16x64xf32>, vector<16x64xf32> -> vector<16x128xf32>
    %c1856 = arith.constant 1856 : index
    %c0_129 = arith.constant 0 : index
    %384 = vector.load %arg7[%c1856, %c0_129] : memref<2304x64xbf16, #tpu.memory_space<vmem>>, vector<128x64xbf16>
    %385 = arith.truncf %383 : vector<16x128xf32> to vector<16x128xbf16>
    %cst_130 = arith.constant dense<0.000000e+00> : vector<16x64xf32>
    %386 = tpu.matmul %385, %384, %cst_130 {dimension_numbers = #tpu.dot_dimension_numbers<[1], [0], [0], [1], [0, 0, 1, 1], [], []>} : vector<16x128xbf16>, vector<128x64xbf16>, vector<16x64xf32> -> vector<16x64xf32>
    %387 = vector.extract_strided_slice %17 {offsets = [10, 0], sizes = [1, 64], strides = [1, 1]} : vector<20x128xf32> to vector<1x64xf32>
    %388 = vector.broadcast %387 : vector<1x64xf32> to vector<16x64xf32>
    %389 = arith.addf %386, %388 : vector<16x64xf32>
    %cst_131 = arith.constant 0.000000e+00 : f32
    %390 = vector.broadcast %cst_131 : f32 to vector<16x64xf32>
    %391 = arith.maximumf %389, %390 : vector<16x64xf32>
    %cst_132 = arith.constant 0.000000e+00 : f32
    %392 = vector.broadcast %cst_132 : f32 to vector<4x64xf32>
    %393 = vector.extract_strided_slice %391 {offsets = [0, 0], sizes = [12, 64], strides = [1, 1]} : vector<16x64xf32> to vector<12x64xf32>
    %394 = tpu.concatenate %392, %393 in 0 : vector<4x64xf32>, vector<12x64xf32> -> vector<16x64xf32>
    %c4_i32_133 = arith.constant 4 : i32
    %395 = vector.broadcast %c4_i32_133 : i32 to vector<16x1xi32>
    %396 = arith.cmpi sge, %16, %395 : vector<16x1xi32>
    %cst_134 = arith.constant 0.000000e+00 : f32
    %397 = vector.shape_cast %396 : vector<16x1xi1> to vector<16x1xi1>
    %398 = vector.broadcast %397 : vector<16x1xi1> to vector<16x64xi1>
    %399 = vector.broadcast %cst_134 : f32 to vector<16x64xf32>
    %400 = arith.select %398, %394, %399 : vector<16x64xi1>, vector<16x64xf32>
    %401 = tpu.concatenate %400, %391 in 1 : vector<16x64xf32>, vector<16x64xf32> -> vector<16x128xf32>
    %c1984 = arith.constant 1984 : index
    %c0_135 = arith.constant 0 : index
    %402 = vector.load %arg7[%c1984, %c0_135] : memref<2304x64xbf16, #tpu.memory_space<vmem>>, vector<128x64xbf16>
    %403 = arith.truncf %401 : vector<16x128xf32> to vector<16x128xbf16>
    %cst_136 = arith.constant dense<0.000000e+00> : vector<16x64xf32>
    %404 = tpu.matmul %403, %402, %cst_136 {dimension_numbers = #tpu.dot_dimension_numbers<[1], [0], [0], [1], [0, 0, 1, 1], [], []>} : vector<16x128xbf16>, vector<128x64xbf16>, vector<16x64xf32> -> vector<16x64xf32>
    %405 = vector.extract_strided_slice %17 {offsets = [11, 0], sizes = [1, 64], strides = [1, 1]} : vector<20x128xf32> to vector<1x64xf32>
    %406 = vector.broadcast %405 : vector<1x64xf32> to vector<16x64xf32>
    %407 = arith.addf %404, %406 : vector<16x64xf32>
    %cst_137 = arith.constant 0.000000e+00 : f32
    %408 = vector.broadcast %cst_137 : f32 to vector<16x64xf32>
    %409 = arith.maximumf %407, %408 : vector<16x64xf32>
    %410 = arith.addf %409, %373 : vector<16x64xf32>
    %cst_138 = arith.constant 0.000000e+00 : f32
    %411 = vector.broadcast %cst_138 : f32 to vector<16x64xf32>
    %412 = arith.maximumf %410, %411 : vector<16x64xf32>
    %c2112 = arith.constant 2112 : index
    %c0_139 = arith.constant 0 : index
    %413 = vector.load %arg7[%c2112, %c0_139] : memref<2304x64xbf16, #tpu.memory_space<vmem>>, vector<64x64xbf16>
    %414 = arith.truncf %412 : vector<16x64xf32> to vector<16x64xbf16>
    %cst_140 = arith.constant dense<0.000000e+00> : vector<16x64xf32>
    %415 = tpu.matmul %414, %413, %cst_140 {dimension_numbers = #tpu.dot_dimension_numbers<[1], [0], [0], [1], [0, 0, 1, 1], [], []>} : vector<16x64xbf16>, vector<64x64xbf16>, vector<16x64xf32> -> vector<16x64xf32>
    %416 = vector.extract_strided_slice %17 {offsets = [12, 0], sizes = [1, 64], strides = [1, 1]} : vector<20x128xf32> to vector<1x64xf32>
    %417 = vector.broadcast %416 : vector<1x64xf32> to vector<16x64xf32>
    %418 = arith.addf %415, %417 : vector<16x64xf32>
    %cst_141 = arith.constant 0.000000e+00 : f32
    %419 = vector.broadcast %cst_141 : f32 to vector<16x64xf32>
    %420 = arith.maximumf %418, %419 : vector<16x64xf32>
    %c2176 = arith.constant 2176 : index
    %c0_142 = arith.constant 0 : index
    %421 = vector.load %arg7[%c2176, %c0_142] : memref<2304x64xbf16, #tpu.memory_space<vmem>>, vector<64x64xbf16>
    %422 = arith.truncf %420 : vector<16x64xf32> to vector<16x64xbf16>
    %cst_143 = arith.constant dense<0.000000e+00> : vector<16x64xf32>
    %423 = tpu.matmul %422, %421, %cst_143 {dimension_numbers = #tpu.dot_dimension_numbers<[1], [0], [0], [1], [0, 0, 1, 1], [], []>} : vector<16x64xbf16>, vector<64x64xbf16>, vector<16x64xf32> -> vector<16x64xf32>
    %424 = vector.extract_strided_slice %17 {offsets = [13, 0], sizes = [1, 64], strides = [1, 1]} : vector<20x128xf32> to vector<1x64xf32>
    %425 = vector.broadcast %424 : vector<1x64xf32> to vector<16x64xf32>
    %426 = arith.addf %423, %425 : vector<16x64xf32>
    %cst_144 = arith.constant 0.000000e+00 : f32
    %427 = vector.broadcast %cst_144 : f32 to vector<16x64xf32>
    %428 = arith.maximumf %426, %427 : vector<16x64xf32>
    %429 = arith.addf %428, %412 : vector<16x64xf32>
    %cst_145 = arith.constant 0.000000e+00 : f32
    %430 = vector.broadcast %cst_145 : f32 to vector<16x64xf32>
    %431 = arith.maximumf %429, %430 : vector<16x64xf32>
    %c4736 = arith.constant 4736 : index
    %c0_146 = arith.constant 0 : index
    %432 = vector.load %arg6[%c4736, %c0_146] : memref<5152x128xbf16, #tpu.memory_space<vmem>>, vector<128x128xbf16>
    %433 = arith.truncf %198 : vector<16x128xf32> to vector<16x128xbf16>
    %cst_147 = arith.constant dense<0.000000e+00> : vector<16x128xf32>
    %434 = tpu.matmul %433, %432, %cst_147 {dimension_numbers = #tpu.dot_dimension_numbers<[1], [0], [0], [1], [0, 0, 1, 1], [], []>} : vector<16x128xbf16>, vector<128x128xbf16>, vector<16x128xf32> -> vector<16x128xf32>
    %435 = vector.extract_strided_slice %17 {offsets = [14, 0], sizes = [1, 128], strides = [1, 1]} : vector<20x128xf32> to vector<1x128xf32>
    %436 = vector.broadcast %435 : vector<1x128xf32> to vector<16x128xf32>
    %437 = arith.addf %434, %436 : vector<16x128xf32>
    %438 = vector.extract_strided_slice %437 {offsets = [0, 0], sizes = [16, 32], strides = [1, 1]} : vector<16x128xf32> to vector<16x32xf32>
    %439 = vector.extract_strided_slice %437 {offsets = [0, 32], sizes = [16, 32], strides = [1, 1]} : vector<16x128xf32> to vector<16x32xf32>
    %440 = vector.extract_strided_slice %437 {offsets = [0, 64], sizes = [16, 32], strides = [1, 1]} : vector<16x128xf32> to vector<16x32xf32>
    %c2240 = arith.constant 2240 : index
    %c0_148 = arith.constant 0 : index
    %441 = vector.load %arg7[%c2240, %c0_148] : memref<2304x64xbf16, #tpu.memory_space<vmem>>, vector<64x64xbf16>
    %442 = arith.truncf %431 : vector<16x64xf32> to vector<16x64xbf16>
    %cst_149 = arith.constant dense<0.000000e+00> : vector<16x64xf32>
    %443 = tpu.matmul %442, %441, %cst_149 {dimension_numbers = #tpu.dot_dimension_numbers<[1], [0], [0], [1], [0, 0, 1, 1], [], []>} : vector<16x64xbf16>, vector<64x64xbf16>, vector<16x64xf32> -> vector<16x64xf32>
    %444 = vector.extract_strided_slice %17 {offsets = [15, 0], sizes = [1, 64], strides = [1, 1]} : vector<20x128xf32> to vector<1x64xf32>
    %445 = vector.broadcast %444 : vector<1x64xf32> to vector<16x64xf32>
    %446 = arith.addf %443, %445 : vector<16x64xf32>
    %c4864 = arith.constant 4864 : index
    %c0_150 = arith.constant 0 : index
    %447 = vector.load %arg6[%c4864, %c0_150] : memref<5152x128xbf16, #tpu.memory_space<vmem>>, vector<64x128xbf16>
    %448 = arith.truncf %446 : vector<16x64xf32> to vector<16x64xbf16>
    %cst_151 = arith.constant dense<0.000000e+00> : vector<16x128xf32>
    %449 = tpu.matmul %448, %447, %cst_151 {dimension_numbers = #tpu.dot_dimension_numbers<[1], [0], [0], [1], [0, 0, 1, 1], [], []>} : vector<16x64xbf16>, vector<64x128xbf16>, vector<16x128xf32> -> vector<16x128xf32>
    %450 = vector.extract_strided_slice %17 {offsets = [16, 0], sizes = [1, 128], strides = [1, 1]} : vector<20x128xf32> to vector<1x128xf32>
    %451 = vector.broadcast %450 : vector<1x128xf32> to vector<16x128xf32>
    %452 = arith.addf %449, %451 : vector<16x128xf32>
    %453 = vector.extract_strided_slice %446 {offsets = [0, 0], sizes = [16, 32], strides = [1, 1]} : vector<16x64xf32> to vector<16x32xf32>
    %454 = vector.extract_strided_slice %446 {offsets = [0, 32], sizes = [16, 32], strides = [1, 1]} : vector<16x64xf32> to vector<16x32xf32>
    %455 = vector.extract_strided_slice %452 {offsets = [0, 0], sizes = [16, 32], strides = [1, 1]} : vector<16x128xf32> to vector<16x32xf32>
    %456 = vector.extract_strided_slice %452 {offsets = [0, 32], sizes = [16, 32], strides = [1, 1]} : vector<16x128xf32> to vector<16x32xf32>
    %457 = vector.extract_strided_slice %452 {offsets = [0, 64], sizes = [16, 32], strides = [1, 1]} : vector<16x128xf32> to vector<16x32xf32>
    %458 = vector.extract_strided_slice %452 {offsets = [0, 96], sizes = [16, 32], strides = [1, 1]} : vector<16x128xf32> to vector<16x32xf32>
    %459 = arith.mulf %438, %439 : vector<16x32xf32>
    %cst_152 = arith.constant dense<0.000000e+00> : vector<16xf32>
    %460 = vector.multi_reduction <add>, %459, %cst_152 [1] : vector<16x32xf32> to vector<16xf32>
    %461 = vector.shape_cast %460 : vector<16xf32> to vector<16x1xf32>
    %cst_153 = arith.constant 0.176776692 : f32
    %462 = vector.broadcast %cst_153 : f32 to vector<16x1xf32>
    %463 = arith.mulf %461, %462 : vector<16x1xf32>
    %464 = arith.mulf %438, %455 : vector<16x32xf32>
    %cst_154 = arith.constant dense<0.000000e+00> : vector<16xf32>
    %465 = vector.multi_reduction <add>, %464, %cst_154 [1] : vector<16x32xf32> to vector<16xf32>
    %466 = vector.shape_cast %465 : vector<16xf32> to vector<16x1xf32>
    %cst_155 = arith.constant 0.176776692 : f32
    %467 = vector.broadcast %cst_155 : f32 to vector<16x1xf32>
    %468 = arith.mulf %466, %467 : vector<16x1xf32>
    %469 = arith.mulf %438, %457 : vector<16x32xf32>
    %cst_156 = arith.constant dense<0.000000e+00> : vector<16xf32>
    %470 = vector.multi_reduction <add>, %469, %cst_156 [1] : vector<16x32xf32> to vector<16xf32>
    %471 = vector.shape_cast %470 : vector<16xf32> to vector<16x1xf32>
    %cst_157 = arith.constant 0.176776692 : f32
    %472 = vector.broadcast %cst_157 : f32 to vector<16x1xf32>
    %473 = arith.mulf %471, %472 : vector<16x1xf32>
    %474 = arith.mulf %453, %439 : vector<16x32xf32>
    %cst_158 = arith.constant dense<0.000000e+00> : vector<16xf32>
    %475 = vector.multi_reduction <add>, %474, %cst_158 [1] : vector<16x32xf32> to vector<16xf32>
    %476 = vector.shape_cast %475 : vector<16xf32> to vector<16x1xf32>
    %cst_159 = arith.constant 0.176776692 : f32
    %477 = vector.broadcast %cst_159 : f32 to vector<16x1xf32>
    %478 = arith.mulf %476, %477 : vector<16x1xf32>
    %479 = arith.mulf %453, %455 : vector<16x32xf32>
    %cst_160 = arith.constant dense<0.000000e+00> : vector<16xf32>
    %480 = vector.multi_reduction <add>, %479, %cst_160 [1] : vector<16x32xf32> to vector<16xf32>
    %481 = vector.shape_cast %480 : vector<16xf32> to vector<16x1xf32>
    %cst_161 = arith.constant 0.176776692 : f32
    %482 = vector.broadcast %cst_161 : f32 to vector<16x1xf32>
    %483 = arith.mulf %481, %482 : vector<16x1xf32>
    %484 = arith.mulf %453, %457 : vector<16x32xf32>
    %cst_162 = arith.constant dense<0.000000e+00> : vector<16xf32>
    %485 = vector.multi_reduction <add>, %484, %cst_162 [1] : vector<16x32xf32> to vector<16xf32>
    %486 = vector.shape_cast %485 : vector<16xf32> to vector<16x1xf32>
    %cst_163 = arith.constant 0.176776692 : f32
    %487 = vector.broadcast %cst_163 : f32 to vector<16x1xf32>
    %488 = arith.mulf %486, %487 : vector<16x1xf32>
    %489 = arith.mulf %454, %439 : vector<16x32xf32>
    %cst_164 = arith.constant dense<0.000000e+00> : vector<16xf32>
    %490 = vector.multi_reduction <add>, %489, %cst_164 [1] : vector<16x32xf32> to vector<16xf32>
    %491 = vector.shape_cast %490 : vector<16xf32> to vector<16x1xf32>
    %cst_165 = arith.constant 0.176776692 : f32
    %492 = vector.broadcast %cst_165 : f32 to vector<16x1xf32>
    %493 = arith.mulf %491, %492 : vector<16x1xf32>
    %494 = arith.mulf %454, %455 : vector<16x32xf32>
    %cst_166 = arith.constant dense<0.000000e+00> : vector<16xf32>
    %495 = vector.multi_reduction <add>, %494, %cst_166 [1] : vector<16x32xf32> to vector<16xf32>
    %496 = vector.shape_cast %495 : vector<16xf32> to vector<16x1xf32>
    %cst_167 = arith.constant 0.176776692 : f32
    %497 = vector.broadcast %cst_167 : f32 to vector<16x1xf32>
    %498 = arith.mulf %496, %497 : vector<16x1xf32>
    %499 = arith.mulf %454, %457 : vector<16x32xf32>
    %cst_168 = arith.constant dense<0.000000e+00> : vector<16xf32>
    %500 = vector.multi_reduction <add>, %499, %cst_168 [1] : vector<16x32xf32> to vector<16xf32>
    %501 = vector.shape_cast %500 : vector<16xf32> to vector<16x1xf32>
    %cst_169 = arith.constant 0.176776692 : f32
    %502 = vector.broadcast %cst_169 : f32 to vector<16x1xf32>
    %503 = arith.mulf %501, %502 : vector<16x1xf32>
    %504 = arith.maximumf %463, %468 : vector<16x1xf32>
    %505 = arith.maximumf %504, %473 : vector<16x1xf32>
    %506 = arith.subf %463, %505 : vector<16x1xf32>
    %507 = math.exp %506 : vector<16x1xf32>
    %508 = arith.subf %468, %505 : vector<16x1xf32>
    %509 = math.exp %508 : vector<16x1xf32>
    %510 = arith.subf %473, %505 : vector<16x1xf32>
    %511 = math.exp %510 : vector<16x1xf32>
    %512 = arith.addf %507, %509 : vector<16x1xf32>
    %513 = arith.addf %512, %511 : vector<16x1xf32>
    %514 = tpu.reciprocal %513 {approx = true} : vector<16x1xf32> -> vector<16x1xf32>
    %515 = vector.broadcast %507 : vector<16x1xf32> to vector<16x32xf32>
    %516 = arith.mulf %515, %440 : vector<16x32xf32>
    %517 = vector.broadcast %509 : vector<16x1xf32> to vector<16x32xf32>
    %518 = arith.mulf %517, %456 : vector<16x32xf32>
    %519 = arith.addf %516, %518 : vector<16x32xf32>
    %520 = vector.broadcast %511 : vector<16x1xf32> to vector<16x32xf32>
    %521 = arith.mulf %520, %458 : vector<16x32xf32>
    %522 = arith.addf %519, %521 : vector<16x32xf32>
    %523 = vector.broadcast %514 : vector<16x1xf32> to vector<16x32xf32>
    %524 = arith.mulf %522, %523 : vector<16x32xf32>
    %525 = arith.addf %524, %440 : vector<16x32xf32>
    %526 = arith.maximumf %478, %483 : vector<16x1xf32>
    %527 = arith.maximumf %526, %488 : vector<16x1xf32>
    %528 = arith.subf %478, %527 : vector<16x1xf32>
    %529 = math.exp %528 : vector<16x1xf32>
    %530 = arith.subf %483, %527 : vector<16x1xf32>
    %531 = math.exp %530 : vector<16x1xf32>
    %532 = arith.subf %488, %527 : vector<16x1xf32>
    %533 = math.exp %532 : vector<16x1xf32>
    %534 = arith.addf %529, %531 : vector<16x1xf32>
    %535 = arith.addf %534, %533 : vector<16x1xf32>
    %536 = tpu.reciprocal %535 {approx = true} : vector<16x1xf32> -> vector<16x1xf32>
    %537 = vector.broadcast %529 : vector<16x1xf32> to vector<16x32xf32>
    %538 = arith.mulf %537, %440 : vector<16x32xf32>
    %539 = vector.broadcast %531 : vector<16x1xf32> to vector<16x32xf32>
    %540 = arith.mulf %539, %456 : vector<16x32xf32>
    %541 = arith.addf %538, %540 : vector<16x32xf32>
    %542 = vector.broadcast %533 : vector<16x1xf32> to vector<16x32xf32>
    %543 = arith.mulf %542, %458 : vector<16x32xf32>
    %544 = arith.addf %541, %543 : vector<16x32xf32>
    %545 = vector.broadcast %536 : vector<16x1xf32> to vector<16x32xf32>
    %546 = arith.mulf %544, %545 : vector<16x32xf32>
    %547 = arith.addf %546, %456 : vector<16x32xf32>
    %548 = arith.maximumf %493, %498 : vector<16x1xf32>
    %549 = arith.maximumf %548, %503 : vector<16x1xf32>
    %550 = arith.subf %493, %549 : vector<16x1xf32>
    %551 = math.exp %550 : vector<16x1xf32>
    %552 = arith.subf %498, %549 : vector<16x1xf32>
    %553 = math.exp %552 : vector<16x1xf32>
    %554 = arith.subf %503, %549 : vector<16x1xf32>
    %555 = math.exp %554 : vector<16x1xf32>
    %556 = arith.addf %551, %553 : vector<16x1xf32>
    %557 = arith.addf %556, %555 : vector<16x1xf32>
    %558 = tpu.reciprocal %557 {approx = true} : vector<16x1xf32> -> vector<16x1xf32>
    %559 = vector.broadcast %551 : vector<16x1xf32> to vector<16x32xf32>
    %560 = arith.mulf %559, %440 : vector<16x32xf32>
    %561 = vector.broadcast %553 : vector<16x1xf32> to vector<16x32xf32>
    %562 = arith.mulf %561, %456 : vector<16x32xf32>
    %563 = arith.addf %560, %562 : vector<16x32xf32>
    %564 = vector.broadcast %555 : vector<16x1xf32> to vector<16x32xf32>
    %565 = arith.mulf %564, %458 : vector<16x32xf32>
    %566 = arith.addf %563, %565 : vector<16x32xf32>
    %567 = vector.broadcast %558 : vector<16x1xf32> to vector<16x32xf32>
    %568 = arith.mulf %566, %567 : vector<16x32xf32>
    %569 = arith.addf %568, %458 : vector<16x32xf32>
    %570 = arith.addf %525, %547 : vector<16x32xf32>
    %571 = arith.addf %570, %569 : vector<16x32xf32>
    %cst_170 = arith.constant dense<0.000000e+00> : vector<16xf32>
    %572 = vector.multi_reduction <add>, %571, %cst_170 [1] : vector<16x32xf32> to vector<16xf32>
    %573 = vector.shape_cast %572 : vector<16xf32> to vector<16x1xf32>
    %cst_171 = arith.constant 0.010416667 : f32
    %574 = vector.broadcast %cst_171 : f32 to vector<16x1xf32>
    %575 = arith.mulf %573, %574 : vector<16x1xf32>
    %576 = vector.broadcast %575 : vector<16x1xf32> to vector<16x32xf32>
    %577 = arith.subf %525, %576 : vector<16x32xf32>
    %578 = arith.mulf %577, %577 : vector<16x32xf32>
    %579 = vector.broadcast %575 : vector<16x1xf32> to vector<16x32xf32>
    %580 = arith.subf %547, %579 : vector<16x32xf32>
    %581 = arith.mulf %580, %580 : vector<16x32xf32>
    %582 = arith.addf %578, %581 : vector<16x32xf32>
    %583 = vector.broadcast %575 : vector<16x1xf32> to vector<16x32xf32>
    %584 = arith.subf %569, %583 : vector<16x32xf32>
    %585 = arith.mulf %584, %584 : vector<16x32xf32>
    %586 = arith.addf %582, %585 : vector<16x32xf32>
    %cst_172 = arith.constant dense<0.000000e+00> : vector<16xf32>
    %587 = vector.multi_reduction <add>, %586, %cst_172 [1] : vector<16x32xf32> to vector<16xf32>
    %588 = vector.shape_cast %587 : vector<16xf32> to vector<16x1xf32>
    %cst_173 = arith.constant 0.010416667 : f32
    %589 = vector.broadcast %cst_173 : f32 to vector<16x1xf32>
    %590 = arith.mulf %588, %589 : vector<16x1xf32>
    %cst_174 = arith.constant 9.99999974E-6 : f32
    %591 = vector.broadcast %cst_174 : f32 to vector<16x1xf32>
    %592 = arith.addf %590, %591 : vector<16x1xf32>
    %593 = math.rsqrt %592 : vector<16x1xf32>
    %594 = vector.extract_strided_slice %17 {offsets = [18, 0], sizes = [1, 96], strides = [1, 1]} : vector<20x128xf32> to vector<1x96xf32>
    %595 = vector.extract_strided_slice %17 {offsets = [19, 0], sizes = [1, 96], strides = [1, 1]} : vector<20x128xf32> to vector<1x96xf32>
    %596 = vector.broadcast %575 : vector<16x1xf32> to vector<16x32xf32>
    %597 = arith.subf %525, %596 : vector<16x32xf32>
    %598 = vector.broadcast %593 : vector<16x1xf32> to vector<16x32xf32>
    %599 = arith.mulf %597, %598 : vector<16x32xf32>
    %600 = vector.extract_strided_slice %594 {offsets = [0, 0], sizes = [1, 32], strides = [1, 1]} : vector<1x96xf32> to vector<1x32xf32>
    %601 = vector.broadcast %600 : vector<1x32xf32> to vector<16x32xf32>
    %602 = arith.mulf %599, %601 : vector<16x32xf32>
    %603 = vector.extract_strided_slice %595 {offsets = [0, 0], sizes = [1, 32], strides = [1, 1]} : vector<1x96xf32> to vector<1x32xf32>
    %604 = vector.broadcast %603 : vector<1x32xf32> to vector<16x32xf32>
    %605 = arith.addf %602, %604 : vector<16x32xf32>
    %606 = vector.broadcast %575 : vector<16x1xf32> to vector<16x32xf32>
    %607 = arith.subf %547, %606 : vector<16x32xf32>
    %608 = vector.broadcast %593 : vector<16x1xf32> to vector<16x32xf32>
    %609 = arith.mulf %607, %608 : vector<16x32xf32>
    %610 = vector.extract_strided_slice %594 {offsets = [0, 32], sizes = [1, 32], strides = [1, 1]} : vector<1x96xf32> to vector<1x32xf32>
    %611 = vector.broadcast %610 : vector<1x32xf32> to vector<16x32xf32>
    %612 = arith.mulf %609, %611 : vector<16x32xf32>
    %613 = vector.extract_strided_slice %595 {offsets = [0, 32], sizes = [1, 32], strides = [1, 1]} : vector<1x96xf32> to vector<1x32xf32>
    %614 = vector.broadcast %613 : vector<1x32xf32> to vector<16x32xf32>
    %615 = arith.addf %612, %614 : vector<16x32xf32>
    %616 = vector.broadcast %575 : vector<16x1xf32> to vector<16x32xf32>
    %617 = arith.subf %569, %616 : vector<16x32xf32>
    %618 = vector.broadcast %593 : vector<16x1xf32> to vector<16x32xf32>
    %619 = arith.mulf %617, %618 : vector<16x32xf32>
    %620 = vector.extract_strided_slice %594 {offsets = [0, 64], sizes = [1, 32], strides = [1, 1]} : vector<1x96xf32> to vector<1x32xf32>
    %621 = vector.broadcast %620 : vector<1x32xf32> to vector<16x32xf32>
    %622 = arith.mulf %619, %621 : vector<16x32xf32>
    %623 = vector.extract_strided_slice %595 {offsets = [0, 64], sizes = [1, 32], strides = [1, 1]} : vector<1x96xf32> to vector<1x32xf32>
    %624 = vector.broadcast %623 : vector<1x32xf32> to vector<16x32xf32>
    %625 = arith.addf %622, %624 : vector<16x32xf32>
    %626 = tpu.concatenate %198, %605, %615, %625 in 1 : vector<16x128xf32>, vector<16x32xf32>, vector<16x32xf32>, vector<16x32xf32> -> vector<16x224xf32>
    %c4928 = arith.constant 4928 : index
    %c0_175 = arith.constant 0 : index
    %627 = vector.load %arg6[%c4928, %c0_175] : memref<5152x128xbf16, #tpu.memory_space<vmem>>, vector<224x128xbf16>
    %628 = arith.truncf %626 : vector<16x224xf32> to vector<16x224xbf16>
    %cst_176 = arith.constant dense<0.000000e+00> : vector<16x128xf32>
    %629 = tpu.matmul %628, %627, %cst_176 {dimension_numbers = #tpu.dot_dimension_numbers<[1], [0], [0], [1], [0, 0, 1, 1], [], []>} : vector<16x224xbf16>, vector<224x128xbf16>, vector<16x128xf32> -> vector<16x128xf32>
    %630 = vector.extract_strided_slice %17 {offsets = [17, 0], sizes = [1, 128], strides = [1, 1]} : vector<20x128xf32> to vector<1x128xf32>
    %631 = vector.broadcast %630 : vector<1x128xf32> to vector<16x128xf32>
    %632 = arith.addf %629, %631 : vector<16x128xf32>
    %c0_177 = arith.constant 0 : index
    %c0_178 = arith.constant 0 : index
    %633 = vector.load %arg8[%c0_177, %c0_178] : memref<16x128xf32, #tpu.memory_space<vmem>>, vector<16x128xf32>
    tpu.vector_store %arg8[%c0_177, %c0_178], %632 {strides = array<i32>} : memref<16x128xf32, #tpu.memory_space<vmem>>, vector<16x128xf32>,
    return
  }
  func.func @transform_0(%arg0: i32) -> (i32, i32) {
    %c0_i32 = arith.constant 0 : i32
    %c0_i32_0 = arith.constant 0 : i32
    return %arg0, %c0_i32 : i32, i32
  }
  func.func @transform_1(%arg0: i32) -> (i32, i32) {
    %c0_i32 = arith.constant 0 : i32
    %c0_i32_0 = arith.constant 0 : i32
    return %arg0, %c0_i32 : i32, i32
  }
  func.func @transform_2(%arg0: i32) -> (i32, i32) {
    %c0_i32 = arith.constant 0 : i32
    %c0_i32_0 = arith.constant 0 : i32
    %c0_i32_1 = arith.constant 0 : i32
    return %c0_i32, %c0_i32_0 : i32, i32
  }
  func.func @transform_3(%arg0: i32) -> (i32, i32) {
    %c0_i32 = arith.constant 0 : i32
    %c0_i32_0 = arith.constant 0 : i32
    %c0_i32_1 = arith.constant 0 : i32
    return %c0_i32, %c0_i32_0 : i32, i32
  }
  func.func @transform_4(%arg0: i32) -> (i32, i32) {
    %c0_i32 = arith.constant 0 : i32
    %c0_i32_0 = arith.constant 0 : i32
    %c0_i32_1 = arith.constant 0 : i32
    return %c0_i32, %c0_i32_0 : i32, i32
  }
  func.func @transform_5(%arg0: i32) -> (i32, i32) {
    %c0_i32 = arith.constant 0 : i32
    %c0_i32_0 = arith.constant 0 : i32
    %c0_i32_1 = arith.constant 0 : i32
    return %c0_i32, %c0_i32_0 : i32, i32
  }
  func.func @transform_6(%arg0: i32) -> (i32, i32) {
    %c0_i32 = arith.constant 0 : i32
    %c0_i32_0 = arith.constant 0 : i32
    %c0_i32_1 = arith.constant 0 : i32
    return %c0_i32, %c0_i32_0 : i32, i32
  }
  func.func @transform_7(%arg0: i32) -> (i32, i32) {
    %c0_i32 = arith.constant 0 : i32
    %c0_i32_0 = arith.constant 0 : i32
    return %arg0, %c0_i32 : i32, i32
  }
}

</mosaic_0001>

<bundles_post_ra>
// kernel: tpu_custom_call.1
= control target key start
LH: loop header
LB: loop body
LE: loop exit
PB: predicated region body
PF: predicated region fallthrough
CT: control target
= control target key end

     0   :  { %12 = vsyncpa [#allocation3], 0  ;;  %s12522_s0 = inlined_call_operand.hbm [shape: f32[16,768], index: 0, kind: input, shape index: {}]   ;;  %s12523_s1 = inlined_call_operand.hbm [shape: f32[16,168], index: 1, kind: input, shape index: {}]   ;;  %s12524_s2 = inlined_call_operand.hbm [shape: bf16[768,512], index: 2, kind: input, shape index: {}]   ;;  %s12525_s3 = inlined_call_operand.hbm [shape: f32[1,512], index: 3, kind: input, shape index: {}]   ;;  %s12526_s4 = inlined_call_operand.hbm [shape: f32[20,128], index: 4, kind: input, shape index: {}]   ;;  %s12527_s5 = inlined_call_operand.hbm [shape: bf16[5152,128], index: 5, kind: input, shape index: {}]   ;;  %s12528_s6 = inlined_call_operand.vmem [shape: bf16[2304,64], index: 6, kind: input, shape index: {}]   ;;  %s12529_s7 = inlined_call_operand.hbm [shape: f32[16,128], index: 7, kind: output, shape index: {}]  }
   0x1   :  { %13 = vsyncpa [#allocation6], 0 }
   0x2   :  { %14 = vsyncpa [#allocation9], 0 }
   0x3   :  { %15 = vsyncpa [#allocation12], 0  ;;  %s34_s26 = sshll.u32 %s12523_s1, 4  ;;  %s35_s26 = int_to_ptr.hbm [resolvable:$true] %s34_s26 }
   0x4   :  { %16 = vsyncpa [#allocation4], 0  ;;  %s11181_s27 = smov [#allocation5]   ;;  %s61_s8 = sshll.u32 %s12525_s3, 4  ;;  %s62_s8 = int_to_ptr.hbm [resolvable:$true] %s61_s8 }
   0x5   :  { %s36_s28 = sshll.u32 %s11181_s27, 4  ;;  %s11182_s9 = smov 256   ;;  %s37_s28 = int_to_ptr.vmem [resolvable:$true] %s36_s28 }
   0x6   :  { %s11183_s10 = smov 16   ;;  %s11184_s11 = smov [#allocation8]  }
   0x7   :  { %42 = dma.hbm_to_vmem [thread:$0]  %s35_s26, 512, %s37_s28, [#allocation6], %s11182_s9, %s11182_s9, %s11183_s10  }
   0x8   :  { %s63_s12 = sshll.u32 %s11184_s11, 4  ;;  %s21_s15 = sshll.u32 %s12522_s0, 4  ;;  %s64_s12 = int_to_ptr.vmem [resolvable:$true] %s63_s12  ;;  %s22_s15 = int_to_ptr.hbm [resolvable:$true] %s21_s15 }
   0x9   :  { %66 = dma.hbm_to_vmem [thread:$0]  %s62_s8, 64, %s64_s12, [#allocation9]  }
   0xa   :  { %s11185_s1 = smov [#allocation2]   ;;  %s47_s3 = sshll.u32 %s12524_s2, 4  ;;  %s48_s3 = int_to_ptr.hbm [resolvable:$true] %s47_s3 }
   0xb   :  { %s23_s16 = sshll.u32 %s11185_s1, 4  ;;  %s11186_s19 = smov 768   ;;  %s24_s16 = int_to_ptr.vmem [resolvable:$true] %s23_s16 }
   0xc   :  { %s11187_s20 = smov 48   ;;  %s11188_s21 = smov [#allocation7]  }
   0xd   :  { %29 = dma.hbm_to_vmem [thread:$0]  %s22_s15, 1536, %s24_s16, [#allocation3], %s11186_s19, %s11186_s19, %s11187_s20  }
   0xe   :  { %s49_s22 = sshll.u32 %s11188_s21, 4  ;;  %s71_s0 = sshll.u32 %s12526_s4, 4  ;;  %s50_s22 = int_to_ptr.vmem [resolvable:$true] %s49_s22  ;;  %s72_s0 = int_to_ptr.hbm [resolvable:$true] %s71_s0 }
   0xf   :  { %55 = dma.hbm_to_vmem [thread:$0]  %s48_s3, 24576, %s50_s22, [#allocation6], %s11182_s9, %s11182_s9, %s11183_s10  }
  0x10   :  { %s11189_s25 = smov [#allocation10]   ;;  %s84_s2 = sshll.u32 %s12527_s5, 4  ;;  %s85_s2 = int_to_ptr.hbm [resolvable:$true] %s84_s2 }
  0x11   :  { %s73_s26 = sshll.u32 %s11189_s25, 4  ;;  %s11190_s29 = smov 128   ;;  %s74_s26 = int_to_ptr.vmem [resolvable:$true] %s73_s26 }
  0x12   :  { %s11191_s30 = smov 8   ;;  %s11192_s8 = smov [#allocation11]  }
  0x13   :  { %79 = dma.hbm_to_vmem [thread:$0]  %s72_s0, 384, %s74_s26, [#allocation9], %s11190_s29, %s11190_s29, %s11191_s30  }
  0x14   :  { %s86_s11 = sshll.u32 %s11192_s8, 4  ;;  %s11193_s4 = smov 64   ;;  %s87_s11 = int_to_ptr.vmem [resolvable:$true] %s86_s11 }
  0x15   :  { %s11194_s12 = smov 4  }
  0x16   :  { %92 = dma.hbm_to_vmem [thread:$0]  %s85_s2, 41216, %s87_s11, [#allocation12], %s11193_s4, %s11193_s4, %s11194_s12  }
  0x17   :  { %11171 = dma.done.wait [#allocation3], 1536  }
  0x18   :  { %11172 = vsyncadd [#allocation3], 4294965760 }
  0x19   :  { %11173 = dma.done.wait [#allocation6], 25088  }
  0x1a   :  { %11174 = vsyncadd [#allocation6], 4294942208 }
  0x1b   :  { %11175 = dma.done.wait [#allocation9], 448  }
  0x1c   :  { %11176 = vsyncadd [#allocation9], 4294966848 }
  0x1d   :  { %11177 = dma.done.wait [#allocation12], 41216  }
  0x1e   :  { %11178 = vsyncadd [#allocation12], 4294926080  ;;  %v7581_v0 = vld [vmem:[#allocation7 + $0xe0] sm:$0xf]  ;;  %v10210_v1 = vld [vmem:[#allocation7 + $0xec] sm:$0xf0] }
  0x1f   :  { %v7709_v2 = vld [vmem:[#allocation7 + $0x1e0] sm:$0xf]  ;;  %v7582_v3 = vor.u32 %v10210_v1, %v7581_v0  ;;  %v10242_v4 = vld [vmem:[#allocation7 + $0x1ec] sm:$0xf0]  ;;  %vm1791_vm0 = vcmask 1040384   ;;  %vm1674_vm1 = vcmask 1043456  }
  0x20   :  { %v7837_v5 = vld [vmem:[#allocation7 + $0x2e0] sm:$0xf]  ;;  %v10274_v6 = vld [vmem:[#allocation7 + $0x2ec] sm:$0xf0]  ;;  %v7710_v7 = vor.u32 %v10242_v4, %v7709_v2  ;;  %vm1713_vm5 = vcmask 1042432   ;;  %vm1752_vm9 = vcmask 1041408  }
  0x21   :  { %v7838_v8 = vor.u32 %v10274_v6, %v7837_v5  ;;  %v7965_v9 = vld [vmem:[#allocation7 + $0x3e0] sm:$0xf]  ;;  %v10306_v10 = vld [vmem:[#allocation7 + $0x3ec] sm:$0xf0]  ;;  %1330 = vmatpush.bf16.msra.mxu0 %v7582_v3  ;;  %s11195_s5 = smov 40   ;;  %s11196_s9 = smov 80  }
  0x22   :  { %v7565_v11 = vld [vmem:[#allocation7 + $0xc0] sm:$0xf]  ;;  %v7966_v12 = vor.u32 %v10306_v10, %v7965_v9  ;;  %v10206_v13 = vld [vmem:[#allocation7 + $0xcc] sm:$0xf0]  ;;  %1344 = vmatpush.bf16.msra.mxu1 %v7710_v7  ;;  %s11197_s10 = smov 32   ;;  %s11198_s13 = smov 120  }
  0x23   :  { %v7693_v14 = vld [vmem:[#allocation7 + $0x1c0] sm:$0xf]  ;;  %v10238_v15 = vld [vmem:[#allocation7 + $0x1cc] sm:$0xf0]  ;;  %1358 = vmatpush.bf16.msra.mxu2 %v7838_v8  ;;  %v7566_v16 = vor.u32 %v10206_v13, %v7565_v11  ;;  %s11199_s18 = smov 96   ;;  %s7451_s26 = sshll.u32 %s12529_s7, 4  ;;  %s7452_s26 = int_to_ptr.hbm [resolvable:$true] %s7451_s26 }
  0x24   :  { %v7694_v17 = vor.u32 %v10238_v15, %v7693_v14  ;;  %v7821_v18 = vld [vmem:[#allocation7 + $0x2c0] sm:$0xf]  ;;  %v10270_v19 = vld [vmem:[#allocation7 + $0x2cc] sm:$0xf0]  ;;  %1372 = vmatpush.bf16.msra.mxu3 %v7966_v12 }
  0x25   :  { %v7949_v20 = vld [vmem:[#allocation7 + $0x3c0] sm:$0xf]  ;;  %v7822_v21 = vor.u32 %v10270_v19, %v7821_v18  ;;  %v10302_v22 = vld [vmem:[#allocation7 + $0x3cc] sm:$0xf0]  ;;  %1331 = vmatpush.bf16.msra.mxu0 %v7566_v16 }
  0x26   :  { %v7549_v23 = vld [vmem:[#allocation7 + $0xa0] sm:$0xf]  ;;  %v10202_v24 = vld [vmem:[#allocation7 + $0xac] sm:$0xf0]  ;;  %v7950_v25 = vor.u32 %v10302_v22, %v7949_v20  ;;  %1345 = vmatpush.bf16.msra.mxu1 %v7694_v17 }
  0x27   :  { %v7677_v26 = vld [vmem:[#allocation7 + $0x1a0] sm:$0xf]  ;;  %v10234_v27 = vld [vmem:[#allocation7 + $0x1ac] sm:$0xf0]  ;;  %v7550_v29 = vor.u32 %v10202_v24, %v7549_v23  ;;  %1359 = vmatpush.bf16.msra.mxu2 %v7822_v21 }
  0x28   :  { %v7805_v28 = vld [vmem:[#allocation7 + $0x2a0] sm:$0xf]  ;;  %v10266_v30 = vld [vmem:[#allocation7 + $0x2ac] sm:$0xf0]  ;;  %v7678_v33 = vor.u32 %v10234_v27, %v7677_v26  ;;  %1373 = vmatpush.bf16.msra.mxu3 %v7950_v25 }
  0x29   :  { %v7933_v31 = vld [vmem:[#allocation7 + $0x3a0] sm:$0xf]  ;;  %v10298_v32 = vld [vmem:[#allocation7 + $0x3ac] sm:$0xf0]  ;;  %v7806_v34 = vor.u32 %v10266_v30, %v7805_v28  ;;  %1332 = vmatpush.bf16.msra.mxu0 %v7550_v29 }
  0x2a   :  { %v7533_v35 = vld [vmem:[#allocation7 + $0x80] sm:$0xf]  ;;  %v10198_v36 = vld [vmem:[#allocation7 + $0x8c] sm:$0xf0]  ;;  %v7934_v38 = vor.u32 %v10298_v32, %v7933_v31  ;;  %1346 = vmatpush.bf16.msra.mxu1 %v7678_v33  ;;  %v10208_v33 = vld [vmem:[#allocation7 + $0xe4] sm:$0xf] }
  0x2b   :  { %v7661_v37 = vld [vmem:[#allocation7 + $0x180] sm:$0xf]  ;;  %v10230_v39 = vld [vmem:[#allocation7 + $0x18c] sm:$0xf0]  ;;  %v7534_v44 = vor.u32 %v10198_v36, %v7533_v35  ;;  %1360 = vmatpush.bf16.msra.mxu2 %v7806_v34  ;;  %v7583_v34 = vld [vmem:[#allocation7 + $0xf0] sm:$0xf0] }
  0x2c   :  { %v7789_v40 = vld [vmem:[#allocation7 + $0x280] sm:$0xf]  ;;  %v10262_v41 = vld [vmem:[#allocation7 + $0x28c] sm:$0xf0]  ;;  %v7662_v45 = vor.u32 %v10230_v39, %v7661_v37  ;;  %1374 = vmatpush.bf16.msra.mxu3 %v7934_v38  ;;  %v10240_v37 = vld [vmem:[#allocation7 + $0x1e4] sm:$0xf] }
  0x2d   :  { %v7917_v42 = vld [vmem:[#allocation7 + $0x380] sm:$0xf]  ;;  %v10294_v43 = vld [vmem:[#allocation7 + $0x38c] sm:$0xf0]  ;;  %v7790_v46 = vor.u32 %v10262_v41, %v7789_v40  ;;  %1333 = vmatpush.bf16.msra.mxu0 %v7534_v44  ;;  %v7711_v38 = vld [vmem:[#allocation7 + $0x1f0] sm:$0xf0] }
  0x2e   :  { %v7517_v47 = vld [vmem:[#allocation7 + $0x60] sm:$0xf]  ;;  %v10194_v48 = vld [vmem:[#allocation7 + $0x6c] sm:$0xf0]  ;;  %v7918_v50 = vor.u32 %v10294_v43, %v7917_v42  ;;  %1347 = vmatpush.bf16.msra.mxu1 %v7662_v45  ;;  %v7586_v43 = vor.u32 %v10208_v33, %v7583_v34  ;;  %v7519_v33 = vld [vmem:[#allocation7 + $0x70] sm:$0xf0] }
  0x2f   :  { %v7645_v49 = vld [vmem:[#allocation7 + $0x160] sm:$0xf]  ;;  %v10226_v51 = vld [vmem:[#allocation7 + $0x16c] sm:$0xf0]  ;;  %v7518_v56 = vor.u32 %v10194_v48, %v7517_v47  ;;  %1361 = vmatpush.bf16.msra.mxu2 %v7790_v46  ;;  %v7714_v47 = vor.u32 %v10240_v37, %v7711_v38  ;;  %v10204_v48 = vld [vmem:[#allocation7 + $0xc4] sm:$0xf] }
  0x30   :  { %v7773_v52 = vld [vmem:[#allocation7 + $0x260] sm:$0xf]  ;;  %v10258_v53 = vld [vmem:[#allocation7 + $0x26c] sm:$0xf0]  ;;  %v7646_v57 = vor.u32 %v10226_v51, %v7645_v49  ;;  %1375 = vmatpush.bf16.msra.mxu3 %v7918_v50  ;;  %v7567_v49 = vld [vmem:[#allocation7 + $0xd0] sm:$0xf0] }
  0x31   :  { %v7901_v54 = vld [vmem:[#allocation7 + $0x360] sm:$0xf]  ;;  %v10290_v55 = vld [vmem:[#allocation7 + $0x36c] sm:$0xf0]  ;;  %v7774_v58 = vor.u32 %v10258_v53, %v7773_v52  ;;  %1334 = vmatpush.bf16.msra.mxu0 %v7518_v56  ;;  %v10236_v50 = vld [vmem:[#allocation7 + $0x1c4] sm:$0xf] }
  0x32   :  { %v7501_v59 = vld [vmem:[#allocation7 + $0x40] sm:$0xf]  ;;  %v10190_v60 = vld [vmem:[#allocation7 + $0x4c] sm:$0xf0]  ;;  %v7902_v62 = vor.u32 %v10290_v55, %v7901_v54  ;;  %1348 = vmatpush.bf16.msra.mxu1 %v7646_v57  ;;  %v7695_v51 = vld [vmem:[#allocation7 + $0x1d0] sm:$0xf0] }
  0x33   :  { %v7629_v61 = vld [vmem:[#allocation7 + $0x140] sm:$0xf]  ;;  %v10222_v63 = vld [vmem:[#allocation7 + $0x14c] sm:$0xf0]  ;;  %v7502_v4 = vor.u32 %v10190_v60, %v7501_v59  ;;  %1362 = vmatpush.bf16.msra.mxu2 %v7774_v58  ;;  %v7570_v59 = vor.u32 %v10204_v48, %v7567_v49  ;;  %v10224_v34 = vld [vmem:[#allocation7 + $0x164] sm:$0xf] }
  0x34   :  { %v7757_v0 = vld [vmem:[#allocation7 + $0x240] sm:$0xf]  ;;  %v10254_v1 = vld [vmem:[#allocation7 + $0x24c] sm:$0xf0]  ;;  %v7630_v5 = vor.u32 %v10222_v63, %v7629_v61  ;;  %1376 = vmatpush.bf16.msra.mxu3 %v7902_v62  ;;  %v10200_v62 = vld [vmem:[#allocation7 + $0xa4] sm:$0xf]  ;;  %v7698_v63 = vor.u32 %v10236_v50, %v7695_v51 }
  0x35   :  { %v7885_v2 = vld [vmem:[#allocation7 + $0x340] sm:$0xf]  ;;  %v10286_v3 = vld [vmem:[#allocation7 + $0x34c] sm:$0xf0]  ;;  %v7758_v6 = vor.u32 %v10254_v1, %v7757_v0  ;;  %1335 = vmatpush.bf16.msra.mxu0 %v7502_v4  ;;  %v7551_v0 = vld [vmem:[#allocation7 + $0xb0] sm:$0xf0] }
  0x36   :  { %v7485_v7 = vld [vmem:[#allocation7 + $0x20] sm:$0xf]  ;;  %v10186_v8 = vld [vmem:[#allocation7 + $0x2c] sm:$0xf0]  ;;  %v7886_v10 = vor.u32 %v10286_v3, %v7885_v2  ;;  %1349 = vmatpush.bf16.msra.mxu1 %v7630_v5  ;;  %v151_v1 = vld [vmem:[#allocation2 + $0x8] sm:$0xff] }
  0x37   :  { %v7613_v9 = vld [vmem:[#allocation7 + $0x120] sm:$0xf]  ;;  %v10218_v11 = vld [vmem:[#allocation7 + $0x12c] sm:$0xf0]  ;;  %v7486_v16 = vor.u32 %v10186_v8, %v7485_v7  ;;  %1363 = vmatpush.bf16.msra.mxu2 %v7758_v6  ;;  %v157_v2 = vld [vmem:[#allocation2 + $0x38] sm:$0xff] }
  0x38   :  { %v7741_v12 = vld [vmem:[#allocation7 + $0x220] sm:$0xf]  ;;  %v10250_v13 = vld [vmem:[#allocation7 + $0x22c] sm:$0xf0]  ;;  %v7614_v19 = vor.u32 %v10218_v11, %v7613_v9  ;;  %1377 = vmatpush.bf16.msra.mxu3 %v7886_v10  ;;  %v10232_v3 = vld [vmem:[#allocation7 + $0x1a4] sm:$0xf]  ;;  %v11267_v6 = vpack.c.bf16 %v157_v2, %v151_v1 }
  0x39   :  { %v7869_v14 = vld [vmem:[#allocation7 + $0x320] sm:$0xf]  ;;  %v10282_v15 = vld [vmem:[#allocation7 + $0x32c] sm:$0xf0]  ;;  %v7742_v20 = vor.u32 %v10250_v13, %v7741_v12  ;;  %1336 = vmatpush.bf16.msra.mxu0 %v7486_v16  ;;  %v7679_v4 = vld [vmem:[#allocation7 + $0x1b0] sm:$0xf0]  ;;  %v7554_v12 = vor.u32 %v10200_v62, %v7551_v0 }
  0x3a   :  { %v7469_v17 = vld [vmem:[#allocation7] sm:$0xf]  ;;  %v10182_v18 = vld [vmem:[#allocation7 + $0xc] sm:$0xf0]  ;;  %v7870_v24 = vor.u32 %v10282_v15, %v7869_v14  ;;  %1350 = vmatpush.bf16.msra.mxu1 %v7614_v19  ;;  %v10196_v13 = vld [vmem:[#allocation7 + $0x84] sm:$0xf]  ;;  %v7682_v16 = vor.u32 %v10232_v3, %v7679_v4 }
  0x3b   :  { %v7597_v21 = vld [vmem:[#allocation7 + $0x100] sm:$0xf]  ;;  %v10214_v22 = vld [vmem:[#allocation7 + $0x10c] sm:$0xf0]  ;;  %v7470_v31 = vor.u32 %v10182_v18, %v7469_v17  ;;  %1364 = vmatpush.bf16.msra.mxu2 %v7742_v20  ;;  %v7535_v14 = vld [vmem:[#allocation7 + $0x90] sm:$0xf0] }
  0x3c   :  { %v7725_v23 = vld [vmem:[#allocation7 + $0x200] sm:$0xf]  ;;  %v10246_v25 = vld [vmem:[#allocation7 + $0x20c] sm:$0xf0]  ;;  %v7598_v35 = vor.u32 %v10214_v22, %v7597_v21  ;;  %1378 = vmatpush.bf16.msra.mxu3 %v7870_v24  ;;  %v153_v18 = vld [vmem:[#allocation2 + $0x18] sm:$0xff] }
  0x3d   :  { %v7853_v26 = vld [vmem:[#allocation7 + $0x300] sm:$0xf]  ;;  %v10278_v27 = vld [vmem:[#allocation7 + $0x30c] sm:$0xf0]  ;;  %v7726_v36 = vor.u32 %v10246_v25, %v7725_v23  ;;  %1337 = vmatpush.bf16.msra.mxu0 %v7470_v31  ;;  %v159_v19 = vld [vmem:[#allocation2 + $0x48] sm:$0xff] }
  0x3e   :  { %v8093_v28 = vld [vmem:[#allocation7 + $0x4e0] sm:$0xf]  ;;  %v10338_v29 = vld [vmem:[#allocation7 + $0x4ec] sm:$0xf0]  ;;  %v7854_v39 = vor.u32 %v10278_v27, %v7853_v26  ;;  %1351 = vmatpush.bf16.msra.mxu1 %v7598_v35  ;;  %v10228_v20 = vld [vmem:[#allocation7 + $0x184] sm:$0xf]  ;;  %v11272_v23 = vpack.c.bf16 %v159_v19, %v153_v18  ;;  %v7538_v26 = vor.u32 %v10196_v13, %v7535_v14 }
  0x3f   :  { %v8221_v30 = vld [vmem:[#allocation7 + $0x5e0] sm:$0xf]  ;;  %v10370_v32 = vld [vmem:[#allocation7 + $0x5ec] sm:$0xf0]  ;;  %v8094_v40 = vor.u32 %v10338_v29, %v8093_v28  ;;  %1365 = vmatpush.bf16.msra.mxu2 %v7726_v36  ;;  %v7663_v21 = vld [vmem:[#allocation7 + $0x190] sm:$0xf0] }
  0x40   :  { %v8077_v41 = vld [vmem:[#allocation7 + $0x4c0] sm:$0xf]  ;;  %v8222_v42 = vor.u32 %v10370_v32, %v8221_v30  ;;  %v10334_v44 = vld [vmem:[#allocation7 + $0x4cc] sm:$0xf0]  ;;  %1379 = vmatpush.bf16.msra.mxu3 %v7854_v39  ;;  %v7666_v30 = vor.u32 %v10228_v20, %v7663_v21  ;;  %v10192_v32 = vld [vmem:[#allocation7 + $0x64] sm:$0xf] }
  0x41   :  { %v8205_v45 = vld [vmem:[#allocation7 + $0x5c0] sm:$0xf]  ;;  %v10366_v46 = vld [vmem:[#allocation7 + $0x5cc] sm:$0xf0]  ;;  %1386 = vmatpush.bf16.msrb.mxu0 %v8094_v40  ;;  %v8078_v54 = vor.u32 %v10334_v44, %v8077_v41  ;;  %1352 = vmatmul.bf16.vlgmr.msra.gmra.mxu1 %v11267_v6  ;;  %v7647_v35 = vld [vmem:[#allocation7 + $0x170] sm:$0xf0]  ;;  %v7522_v38 = vor.u32 %v10192_v32, %v7519_v33 }
  0x42   :  { %v150_v52 = vld [vmem:[#allocation2] sm:$0xff]  ;;  %v156_v53 = vld [vmem:[#allocation2 + $0x30] sm:$0xff]  ;;  %1400 = vmatpush.bf16.msrb.mxu1 %v8222_v42  ;;  %v8206_v58 = vor.u32 %v10366_v46, %v8205_v45  ;;  %v7650_v42 = vor.u32 %v10224_v34, %v7647_v35 }
  0x43   :  { %v8061_v55 = vld [vmem:[#allocation7 + $0x4a0] sm:$0xf]  ;;  %v10330_v56 = vld [vmem:[#allocation7 + $0x4ac] sm:$0xf0]  ;;  %v11264_v57 = vpack.c.bf16 %v156_v53, %v150_v52  ;;  %1414 = vmatpush.bf16.msrb.mxu2 %v7586_v43  ;;  %1380 = vmatmul.bf16.vlgmr.msra.gmra.mxu3 %v11272_v23  ;;  %v10188_v44 = vld [vmem:[#allocation7 + $0x44] sm:$0xf] }
  0x44   :  { %v8189_v60 = vld [vmem:[#allocation7 + $0x5a0] sm:$0xf]  ;;  %v10362_v61 = vld [vmem:[#allocation7 + $0x5ac] sm:$0xf0]  ;;  %1428 = vmatpush.bf16.msrb.mxu3 %v7714_v47  ;;  %v8062_v7 = vor.u32 %v10330_v56, %v8061_v55  ;;  %v7503_v45 = vld [vmem:[#allocation7 + $0x50] sm:$0xf0] }
  0x45   :  { %1338 = vmatmul.bf16.vlgmr.msra.gmra.mxu0 %v11264_v57  ;;  %v8045_v5 = vld [vmem:[#allocation7 + $0x480] sm:$0xf]  ;;  %v10326_v8 = vld [vmem:[#allocation7 + $0x48c] sm:$0xf0]  ;;  %v8190_v11 = vor.u32 %v10362_v61, %v8189_v60  ;;  %v10220_v46 = vld [vmem:[#allocation7 + $0x144] sm:$0xf]  ;;  %v7506_v50 = vor.u32 %v10188_v44, %v7503_v45 }
  0x46   :  { %1387 = vmatpush.bf16.msrb.mxu0 %v8078_v54  ;;  %v8173_v9 = vld [vmem:[#allocation7 + $0x580] sm:$0xf]  ;;  %v10358_v10 = vld [vmem:[#allocation7 + $0x58c] sm:$0xf0]  ;;  %1401 = vmatpush.bf16.msrb.mxu1 %v8206_v58  ;;  %v8046_v24 = vor.u32 %v10326_v8, %v8045_v5  ;;  %v7631_v47 = vld [vmem:[#allocation7 + $0x150] sm:$0xf0] }
  0x47   :  { %1415 = vmatpush.bf16.msrb.mxu2 %v7570_v59  ;;  %v152_v15 = vld [vmem:[#allocation2 + $0x10] sm:$0xff]  ;;  %v158_v17 = vld [vmem:[#allocation2 + $0x40] sm:$0xff]  ;;  %v8174_v25 = vor.u32 %v10358_v10, %v8173_v9  ;;  %v7634_v54 = vor.u32 %v10220_v46, %v7631_v47 }
  0x48   :  { %1429 = vmatpush.bf16.msrb.mxu3 %v7698_v63  ;;  %v11270_v22 = vpack.c.bf16 %v158_v17, %v152_v15  ;;  %v8029_v27 = vld [vmem:[#allocation7 + $0x460] sm:$0xf]  ;;  %v10322_v28 = vld [vmem:[#allocation7 + $0x46c] sm:$0xf0]  ;;  %v10184_v56 = vld [vmem:[#allocation7 + $0x24] sm:$0xf] }
  0x49   :  { %v8157_v29 = vld [vmem:[#allocation7 + $0x560] sm:$0xf]  ;;  %v10354_v31 = vld [vmem:[#allocation7 + $0x56c] sm:$0xf0]  ;;  %v8030_v36 = vor.u32 %v10322_v28, %v8029_v27  ;;  %v7487_v58 = vld [vmem:[#allocation7 + $0x30] sm:$0xf0] }
  0x4a   :  { %1388 = vmatpush.bf16.msrb.mxu0 %v8062_v7  ;;  %1402 = vmatpush.bf16.msrb.mxu1 %v8190_v11  ;;  %v8158_v37 = vor.u32 %v10354_v31, %v8157_v29  ;;  %v8013_v39 = vld [vmem:[#allocation7 + $0x440] sm:$0xf]  ;;  %v10318_v40 = vld [vmem:[#allocation7 + $0x44c] sm:$0xf0]  ;;  %v10216_v59 = vld [vmem:[#allocation7 + $0x124] sm:$0xf]  ;;  %v7490_v2 = vor.u32 %v10184_v56, %v7487_v58 }
  0x4b   :  { %1416 = vmatpush.bf16.msrb.mxu2 %v7554_v12  ;;  %v8141_v41 = vld [vmem:[#allocation7 + $0x540] sm:$0xf]  ;;  %v10350_v43 = vld [vmem:[#allocation7 + $0x54c] sm:$0xf0]  ;;  %v8014_v48 = vor.u32 %v10318_v40, %v8013_v39  ;;  %v7615_v60 = vld [vmem:[#allocation7 + $0x130] sm:$0xf0] }
  0x4c   :  { %1430 = vmatpush.bf16.msrb.mxu3 %v7682_v16  ;;  %1366 = vmatmul.bf16.vlgmr.msra.gmra.mxu2 %v11270_v22  ;;  %v8142_v49 = vor.u32 %v10350_v43, %v8141_v41  ;;  %v7997_v51 = vld [vmem:[#allocation7 + $0x420] sm:$0xf]  ;;  %v10314_v52 = vld [vmem:[#allocation7 + $0x42c] sm:$0xf0]  ;;  %v10180_v4 = vld [vmem:[#allocation7 + $0x4] sm:$0xf]  ;;  %v7618_v7 = vor.u32 %v10216_v59, %v7615_v60 }
  0x4d   :  { %v8125_v53 = vld [vmem:[#allocation7 + $0x520] sm:$0xf]  ;;  %v10346_v55 = vld [vmem:[#allocation7 + $0x52c] sm:$0xf0]  ;;  %v7998_v61 = vor.u32 %v10314_v52, %v7997_v51  ;;  %v7471_v5 = vld [vmem:[#allocation7 + $0x10] sm:$0xf0] }
  0x4e   :  { %1389 = vmatpush.bf16.msrb.mxu0 %v8046_v24  ;;  %1403 = vmatpush.bf16.msrb.mxu1 %v8174_v25  ;;  %v7981_v62 = vld [vmem:[#allocation7 + $0x400] sm:$0xf]  ;;  %v10310_v63 = vld [vmem:[#allocation7 + $0x40c] sm:$0xf0]  ;;  %v8126_v1 = vor.u32 %v10346_v55, %v8125_v53  ;;  %v10212_v8 = vld [vmem:[#allocation7 + $0x104] sm:$0xf]  ;;  %v7474_v19 = vor.u32 %v10180_v4, %v7471_v5 }
  0x4f   :  { %1417 = vmatpush.bf16.msrb.mxu2 %v7538_v26  ;;  %v8109_v0 = vld [vmem:[#allocation7 + $0x500] sm:$0xf]  ;;  %v10342_v3 = vld [vmem:[#allocation7 + $0x50c] sm:$0xf0]  ;;  %v7599_v9 = vld [vmem:[#allocation7 + $0x110] sm:$0xf0]  ;;  %v7982_v14 = vor.u32 %v10310_v63, %v7981_v62 }
  0x50   :  { %1431 = vmatpush.bf16.msrb.mxu3 %v7666_v30  ;;  %v10272_v10 = vld [vmem:[#allocation7 + $0x2e4] sm:$0xf]  ;;  %v7839_v11 = vld [vmem:[#allocation7 + $0x2f0] sm:$0xf0]  ;;  %v8110_v18 = vor.u32 %v10342_v3, %v8109_v0  ;;  %v7602_v25 = vor.u32 %v10212_v8, %v7599_v9  ;;  %v155_v27 = vld [vmem:[#allocation2 + $0x28] sm:$0xff] }
  0x51   :  { %v10304_v12 = vld [vmem:[#allocation7 + $0x3e4] sm:$0xf]  ;;  %v7967_v13 = vld [vmem:[#allocation7 + $0x3f0] sm:$0xf0]  ;;  %v7842_v26 = vor.u32 %v10272_v10, %v7839_v11  ;;  %v161_v28 = vld [vmem:[#allocation2 + $0x58] sm:$0xff] }
  0x52   :  { %1390 = vmatpush.bf16.msrb.mxu0 %v8030_v36  ;;  %1404 = vmatpush.bf16.msrb.mxu1 %v8158_v37  ;;  %v10336_v15 = vld [vmem:[#allocation7 + $0x4e4] sm:$0xf]  ;;  %v8095_v16 = vld [vmem:[#allocation7 + $0x4f0] sm:$0xf0]  ;;  %v7970_v29 = vor.u32 %v10304_v12, %v7967_v13  ;;  %v11278_v39 = vpack.c.bf16 %v161_v28, %v155_v27 }
  0x53   :  { %1418 = vmatpush.bf16.msrb.mxu2 %v7522_v38  ;;  %v10368_v17 = vld [vmem:[#allocation7 + $0x5e4] sm:$0xf]  ;;  %v8223_v20 = vld [vmem:[#allocation7 + $0x5f0] sm:$0xf0]  ;;  %v8098_v30 = vor.u32 %v10336_v15, %v8095_v16 }
  0x54   :  { %1432 = vmatpush.bf16.msrb.mxu3 %v7650_v42  ;;  %v154_v21 = vld [vmem:[#allocation2 + $0x20] sm:$0xff]  ;;  %v160_v24 = vld [vmem:[#allocation2 + $0x50] sm:$0xff]  ;;  %v8226_v34 = vor.u32 %v10368_v17, %v8223_v20 }
  0x55   :  { %v10268_v31 = vld [vmem:[#allocation7 + $0x2c4] sm:$0xf]  ;;  %v7823_v32 = vld [vmem:[#allocation7 + $0x2d0] sm:$0xf0]  ;;  %v11276_v35 = vpack.c.bf16 %v160_v24, %v154_v21 }
  0x56   :  { %1391 = vmatpush.bf16.msrb.mxu0 %v8014_v48  ;;  %1405 = vmatpush.bf16.msrb.mxu1 %v8142_v49  ;;  %v10300_v33 = vld [vmem:[#allocation7 + $0x3c4] sm:$0xf]  ;;  %v7951_v36 = vld [vmem:[#allocation7 + $0x3d0] sm:$0xf0]  ;;  %v7826_v42 = vor.u32 %v10268_v31, %v7823_v32 }
  0x57   :  { %1419 = vmatpush.bf16.msrb.mxu2 %v7506_v50  ;;  %v10332_v37 = vld [vmem:[#allocation7 + $0x4c4] sm:$0xf]  ;;  %v8079_v38 = vld [vmem:[#allocation7 + $0x4d0] sm:$0xf0]  ;;  %v7954_v43 = vor.u32 %v10300_v33, %v7951_v36 }
  0x58   :  { %1433 = vmatpush.bf16.msrb.mxu3 %v7634_v54  ;;  %v10364_v40 = vld [vmem:[#allocation7 + $0x5c4] sm:$0xf]  ;;  %v8207_v41 = vld [vmem:[#allocation7 + $0x5d0] sm:$0xf0]  ;;  %v8082_v44 = vor.u32 %v10332_v37, %v8079_v38 }
  0x59   :  { %v10264_v45 = vld [vmem:[#allocation7 + $0x2a4] sm:$0xf]  ;;  %v7807_v46 = vld [vmem:[#allocation7 + $0x2b0] sm:$0xf0]  ;;  %v8210_v48 = vor.u32 %v10364_v40, %v8207_v41 }
  0x5a   :  { %1392 = vmatpush.bf16.msrb.mxu0 %v7998_v61  ;;  %1406 = vmatpush.bf16.msrb.mxu1 %v8126_v1  ;;  %v10296_v47 = vld [vmem:[#allocation7 + $0x3a4] sm:$0xf]  ;;  %v7935_v49 = vld [vmem:[#allocation7 + $0x3b0] sm:$0xf0]  ;;  %v7810_v54 = vor.u32 %v10264_v45, %v7807_v46 }
  0x5b   :  { %1420 = vmatpush.bf16.msrb.mxu2 %v7490_v2  ;;  %v10328_v50 = vld [vmem:[#allocation7 + $0x4a4] sm:$0xf]  ;;  %v8063_v51 = vld [vmem:[#allocation7 + $0x4b0] sm:$0xf0]  ;;  %v7938_v55 = vor.u32 %v10296_v47, %v7935_v49 }
  0x5c   :  { %1434 = vmatpush.bf16.msrb.mxu3 %v7618_v7  ;;  %v10360_v52 = vld [vmem:[#allocation7 + $0x5a4] sm:$0xf]  ;;  %v8191_v53 = vld [vmem:[#allocation7 + $0x5b0] sm:$0xf0]  ;;  %v8066_v56 = vor.u32 %v10328_v50, %v8063_v51 }
  0x5d   :  { %v10260_v58 = vld [vmem:[#allocation7 + $0x284] sm:$0xf]  ;;  %v7791_v59 = vld [vmem:[#allocation7 + $0x290] sm:$0xf0]  ;;  %v8194_v61 = vor.u32 %v10360_v52, %v8191_v53 }
  0x5e   :  { %1393 = vmatpush.bf16.msrb.mxu0 %v7982_v14  ;;  %1407 = vmatpush.bf16.msrb.mxu1 %v8110_v18  ;;  %v10292_v60 = vld [vmem:[#allocation7 + $0x384] sm:$0xf]  ;;  %v7919_v62 = vld [vmem:[#allocation7 + $0x390] sm:$0xf0]  ;;  %v7794_v3 = vor.u32 %v10260_v58, %v7791_v59  ;;  %v10211_v58 = vld [vmem:[#allocation7 + $0xf4] sm:$0xf0] }
  0x5f   :  { %1421 = vmatpush.bf16.msrb.mxu2 %v7474_v19  ;;  %v10324_v63 = vld [vmem:[#allocation7 + $0x484] sm:$0xf]  ;;  %v8047_v0 = vld [vmem:[#allocation7 + $0x490] sm:$0xf0]  ;;  %v7922_v4 = vor.u32 %v10292_v60, %v7919_v62  ;;  %v7717_v59 = vld [vmem:[#allocation7 + $0x1e8] sm:$0xf] }
  0x60   :  { %1435 = vmatpush.bf16.msrb.mxu3 %v7602_v25  ;;  %v10356_v1 = vld [vmem:[#allocation7 + $0x584] sm:$0xf]  ;;  %v8175_v2 = vld [vmem:[#allocation7 + $0x590] sm:$0xf0]  ;;  %v8050_v5 = vor.u32 %v10324_v63, %v8047_v0  ;;  %v7845_v62 = vld [vmem:[#allocation7 + $0x2e8] sm:$0xf] }
  0x61   :  { %1394 = vmatmul.bf16.vlgmr.msrb.gmra.mxu0 %v11276_v35  ;;  %1408 = vmatmul.bf16.vlgmr.msrb.gmra.mxu1 %v11278_v39  ;;  %v10256_v7 = vld [vmem:[#allocation7 + $0x264] sm:$0xf]  ;;  %v7775_v8 = vld [vmem:[#allocation7 + $0x270] sm:$0xf0]  ;;  %v8178_v10 = vor.u32 %v10356_v1, %v8175_v2  ;;  %v10275_v63 = vld [vmem:[#allocation7 + $0x2f4] sm:$0xf0] }
  0x62   :  { %1442 = vmatpush.bf16.msra.mxu0 %v7842_v26  ;;  %1456 = vmatpush.bf16.msra.mxu1 %v7970_v29  ;;  %v10288_v9 = vld [vmem:[#allocation7 + $0x364] sm:$0xf]  ;;  %v7903_v11 = vld [vmem:[#allocation7 + $0x370] sm:$0xf0]  ;;  %v7778_v16 = vor.u32 %v10256_v7, %v7775_v8  ;;  %v7973_v2 = vld [vmem:[#allocation7 + $0x3e8] sm:$0xf]  ;;  %v7846_v8 = vor.u32 %v10275_v63, %v7845_v62 }
  0x63   :  { %1470 = vmatpush.bf16.msra.mxu2 %v8098_v30  ;;  %1436 = vmatmul.bf16.vlgmr.msrb.gmra.mxu3 %v11267_v6  ;;  %v10320_v12 = vld [vmem:[#allocation7 + $0x464] sm:$0xf]  ;;  %v8031_v13 = vld [vmem:[#allocation7 + $0x470] sm:$0xf0]  ;;  %v7906_v17 = vor.u32 %v10288_v9, %v7903_v11  ;;  %v7573_v9 = vld [vmem:[#allocation7 + $0xc8] sm:$0xf] }
  0x64   :  { %1484 = vmatpush.bf16.msra.mxu3 %v8226_v34  ;;  %1422 = vmatmul.bf16.vlgmr.msrb.gmra.mxu2 %v11264_v57  ;;  %v10352_v14 = vld [vmem:[#allocation7 + $0x564] sm:$0xf]  ;;  %v8159_v15 = vld [vmem:[#allocation7 + $0x570] sm:$0xf0]  ;;  %v8034_v18 = vor.u32 %v10320_v12, %v8031_v13  ;;  %v7701_v11 = vld [vmem:[#allocation7 + $0x1c8] sm:$0xf] }
  0x65   :  { %v10252_v19 = vld [vmem:[#allocation7 + $0x244] sm:$0xf]  ;;  %v7759_v20 = vld [vmem:[#allocation7 + $0x250] sm:$0xf0]  ;;  %v8162_v24 = vor.u32 %v10352_v14, %v8159_v15  ;;  %v10239_v13 = vld [vmem:[#allocation7 + $0x1d4] sm:$0xf0] }
  0x66   :  { %1443 = vmatpush.bf16.msra.mxu0 %v7826_v42  ;;  %1457 = vmatpush.bf16.msra.mxu1 %v7954_v43  ;;  %v10284_v21 = vld [vmem:[#allocation7 + $0x344] sm:$0xf]  ;;  %v7887_v25 = vld [vmem:[#allocation7 + $0x350] sm:$0xf0]  ;;  %v7762_v30 = vor.u32 %v10252_v19, %v7759_v20  ;;  %v7829_v14 = vld [vmem:[#allocation7 + $0x2c8] sm:$0xf]  ;;  %v7702_v19 = vor.u32 %v10239_v13, %v7701_v11 }
  0x67   :  { %1471 = vmatpush.bf16.msra.mxu2 %v8082_v44  ;;  %v10316_v26 = vld [vmem:[#allocation7 + $0x444] sm:$0xf]  ;;  %v8015_v27 = vld [vmem:[#allocation7 + $0x450] sm:$0xf0]  ;;  %v7890_v31 = vor.u32 %v10284_v21, %v7887_v25  ;;  %v10271_v15 = vld [vmem:[#allocation7 + $0x2d4] sm:$0xf0] }
  0x68   :  { %1485 = vmatpush.bf16.msra.mxu3 %v8210_v48  ;;  %v10348_v28 = vld [vmem:[#allocation7 + $0x544] sm:$0xf]  ;;  %v8143_v29 = vld [vmem:[#allocation7 + $0x550] sm:$0xf0]  ;;  %v8018_v32 = vor.u32 %v10316_v26, %v8015_v27  ;;  %v7830_v20 = vor.u32 %v10271_v15, %v7829_v14  ;;  %v7557_v21 = vld [vmem:[#allocation7 + $0xa8] sm:$0xf] }
  0x69   :  { %v10248_v33 = vld [vmem:[#allocation7 + $0x224] sm:$0xf]  ;;  %v7743_v34 = vld [vmem:[#allocation7 + $0x230] sm:$0xf0]  ;;  %v8146_v37 = vor.u32 %v10348_v28, %v8143_v29  ;;  %v7685_v25 = vld [vmem:[#allocation7 + $0x1a8] sm:$0xf] }
  0x6a   :  { %1444 = vmatpush.bf16.msra.mxu0 %v7810_v54  ;;  %1458 = vmatpush.bf16.msra.mxu1 %v7938_v55  ;;  %v10280_v36 = vld [vmem:[#allocation7 + $0x324] sm:$0xf]  ;;  %v7871_v38 = vld [vmem:[#allocation7 + $0x330] sm:$0xf0]  ;;  %v7746_v44 = vor.u32 %v10248_v33, %v7743_v34  ;;  %v10235_v27 = vld [vmem:[#allocation7 + $0x1b4] sm:$0xf0] }
  0x6b   :  { %1472 = vmatpush.bf16.msra.mxu2 %v8066_v56  ;;  %v10312_v40 = vld [vmem:[#allocation7 + $0x424] sm:$0xf]  ;;  %v7999_v41 = vld [vmem:[#allocation7 + $0x430] sm:$0xf0]  ;;  %v7874_v47 = vor.u32 %v10280_v36, %v7871_v38  ;;  %v7589_v56 = vld [vmem:[#allocation7 + $0xe8] sm:$0xf]  ;;  %v7686_v33 = vor.u32 %v10235_v27, %v7685_v25 }
  0x6c   :  { %1486 = vmatpush.bf16.msra.mxu3 %v8194_v61  ;;  %v10344_v42 = vld [vmem:[#allocation7 + $0x524] sm:$0xf]  ;;  %v8127_v43 = vld [vmem:[#allocation7 + $0x530] sm:$0xf0]  ;;  %v8002_v48 = vor.u32 %v10312_v40, %v7999_v41  ;;  %v10243_v61 = vld [vmem:[#allocation7 + $0x1f4] sm:$0xf0] }
  0x6d   :  { %v10244_v45 = vld [vmem:[#allocation7 + $0x204] sm:$0xf]  ;;  %v7727_v46 = vld [vmem:[#allocation7 + $0x210] sm:$0xf0]  ;;  %v8130_v52 = vor.u32 %v10344_v42, %v8127_v43  ;;  %v7718_v7 = vor.u32 %v10243_v61, %v7717_v59  ;;  %v7813_v28 = vld [vmem:[#allocation7 + $0x2a8] sm:$0xf] }
  0x6e   :  { %1445 = vmatpush.bf16.msra.mxu0 %v7794_v3  ;;  %1459 = vmatpush.bf16.msra.mxu1 %v7922_v4  ;;  %v10276_v49 = vld [vmem:[#allocation7 + $0x304] sm:$0xf]  ;;  %v7855_v50 = vld [vmem:[#allocation7 + $0x310] sm:$0xf0]  ;;  %v7730_v60 = vor.u32 %v10244_v45, %v7727_v46  ;;  %v10307_v3 = vld [vmem:[#allocation7 + $0x3f4] sm:$0xf0] }
  0x6f   :  { %1473 = vmatpush.bf16.msra.mxu2 %v8050_v5  ;;  %v10308_v51 = vld [vmem:[#allocation7 + $0x404] sm:$0xf]  ;;  %v7983_v53 = vld [vmem:[#allocation7 + $0x410] sm:$0xf0]  ;;  %v7858_v0 = vor.u32 %v10276_v49, %v7855_v50  ;;  %v7590_v5 = vor.u32 %v10211_v58, %v7589_v56  ;;  %v7974_v12 = vor.u32 %v10307_v3, %v7973_v2  ;;  %v10267_v29 = vld [vmem:[#allocation7 + $0x2b4] sm:$0xf0] }
  0x70   :  { %1487 = vmatpush.bf16.msra.mxu3 %v8178_v10  ;;  %v10340_v54 = vld [vmem:[#allocation7 + $0x504] sm:$0xf]  ;;  %v8111_v55 = vld [vmem:[#allocation7 + $0x510] sm:$0xf0]  ;;  %v7986_v1 = vor.u32 %v10308_v51, %v7983_v53  ;;  %v10207_v10 = vld [vmem:[#allocation7 + $0xd4] sm:$0xf0]  ;;  %v7814_v34 = vor.u32 %v10267_v29, %v7813_v28 }
  0x71   :  { %v8114_v4 = vor.u32 %v10340_v54, %v8111_v55  ;;  %v7541_v36 = vld [vmem:[#allocation7 + $0x88] sm:$0xf]  ;;  %v10231_v41 = vld [vmem:[#allocation7 + $0x194] sm:$0xf0] }
  0x72   :  { %1446 = vmatpush.bf16.msra.mxu0 %v7778_v16  ;;  %1460 = vmatpush.bf16.msra.mxu1 %v7906_v17  ;;  %v7957_v16 = vld [vmem:[#allocation7 + $0x3c8] sm:$0xf]  ;;  %v10303_v17 = vld [vmem:[#allocation7 + $0x3d4] sm:$0xf0] }
  0x73   :  { %1474 = vmatpush.bf16.msra.mxu2 %v8034_v18  ;;  %v7574_v18 = vor.u32 %v10207_v10, %v7573_v9  ;;  %v7958_v26 = vor.u32 %v10303_v17, %v7957_v16  ;;  %v7669_v38 = vld [vmem:[#allocation7 + $0x188] sm:$0xf]  ;;  %v10263_v43 = vld [vmem:[#allocation7 + $0x294] sm:$0xf0] }
  0x74   :  { %1488 = vmatpush.bf16.msra.mxu3 %v8162_v24  ;;  %v10203_v24 = vld [vmem:[#allocation7 + $0xb4] sm:$0xf0]  ;;  %v7797_v42 = vld [vmem:[#allocation7 + $0x288] sm:$0xf] }
  0x75   :  { %v10295_v45 = vld [vmem:[#allocation7 + $0x394] sm:$0xf0]  ;;  %v7525_v49 = vld [vmem:[#allocation7 + $0x68] sm:$0xf] }
  0x76   :  { %1447 = vmatpush.bf16.msra.mxu0 %v7762_v30  ;;  %1461 = vmatpush.bf16.msra.mxu1 %v7890_v31  ;;  %v7941_v30 = vld [vmem:[#allocation7 + $0x3a8] sm:$0xf]  ;;  %v10299_v31 = vld [vmem:[#allocation7 + $0x3b4] sm:$0xf0] }
  0x77   :  { %1475 = vmatpush.bf16.msra.mxu2 %v8018_v32  ;;  %v7558_v32 = vor.u32 %v10203_v24, %v7557_v21  ;;  %v7942_v40 = vor.u32 %v10299_v31, %v7941_v30  ;;  %v10195_v50 = vld [vmem:[#allocation7 + $0x74] sm:$0xf0]  ;;  %v7653_v51 = vld [vmem:[#allocation7 + $0x168] sm:$0xf] }
  0x78   :  { %1489 = vmatpush.bf16.msra.mxu3 %v8146_v37  ;;  %v10199_v37 = vld [vmem:[#allocation7 + $0x94] sm:$0xf0]  ;;  %v7781_v54 = vld [vmem:[#allocation7 + $0x268] sm:$0xf]  ;;  %v7526_v59 = vor.u32 %v10195_v50, %v7525_v49 }
  0x79   :  { %v7542_v46 = vor.u32 %v10199_v37, %v7541_v36  ;;  %v10227_v53 = vld [vmem:[#allocation7 + $0x174] sm:$0xf0]  ;;  %v7909_v56 = vld [vmem:[#allocation7 + $0x368] sm:$0xf] }
  0x7a   :  { %1448 = vmatpush.bf16.msra.mxu0 %v7746_v44  ;;  %1462 = vmatpush.bf16.msra.mxu1 %v7874_v47  ;;  %v7925_v44 = vld [vmem:[#allocation7 + $0x388] sm:$0xf]  ;;  %v7670_v47 = vor.u32 %v10231_v41, %v7669_v38  ;;  %v10259_v55 = vld [vmem:[#allocation7 + $0x274] sm:$0xf0]  ;;  %v10209_v41 = vld [vmem:[#allocation7 + $0xec] sm:$0xf] }
  0x7b   :  { %1476 = vmatpush.bf16.msra.mxu2 %v8002_v48  ;;  %v7798_v48 = vor.u32 %v10263_v43, %v7797_v42  ;;  %v10291_v58 = vld [vmem:[#allocation7 + $0x374] sm:$0xf0]  ;;  %v7782_v61 = vor.u32 %v10259_v55, %v7781_v54  ;;  %v7509_v62 = vld [vmem:[#allocation7 + $0x48] sm:$0xf]  ;;  %v7591_v42 = vld [vmem:[#allocation7 + $0xf8] sm:$0xf0] }
  0x7c   :  { %1490 = vmatpush.bf16.msra.mxu3 %v8130_v52  ;;  %v7926_v52 = vor.u32 %v10295_v45, %v7925_v44  ;;  %v10191_v63 = vld [vmem:[#allocation7 + $0x54] sm:$0xf0]  ;;  %v7765_v3 = vld [vmem:[#allocation7 + $0x248] sm:$0xf]  ;;  %v10241_v45 = vld [vmem:[#allocation7 + $0x1ec] sm:$0xf]  ;;  %v7594_v50 = vor.u32 %v10209_v41, %v7591_v42 }
  0x7d   :  { %v10223_v2 = vld [vmem:[#allocation7 + $0x154] sm:$0xf0]  ;;  %v7493_v11 = vld [vmem:[#allocation7 + $0x28] sm:$0xf] }
  0x7e   :  { %1449 = vmatpush.bf16.msra.mxu0 %v7730_v60  ;;  %1463 = vmatpush.bf16.msra.mxu1 %v7858_v0  ;;  %v7654_v60 = vor.u32 %v10227_v53, %v7653_v51  ;;  %v7637_v0 = vld [vmem:[#allocation7 + $0x148] sm:$0xf]  ;;  %v10219_v15 = vld [vmem:[#allocation7 + $0x134] sm:$0xf0] }
  0x7f   :  { %1477 = vmatpush.bf16.msra.mxu2 %v7986_v1  ;;  %v7910_v1 = vor.u32 %v10291_v58, %v7909_v56  ;;  %v7638_v9 = vor.u32 %v10223_v2, %v7637_v0  ;;  %v7621_v13 = vld [vmem:[#allocation7 + $0x128] sm:$0xf]  ;;  %v10251_v17 = vld [vmem:[#allocation7 + $0x234] sm:$0xf0]  ;;  %v10205_v56 = vld [vmem:[#allocation7 + $0xcc] sm:$0xf] }
  0x80   :  { %1491 = vmatpush.bf16.msra.mxu3 %v8114_v4  ;;  %v10255_v4 = vld [vmem:[#allocation7 + $0x254] sm:$0xf0]  ;;  %v7749_v16 = vld [vmem:[#allocation7 + $0x228] sm:$0xf]  ;;  %v7622_v25 = vor.u32 %v10219_v15, %v7621_v13  ;;  %v7575_v58 = vld [vmem:[#allocation7 + $0xd8] sm:$0xf0] }
  0x81   :  { %1450 = vmatmul.bf16.vlgmr.msra.gmra.mxu0 %v11270_v22  ;;  %1464 = vmatmul.bf16.vlgmr.msra.gmra.mxu1 %v11272_v23  ;;  %v7766_v10 = vor.u32 %v10255_v4, %v7765_v3  ;;  %v7477_v21 = vld [vmem:[#allocation7 + $0x8] sm:$0xf]  ;;  %v10183_v24 = vld [vmem:[#allocation7 + $0x14] sm:$0xf0] }
  0x82   :  { %1498 = vmatpush.bf16.msrb.mxu0 %v7590_v5  ;;  %1512 = vmatpush.bf16.msrb.mxu1 %v7718_v7  ;;  %v7893_v5 = vld [vmem:[#allocation7 + $0x348] sm:$0xf]  ;;  %v10287_v7 = vld [vmem:[#allocation7 + $0x354] sm:$0xf0]  ;;  %v7478_v38 = vor.u32 %v10183_v24, %v7477_v21  ;;  %v7671_v21 = vld [vmem:[#allocation7 + $0x198] sm:$0xf0] }
  0x83   :  { %1526 = vmatpush.bf16.msrb.mxu2 %v7846_v8  ;;  %1492 = vmatmul.bf16.vlgmr.msra.gmra.mxu3 %v11278_v39  ;;  %v7510_v8 = vor.u32 %v10191_v63, %v7509_v62  ;;  %v7894_v14 = vor.u32 %v10287_v7, %v7893_v5  ;;  %v7605_v27 = vld [vmem:[#allocation7 + $0x108] sm:$0xf]  ;;  %v10215_v28 = vld [vmem:[#allocation7 + $0x114] sm:$0xf0]  ;;  %v7578_v63 = vor.u32 %v10205_v56, %v7575_v58  ;;  %v10201_v5 = vld [vmem:[#allocation7 + $0xac] sm:$0xf] }
  0x84   :  { %1540 = vmatpush.bf16.msrb.mxu3 %v7974_v12  ;;  %1478 = vmatmul.bf16.vlgmr.msra.gmra.mxu2 %v11276_v35  ;;  %v10187_v12 = vld [vmem:[#allocation7 + $0x34] sm:$0xf0]  ;;  %v7733_v29 = vld [vmem:[#allocation7 + $0x208] sm:$0xf]  ;;  %v7606_v43 = vor.u32 %v10215_v28, %v7605_v27  ;;  %v7559_v7 = vld [vmem:[#allocation7 + $0xb8] sm:$0xf0] }
  0x85   :  { %v10247_v31 = vld [vmem:[#allocation7 + $0x214] sm:$0xf0]  ;;  %v8229_v37 = vld [vmem:[#allocation7 + $0x5e8] sm:$0xf] }
  0x86   :  { %1499 = vmatpush.bf16.msrb.mxu0 %v7574_v18  ;;  %1513 = vmatpush.bf16.msrb.mxu1 %v7702_v19  ;;  %v7877_v18 = vld [vmem:[#allocation7 + $0x328] sm:$0xf]  ;;  %v10283_v19 = vld [vmem:[#allocation7 + $0x334] sm:$0xf0]  ;;  %v7734_v44 = vor.u32 %v10247_v31, %v7733_v29 }
  0x87   :  { %1527 = vmatpush.bf16.msrb.mxu2 %v7830_v20  ;;  %v7494_v20 = vor.u32 %v10187_v12, %v7493_v11  ;;  %v7878_v30 = vor.u32 %v10283_v19, %v7877_v18  ;;  %v10339_v36 = vld [vmem:[#allocation7 + $0x4f4] sm:$0xf0]  ;;  %v8085_v51 = vld [vmem:[#allocation7 + $0x4c8] sm:$0xf]  ;;  %v7562_v12 = vor.u32 %v10201_v5, %v7559_v7  ;;  %v10197_v18 = vld [vmem:[#allocation7 + $0x8c] sm:$0xf] }
  0x88   :  { %1541 = vmatpush.bf16.msrb.mxu3 %v7958_v26  ;;  %v7750_v26 = vor.u32 %v10251_v17, %v7749_v16  ;;  %v8213_v53 = vld [vmem:[#allocation7 + $0x5c8] sm:$0xf]  ;;  %v10367_v55 = vld [vmem:[#allocation7 + $0x5d4] sm:$0xf0]  ;;  %v7543_v19 = vld [vmem:[#allocation7 + $0x98] sm:$0xf0] }
  0x89   :  { %v8214_v62 = vor.u32 %v10367_v55, %v8213_v53  ;;  %v8069_v0 = vld [vmem:[#allocation7 + $0x4a8] sm:$0xf]  ;;  %v10363_v4 = vld [vmem:[#allocation7 + $0x5b4] sm:$0xf0]  ;;  %v10181_v7 = vld [vmem:[#allocation7 + $0xc] sm:$0xf] }
  0x8a   :  { %1500 = vmatpush.bf16.msrb.mxu0 %v7558_v32  ;;  %1514 = vmatpush.bf16.msrb.mxu1 %v7686_v33  ;;  %v7861_v32 = vld [vmem:[#allocation7 + $0x308] sm:$0xf]  ;;  %v10279_v33 = vld [vmem:[#allocation7 + $0x314] sm:$0xf0] }
  0x8b   :  { %1528 = vmatpush.bf16.msrb.mxu2 %v7814_v34  ;;  %v8101_v34 = vld [vmem:[#allocation7 + $0x4e8] sm:$0xf]  ;;  %v10359_v17 = vld [vmem:[#allocation7 + $0x594] sm:$0xf0] }
  0x8c   :  { %1542 = vmatpush.bf16.msrb.mxu3 %v7942_v40  ;;  %v10371_v40 = vld [vmem:[#allocation7 + $0x5f4] sm:$0xf0]  ;;  %v8197_v2 = vld [vmem:[#allocation7 + $0x5a8] sm:$0xf] }
  0x8d   :  { %v8230_v49 = vor.u32 %v10371_v40, %v8229_v37  ;;  %v8198_v11 = vor.u32 %v10363_v4, %v8197_v2  ;;  %v8053_v13 = vld [vmem:[#allocation7 + $0x488] sm:$0xf]  ;;  %v10323_v28 = vld [vmem:[#allocation7 + $0x474] sm:$0xf0] }
  0x8e   :  { %1501 = vmatpush.bf16.msrb.mxu0 %v7542_v46  ;;  %1515 = vmatpush.bf16.msrb.mxu1 %v7670_v47  ;;  %v7719_v46 = vld [vmem:[#allocation7 + $0x1f8] sm:$0xf0]  ;;  %v7862_v47 = vor.u32 %v10279_v33, %v7861_v32  ;;  %v8181_v15 = vld [vmem:[#allocation7 + $0x588] sm:$0xf]  ;;  %v10355_v31 = vld [vmem:[#allocation7 + $0x574] sm:$0xf0] }
  0x8f   :  { %1529 = vmatpush.bf16.msrb.mxu2 %v7798_v48  ;;  %v8102_v48 = vor.u32 %v10339_v36, %v8101_v34  ;;  %v7722_v54 = vor.u32 %v10241_v45, %v7719_v46  ;;  %v8037_v27 = vld [vmem:[#allocation7 + $0x468] sm:$0xf]  ;;  %v10193_v32 = vld [vmem:[#allocation7 + $0x6c] sm:$0xf]  ;;  %v7527_v33 = vld [vmem:[#allocation7 + $0x78] sm:$0xf0] }
  0x90   :  { %1543 = vmatpush.bf16.msrb.mxu3 %v7926_v52  ;;  %v10335_v52 = vld [vmem:[#allocation7 + $0x4d4] sm:$0xf0]  ;;  %v8165_v29 = vld [vmem:[#allocation7 + $0x568] sm:$0xf]  ;;  %v10225_v34 = vld [vmem:[#allocation7 + $0x16c] sm:$0xf]  ;;  %v8038_v37 = vor.u32 %v10323_v28, %v8037_v27  ;;  %v7530_v40 = vor.u32 %v10193_v32, %v7527_v33 }
  0x91   :  { %v7655_v36 = vld [vmem:[#allocation7 + $0x178] sm:$0xf0]  ;;  %v8021_v41 = vld [vmem:[#allocation7 + $0x448] sm:$0xf]  ;;  %v10319_v42 = vld [vmem:[#allocation7 + $0x454] sm:$0xf0] }
  0x92   :  { %1502 = vmatpush.bf16.msrb.mxu0 %v7526_v59  ;;  %1516 = vmatpush.bf16.msrb.mxu1 %v7654_v60  ;;  %v10237_v59 = vld [vmem:[#allocation7 + $0x1cc] sm:$0xf]  ;;  %v7703_v60 = vld [vmem:[#allocation7 + $0x1d8] sm:$0xf0]  ;;  %v10351_v45 = vld [vmem:[#allocation7 + $0x554] sm:$0xf0] }
  0x93   :  { %1530 = vmatpush.bf16.msrb.mxu2 %v7782_v61  ;;  %v8086_v61 = vor.u32 %v10335_v52, %v8085_v51  ;;  %v7706_v3 = vor.u32 %v10237_v59, %v7703_v60  ;;  %v10189_v46 = vld [vmem:[#allocation7 + $0x4c] sm:$0xf]  ;;  %v8005_v53 = vld [vmem:[#allocation7 + $0x428] sm:$0xf]  ;;  %v10347_v58 = vld [vmem:[#allocation7 + $0x534] sm:$0xf0] }
  0x94   :  { %1544 = vmatpush.bf16.msrb.mxu3 %v7910_v1  ;;  %v10331_v1 = vld [vmem:[#allocation7 + $0x4b4] sm:$0xf0]  ;;  %v8133_v55 = vld [vmem:[#allocation7 + $0x528] sm:$0xf]  ;;  %v10185_v59 = vld [vmem:[#allocation7 + $0x2c] sm:$0xf] }
  0x95   :  { %v7495_v60 = vld [vmem:[#allocation7 + $0x38] sm:$0xf0]  ;;  %v8134_v2 = vor.u32 %v10347_v58, %v8133_v55  ;;  %v8117_v4 = vld [vmem:[#allocation7 + $0x508] sm:$0xf]  ;;  %v10343_v5 = vld [vmem:[#allocation7 + $0x514] sm:$0xf0] }
  0x96   :  { %1503 = vmatpush.bf16.msrb.mxu0 %v7510_v8  ;;  %1517 = vmatpush.bf16.msrb.mxu1 %v7638_v9  ;;  %v10233_v8 = vld [vmem:[#allocation7 + $0x1ac] sm:$0xf]  ;;  %v7687_v9 = vld [vmem:[#allocation7 + $0x1b8] sm:$0xf0] }
  0x97   :  { %1531 = vmatpush.bf16.msrb.mxu2 %v7766_v10  ;;  %v8070_v10 = vor.u32 %v10331_v1, %v8069_v0  ;;  %v7690_v16 = vor.u32 %v10233_v8, %v7687_v9  ;;  %v7989_v0 = vld [vmem:[#allocation7 + $0x408] sm:$0xf]  ;;  %v10311_v1 = vld [vmem:[#allocation7 + $0x414] sm:$0xf0]  ;;  %v7479_v9 = vld [vmem:[#allocation7 + $0x18] sm:$0xf0] }
  0x98   :  { %1545 = vmatpush.bf16.msrb.mxu3 %v7894_v14  ;;  %v10327_v14 = vld [vmem:[#allocation7 + $0x494] sm:$0xf0]  ;;  %v7959_v33 = vld [vmem:[#allocation7 + $0x3d8] sm:$0xf0]  ;;  %v10261_v55 = vld [vmem:[#allocation7 + $0x28c] sm:$0xf] }
  0x99   :  { %v8054_v24 = vor.u32 %v10327_v14, %v8053_v13  ;;  %v7847_v13 = vld [vmem:[#allocation7 + $0x2f8] sm:$0xf0]  ;;  %v10305_v14 = vld [vmem:[#allocation7 + $0x3ec] sm:$0xf] }
  0x9a   :  { %1504 = vmatpush.bf16.msrb.mxu0 %v7494_v20  ;;  %1518 = vmatpush.bf16.msrb.mxu1 %v7622_v25  ;;  %v10229_v20 = vld [vmem:[#allocation7 + $0x18c] sm:$0xf]  ;;  %v8182_v25 = vor.u32 %v10359_v17, %v8181_v15  ;;  %v7990_v15 = vor.u32 %v10311_v1, %v7989_v0 }
  0x9b   :  { %1532 = vmatpush.bf16.msrb.mxu2 %v7750_v26  ;;  %v7546_v26 = vor.u32 %v10197_v18, %v7543_v19  ;;  %v10337_v17 = vld [vmem:[#allocation7 + $0x4ec] sm:$0xf]  ;;  %v8103_v18 = vld [vmem:[#allocation7 + $0x4f8] sm:$0xf0]  ;;  %v8118_v19 = vor.u32 %v10343_v5, %v8117_v4 }
  0x9c   :  { %1546 = vmatpush.bf16.msrb.mxu3 %v7878_v30  ;;  %v7674_v30 = vor.u32 %v10229_v20, %v7671_v21  ;;  %v7482_v20 = vor.u32 %v10181_v7, %v7479_v9  ;;  %v10369_v21 = vld [vmem:[#allocation7 + $0x5ec] sm:$0xf]  ;;  %v8106_v28 = vor.u32 %v10337_v17, %v8103_v18  ;;  %v7911_v7 = vld [vmem:[#allocation7 + $0x378] sm:$0xf0] }
  0x9d   :  { %v10293_v58 = vld [vmem:[#allocation7 + $0x38c] sm:$0xf]  ;;  %v8039_v9 = vld [vmem:[#allocation7 + $0x478] sm:$0xf0] }
  0x9e   :  { %1505 = vmatpush.bf16.msrb.mxu0 %v7478_v38  ;;  %1519 = vmatpush.bf16.msrb.mxu1 %v7606_v43  ;;  %v8166_v38 = vor.u32 %v10355_v31, %v8165_v29  ;;  %v8149_v43 = vld [vmem:[#allocation7 + $0x548] sm:$0xf]  ;;  %v10269_v29 = vld [vmem:[#allocation7 + $0x2cc] sm:$0xf] }
  0x9f   :  { %1533 = vmatpush.bf16.msrb.mxu2 %v7734_v44  ;;  %v7658_v44 = vor.u32 %v10225_v34, %v7655_v36  ;;  %v8150_v51 = vor.u32 %v10351_v45, %v8149_v43  ;;  %v10301_v31 = vld [vmem:[#allocation7 + $0x3cc] sm:$0xf]  ;;  %v8087_v36 = vld [vmem:[#allocation7 + $0x4d8] sm:$0xf0] }
  0xa0   :  { %1547 = vmatpush.bf16.msrb.mxu3 %v7862_v47  ;;  %v7511_v47 = vld [vmem:[#allocation7 + $0x58] sm:$0xf0]  ;;  %v10333_v34 = vld [vmem:[#allocation7 + $0x4cc] sm:$0xf] }
  0xa1   :  { %1506 = vmatmul.bf16.vlgmr.msrb.gmra.mxu0 %v11264_v57  ;;  %1520 = vmatmul.bf16.vlgmr.msrb.gmra.mxu1 %v11267_v6  ;;  %v7514_v52 = vor.u32 %v10189_v46, %v7511_v47  ;;  %v10265_v43 = vld [vmem:[#allocation7 + $0x2ac] sm:$0xf]  ;;  %v7943_v47 = vld [vmem:[#allocation7 + $0x3b8] sm:$0xf0] }
  0xa2   :  { %1554 = vmatpush.bf16.msra.mxu0 %v8102_v48  ;;  %1568 = vmatpush.bf16.msra.mxu1 %v8230_v49  ;;  %v10221_v48 = vld [vmem:[#allocation7 + $0x14c] sm:$0xf]  ;;  %v7639_v49 = vld [vmem:[#allocation7 + $0x158] sm:$0xf0] }
  0xa3   :  { %1582 = vmatpush.bf16.msra.mxu2 %v7594_v50  ;;  %1548 = vmatmul.bf16.vlgmr.msrb.gmra.mxu3 %v11272_v23  ;;  %v8022_v50 = vor.u32 %v10319_v42, %v8021_v41  ;;  %v7642_v56 = vor.u32 %v10221_v48, %v7639_v49  ;;  %v7962_v41 = vor.u32 %v10301_v31, %v7959_v33  ;;  %v10297_v45 = vld [vmem:[#allocation7 + $0x3ac] sm:$0xf]  ;;  %v8071_v49 = vld [vmem:[#allocation7 + $0x4b8] sm:$0xf0] }
  0xa4   :  { %1596 = vmatpush.bf16.msra.mxu3 %v7722_v54  ;;  %1534 = vmatmul.bf16.vlgmr.msrb.gmra.mxu2 %v11270_v22  ;;  %v10315_v54 = vld [vmem:[#allocation7 + $0x434] sm:$0xf0]  ;;  %v8090_v42 = vor.u32 %v10333_v34, %v8087_v36  ;;  %v10329_v48 = vld [vmem:[#allocation7 + $0x4ac] sm:$0xf]  ;;  %v7879_v36 = vld [vmem:[#allocation7 + $0x338] sm:$0xf0] }
  0xa5   :  { %v10289_v4 = vld [vmem:[#allocation7 + $0x36c] sm:$0xf] }
  0xa6   :  { %1555 = vmatpush.bf16.msra.mxu0 %v8086_v61  ;;  %1569 = vmatpush.bf16.msra.mxu1 %v8214_v62  ;;  %v10217_v61 = vld [vmem:[#allocation7 + $0x12c] sm:$0xf]  ;;  %v7623_v62 = vld [vmem:[#allocation7 + $0x138] sm:$0xf0] }
  0xa7   :  { %1583 = vmatpush.bf16.msra.mxu2 %v7578_v63  ;;  %v8006_v63 = vor.u32 %v10315_v54, %v8005_v53  ;;  %v7626_v8 = vor.u32 %v10217_v61, %v7623_v62  ;;  %v7946_v53 = vor.u32 %v10297_v45, %v7943_v47  ;;  %v8074_v54 = vor.u32 %v10329_v48, %v8071_v49  ;;  %v10325_v61 = vld [vmem:[#allocation7 + $0x48c] sm:$0xf]  ;;  %v8055_v62 = vld [vmem:[#allocation7 + $0x498] sm:$0xf0] }
  0xa8   :  { %1597 = vmatpush.bf16.msra.mxu3 %v7706_v3  ;;  %v7498_v3 = vor.u32 %v10185_v59, %v7495_v60  ;;  %v7927_v60 = vld [vmem:[#allocation7 + $0x398] sm:$0xf0]  ;;  %v10285_v17 = vld [vmem:[#allocation7 + $0x34c] sm:$0xf] }
  0xa9   :  { %v7930_v1 = vor.u32 %v10293_v58, %v7927_v60  ;;  %v10249_v31 = vld [vmem:[#allocation7 + $0x22c] sm:$0xf]  ;;  %v7735_v48 = vld [vmem:[#allocation7 + $0x218] sm:$0xf0] }
  0xaa   :  { %1556 = vmatpush.bf16.msra.mxu0 %v8070_v10  ;;  %1570 = vmatpush.bf16.msra.mxu1 %v8198_v11  ;;  %v10213_v10 = vld [vmem:[#allocation7 + $0x10c] sm:$0xf]  ;;  %v7607_v11 = vld [vmem:[#allocation7 + $0x118] sm:$0xf0] }
  0xab   :  { %1584 = vmatpush.bf16.msra.mxu2 %v7562_v12  ;;  %v10273_v12 = vld [vmem:[#allocation7 + $0x2ec] sm:$0xf] }
  0xac   :  { %1598 = vmatpush.bf16.msra.mxu3 %v7690_v16  ;;  %v7975_v16 = vld [vmem:[#allocation7 + $0x3f8] sm:$0xf0]  ;;  %v10281_v33 = vld [vmem:[#allocation7 + $0x32c] sm:$0xf] }
  0xad   :  { %v7978_v27 = vor.u32 %v10305_v14, %v7975_v16  ;;  %v7767_v16 = vld [vmem:[#allocation7 + $0x258] sm:$0xf0]  ;;  %v7882_v45 = vor.u32 %v10281_v33, %v7879_v36  ;;  %v10245_v47 = vld [vmem:[#allocation7 + $0x20c] sm:$0xf]  ;;  %v10381_v36 = vld [vmem:[#allocation11 + $0x48] sm:$0xff] }
  0xae   :  { %1557 = vmatpush.bf16.msra.mxu0 %v8054_v24  ;;  %1571 = vmatpush.bf16.msra.mxu1 %v8182_v25  ;;  %v8231_v24 = vld [vmem:[#allocation7 + $0x5f8] sm:$0xf0]  ;;  %v7610_v25 = vor.u32 %v10213_v10, %v7607_v11  ;;  %v10353_v10 = vld [vmem:[#allocation7 + $0x56c] sm:$0xf]  ;;  %v7738_v58 = vor.u32 %v10245_v47, %v7735_v48  ;;  %v10411_v48 = vld [vmem:[#allocation11 + $0x138] sm:$0xff] }
  0xaf   :  { %1585 = vmatpush.bf16.msra.mxu2 %v7546_v26  ;;  %v7850_v26 = vor.u32 %v10273_v12, %v7847_v13  ;;  %v8234_v32 = vor.u32 %v10369_v21, %v8231_v24  ;;  %v8167_v11 = vld [vmem:[#allocation7 + $0x578] sm:$0xf0]  ;;  %v7914_v13 = vor.u32 %v10289_v4, %v7911_v7  ;;  %v10349_v24 = vld [vmem:[#allocation7 + $0x54c] sm:$0xf] }
  0xb0   :  { %1599 = vmatpush.bf16.msra.mxu3 %v7674_v30  ;;  %v7831_v30 = vld [vmem:[#allocation7 + $0x2d8] sm:$0xf0]  ;;  %v8170_v18 = vor.u32 %v10353_v10, %v8167_v11  ;;  %v10277_v49 = vld [vmem:[#allocation7 + $0x30c] sm:$0xf]  ;;  %v10385_v11 = vld [vmem:[#allocation11 + $0x68] sm:$0xff] }
  0xb1   :  { %v8023_v21 = vld [vmem:[#allocation7 + $0x458] sm:$0xf0]  ;;  %v10378_v4 = vld [vmem:[#allocation11 + $0x30] sm:$0xff] }
  0xb2   :  { %1558 = vmatpush.bf16.msra.mxu0 %v8038_v37  ;;  %1572 = vmatpush.bf16.msra.mxu1 %v8166_v38  ;;  %v10365_v37 = vld [vmem:[#allocation7 + $0x5cc] sm:$0xf]  ;;  %v8215_v38 = vld [vmem:[#allocation7 + $0x5d8] sm:$0xf0] }
  0xb3   :  { %1586 = vmatpush.bf16.msra.mxu2 %v7530_v40  ;;  %v7834_v40 = vor.u32 %v10269_v29, %v7831_v30  ;;  %v8218_v46 = vor.u32 %v10365_v37, %v8215_v38  ;;  %v10313_v37 = vld [vmem:[#allocation7 + $0x42c] sm:$0xf]  ;;  %v8007_v38 = vld [vmem:[#allocation7 + $0x438] sm:$0xf0] }
  0xb4   :  { %1600 = vmatpush.bf16.msra.mxu3 %v7658_v44  ;;  %v7815_v44 = vld [vmem:[#allocation7 + $0x2b8] sm:$0xf0]  ;;  %v10386_v7 = vld [vmem:[#allocation11 + $0x70] sm:$0xff] }
  0xb6   :  { %1559 = vmatpush.bf16.msra.mxu0 %v8022_v50  ;;  %1573 = vmatpush.bf16.msra.mxu1 %v8150_v51  ;;  %v10361_v50 = vld [vmem:[#allocation7 + $0x5ac] sm:$0xf]  ;;  %v8199_v51 = vld [vmem:[#allocation7 + $0x5b8] sm:$0xf0] }
  0xb7   :  { %1587 = vmatpush.bf16.msra.mxu2 %v7514_v52  ;;  %v7818_v52 = vor.u32 %v10265_v43, %v7815_v44  ;;  %v8202_v59 = vor.u32 %v10361_v50, %v8199_v51  ;;  %v8135_v43 = vld [vmem:[#allocation7 + $0x538] sm:$0xf0] }
  0xb8   :  { %1601 = vmatpush.bf16.msra.mxu3 %v7642_v56  ;;  %v7799_v56 = vld [vmem:[#allocation7 + $0x298] sm:$0xf0] }
  0xb9   :  { %v7802_v0 = vor.u32 %v10261_v55, %v7799_v56  ;;  %v7863_v51 = vld [vmem:[#allocation7 + $0x318] sm:$0xf0]  ;;  %v10341_v55 = vld [vmem:[#allocation7 + $0x50c] sm:$0xf] }
  0xba   :  { %1560 = vmatpush.bf16.msra.mxu0 %v8006_v63  ;;  %1574 = vmatpush.bf16.msra.mxu1 %v8134_v2  ;;  %v10357_v63 = vld [vmem:[#allocation7 + $0x58c] sm:$0xf]  ;;  %v8119_v56 = vld [vmem:[#allocation7 + $0x518] sm:$0xf0] }
  0xbb   :  { %1588 = vmatpush.bf16.msra.mxu2 %v7498_v3  ;;  %v10257_v2 = vld [vmem:[#allocation7 + $0x26c] sm:$0xf]  ;;  %v7783_v3 = vld [vmem:[#allocation7 + $0x278] sm:$0xf0] }
  0xbc   :  { %1602 = vmatpush.bf16.msra.mxu3 %v7626_v8  ;;  %v10321_v8 = vld [vmem:[#allocation7 + $0x46c] sm:$0xf]  ;;  %v7786_v12 = vor.u32 %v10257_v2, %v7783_v3 }
  0xbd   :  { %v8042_v14 = vor.u32 %v10321_v8, %v8039_v9  ;;  %v10377_v9 = vld [vmem:[#allocation11 + $0x28] sm:$0xff] }
  0xbe   :  { %1561 = vmatpush.bf16.msra.mxu0 %v7990_v15  ;;  %1575 = vmatpush.bf16.msra.mxu1 %v8118_v19  ;;  %v10253_v15 = vld [vmem:[#allocation7 + $0x24c] sm:$0xf]  ;;  %v7895_v19 = vld [vmem:[#allocation7 + $0x358] sm:$0xf0] }
  0xbf   :  { %1589 = vmatpush.bf16.msra.mxu2 %v7482_v20  ;;  %v10317_v20 = vld [vmem:[#allocation7 + $0x44c] sm:$0xf] }
  0xc0   :  { %1603 = vmatpush.bf16.msra.mxu3 %v7610_v25  ;;  %v8151_v25 = vld [vmem:[#allocation7 + $0x558] sm:$0xf0]  ;;  %v8026_v29 = vor.u32 %v10317_v20, %v8023_v21  ;;  %v10383_v20 = vld [vmem:[#allocation11 + $0x58] sm:$0xff] }
  0xc1   :  { %1562 = vmatmul.bf16.vlgmr.msra.gmra.mxu0 %v11276_v35  ;;  %1576 = vmatmul.bf16.vlgmr.msra.gmra.mxu1 %v11278_v39  ;;  %v8154_v34 = vor.u32 %v10349_v24, %v8151_v25 }
  0xc2   :  { %1610 = vmatpush.bf16.msrb.mxu0 %v7850_v26  ;;  %1624 = vmatpush.bf16.msrb.mxu1 %v7978_v27  ;;  %v7770_v26 = vor.u32 %v10253_v15, %v7767_v16  ;;  %v11296_v27 = vld [vmem:[#allocation8] sm:$0xf]  ;;  %v1339_v30 = vpop.f32.mrf.mxu0 }
  0xc3   :  { %1638 = vmatpush.bf16.msrb.mxu2 %v8106_v28  ;;  %1604 = vmatmul.bf16.vlgmr.msra.gmra.mxu3 %v11267_v6  ;;  %v8058_v6 = vor.u32 %v10325_v61, %v8055_v62  ;;  %v7898_v28 = vor.u32 %v10285_v17, %v7895_v19  ;;  %v8122_v62 = vor.u32 %v10341_v55, %v8119_v56  ;;  %v363_v55 = vperm.slane %v11296_v27, 1  ;;  %v10701_v56 = vld [vmem:[%s12528_s6 + $0x108] sm:$0xff] }
  0xc4   :  { %1652 = vmatpush.bf16.msrb.mxu3 %v8234_v32  ;;  %1590 = vmatmul.bf16.vlgmr.msra.gmra.mxu2 %v11264_v57  ;;  %v8183_v57 = vld [vmem:[#allocation7 + $0x598] sm:$0xf0] }
  0xc5   :  { %v8186_v5 = vor.u32 %v10357_v63, %v8183_v57  ;;  %v7751_v32 = vld [vmem:[#allocation7 + $0x238] sm:$0xf0]  ;;  %v10379_v63 = vld [vmem:[#allocation11 + $0x38] sm:$0xff] }
  0xc6   :  { %1611 = vmatpush.bf16.msrb.mxu0 %v7834_v40  ;;  %1625 = vmatpush.bf16.msrb.mxu1 %v7962_v41  ;;  %v1353_v40 = vpop.f32.mrf.mxu1  ;;  %v362_v41 = vperm.slane %v11296_v27, 0  ;;  %v7754_v44 = vor.u32 %v10249_v31, %v7751_v32  ;;  %v1381_v2 = vpop.f32.mrf.mxu3 }
  0xc7   :  { %1639 = vmatpush.bf16.msrb.mxu2 %v8090_v42  ;;  %v10345_v42 = vld [vmem:[#allocation7 + $0x52c] sm:$0xf] }
  0xc8   :  { %1653 = vmatpush.bf16.msrb.mxu3 %v8218_v46  ;;  %v8010_v46 = vor.u32 %v10313_v37, %v8007_v38  ;;  %v8138_v50 = vor.u32 %v10345_v42, %v8135_v43 }
  0xca   :  { %1612 = vmatpush.bf16.msrb.mxu0 %v7818_v52  ;;  %1626 = vmatpush.bf16.msrb.mxu1 %v7946_v53  ;;  %v10309_v52 = vld [vmem:[#allocation7 + $0x40c] sm:$0xf]  ;;  %v7991_v53 = vld [vmem:[#allocation7 + $0x418] sm:$0xf0] }
  0xcb   :  { %1640 = vmatpush.bf16.msrb.mxu2 %v8074_v54  ;;  %v1340_v54 = vadd.f32 %v1339_v30, %v362_v41  ;;  %v7994_v60 = vor.u32 %v10309_v52, %v7991_v53  ;;  %v10382_v30 = vld [vmem:[#allocation11 + $0x50] sm:$0xff] }
  0xcc   :  { %1654 = vmatpush.bf16.msrb.mxu3 %v8202_v59  ;;  %v7866_v59 = vor.u32 %v10277_v49, %v7863_v51  ;;  %v10395_v51 = vld [vmem:[#allocation11 + $0xb8] sm:$0xff] }
  0xcd   :  { %v1354_v57 = vadd.f32 %v1353_v40, %v1340_v54  ;;  %v10419_v54 = vld [vmem:[#allocation11 + $0x178] sm:$0xff] }
  0xce   :  { %1613 = vmatpush.bf16.msrb.mxu0 %v7802_v0  ;;  %1627 = vmatpush.bf16.msrb.mxu1 %v7930_v1  ;;  %v1341_v0 = vpop.f32.mrf.mxu0  ;;  %v10387_v1 = vld [vmem:[#allocation11 + $0x78] sm:$0xff]  ;;  %v1383_v17 = vpop.f32.mrf.mxu3 }
  0xcf   :  { %1641 = vmatpush.bf16.msrb.mxu2 %v8058_v6  ;;  %v1367_v61 = vpop.f32.mrf.mxu2  ;;  %v1355_v6 = vpop.f32.mrf.mxu1  ;;  %v1342_v3 = vadd.f32 %v1341_v0, %v362_v41 }
  0xd0   :  { %1655 = vmatpush.bf16.msrb.mxu3 %v8186_v5  ;;  %v1368_v5 = vadd.f32 %v1367_v61, %v1354_v57  ;;  %v10418_v61 = vld [vmem:[#allocation11 + $0x170] sm:$0xff]  ;;  %v10409_v57 = vld [vmem:[#allocation11 + $0x128] sm:$0xff] }
  0xd1   :  { %v1356_v8 = vadd.f32 %v1355_v6, %v1342_v3  ;;  %v10392_v3 = vld [vmem:[#allocation11 + $0xa0] sm:$0xff] }
  0xd2   :  { %1614 = vmatpush.bf16.msrb.mxu0 %v7786_v12  ;;  %1628 = vmatpush.bf16.msrb.mxu1 %v7914_v13  ;;  %v1382_v10 = vadd.f32 %v1381_v2, %v1368_v5  ;;  %v10408_v5 = vld [vmem:[#allocation11 + $0x120] sm:$0xff] }
  0xd3   :  { %1642 = vmatpush.bf16.msrb.mxu2 %v8042_v14  ;;  %v10376_v14 = vld [vmem:[#allocation11 + $0x20] sm:$0xff] }
  0xd4   :  { %1656 = vmatpush.bf16.msrb.mxu3 %v8170_v18  ;;  %v120_v18 = vlaneseq }
  0xd6   :  { %1615 = vmatpush.bf16.msrb.mxu0 %v7770_v26  ;;  %1629 = vmatpush.bf16.msrb.mxu1 %v7898_v28  ;;  %v121_v21 = vshrl.u32 %v120_v18, 7  ;;  %v10374_v26 = vld [vmem:[#allocation11 + $0x10] sm:$0xff] }
  0xd7   :  { %1643 = vmatpush.bf16.msrb.mxu2 %v8026_v29  ;;  %v1369_v12 = vpop.f32.mrf.mxu2  ;;  %v10406_v18 = vld [vmem:[#allocation11 + $0x110] sm:$0xff] }
  0xd8   :  { %1657 = vmatpush.bf16.msrb.mxu3 %v8154_v34  ;;  %v1370_v15 = vadd.f32 %v1369_v12, %v1356_v8  ;;  %v122_v31 = vadd.s32 8, %v121_v21  ;;  %v10373_v34 = vld [vmem:[#allocation11 + $0x8] sm:$0xff]  ;;  %v11309_v37 = vand.u32 7, %v121_v21  ;;  %v10416_v8 = vld [vmem:[#allocation11 + $0x160] sm:$0xff]  ;;  %v10407_v12 = vld [vmem:[#allocation11 + $0x118] sm:$0xff] }
  0xd9   :  { %v10389_v21 = vld [vmem:[#allocation11 + $0x88] sm:$0xff] }
  0xda   :  { %1616 = vmatpush.bf16.msrb.mxu0 %v7754_v44  ;;  %1630 = vmatpush.bf16.msrb.mxu1 %v7882_v45  ;;  %v11311_v38 = vand.u32 7, %v122_v31  ;;  %v10372_v45 = vld [vmem:[#allocation11] sm:$0xff]  ;;  %vm1699_vm2 = vcmp.ge.s32.totalorder %v11309_v37, 4  ;;  %vm1738_vm6 = vcmp.ge.s32.totalorder %v11309_v37, 3  ;;  %vm12531_vm10 = vcmp.ge.s32.totalorder %v11309_v37, 2 }
  0xdb   :  { %1644 = vmatpush.bf16.msrb.mxu2 %v8010_v46  ;;  %vm1816_vm13 = vcmp.ge.s32.totalorder %v11309_v37, 1 }
  0xdc   :  { %1658 = vmatpush.bf16.msrb.mxu3 %v8138_v50  ;;  %vm1700_vm3 = vcmp.ge.s32.totalorder %v11311_v38, 4  ;;  %v10380_v50 = vld [vmem:[#allocation11 + $0x40] sm:$0xff]  ;;  %vm1739_vm7 = vcmp.ge.s32.totalorder %v11311_v38, 3  ;;  %vm12530_vm11 = vcmp.ge.s32.totalorder %v11311_v38, 2  ;;  %vm1817_vm14 = vcmp.ge.s32.totalorder %v11311_v38, 1 }
  0xdd   :  { %vm11336_vm4 = vmpackc.low %vm1700_vm3, %vm1699_vm2 }
  0xde   :  { %1617 = vmatpush.bf16.msrb.mxu0 %v7738_v58  ;;  %1631 = vmatpush.bf16.msrb.mxu1 %v7866_v59  ;;  %v1395_v13 = vpop.f32.mrf.mxu0  ;;  %v10394_v58 = vld [vmem:[#allocation11 + $0xb0] sm:$0xff]  ;;  %vm11358_vm8 = vmpackc.low %vm1739_vm7, %vm1738_vm6 }
  0xdf   :  { %1645 = vmatpush.bf16.msrb.mxu2 %v7994_v60  ;;  %v1396_v16 = vadd.f32 %v1395_v13, %v1382_v10  ;;  %v10410_v60 = vld [vmem:[#allocation11 + $0x130] sm:$0xff]  ;;  %v10415_v13 = vld [vmem:[#allocation11 + $0x158] sm:$0xff]  ;;  %vm11390_vm12 = vmpackc.low %vm12530_vm11, %vm12531_vm10 }
  0xe0   :  { %1659 = vmatpush.bf16.msrb.mxu3 %v8122_v62  ;;  %vm11422_vm15 = vmpackc.low %vm1817_vm14, %vm1816_vm13 }
  0xe1   :  { %1618 = vmatmul.bf16.vlgmr.msrb.gmra.mxu0 %v11270_v22  ;;  %1632 = vmatmul.bf16.vlgmr.msrb.gmra.mxu1 %v11272_v23  ;;  %v1409_v22 = vpop.f32.mrf.mxu1  ;;  %v10384_v23 = vld [vmem:[#allocation11 + $0x60] sm:$0xff] }
  0xe2   :  { %3131 = vmatpush.bf16.msra.mxu0 %v10379_v63  ;;  %3145 = vmatpush.bf16.msra.mxu1 %v10387_v1  ;;  %v11303_v19 = vadd.f32 %v1409_v22, %v1396_v16  ;;  %v10393_v63 = vld [vmem:[#allocation11 + $0xa8] sm:$0xff] }
  0xe3   :  { %1646 = vmatmul.bf16.vlgmr.msrb.gmra.mxu2 %v11276_v35  ;;  %1660 = vmatmul.bf16.vlgmr.msrb.gmra.mxu3 %v11278_v39  ;;  %v10375_v35 = vld [vmem:[#allocation11 + $0x18] sm:$0xff]  ;;  %v1384_v39 = vadd.f32 %v1383_v17, %v1370_v15  ;;  %v10417_v1 = vld [vmem:[#allocation11 + $0x168] sm:$0xff]  ;;  %v10390_v15 = vld [vmem:[#allocation11 + $0x90] sm:$0xff] }
  0xe4   :  { %v1792_v29 = vrot.slane %v11303_v19, 7  ;;  %v1675_v42 = vrot.slane %v11303_v19, 4  ;;  %3159 = vmatpush.bf16.msra.mxu2 %v10395_v51 }
  0xe6   :  { %3132 = vmatpush.bf16.msra.mxu0 %v10378_v4  ;;  %3146 = vmatpush.bf16.msra.mxu1 %v10386_v7  ;;  %v1397_v24 = vpop.f32.mrf.mxu0  ;;  %v11314_v40 = vsel %vm1791_vm0, 0.0, %v1792_v29  ;;  %v1437_v49 = vpop.f32.mrf.mxu3  ;;  %v1695_v53 = vsel %vm1674_vm1, 0.0, %v1675_v42 }
  0xe7   :  { %v1398_v25 = vadd.f32 %v1397_v24, %v1384_v39  ;;  %v1423_v46 = vpop.f32.mrf.mxu2 }
  0xe8   :  { %v1424_v62 = vadd.f32 %v1423_v46, %v363_v55  ;;  %3160 = vmatpush.bf16.msra.mxu2 %v10394_v58  ;;  %v10412_v46 = vld [vmem:[#allocation11 + $0x140] sm:$0xff] }
  0xe9   :  { %v1411_v28 = vpop.f32.mrf.mxu1 }
  0xea   :  { %3133 = vmatpush.bf16.msra.mxu0 %v10377_v9  ;;  %3147 = vmatpush.bf16.msra.mxu1 %v10385_v11  ;;  %v11306_v32 = vadd.f32 %v1411_v28, %v1398_v25  ;;  %v1438_v6 = vadd.f32 %v1437_v49, %v1424_v62  ;;  %v10391_v11 = vld [vmem:[#allocation11 + $0x98] sm:$0xff]  ;;  %v10405_v25 = vld [vmem:[#allocation11 + $0x108] sm:$0xff]  ;;  %v1714_v28 = vrot.slane %v11303_v19, 5 }
  0xec   :  { %v1796_v33 = vrot.slane %v11306_v32, 7  ;;  %v11318_v41 = vpack.c.bf16 %v11306_v32, %v11303_v19  ;;  %v1679_v43 = vrot.slane %v11306_v32, 4  ;;  %3161 = vmatpush.bf16.msra.mxu2 %v10393_v63  ;;  %v10451_v63 = vld [vmem:[#allocation11 + $0x278] sm:$0xff] }
  0xee   :  { %3134 = vmatpush.bf16.msra.mxu0 %v10376_v14  ;;  %3148 = vmatpush.bf16.msra.mxu1 %v10384_v23  ;;  %v11323_v44 = vsel %vm1791_vm0, %v1792_v29, %v1796_v33  ;;  %v1680_v52 = vsel %vm1674_vm1, %v1675_v42, %v1679_v43  ;;  %v1439_v2 = vpop.f32.mrf.mxu3  ;;  %v1718_v29 = vrot.slane %v11306_v32, 5  ;;  %v10388_v33 = vld [vmem:[#allocation11 + $0x80] sm:$0xff] }
  0xef   :  { %v8912_v47 = vpack.c.bf16 %v11323_v44, %v11314_v40  ;;  %v8876_v59 = vpack.c.bf16 %v1680_v52, %v1695_v53  ;;  %v1425_v0 = vpop.f32.mrf.mxu2  ;;  %v10404_v43 = vld [vmem:[#allocation11 + $0x100] sm:$0xff]  ;;  %v1734_v52 = vsel %vm1713_vm5, 0.0, %v1714_v28 }
  0xf0   :  { %v1426_v9 = vadd.f32 %v1425_v0, %v363_v55  ;;  %3162 = vmatpush.bf16.msra.mxu2 %v10392_v3  ;;  %v1719_v51 = vsel %vm1713_vm5, %v1714_v28, %v1718_v29  ;;  %v10426_v55 = vld [vmem:[#allocation11 + $0x1b0] sm:$0xff]  ;;  %v1753_v29 = vrot.slane %v11303_v19, 6 }
  0xf1   :  { %v8888_v58 = vpack.c.bf16 %v1719_v51, %v1734_v52  ;;  %v10402_v3 = vld [vmem:[#allocation11 + $0xf0] sm:$0xff]  ;;  %v10719_v51 = vld [vmem:[%s12528_s6 + $0x198] sm:$0xff] }
  0xf2   :  { %3135 = vmatpush.bf16.msra.mxu0 %v10375_v35  ;;  %3149 = vmatpush.bf16.msra.mxu1 %v10383_v20  ;;  %v1440_v14 = vadd.f32 %v1439_v2, %v1426_v9  ;;  %v10414_v35 = vld [vmem:[#allocation11 + $0x150] sm:$0xff]  ;;  %v1773_v19 = vsel %vm1752_vm9, 0.0, %v1753_v29 }
  0xf3   :  { %v10450_v2 = vld [vmem:[#allocation11 + $0x270] sm:$0xff] }
  0xf4   :  { %3163 = vmatpush.bf16.msra.mxu2 %v10391_v11  ;;  %v10423_v11 = vld [vmem:[#allocation11 + $0x198] sm:$0xff]  ;;  %v10398_v28 = vld [vmem:[#allocation11 + $0xd0] sm:$0xff] }
  0xf6   :  { %3136 = vmatpush.bf16.msra.mxu0 %v10374_v26  ;;  %3150 = vmatpush.bf16.msra.mxu1 %v10382_v30  ;;  %v10413_v26 = vld [vmem:[#allocation11 + $0x148] sm:$0xff] }
  0xf8   :  { %3164 = vmatpush.bf16.msra.mxu2 %v10390_v15  ;;  %v10438_v15 = vld [vmem:[#allocation11 + $0x210] sm:$0xff] }
  0xfa   :  { %3137 = vmatpush.bf16.msra.mxu0 %v10373_v34  ;;  %3151 = vmatpush.bf16.msra.mxu1 %v10381_v36 }
  0xfc   :  { %3165 = vmatpush.bf16.msra.mxu2 %v10389_v21  ;;  %v10437_v21 = vld [vmem:[#allocation11 + $0x208] sm:$0xff] }
  0xfe   :  { %3138 = vmatpush.bf16.msra.mxu0 %v10372_v45  ;;  %3152 = vmatpush.bf16.msra.mxu1 %v10380_v50  ;;  %v1451_v4 = vpop.f32.mrf.mxu0  ;;  %v1465_v7 = vpop.f32.mrf.mxu1  ;;  %v10443_v45 = vld [vmem:[#allocation11 + $0x238] sm:$0xff] }
  0xff   :  { %v1452_v10 = vadd.f32 %v1451_v4, %v1438_v6  ;;  %v10441_v6 = vld [vmem:[#allocation11 + $0x228] sm:$0xff]  ;;  %v10440_v4 = vld [vmem:[#allocation11 + $0x220] sm:$0xff] }
 0x100   :  { %3166 = vmatpush.bf16.msra.mxu2 %v10388_v33  ;;  %v10420_v33 = vld [vmem:[#allocation11 + $0x180] sm:$0xff] }
 0x101   :  { %8877 = vmatmul.msk.bf16.vlgmr.msra.gmra.mxu0 %vm11336_vm4, %v8876_v59  ;;  %v1466_v22 = vadd.f32 %v1465_v7, %v1452_v10  ;;  %v10442_v59 = vld [vmem:[#allocation11 + $0x230] sm:$0xff]  ;;  %v10449_v7 = vld [vmem:[#allocation11 + $0x268] sm:$0xff]  ;;  %v10439_v10 = vld [vmem:[#allocation11 + $0x218] sm:$0xff] }
 0x102   :  { %3187 = vmatpush.bf16.msrb.mxu0 %v10411_v48  ;;  %3201 = vmatpush.bf16.msrb.mxu1 %v10419_v54  ;;  %v10427_v48 = vld [vmem:[#allocation11 + $0x1b8] sm:$0xff]  ;;  %v10598_v54 = vld [vmem:[#allocation11 + $0x710] sm:$0xff] }
 0x104   :  { %3215 = vmatpush.bf16.msrb.mxu2 %v10427_v48 }
 0x106   :  { %3188 = vmatpush.bf16.msrb.mxu0 %v10410_v60  ;;  %3202 = vmatpush.bf16.msrb.mxu1 %v10418_v61  ;;  %v1453_v17 = vpop.f32.mrf.mxu0  ;;  %v1493_v23 = vpop.f32.mrf.mxu3 }
 0x107   :  { %v1479_v16 = vpop.f32.mrf.mxu2  ;;  %v1454_v20 = vadd.f32 %v1453_v17, %v1440_v14  ;;  %v1467_v24 = vpop.f32.mrf.mxu1  ;;  %v10400_v14 = vld [vmem:[#allocation11 + $0xe0] sm:$0xff] }
 0x108   :  { %v1480_v39 = vadd.f32 %v1479_v16, %v1466_v22  ;;  %3216 = vmatpush.bf16.msrb.mxu2 %v10426_v55  ;;  %v10422_v16 = vld [vmem:[#allocation11 + $0x190] sm:$0xff] }
 0x109   :  { %v1468_v31 = vadd.f32 %v1467_v24, %v1454_v20  ;;  %v364_v20 = vperm.slane %v11296_v27, 2 }
 0x10a   :  { %3189 = vmatpush.bf16.msrb.mxu0 %v10409_v57  ;;  %3203 = vmatpush.bf16.msrb.mxu1 %v10417_v1  ;;  %v11344_v30 = vadd.f32 %v1493_v23, %v1480_v39  ;;  %v10403_v57 = vld [vmem:[#allocation11 + $0xf8] sm:$0xff]  ;;  %v10425_v1 = vld [vmem:[#allocation11 + $0x1a8] sm:$0xff] }
 0x10b   :  { %3173 = vmatpush.bf16.msra.mxu3 %v10403_v57  ;;  %v10447_v23 = vld [vmem:[#allocation11 + $0x258] sm:$0xff] }
 0x10c   :  { %v1676_v49 = vrot.slane %v11344_v30, 4  ;;  %3217 = vmatpush.bf16.msrb.mxu2 %v10425_v1  ;;  %v1754_v52 = vrot.slane %v11344_v30, 6  ;;  %v10435_v1 = vld [vmem:[#allocation11 + $0x1f8] sm:$0xff] }
 0x10e   :  { %3190 = vmatpush.bf16.msrb.mxu0 %v10408_v5  ;;  %3204 = vmatpush.bf16.msrb.mxu1 %v10416_v8  ;;  %v1495_v42 = vpop.f32.mrf.mxu3  ;;  %v1696_v62 = vsel %vm1674_vm1, 0.0, %v1676_v49  ;;  %v10424_v5 = vld [vmem:[#allocation11 + $0x1a0] sm:$0xff]  ;;  %v10401_v8 = vld [vmem:[#allocation11 + $0xe8] sm:$0xff] }
 0x10f   :  { %v1481_v34 = vpop.f32.mrf.mxu2  ;;  %3174 = vmatpush.bf16.msra.mxu3 %v10402_v3  ;;  %v10473_v3 = vld [vmem:[#allocation11 + $0x328] sm:$0xff] }
 0x110   :  { %v1482_v36 = vadd.f32 %v1481_v34, %v1468_v31  ;;  %3218 = vmatpush.bf16.msrb.mxu2 %v10424_v5  ;;  %v1757_v31 = vrot.slane %v11306_v32, 6  ;;  %v10397_v32 = vld [vmem:[#allocation11 + $0xc8] sm:$0xff] }
 0x112   :  { %3191 = vmatpush.bf16.msrb.mxu0 %v10407_v12  ;;  %3205 = vmatpush.bf16.msrb.mxu1 %v10415_v13  ;;  %v11349_v50 = vadd.f32 %v1495_v42, %v1482_v36  ;;  %v1715_v12 = vrot.slane %v11344_v30, 5  ;;  %v10448_v13 = vld [vmem:[#allocation11 + $0x260] sm:$0xff]  ;;  %v10475_v42 = vld [vmem:[#allocation11 + $0x338] sm:$0xff] }
 0x113   :  { %3175 = vmatpush.bf16.msra.mxu3 %v10401_v8  ;;  %v10436_v36 = vld [vmem:[#allocation11 + $0x200] sm:$0xff]  ;;  %v10434_v8 = vld [vmem:[#allocation11 + $0x1f0] sm:$0xff] }
 0x114   :  { %v1681_v53 = vrot.slane %v11349_v50, 4  ;;  %v11364_v60 = vpack.c.bf16 %v11349_v50, %v11344_v30  ;;  %v1720_v9 = vrot.slane %v11349_v50, 5  ;;  %3219 = vmatpush.bf16.msrb.mxu2 %v10423_v11  ;;  %v1735_v17 = vsel %vm1713_vm5, 0.0, %v1715_v12  ;;  %v10472_v11 = vld [vmem:[#allocation11 + $0x320] sm:$0xff] }
 0x116   :  { %3192 = vmatpush.bf16.msrb.mxu0 %v10406_v18  ;;  %3206 = vmatpush.bf16.msrb.mxu1 %v10414_v35  ;;  %v1682_v61 = vsel %vm1674_vm1, %v1676_v49, %v1681_v53  ;;  %v1721_v22 = vsel %vm1713_vm5, %v1715_v12, %v1720_v9  ;;  %v10399_v35 = vld [vmem:[#allocation11 + $0xd8] sm:$0xff] }
 0x117   :  { %v8879_v0 = vpack.c.bf16 %v1682_v61, %v1696_v62  ;;  %3176 = vmatpush.bf16.msra.mxu3 %v10400_v14  ;;  %v8891_v18 = vpack.c.bf16 %v1721_v22, %v1735_v17  ;;  %v10483_v62 = vld [vmem:[#allocation11 + $0x378] sm:$0xff]  ;;  %v10433_v22 = vld [vmem:[#allocation11 + $0x1e8] sm:$0xff] }
 0x118   :  { %3220 = vmatpush.bf16.msrb.mxu2 %v10422_v16 }
 0x119   :  { %8880 = vmatmul.msk.bf16.vlgmr.msra.gmra.mxu1 %vm11336_vm4, %v8879_v0 }
 0x11a   :  { %3193 = vmatpush.bf16.msrb.mxu0 %v10405_v25  ;;  %3207 = vmatpush.bf16.msrb.mxu1 %v10413_v26  ;;  %v10421_v25 = vld [vmem:[#allocation11 + $0x188] sm:$0xff]  ;;  %v10446_v26 = vld [vmem:[#allocation11 + $0x250] sm:$0xff] }
 0x11b   :  { %3177 = vmatpush.bf16.msra.mxu3 %v10399_v35  ;;  %v10480_v35 = vld [vmem:[#allocation11 + $0x360] sm:$0xff] }
 0x11c   :  { %3221 = vmatpush.bf16.msrb.mxu2 %v10421_v25  ;;  %v10479_v25 = vld [vmem:[#allocation11 + $0x358] sm:$0xff] }
 0x11e   :  { %3194 = vmatpush.bf16.msrb.mxu0 %v10404_v43  ;;  %3208 = vmatpush.bf16.msrb.mxu1 %v10412_v46  ;;  %v1507_v39 = vpop.f32.mrf.mxu0  ;;  %v1521_v24 = vpop.f32.mrf.mxu1  ;;  %v10445_v43 = vld [vmem:[#allocation11 + $0x248] sm:$0xff]  ;;  %v1759_v46 = vrot.slane %v11349_v50, 6 }
 0x11f   :  { %v1508_v34 = vadd.f32 %v1507_v39, %v364_v20  ;;  %3178 = vmatpush.bf16.msra.mxu3 %v10398_v28  ;;  %v10432_v39 = vld [vmem:[#allocation11 + $0x1e0] sm:$0xff]  ;;  %v10431_v28 = vld [vmem:[#allocation11 + $0x1d8] sm:$0xff] }
 0x120   :  { %3222 = vmatpush.bf16.msrb.mxu2 %v10420_v33  ;;  %v1760_v0 = vsel %vm1752_vm9, %v1754_v52, %v1759_v46 }
 0x121   :  { %8889 = vmatmul.msk.bf16.vlgmr.msrb.gmra.mxu0 %vm11358_vm8, %v8888_v58  ;;  %v1522_v49 = vadd.f32 %v1521_v24, %v1508_v34  ;;  %v10474_v58 = vld [vmem:[#allocation11 + $0x330] sm:$0xff]  ;;  %v10469_v34 = vld [vmem:[#allocation11 + $0x308] sm:$0xff] }
 0x122   :  { %3243 = vmatpush.bf16.msra.mxu0 %v10443_v45  ;;  %3257 = vmatpush.bf16.msra.mxu1 %v10451_v63  ;;  %v1758_v45 = vsel %vm1752_vm9, %v1753_v29, %v1757_v31  ;;  %v10396_v63 = vld [vmem:[#allocation11 + $0xc0] sm:$0xff]  ;;  %v10470_v24 = vld [vmem:[#allocation11 + $0x310] sm:$0xff] }
 0x123   :  { %v8900_v53 = vpack.c.bf16 %v1758_v45, %v1773_v19  ;;  %3179 = vmatpush.bf16.msra.mxu3 %v10397_v32  ;;  %v10468_v32 = vld [vmem:[#allocation11 + $0x300] sm:$0xff] }
 0x126   :  { %3244 = vmatpush.bf16.msra.mxu0 %v10442_v59  ;;  %3258 = vmatpush.bf16.msra.mxu1 %v10450_v2  ;;  %v1509_v55 = vpop.f32.mrf.mxu0  ;;  %v10444_v59 = vld [vmem:[#allocation11 + $0x240] sm:$0xff]  ;;  %v1523_v61 = vpop.f32.mrf.mxu1 }
 0x127   :  { %v1535_v48 = vpop.f32.mrf.mxu2  ;;  %v1549_v57 = vpop.f32.mrf.mxu3  ;;  %3180 = vmatpush.bf16.msra.mxu3 %v10396_v63 }
 0x128   :  { %v1536_v2 = vadd.f32 %v1535_v48, %v1522_v49  ;;  %v10459_v49 = vld [vmem:[#allocation11 + $0x2b8] sm:$0xff] }
 0x129   :  { %8892 = vmatmul.msk.bf16.vlgmr.msrb.gmra.mxu1 %vm11358_vm8, %v8891_v18  ;;  %v10471_v18 = vld [vmem:[#allocation11 + $0x318] sm:$0xff] }
 0x12a   :  { %3245 = vmatpush.bf16.msra.mxu0 %v10441_v6  ;;  %3259 = vmatpush.bf16.msra.mxu1 %v10449_v7  ;;  %v1510_v6 = vadd.f32 %v1509_v55, %v364_v20  ;;  %v10482_v7 = vld [vmem:[#allocation11 + $0x370] sm:$0xff]  ;;  %v10477_v55 = vld [vmem:[#allocation11 + $0x348] sm:$0xff] }
 0x12b   :  { %3229 = vmatpush.bf16.msrb.mxu3 %v10435_v1  ;;  %v10476_v1 = vld [vmem:[#allocation11 + $0x340] sm:$0xff] }
 0x12c   :  { %v1524_v9 = vadd.f32 %v1523_v61, %v1510_v6  ;;  %v10428_v6 = vld [vmem:[#allocation11 + $0x1c0] sm:$0xff] }
 0x12e   :  { %3246 = vmatpush.bf16.msra.mxu0 %v10440_v4  ;;  %3260 = vmatpush.bf16.msra.mxu1 %v10448_v13  ;;  %v1774_v4 = vsel %vm1752_vm9, 0.0, %v1754_v52  ;;  %v10481_v13 = vld [vmem:[#allocation11 + $0x368] sm:$0xff]  ;;  %v10507_v52 = vld [vmem:[#allocation11 + $0x438] sm:$0xff] }
 0x12f   :  { %v8903_v5 = vpack.c.bf16 %v1760_v0, %v1774_v4  ;;  %v1537_v12 = vpop.f32.mrf.mxu2  ;;  %3230 = vmatpush.bf16.msrb.mxu3 %v10434_v8  ;;  %v10506_v0 = vld [vmem:[#allocation11 + $0x430] sm:$0xff]  ;;  %v365_v4 = vperm.slane %v11296_v27, 3  ;;  %v10456_v27 = vld [vmem:[#allocation11 + $0x2a0] sm:$0xff] }
 0x130   :  { %v1538_v17 = vadd.f32 %v1537_v12, %v1524_v9 }
 0x132   :  { %3247 = vmatpush.bf16.msra.mxu0 %v10439_v10  ;;  %3261 = vmatpush.bf16.msra.mxu1 %v10447_v23  ;;  %v1550_v10 = vadd.f32 %v1549_v57, %v1536_v2  ;;  %v1551_v23 = vpop.f32.mrf.mxu3  ;;  %v10458_v57 = vld [vmem:[#allocation11 + $0x2b0] sm:$0xff]  ;;  %v10515_v2 = vld [vmem:[#allocation11 + $0x478] sm:$0xff] }
 0x133   :  { %3231 = vmatpush.bf16.msrb.mxu3 %v10433_v22 }
 0x136   :  { %3248 = vmatpush.bf16.msra.mxu0 %v10438_v15  ;;  %3262 = vmatpush.bf16.msra.mxu1 %v10446_v26 }
 0x137   :  { %3232 = vmatpush.bf16.msrb.mxu3 %v10432_v39 }
 0x13a   :  { %3249 = vmatpush.bf16.msra.mxu0 %v10437_v21  ;;  %3263 = vmatpush.bf16.msra.mxu1 %v10445_v43  ;;  %v1552_v21 = vadd.f32 %v1551_v23, %v1538_v17  ;;  %v10430_v43 = vld [vmem:[#allocation11 + $0x1d0] sm:$0xff]  ;;  %v10455_v17 = vld [vmem:[#allocation11 + $0x298] sm:$0xff] }
 0x13b   :  { %3233 = vmatpush.bf16.msrb.mxu3 %v10431_v28  ;;  %v10502_v28 = vld [vmem:[#allocation11 + $0x410] sm:$0xff] }
 0x13e   :  { %3250 = vmatpush.bf16.msra.mxu0 %v10436_v36  ;;  %3264 = vmatpush.bf16.msra.mxu1 %v10444_v59  ;;  %v1563_v14 = vpop.f32.mrf.mxu0  ;;  %v1577_v16 = vpop.f32.mrf.mxu1  ;;  %v1798_v59 = vrot.slane %v11349_v50, 7  ;;  %v1793_v50 = vrot.slane %v11344_v30, 7 }
 0x13f   :  { %v1564_v15 = vadd.f32 %v1563_v14, %v1550_v10  ;;  %3234 = vmatpush.bf16.msrb.mxu3 %v10430_v43  ;;  %v10513_v14 = vld [vmem:[#allocation11 + $0x468] sm:$0xff] }
 0x140   :  { %v1813_v30 = vsel %vm1791_vm0, 0.0, %v1793_v50 }
 0x141   :  { %8901 = vmatmul.msk.bf16.vlgmr.msra.gmra.mxu0 %vm11390_vm12, %v8900_v53  ;;  %8904 = vmatmul.msk.bf16.vlgmr.msra.gmra.mxu1 %vm11390_vm12, %v8903_v5  ;;  %v11401_v20 = vadd.f32 %v1577_v16, %v1564_v15  ;;  %v10457_v5 = vld [vmem:[#allocation11 + $0x2a8] sm:$0xff] }
 0x142   :  { %3299 = vmatpush.bf16.msrb.mxu0 %v10475_v42  ;;  %3313 = vmatpush.bf16.msrb.mxu1 %v10483_v62  ;;  %v10478_v42 = vld [vmem:[#allocation11 + $0x350] sm:$0xff]  ;;  %v10597_v62 = vld [vmem:[#allocation11 + $0x708] sm:$0xff] }
 0x143   :  { %v1677_v29 = vrot.slane %v11401_v20, 4  ;;  %v1716_v8 = vrot.slane %v11401_v20, 5 }
 0x145   :  { %v1697_v19 = vsel %vm1674_vm1, 0.0, %v1677_v29  ;;  %v1736_v15 = vsel %vm1713_vm5, 0.0, %v1716_v8 }
 0x146   :  { %3300 = vmatpush.bf16.msrb.mxu0 %v10474_v58  ;;  %3314 = vmatpush.bf16.msrb.mxu1 %v10482_v7  ;;  %v1565_v26 = vpop.f32.mrf.mxu0  ;;  %v1579_v33 = vpop.f32.mrf.mxu1  ;;  %v10429_v58 = vld [vmem:[#allocation11 + $0x1c8] sm:$0xff] }
 0x147   :  { %v1566_v31 = vadd.f32 %v1565_v26, %v1552_v21  ;;  %v1591_v61 = vpop.f32.mrf.mxu2  ;;  %v1605_v63 = vpop.f32.mrf.mxu3  ;;  %3235 = vmatpush.bf16.msrb.mxu3 %v10429_v58  ;;  %v10505_v7 = vld [vmem:[#allocation11 + $0x428] sm:$0xff] }
 0x148   :  { %v1592_v9 = vadd.f32 %v1591_v61, %v365_v4 }
 0x149   :  { %v11404_v36 = vadd.f32 %v1579_v33, %v1566_v31 }
 0x14a   :  { %3301 = vmatpush.bf16.msrb.mxu0 %v10473_v3  ;;  %3315 = vmatpush.bf16.msrb.mxu1 %v10481_v13  ;;  %v1799_v3 = vsel %vm1791_vm0, %v1793_v50, %v1798_v59  ;;  %v1606_v16 = vadd.f32 %v1605_v63, %v1592_v9  ;;  %v10452_v59 = vld [vmem:[#allocation11 + $0x280] sm:$0xff]  ;;  %v10509_v50 = vld [vmem:[#allocation11 + $0x448] sm:$0xff]  ;;  %v10467_v9 = vld [vmem:[#allocation11 + $0x2f8] sm:$0xff] }
 0x14b   :  { %v1683_v45 = vrot.slane %v11404_v36, 4  ;;  %v11410_v46 = vpack.c.bf16 %v11404_v36, %v11401_v20  ;;  %3236 = vmatpush.bf16.msrb.mxu3 %v10428_v6  ;;  %v1722_v40 = vrot.slane %v11404_v36, 5  ;;  %v8915_v44 = vpack.c.bf16 %v1799_v3, %v1813_v30  ;;  %v10500_v63 = vld [vmem:[#allocation11 + $0x400] sm:$0xff]  ;;  %v10490_v30 = vld [vmem:[#allocation11 + $0x3b0] sm:$0xff] }
 0x14d   :  { %v1684_v48 = vsel %vm1674_vm1, %v1677_v29, %v1683_v45  ;;  %v1723_v22 = vsel %vm1713_vm5, %v1716_v8, %v1722_v40  ;;  %v10508_v8 = vld [vmem:[#allocation11 + $0x440] sm:$0xff] }
 0x14e   :  { %3302 = vmatpush.bf16.msrb.mxu0 %v10472_v11  ;;  %3316 = vmatpush.bf16.msrb.mxu1 %v10480_v35  ;;  %v8882_v53 = vpack.c.bf16 %v1684_v48, %v1697_v19  ;;  %v10504_v11 = vld [vmem:[#allocation11 + $0x420] sm:$0xff]  ;;  %v10503_v35 = vld [vmem:[#allocation11 + $0x418] sm:$0xff]  ;;  %v10453_v19 = vld [vmem:[#allocation11 + $0x288] sm:$0xff]  ;;  %v1755_v48 = vrot.slane %v11401_v20, 6 }
 0x14f   :  { %v1593_v10 = vpop.f32.mrf.mxu2  ;;  %v1607_v12 = vpop.f32.mrf.mxu3 }
 0x150   :  { %8883 = vmatmul.msk.bf16.vlgmr.msra.gmra.mxu2 %vm11336_vm4, %v8882_v53  ;;  %v1594_v39 = vadd.f32 %v1593_v10, %v365_v4  ;;  %v1775_v6 = vsel %vm1752_vm9, 0.0, %v1755_v48  ;;  %v10489_v10 = vld [vmem:[#allocation11 + $0x3a8] sm:$0xff] }
 0x151   :  { %3271 = vmatpush.bf16.msra.mxu2 %v10459_v49  ;;  %v1761_v49 = vrot.slane %v11404_v36, 6 }
 0x152   :  { %3303 = vmatpush.bf16.msrb.mxu0 %v10471_v18  ;;  %3317 = vmatpush.bf16.msrb.mxu1 %v10479_v25  ;;  %v8894_v18 = vpack.c.bf16 %v1723_v22, %v1736_v15  ;;  %v10454_v25 = vld [vmem:[#allocation11 + $0x290] sm:$0xff]  ;;  %v1608_v29 = vadd.f32 %v1607_v12, %v1594_v39  ;;  %v10488_v12 = vld [vmem:[#allocation11 + $0x3a0] sm:$0xff] }
 0x155   :  { %3272 = vmatpush.bf16.msra.mxu2 %v10458_v57  ;;  %v10491_v57 = vld [vmem:[#allocation11 + $0x3b8] sm:$0xff] }
 0x156   :  { %3304 = vmatpush.bf16.msrb.mxu0 %v10470_v24  ;;  %3318 = vmatpush.bf16.msrb.mxu1 %v10478_v42  ;;  %v10512_v24 = vld [vmem:[#allocation11 + $0x460] sm:$0xff]  ;;  %v10511_v42 = vld [vmem:[#allocation11 + $0x458] sm:$0xff] }
 0x159   :  { %3273 = vmatpush.bf16.msra.mxu2 %v10457_v5 }
 0x15a   :  { %3305 = vmatpush.bf16.msrb.mxu0 %v10469_v34  ;;  %3319 = vmatpush.bf16.msrb.mxu1 %v10477_v55 }
 0x15d   :  { %3274 = vmatpush.bf16.msra.mxu2 %v10456_v27 }
 0x15e   :  { %3306 = vmatpush.bf16.msrb.mxu0 %v10468_v32  ;;  %3320 = vmatpush.bf16.msrb.mxu1 %v10476_v1  ;;  %v1619_v13 = vpop.f32.mrf.mxu0  ;;  %v1633_v23 = vpop.f32.mrf.mxu1  ;;  %v10501_v32 = vld [vmem:[#allocation11 + $0x408] sm:$0xff]  ;;  %v1762_v1 = vsel %vm1752_vm9, %v1755_v48, %v1761_v49 }
 0x15f   :  { %v1620_v21 = vadd.f32 %v1619_v13, %v1606_v16  ;;  %v8906_v5 = vpack.c.bf16 %v1762_v1, %v1775_v6  ;;  %v10465_v13 = vld [vmem:[#allocation11 + $0x2e8] sm:$0xff]  ;;  %v10464_v16 = vld [vmem:[#allocation11 + $0x2e0] sm:$0xff]  ;;  %v10494_v1 = vld [vmem:[#allocation11 + $0x3d0] sm:$0xff] }
 0x160   :  { %8895 = vmatmul.msk.bf16.vlgmr.msrb.gmra.mxu2 %vm11358_vm8, %v8894_v18  ;;  %v10516_v6 = vld [vmem:[#allocation11 + $0x480] sm:$0xff] }
 0x161   :  { %8913 = vmatmul.msk.bf16.vlgmr.msrb.gmra.mxu0 %vm11422_vm15, %v8912_v47  ;;  %v10514_v47 = vld [vmem:[#allocation11 + $0x470] sm:$0xff]  ;;  %8916 = vmatmul.msk.bf16.vlgmr.msrb.gmra.mxu1 %vm11422_vm15, %v8915_v44  ;;  %v1634_v31 = vadd.f32 %v1633_v23, %v1620_v21  ;;  %v10485_v21 = vld [vmem:[#allocation11 + $0x388] sm:$0xff] }
 0x162   :  { %3355 = vmatpush.bf16.msra.mxu0 %v10507_v52  ;;  %3369 = vmatpush.bf16.msra.mxu1 %v10515_v2  ;;  %v10510_v52 = vld [vmem:[#allocation11 + $0x450] sm:$0xff] }
 0x163   :  { %3275 = vmatpush.bf16.msra.mxu2 %v10455_v17  ;;  %v10486_v17 = vld [vmem:[#allocation11 + $0x390] sm:$0xff] }
 0x166   :  { %3356 = vmatpush.bf16.msra.mxu0 %v10506_v0  ;;  %3370 = vmatpush.bf16.msra.mxu1 %v10514_v47  ;;  %v1647_v26 = vpop.f32.mrf.mxu2  ;;  %v1661_v33 = vpop.f32.mrf.mxu3 }
 0x167   :  { %v1621_v34 = vpop.f32.mrf.mxu0  ;;  %v1648_v43 = vadd.f32 %v1647_v26, %v1634_v31  ;;  %3276 = vmatpush.bf16.msra.mxu2 %v10454_v25  ;;  %v1635_v53 = vpop.f32.mrf.mxu1  ;;  %v1800_v25 = vrot.slane %v11404_v36, 7  ;;  %v10462_v26 = vld [vmem:[#allocation11 + $0x2d0] sm:$0xff] }
 0x168   :  { %v1622_v45 = vadd.f32 %v1621_v34, %v1608_v29  ;;  %v10523_v29 = vld [vmem:[#allocation11 + $0x4b8] sm:$0xff]  ;;  %v10461_v34 = vld [vmem:[#allocation11 + $0x2c8] sm:$0xff]  ;;  %v10522_v36 = vld [vmem:[#allocation11 + $0x4b0] sm:$0xff] }
 0x169   :  { %v11445_v55 = vadd.f32 %v1661_v33, %v1648_v43 }
 0x16a   :  { %3357 = vmatpush.bf16.msra.mxu0 %v10505_v7  ;;  %3371 = vmatpush.bf16.msra.mxu1 %v10513_v14  ;;  %v1636_v58 = vadd.f32 %v1635_v53, %v1622_v45  ;;  %v10487_v14 = vld [vmem:[#allocation11 + $0x398] sm:$0xff]  ;;  %v10460_v45 = vld [vmem:[#allocation11 + $0x2c0] sm:$0xff]  ;;  %v10498_v53 = vld [vmem:[#allocation11 + $0x3f0] sm:$0xff] }
 0x16b   :  { %3277 = vmatpush.bf16.msra.mxu2 %v10453_v19  ;;  %v1678_v3 = vrot.slane %v11445_v55, 4  ;;  %v1717_v15 = vrot.slane %v11445_v55, 5  ;;  %v1756_v43 = vrot.slane %v11445_v55, 6  ;;  %v10499_v19 = vld [vmem:[#allocation11 + $0x3f8] sm:$0xff] }
 0x16d   :  { %v1698_v47 = vsel %vm1674_vm1, 0.0, %v1678_v3  ;;  %v1737_v18 = vsel %vm1713_vm5, 0.0, %v1717_v15  ;;  %v1776_v49 = vsel %vm1752_vm9, 0.0, %v1756_v43 }
 0x16e   :  { %3358 = vmatpush.bf16.msra.mxu0 %v10504_v11  ;;  %3372 = vmatpush.bf16.msra.mxu1 %v10512_v24  ;;  %v1649_v61 = vpop.f32.mrf.mxu2  ;;  %v1663_v2 = vpop.f32.mrf.mxu3  ;;  %v10466_v11 = vld [vmem:[#allocation11 + $0x2f0] sm:$0xff]  ;;  %v1794_v24 = vrot.slane %v11401_v20, 7 }
 0x16f   :  { %v1650_v0 = vadd.f32 %v1649_v61, %v1636_v58  ;;  %3278 = vmatpush.bf16.msra.mxu2 %v10452_v59  ;;  %v10520_v58 = vld [vmem:[#allocation11 + $0x4a0] sm:$0xff]  ;;  %v10497_v59 = vld [vmem:[#allocation11 + $0x3e8] sm:$0xff]  ;;  %v10519_v61 = vld [vmem:[#allocation11 + $0x498] sm:$0xff] }
 0x170   :  { %v1801_v31 = vsel %vm1791_vm0, %v1794_v24, %v1800_v25  ;;  %v1814_v33 = vsel %vm1791_vm0, 0.0, %v1794_v24 }
 0x171   :  { %v11450_v4 = vadd.f32 %v1663_v2, %v1650_v0  ;;  %v8918_v20 = vpack.c.bf16 %v1801_v31, %v1814_v33  ;;  %v10495_v0 = vld [vmem:[#allocation11 + $0x3d8] sm:$0xff]  ;;  %v10493_v2 = vld [vmem:[#allocation11 + $0x3c8] sm:$0xff] }
 0x172   :  { %3359 = vmatpush.bf16.msra.mxu0 %v10503_v35  ;;  %3373 = vmatpush.bf16.msra.mxu1 %v10511_v42  ;;  %v10463_v35 = vld [vmem:[#allocation11 + $0x2d8] sm:$0xff] }
 0x173   :  { %3327 = vmatpush.bf16.msrb.mxu2 %v10491_v57  ;;  %v1685_v7 = vrot.slane %v11450_v4, 4  ;;  %v11457_v40 = vpack.c.bf16 %v11450_v4, %v11445_v55  ;;  %v1724_v22 = vrot.slane %v11450_v4, 5  ;;  %v1763_v42 = vrot.slane %v11450_v4, 6  ;;  %v10518_v57 = vld [vmem:[#allocation11 + $0x490] sm:$0xff] }
 0x174   :  { %8907 = vmatmul.msk.bf16.vlgmr.msra.gmra.mxu2 %vm11390_vm12, %v8906_v5  ;;  %v1795_v5 = vrot.slane %v11445_v55, 7  ;;  %v10528_v55 = vld [vmem:[#allocation11 + $0x4e0] sm:$0xff] }
 0x175   :  { %v1686_v44 = vsel %vm1674_vm1, %v1678_v3, %v1685_v7  ;;  %v1725_v23 = vsel %vm1713_vm5, %v1717_v15, %v1724_v22  ;;  %v1764_v48 = vsel %vm1752_vm9, %v1756_v43, %v1763_v42  ;;  %v1802_v3 = vrot.slane %v11450_v4, 7  ;;  %v10531_v7 = vld [vmem:[#allocation11 + $0x4f8] sm:$0xff]  ;;  %v10529_v4 = vld [vmem:[#allocation11 + $0x4e8] sm:$0xff] }
 0x176   :  { %3360 = vmatpush.bf16.msra.mxu0 %v10502_v28  ;;  %3374 = vmatpush.bf16.msra.mxu1 %v10510_v52  ;;  %v8885_v27 = vpack.c.bf16 %v1686_v44, %v1698_v47  ;;  %v8897_v39 = vpack.c.bf16 %v1725_v23, %v1737_v18  ;;  %v10484_v28 = vld [vmem:[#allocation11 + $0x380] sm:$0xff]  ;;  %v8909_v52 = vpack.c.bf16 %v1764_v48, %v1776_v49  ;;  %v1815_v44 = vsel %vm1791_vm0, 0.0, %v1795_v5  ;;  %v10539_v15 = vld [vmem:[#allocation11 + $0x538] sm:$0xff] }
 0x177   :  { %3328 = vmatpush.bf16.msrb.mxu2 %v10490_v30  ;;  %v10492_v30 = vld [vmem:[#allocation11 + $0x3c0] sm:$0xff]  ;;  %v10555_v42 = vld [vmem:[#allocation11 + $0x5b8] sm:$0xff] }
 0x178   :  { %8886 = vmatmul.msk.bf16.vlgmr.msra.gmra.mxu3 %vm11336_vm4, %v8885_v27  ;;  %v10527_v27 = vld [vmem:[#allocation11 + $0x4d8] sm:$0xff] }
 0x179   :  { %3285 = vmatpush.bf16.msra.mxu3 %v10467_v9  ;;  %v10530_v9 = vld [vmem:[#allocation11 + $0x4f0] sm:$0xff]  ;;  %v10535_v43 = vld [vmem:[#allocation11 + $0x518] sm:$0xff] }
 0x17a   :  { %3361 = vmatpush.bf16.msra.mxu0 %v10501_v32  ;;  %3375 = vmatpush.bf16.msra.mxu1 %v10509_v50  ;;  %v10521_v32 = vld [vmem:[#allocation11 + $0x4a8] sm:$0xff] }
 0x17b   :  { %3329 = vmatpush.bf16.msrb.mxu2 %v10489_v10  ;;  %v10517_v50 = vld [vmem:[#allocation11 + $0x488] sm:$0xff]  ;;  %v10526_v10 = vld [vmem:[#allocation11 + $0x4d0] sm:$0xff] }
 0x17d   :  { %3286 = vmatpush.bf16.msra.mxu3 %v10466_v11  ;;  %v10525_v11 = vld [vmem:[#allocation11 + $0x4c8] sm:$0xff] }
 0x17e   :  { %3362 = vmatpush.bf16.msra.mxu0 %v10500_v63  ;;  %3376 = vmatpush.bf16.msra.mxu1 %v10508_v8  ;;  %v10496_v63 = vld [vmem:[#allocation11 + $0x3e0] sm:$0xff]  ;;  %v1803_v8 = vsel %vm1791_vm0, %v1795_v5, %v1802_v3 }
 0x17f   :  { %3330 = vmatpush.bf16.msrb.mxu2 %v10488_v12  ;;  %v8921_v47 = vpack.c.bf16 %v1803_v8, %v1815_v44  ;;  %v10524_v12 = vld [vmem:[#allocation11 + $0x4c0] sm:$0xff] }
 0x180   :  { %v10544_v3 = vld [vmem:[#allocation11 + $0x560] sm:$0xff] }
 0x181   :  { %3363 = vmatmul.bf16.vlgmr.msra.gmra.mxu0 %v11318_v41  ;;  %3377 = vmatmul.bf16.vlgmr.msra.gmra.mxu1 %v11364_v60  ;;  %v10552_v5 = vld [vmem:[#allocation11 + $0x5a0] sm:$0xff] }
 0x182   :  { %3287 = vmatpush.bf16.msra.mxu3 %v10465_v13  ;;  %v3140_v13 = vpop.f32.mrf.mxu0  ;;  %3773 = vmatpush.bf16.msrb.mxu0 %v10539_v15  ;;  %v10550_v15 = vld [vmem:[#allocation11 + $0x590] sm:$0xff] }
 0x183   :  { %3331 = vmatpush.bf16.msrb.mxu2 %v10487_v14 }
 0x186   :  { %3288 = vmatpush.bf16.msra.mxu3 %v10464_v16 }
 0x187   :  { %3332 = vmatpush.bf16.msrb.mxu2 %v10486_v17 }
 0x188   :  { %8898 = vmatmul.msk.bf16.vlgmr.msrb.gmra.mxu3 %vm11358_vm8, %v8897_v39  ;;  %v11491_v39 = vld [vmem:[#allocation10] sm:$0xff] }
 0x18a   :  { %3289 = vmatpush.bf16.msra.mxu3 %v10463_v35  ;;  %v3142_v17 = vpop.f32.mrf.mxu0  ;;  %v10538_v35 = vld [vmem:[#allocation11 + $0x530] sm:$0xff] }
 0x18b   :  { %3333 = vmatpush.bf16.msrb.mxu2 %v10485_v21  ;;  %3774 = vmatpush.bf16.msrb.mxu0 %v10538_v35  ;;  %v10537_v21 = vld [vmem:[#allocation11 + $0x528] sm:$0xff] }
 0x18e   :  { %3290 = vmatpush.bf16.msra.mxu3 %v10462_v26  ;;  %v2170_v26 = vperm.slane %v11491_v39, 0 }
 0x18f   :  { %3334 = vmatpush.bf16.msrb.mxu2 %v10484_v28  ;;  %3775 = vmatpush.bf16.msrb.mxu0 %v10537_v21 }
 0x190   :  { %v3141_v31 = vadd.f32 %v3140_v13, %v2170_v26 }
 0x192   :  { %3291 = vmatpush.bf16.msra.mxu3 %v10461_v34  ;;  %8919 = vmatmul.msk.bf16.vlgmr.msrb.gmra.mxu2 %vm11422_vm15, %v8918_v20  ;;  %v10547_v34 = vld [vmem:[#allocation11 + $0x578] sm:$0xff] }
 0x193   :  { %3383 = vmatpush.bf16.msra.mxu2 %v10523_v29  ;;  %v10536_v29 = vld [vmem:[#allocation11 + $0x520] sm:$0xff]  ;;  %v10563_v20 = vld [vmem:[#allocation11 + $0x5f8] sm:$0xff]  ;;  %3787 = vmatpush.bf16.msrb.mxu1 %v10547_v34 }
 0x194   :  { %3776 = vmatpush.bf16.msrb.mxu0 %v10536_v29 }
 0x196   :  { %3292 = vmatpush.bf16.msra.mxu3 %v10460_v45  ;;  %v3154_v14 = vpop.f32.mrf.mxu1  ;;  %v10546_v45 = vld [vmem:[#allocation11 + $0x570] sm:$0xff] }
 0x197   :  { %3384 = vmatpush.bf16.msra.mxu2 %v10522_v36  ;;  %v3155_v36 = vadd.f32 %v3154_v14, %v3141_v31  ;;  %3788 = vmatpush.bf16.msrb.mxu1 %v10546_v45  ;;  %v10556_v45 = vld [vmem:[#allocation11 + $0x5c0] sm:$0xff] }
 0x198   :  { %3777 = vmatpush.bf16.msrb.mxu0 %v10535_v43  ;;  %v10548_v43 = vld [vmem:[#allocation11 + $0x580] sm:$0xff] }
 0x199   :  { %8910 = vmatmul.msk.bf16.vlgmr.msra.gmra.mxu3 %vm11390_vm12, %v8909_v52 }
 0x19a   :  { %3341 = vmatpush.bf16.msrb.mxu3 %v10499_v19  ;;  %v10554_v19 = vld [vmem:[#allocation11 + $0x5b0] sm:$0xff] }
 0x19b   :  { %3385 = vmatpush.bf16.msra.mxu2 %v10521_v32  ;;  %v10562_v32 = vld [vmem:[#allocation11 + $0x5f0] sm:$0xff] }
 0x19e   :  { %3342 = vmatpush.bf16.msrb.mxu3 %v10498_v53  ;;  %v3156_v23 = vpop.f32.mrf.mxu1  ;;  %v3196_v24 = vpop.f32.mrf.mxu0 }
 0x19f   :  { %3386 = vmatpush.bf16.msra.mxu2 %v10520_v58 }
 0x1a2   :  { %3343 = vmatpush.bf16.msrb.mxu3 %v10497_v59  ;;  %v3143_v59 = vadd.f32 %v3142_v17, %v2170_v26  ;;  %v10570_v17 = vld [vmem:[#allocation11 + $0x630] sm:$0xff]  ;;  %v10557_v26 = vld [vmem:[#allocation11 + $0x5c8] sm:$0xff] }
 0x1a3   :  { %3387 = vmatpush.bf16.msra.mxu2 %v10519_v61  ;;  %v10534_v61 = vld [vmem:[#allocation11 + $0x510] sm:$0xff] }
 0x1a4   :  { %3778 = vmatpush.bf16.msrb.mxu0 %v10534_v61  ;;  %v10567_v61 = vld [vmem:[#allocation11 + $0x618] sm:$0xff] }
 0x1a6   :  { %3344 = vmatpush.bf16.msrb.mxu3 %v10496_v63  ;;  %v3210_v28 = vpop.f32.mrf.mxu1  ;;  %v3198_v48 = vpop.f32.mrf.mxu0  ;;  %v10545_v63 = vld [vmem:[#allocation11 + $0x568] sm:$0xff] }
 0x1a7   :  { %3388 = vmatpush.bf16.msra.mxu2 %v10518_v57  ;;  %v10553_v57 = vld [vmem:[#allocation11 + $0x5a8] sm:$0xff]  ;;  %3789 = vmatpush.bf16.msrb.mxu1 %v10545_v63  ;;  %v10578_v63 = vld [vmem:[#allocation11 + $0x670] sm:$0xff] }
 0x1aa   :  { %3345 = vmatpush.bf16.msrb.mxu3 %v10495_v0  ;;  %v10561_v0 = vld [vmem:[#allocation11 + $0x5e8] sm:$0xff] }
 0x1ab   :  { %3389 = vmatpush.bf16.msra.mxu2 %v10517_v50  ;;  %v3157_v50 = vadd.f32 %v3156_v23, %v3143_v59  ;;  %3790 = vmatpush.bf16.msrb.mxu1 %v10544_v3  ;;  %v10566_v3 = vld [vmem:[#allocation11 + $0x610] sm:$0xff] }
 0x1ae   :  { %3346 = vmatpush.bf16.msrb.mxu3 %v10494_v1  ;;  %v3212_v53 = vpop.f32.mrf.mxu1 }
 0x1af   :  { %3390 = vmatpush.bf16.msra.mxu2 %v10516_v6 }
 0x1b2   :  { %3347 = vmatpush.bf16.msrb.mxu3 %v10493_v2  ;;  %3391 = vmatmul.bf16.vlgmr.msra.gmra.mxu2 %v11410_v46  ;;  %v10533_v2 = vld [vmem:[#allocation11 + $0x508] sm:$0xff] }
 0x1b3   :  { %3801 = vmatpush.bf16.msrb.mxu2 %v10555_v42  ;;  %3779 = vmatpush.bf16.msrb.mxu0 %v10533_v2 }
 0x1b6   :  { %3348 = vmatpush.bf16.msrb.mxu3 %v10492_v30 }
 0x1b7   :  { %3802 = vmatpush.bf16.msrb.mxu2 %v10554_v19  ;;  %v10568_v19 = vld [vmem:[#allocation11 + $0x620] sm:$0xff] }
 0x1b9   :  { %8922 = vmatmul.msk.bf16.vlgmr.msrb.gmra.mxu3 %vm11422_vm15, %v8921_v47  ;;  %v10532_v47 = vld [vmem:[#allocation11 + $0x500] sm:$0xff] }
 0x1ba   :  { %3397 = vmatpush.bf16.msra.mxu3 %v10531_v7  ;;  %v10560_v7 = vld [vmem:[#allocation11 + $0x5e0] sm:$0xff]  ;;  %3780 = vmatpush.bf16.msrb.mxu0 %v10532_v47 }
 0x1bb   :  { %3803 = vmatpush.bf16.msrb.mxu2 %v10553_v57  ;;  %v10586_v57 = vld [vmem:[#allocation11 + $0x6b0] sm:$0xff] }
 0x1be   :  { %3398 = vmatpush.bf16.msra.mxu3 %v10530_v9  ;;  %v3252_v8 = vpop.f32.mrf.mxu0 }
 0x1bf   :  { %3804 = vmatpush.bf16.msrb.mxu2 %v10552_v5  ;;  %v10577_v5 = vld [vmem:[#allocation11 + $0x668] sm:$0xff] }
 0x1c2   :  { %3399 = vmatpush.bf16.msra.mxu3 %v10529_v4 }
 0x1c6   :  { %3400 = vmatpush.bf16.msra.mxu3 %v10528_v55  ;;  %v10543_v55 = vld [vmem:[#allocation11 + $0x558] sm:$0xff]  ;;  %v3254_v21 = vpop.f32.mrf.mxu0 }
 0x1c7   :  { %3791 = vmatpush.bf16.msrb.mxu1 %v10543_v55 }
 0x1ca   :  { %3401 = vmatpush.bf16.msra.mxu3 %v10527_v27  ;;  %v10551_v27 = vld [vmem:[#allocation11 + $0x598] sm:$0xff] }
 0x1cb   :  { %3805 = vmatpush.bf16.msrb.mxu2 %v10551_v27  ;;  %v10576_v27 = vld [vmem:[#allocation11 + $0x660] sm:$0xff] }
 0x1ce   :  { %3402 = vmatpush.bf16.msra.mxu3 %v10526_v10  ;;  %v10559_v10 = vld [vmem:[#allocation11 + $0x5d8] sm:$0xff] }
 0x1cf   :  { %3806 = vmatpush.bf16.msrb.mxu2 %v10550_v15  ;;  %v10564_v15 = vld [vmem:[#allocation11 + $0x600] sm:$0xff] }
 0x1d2   :  { %3403 = vmatpush.bf16.msra.mxu3 %v10525_v11  ;;  %v10571_v11 = vld [vmem:[#allocation11 + $0x638] sm:$0xff] }
 0x1d3   :  { %v3168_v22 = vpop.f32.mrf.mxu2  ;;  %3829 = vmatpush.bf16.msra.mxu0 %v10571_v11  ;;  %v10592_v11 = vld [vmem:[#allocation11 + $0x6e0] sm:$0xff] }
 0x1d4   :  { %v3169_v49 = vadd.f32 %v3168_v22, %v3155_v36  ;;  %v10542_v22 = vld [vmem:[#allocation11 + $0x550] sm:$0xff]  ;;  %v10540_v36 = vld [vmem:[#allocation11 + $0x540] sm:$0xff] }
 0x1d5   :  { %3792 = vmatpush.bf16.msrb.mxu1 %v10542_v22 }
 0x1d6   :  { %3404 = vmatpush.bf16.msra.mxu3 %v10524_v12  ;;  %v3266_v12 = vpop.f32.mrf.mxu1 }
 0x1d7   :  { %3830 = vmatpush.bf16.msra.mxu0 %v10570_v17  ;;  %v10575_v17 = vld [vmem:[#allocation11 + $0x658] sm:$0xff] }
 0x1d9   :  { %3405 = vmatmul.bf16.vlgmr.msra.gmra.mxu3 %v11457_v40 }
 0x1da   :  { %3815 = vmatpush.bf16.msrb.mxu3 %v10563_v20 }
 0x1db   :  { %v3170_v18 = vpop.f32.mrf.mxu2 }
 0x1dc   :  { %v3171_v30 = vadd.f32 %v3170_v18, %v3157_v50 }
 0x1de   :  { %3816 = vmatpush.bf16.msrb.mxu3 %v10562_v32  ;;  %v3268_v34 = vpop.f32.mrf.mxu1  ;;  %v10579_v32 = vld [vmem:[#allocation11 + $0x678] sm:$0xff] }
 0x1e2   :  { %3817 = vmatpush.bf16.msrb.mxu3 %v10561_v0  ;;  %v10594_v0 = vld [vmem:[#allocation11 + $0x6f0] sm:$0xff] }
 0x1e3   :  { %v3224_v33 = vpop.f32.mrf.mxu2 }
 0x1e6   :  { %3818 = vmatpush.bf16.msrb.mxu3 %v10560_v7  ;;  %v3322_v50 = vpop.f32.mrf.mxu1  ;;  %v10593_v7 = vld [vmem:[#allocation11 + $0x6e8] sm:$0xff] }
 0x1ea   :  { %3819 = vmatpush.bf16.msrb.mxu3 %v10559_v10  ;;  %v10584_v10 = vld [vmem:[#allocation11 + $0x6a0] sm:$0xff] }
 0x1eb   :  { %v3226_v1 = vpop.f32.mrf.mxu2 }
 0x1f7   :  { %v3280_v23 = vpop.f32.mrf.mxu2 }
 0x1fb   :  { %v3182_v16 = vpop.f32.mrf.mxu3 }
 0x1fc   :  { %v3183_v58 = vadd.f32 %v3182_v16, %v3169_v49  ;;  %v10558_v16 = vld [vmem:[#allocation11 + $0x5d0] sm:$0xff]  ;;  %v3308_v49 = vpop.f32.mrf.mxu0 }
 0x1fd   :  { %3820 = vmatpush.bf16.msrb.mxu3 %v10558_v16 }
 0x1fe   :  { %v3197_v6 = vadd.f32 %v3196_v24, %v3183_v58  ;;  %v10541_v24 = vld [vmem:[#allocation11 + $0x548] sm:$0xff] }
 0x1ff   :  { %3793 = vmatpush.bf16.msrb.mxu1 %v10541_v24 }
 0x200   :  { %v3211_v9 = vadd.f32 %v3210_v28, %v3197_v6  ;;  %v10569_v28 = vld [vmem:[#allocation11 + $0x628] sm:$0xff] }
 0x201   :  { %3821 = vmatpush.bf16.msrb.mxu3 %v10557_v26  ;;  %3831 = vmatpush.bf16.msra.mxu0 %v10569_v28  ;;  %v10582_v26 = vld [vmem:[#allocation11 + $0x690] sm:$0xff] }
 0x202   :  { %v3225_v14 = vadd.f32 %v3224_v33, %v3211_v9 }
 0x203   :  { %v3184_v25 = vpop.f32.mrf.mxu3  ;;  %3794 = vmatpush.bf16.msrb.mxu1 %v10540_v36 }
 0x204   :  { %v3185_v44 = vadd.f32 %v3184_v25, %v3171_v30  ;;  %v10549_v25 = vld [vmem:[#allocation11 + $0x588] sm:$0xff]  ;;  %v3310_v9 = vpop.f32.mrf.mxu0 }
 0x205   :  { %3807 = vmatpush.bf16.msrb.mxu2 %v10549_v25  ;;  %3822 = vmatpush.bf16.msrb.mxu3 %v10556_v45  ;;  %v10585_v30 = vld [vmem:[#allocation11 + $0x6a8] sm:$0xff]  ;;  %v10574_v25 = vld [vmem:[#allocation11 + $0x650] sm:$0xff] }
 0x206   :  { %v3199_v13 = vadd.f32 %v3198_v48, %v3185_v44  ;;  %v10587_v48 = vld [vmem:[#allocation11 + $0x6b8] sm:$0xff]  ;;  %3832 = vmatpush.bf16.msra.mxu0 %v10568_v19 }
 0x207   :  { %4102 = vmatpush.bf16.msra.mxu1 %v10579_v32 }
 0x208   :  { %v3213_v35 = vadd.f32 %v3212_v53, %v3199_v13  ;;  %v10595_v53 = vld [vmem:[#allocation11 + $0x6f8] sm:$0xff] }
 0x209   :  { %3808 = vmatpush.bf16.msrb.mxu2 %v10548_v43  ;;  %4130 = vmatpush.bf16.msra.mxu3 %v10595_v53  ;;  %v10589_v43 = vld [vmem:[#allocation11 + $0x6c8] sm:$0xff] }
 0x20a   :  { %v3227_v33 = vadd.f32 %v3226_v1, %v3213_v35  ;;  %3833 = vmatpush.bf16.msra.mxu0 %v10567_v61 }
 0x20b   :  { %v3238_v52 = vpop.f32.mrf.mxu3  ;;  %4103 = vmatpush.bf16.msra.mxu1 %v10578_v63 }
 0x20c   :  { %v3239_v18 = vadd.f32 %v3238_v52, %v3225_v14  ;;  %v3282_v52 = vpop.f32.mrf.mxu2  ;;  %v3324_v14 = vpop.f32.mrf.mxu1 }
 0x20d   :  { %4116 = vmatpush.bf16.msra.mxu2 %v10587_v48  ;;  %4131 = vmatpush.bf16.msra.mxu3 %v10594_v0  ;;  %v3364_v35 = vpop.f32.mrf.mxu0  ;;  %v10572_v48 = vld [vmem:[#allocation11 + $0x640] sm:$0xff] }
 0x20e   :  { %v3253_v29 = vadd.f32 %v3252_v8, %v3239_v18  ;;  %3834 = vmatpush.bf16.msra.mxu0 %v10566_v3  ;;  %v10591_v18 = vld [vmem:[#allocation11 + $0x6d8] sm:$0xff] }
 0x20f   :  { %4104 = vmatpush.bf16.msra.mxu1 %v10577_v5 }
 0x210   :  { %v3267_v20 = vadd.f32 %v3266_v12, %v3253_v29  ;;  %v10590_v29 = vld [vmem:[#allocation11 + $0x6d0] sm:$0xff] }
 0x211   :  { %4117 = vmatpush.bf16.msra.mxu2 %v10586_v57  ;;  %4132 = vmatpush.bf16.msra.mxu3 %v10593_v7 }
 0x212   :  { %v3281_v59 = vadd.f32 %v3280_v23, %v3267_v20  ;;  %v10583_v23 = vld [vmem:[#allocation11 + $0x698] sm:$0xff]  ;;  %v10581_v20 = vld [vmem:[#allocation11 + $0x688] sm:$0xff] }
 0x213   :  { %v3240_v4 = vpop.f32.mrf.mxu3  ;;  %4105 = vmatpush.bf16.msra.mxu1 %v10576_v27 }
 0x214   :  { %v3241_v42 = vadd.f32 %v3240_v4, %v3227_v33  ;;  %v10565_v4 = vld [vmem:[#allocation11 + $0x608] sm:$0xff] }
 0x215   :  { %v3336_v8 = vpop.f32.mrf.mxu2  ;;  %4118 = vmatpush.bf16.msra.mxu2 %v10585_v30  ;;  %3835 = vmatpush.bf16.msra.mxu0 %v10565_v4  ;;  %v3366_v53 = vpop.f32.mrf.mxu0 }
 0x216   :  { %v3255_v58 = vadd.f32 %v3254_v21, %v3241_v42  ;;  %4133 = vmatpush.bf16.msra.mxu3 %v10592_v11  ;;  %v10573_v42 = vld [vmem:[#allocation11 + $0x648] sm:$0xff] }
 0x217   :  { %4106 = vmatpush.bf16.msra.mxu1 %v10575_v17 }
 0x218   :  { %v3269_v2 = vadd.f32 %v3268_v34, %v3255_v58 }
 0x219   :  { %4119 = vmatpush.bf16.msra.mxu2 %v10584_v10  ;;  %3836 = vmatpush.bf16.msra.mxu0 %v10564_v15 }
 0x21a   :  { %v3283_v47 = vadd.f32 %v3282_v52, %v3269_v2  ;;  %4134 = vmatpush.bf16.msra.mxu3 %v10591_v18  ;;  %v10588_v52 = vld [vmem:[#allocation11 + $0x6c0] sm:$0xff] }
 0x21b   :  { %4107 = vmatpush.bf16.msra.mxu1 %v10574_v25  ;;  %v10600_v25 = vld [vmem:[#allocation11 + $0x720] sm:$0xff] }
 0x21c   :  { %v3294_v31 = vpop.f32.mrf.mxu3 }
 0x21d   :  { %v3295_v1 = vadd.f32 %v3294_v31, %v3281_v59  ;;  %v3338_v21 = vpop.f32.mrf.mxu2  ;;  %4120 = vmatpush.bf16.msra.mxu2 %v10583_v23  ;;  %v3378_v31 = vpop.f32.mrf.mxu1 }
 0x21e   :  { %4135 = vmatpush.bf16.msra.mxu3 %v10590_v29  ;;  %v10596_v29 = vld [vmem:[#allocation11 + $0x700] sm:$0xff] }
 0x21f   :  { %v3309_v44 = vadd.f32 %v3308_v49, %v3295_v1  ;;  %4108 = vmatpush.bf16.msra.mxu1 %v10573_v42  ;;  %v10580_v49 = vld [vmem:[#allocation11 + $0x680] sm:$0xff]  ;;  %v10627_v42 = vld [vmem:[#allocation11 + $0x7f8] sm:$0xff] }
 0x221   :  { %v3323_v12 = vadd.f32 %v3322_v50, %v3309_v44  ;;  %4121 = vmatpush.bf16.msra.mxu2 %v10582_v26 }
 0x222   :  { %4136 = vmatpush.bf16.msra.mxu3 %v10589_v43  ;;  %v10609_v43 = vld [vmem:[#allocation11 + $0x768] sm:$0xff] }
 0x223   :  { %v3337_v16 = vadd.f32 %v3336_v8, %v3323_v12  ;;  %4109 = vmatpush.bf16.msra.mxu1 %v10572_v48  ;;  %v10608_v48 = vld [vmem:[#allocation11 + $0x760] sm:$0xff] }
 0x224   :  { %v3296_v6 = vpop.f32.mrf.mxu3 }
 0x225   :  { %v3297_v55 = vadd.f32 %v3296_v6, %v3283_v47  ;;  %4122 = vmatpush.bf16.msra.mxu2 %v10581_v20  ;;  %v3380_v63 = vpop.f32.mrf.mxu1  ;;  %v10626_v20 = vld [vmem:[#allocation11 + $0x7f0] sm:$0xff] }
 0x226   :  { %4137 = vmatpush.bf16.msra.mxu3 %v10588_v52  ;;  %v10624_v52 = vld [vmem:[#allocation11 + $0x7e0] sm:$0xff] }
 0x227   :  { %v3311_v22 = vadd.f32 %v3310_v9, %v3297_v55 }
 0x229   :  { %v3325_v28 = vadd.f32 %v3324_v14, %v3311_v22  ;;  %4123 = vmatpush.bf16.msra.mxu2 %v10580_v49  ;;  %v10616_v49 = vld [vmem:[#allocation11 + $0x7a0] sm:$0xff] }
 0x22b   :  { %v3339_v36 = vadd.f32 %v3338_v21, %v3325_v28  ;;  %v10602_v21 = vld [vmem:[#allocation11 + $0x730] sm:$0xff]  ;;  %v10599_v28 = vld [vmem:[#allocation11 + $0x718] sm:$0xff] }
 0x235   :  { %v3392_v19 = vpop.f32.mrf.mxu2 }
 0x23c   :  { %v3350_v13 = vpop.f32.mrf.mxu3 }
 0x23d   :  { %v3351_v24 = vadd.f32 %v3350_v13, %v3337_v16  ;;  %v3394_v50 = vpop.f32.mrf.mxu2 }
 0x23f   :  { %v3365_v33 = vadd.f32 %v3364_v35, %v3351_v24  ;;  %v10603_v35 = vld [vmem:[#allocation11 + $0x738] sm:$0xff]  ;;  %v10601_v24 = vld [vmem:[#allocation11 + $0x728] sm:$0xff] }
 0x241   :  { %v3379_v32 = vadd.f32 %v3378_v31, %v3365_v33  ;;  %v10635_v31 = vld [vmem:[#allocation11 + $0x838] sm:$0xff] }
 0x242   :  { %v10611_v33 = vld [vmem:[#allocation11 + $0x778] sm:$0xff] }
 0x243   :  { %v3393_v59 = vadd.f32 %v3392_v19, %v3379_v32  ;;  %v10632_v19 = vld [vmem:[#allocation11 + $0x820] sm:$0xff] }
 0x244   :  { %v3352_v34 = vpop.f32.mrf.mxu3 }
 0x245   :  { %v3353_v45 = vadd.f32 %v3352_v34, %v3339_v36  ;;  %v10619_v34 = vld [vmem:[#allocation11 + $0x7b8] sm:$0xff]  ;;  %v10633_v36 = vld [vmem:[#allocation11 + $0x828] sm:$0xff] }
 0x247   :  { %v3367_v58 = vadd.f32 %v3366_v53, %v3353_v45  ;;  %v10625_v45 = vld [vmem:[#allocation11 + $0x7e8] sm:$0xff] }
 0x249   :  { %v3381_v0 = vadd.f32 %v3380_v63, %v3367_v58  ;;  %v10631_v58 = vld [vmem:[#allocation11 + $0x818] sm:$0xff] }
 0x24a   :  { %v10623_v63 = vld [vmem:[#allocation11 + $0x7d8] sm:$0xff] }
 0x24b   :  { %v3395_v6 = vadd.f32 %v3394_v50, %v3381_v0 }
 0x25c   :  { %v3406_v61 = vpop.f32.mrf.mxu3 }
 0x25d   :  { %v3407_v57 = vadd.f32 %v3406_v61, %v3393_v59  ;;  %v10607_v59 = vld [vmem:[#allocation11 + $0x758] sm:$0xff] }
 0x25e   :  { %v10615_v61 = vld [vmem:[#allocation11 + $0x798] sm:$0xff] }
 0x25f   :  { %v3411_v1 = vmax.f32 %v3407_v57, 0.0  ;;  %v10630_v57 = vld [vmem:[#allocation11 + $0x810] sm:$0xff] }
 0x261   :  { %v3415_v5 = vrot.slane %v3411_v1, 4  ;;  %v3423_v30 = vrot.slane %v3411_v1, 5  ;;  %v3431_v7 = vrot.slane %v3411_v1, 6  ;;  %v3439_v8 = vrot.slane %v3411_v1, 7 }
 0x263   :  { %v3420_v27 = vsel %vm1674_vm1, 0.0, %v3415_v5  ;;  %v3428_v10 = vsel %vm1713_vm5, 0.0, %v3423_v30  ;;  %v3436_v11 = vsel %vm1752_vm9, 0.0, %v3431_v7  ;;  %v3444_v12 = vsel %vm1791_vm0, 0.0, %v3439_v8 }
 0x264   :  { %v3408_v2 = vpop.f32.mrf.mxu3 }
 0x265   :  { %v3409_v3 = vadd.f32 %v3408_v2, %v3395_v6  ;;  %v10614_v6 = vld [vmem:[#allocation11 + $0x790] sm:$0xff] }
 0x266   :  { %v10622_v2 = vld [vmem:[#allocation11 + $0x7d0] sm:$0xff] }
 0x267   :  { %v3412_v44 = vmax.f32 %v3409_v3, 0.0 }
 0x269   :  { %v3416_v47 = vrot.slane %v3412_v44, 4  ;;  %v3424_v9 = vrot.slane %v3412_v44, 5  ;;  %v3432_v4 = vrot.slane %v3412_v44, 6  ;;  %v3440_v55 = vrot.slane %v3412_v44, 7 }
 0x26a   :  { %v3531_v26 = vpack.c.bf16 %v3412_v44, %v3411_v1  ;;  %v10606_v1 = vld [vmem:[#allocation11 + $0x750] sm:$0xff]  ;;  %v10613_v44 = vld [vmem:[#allocation11 + $0x788] sm:$0xff] }
 0x26b   :  { %v3417_v13 = vsel %vm1674_vm1, %v3415_v5, %v3416_v47  ;;  %v3425_v14 = vsel %vm1713_vm5, %v3423_v30, %v3424_v9  ;;  %v3433_v22 = vsel %vm1752_vm9, %v3431_v7, %v3432_v4  ;;  %v3441_v15 = vsel %vm1791_vm0, %v3439_v8, %v3440_v55  ;;  %v10629_v5 = vld [vmem:[#allocation11 + $0x808] sm:$0xff]  ;;  %v10628_v9 = vld [vmem:[#allocation11 + $0x800] sm:$0xff] }
 0x26c   :  { %v9084_v16 = vpack.c.bf16 %v3417_v13, %v3420_v27  ;;  %v9087_v17 = vpack.c.bf16 %v3425_v14, %v3428_v10  ;;  %v9090_v23 = vpack.c.bf16 %v3433_v22, %v3436_v11  ;;  %v9093_v18 = vpack.c.bf16 %v3441_v15, %v3444_v12  ;;  %v10605_v8 = vld [vmem:[#allocation11 + $0x748] sm:$0xff]  ;;  %v10604_v10 = vld [vmem:[#allocation11 + $0x740] sm:$0xff] }
 0x26d   :  { %v3532_v7 = vperm.slane %v11491_v39, 1  ;;  %v10621_v47 = vld [vmem:[#allocation11 + $0x7c8] sm:$0xff]  ;;  %v10612_v11 = vld [vmem:[#allocation11 + $0x780] sm:$0xff] }
 0x26e   :  { %9085 = vmatmul.msk.bf16.vlgmr.msrb.gmra.mxu0 %vm11336_vm4, %v9084_v16  ;;  %9088 = vmatmul.msk.bf16.vlgmr.msrb.gmra.mxu1 %vm11358_vm8, %v9087_v17  ;;  %v10620_v12 = vld [vmem:[#allocation11 + $0x7c0] sm:$0xff]  ;;  %v3909_v16 = vperm.slane %v11491_v39, 2  ;;  %vm4164_vm8 = vcmask 1045504  }
 0x26f   :  { %9091 = vmatmul.msk.bf16.vlgmr.msrb.gmra.mxu2 %vm11390_vm12, %v9090_v23  ;;  %9094 = vmatmul.msk.bf16.vlgmr.msrb.gmra.mxu3 %vm11422_vm15, %v9093_v18  ;;  %v11518_v17 = vld [vmem:[#allocation5] sm:$0xff]  ;;  %v11520_v23 = vld [vmem:[#allocation5 + $0x10] sm:$0xff]  ;;  %v11522_v18 = vld [vmem:[#allocation5 + $0x8] sm:$0xff]  ;;  %vm4171_vm15 = vcmp.ge.s32.totalorder %v11309_v37, 6 }
 0x270   :  { %4144 = vmatpush.bf16.msrb.mxu0 %v10603_v35  ;;  %4456 = vmatpush.bf16.msrb.mxu1 %v10611_v33  ;;  %v4905_v33 = vrot.slane %v11520_v23, 6  ;;  %v10664_v39 = vld [vmem:[#allocation11 + $0x920] sm:$0xff] }
 0x271   :  { %4470 = vmatpush.bf16.msrb.mxu2 %v10619_v34  ;;  %4484 = vmatpush.bf16.msrb.mxu3 %v10627_v42  ;;  %v10651_v34 = vld [vmem:[#allocation11 + $0x8b8] sm:$0xff] }
 0x274   :  { %4145 = vmatpush.bf16.msrb.mxu0 %v10602_v21 }
 0x275   :  { %4485 = vmatpush.bf16.msrb.mxu3 %v10626_v20 }
 0x278   :  { %4146 = vmatpush.bf16.msrb.mxu0 %v10601_v24  ;;  %v4887_v24 = vrot.slane %v11518_v17, 5 }
 0x279   :  { %4486 = vmatpush.bf16.msrb.mxu3 %v10625_v45  ;;  %v10650_v45 = vld [vmem:[#allocation11 + $0x8b0] sm:$0xff] }
 0x27c   :  { %4147 = vmatpush.bf16.msrb.mxu0 %v10600_v25  ;;  %v4889_v25 = vrot.slane %v11520_v23, 5 }
 0x27d   :  { %4487 = vmatpush.bf16.msrb.mxu3 %v10624_v52 }
 0x27e   :  { %3837 = vmatmul.bf16.vlgmr.msra.gmra.mxu0 %v3531_v26  ;;  %4110 = vmatmul.bf16.vlgmr.msra.gmra.mxu1 %v11318_v41  ;;  %v10634_v41 = vld [vmem:[#allocation11 + $0x830] sm:$0xff]  ;;  %v11526_v26 = vld [vmem:[#allocation5 + $0x18] sm:$0xff]  ;;  %v4890_v42 = vsel %vm1713_vm5, %v4887_v24, %v4889_v25 }
 0x27f   :  { %4124 = vmatmul.bf16.vlgmr.msra.gmra.mxu2 %v11364_v60  ;;  %4138 = vmatmul.bf16.vlgmr.msra.gmra.mxu3 %v11410_v46  ;;  %v10610_v60 = vld [vmem:[#allocation11 + $0x770] sm:$0xff] }
 0x280   :  { %4148 = vmatpush.bf16.msrb.mxu0 %v10599_v28  ;;  %v10618_v46 = vld [vmem:[#allocation11 + $0x7b0] sm:$0xff]  ;;  %4457 = vmatpush.bf16.msrb.mxu1 %v10610_v60  ;;  %v4888_v28 = vrot.slane %v11522_v18, 5 }
 0x281   :  { %4471 = vmatpush.bf16.msrb.mxu2 %v10618_v46  ;;  %4488 = vmatpush.bf16.msrb.mxu3 %v10623_v63  ;;  %v10642_v60 = vld [vmem:[#allocation11 + $0x870] sm:$0xff]  ;;  %v10667_v46 = vld [vmem:[#allocation11 + $0x938] sm:$0xff] }
 0x282   :  { %v4898_v52 = vsel %vm1713_vm5, 0.0, %v4888_v28 }
 0x284   :  { %4149 = vmatpush.bf16.msrb.mxu0 %v10598_v54  ;;  %4458 = vmatpush.bf16.msrb.mxu1 %v10609_v43  ;;  %v10643_v54 = vld [vmem:[#allocation11 + $0x878] sm:$0xff] }
 0x285   :  { %4489 = vmatpush.bf16.msrb.mxu3 %v10622_v2  ;;  %v10641_v2 = vld [vmem:[#allocation11 + $0x868] sm:$0xff] }
 0x288   :  { %4150 = vmatpush.bf16.msrb.mxu0 %v10597_v62  ;;  %4459 = vmatpush.bf16.msrb.mxu1 %v10608_v48 }
 0x289   :  { %4490 = vmatpush.bf16.msrb.mxu3 %v10621_v47  ;;  %v4919_v47 = vrot.slane %v11518_v17, 7 }
 0x28c   :  { %4151 = vmatpush.bf16.msrb.mxu0 %v10596_v29  ;;  %4460 = vmatpush.bf16.msrb.mxu1 %v10607_v59  ;;  %v4891_v29 = vrot.slane %v11526_v26, 5 }
 0x28d   :  { %4491 = vmatpush.bf16.msrb.mxu3 %v10620_v12 }
 0x28f   :  { %4152 = vmatmul.bf16.vlgmr.msrb.gmra.mxu0 %v11457_v40  ;;  %v10617_v40 = vld [vmem:[#allocation11 + $0x7a8] sm:$0xff] }
 0x290   :  { %4498 = vmatpush.bf16.msra.mxu0 %v10635_v31  ;;  %4472 = vmatpush.bf16.msrb.mxu2 %v10617_v40  ;;  %v4903_v31 = vrot.slane %v11518_v17, 6  ;;  %v4901_v40 = vsel %vm1739_vm7, %v4890_v42, 0.0  ;;  %v10648_v42 = vld [vmem:[#allocation11 + $0x8a0] sm:$0xff] }
 0x291   :  { %4461 = vmatpush.bf16.msrb.mxu1 %v10606_v1 }
 0x292   :  { %v4913_v63 = vsel %vm1752_vm9, 0.0, %v4903_v31 }
 0x293   :  { %v4915_v1 = vsel %vm12531_vm10, %v4913_v63, 0.0 }
 0x294   :  { %4499 = vmatpush.bf16.msra.mxu0 %v10634_v41  ;;  %4473 = vmatpush.bf16.msrb.mxu2 %v10616_v49  ;;  %v4897_v41 = vsel %vm1713_vm5, 0.0, %v4887_v24  ;;  %v4892_v49 = vsel %vm1713_vm5, %v4888_v28, %v4891_v29  ;;  %v4907_v28 = vrot.slane %v11526_v26, 6 }
 0x295   :  { %4462 = vmatpush.bf16.msrb.mxu1 %v10605_v8  ;;  %v4899_v43 = vsel %vm1738_vm6, %v4897_v41, 0.0  ;;  %v10649_v8 = vld [vmem:[#allocation11 + $0x8a8] sm:$0xff] }
 0x296   :  { %v10856_v48 = vpack.i.bf16 %v4901_v40, %v4899_v43 }
 0x298   :  { %4500 = vmatpush.bf16.msra.mxu0 %v10633_v36  ;;  %4474 = vmatpush.bf16.msrb.mxu2 %v10615_v61  ;;  %v4906_v61 = vsel %vm1752_vm9, %v4903_v31, %v4905_v33 }
 0x299   :  { %4463 = vmatpush.bf16.msrb.mxu1 %v10604_v10  ;;  %10857 = vrot.lane.b32.xlu0 %v10856_v48, %s11195_s5  ;;  %v10639_v48 = vld [vmem:[#allocation11 + $0x858] sm:$0xff] }
 0x29c   :  { %4501 = vmatpush.bf16.msra.mxu0 %v10632_v19  ;;  %4475 = vmatpush.bf16.msrb.mxu2 %v10614_v6  ;;  %v10659_v19 = vld [vmem:[#allocation11 + $0x8f8] sm:$0xff]  ;;  %v4917_v6 = vsel %vm12530_vm11, %v4906_v61, 0.0 }
 0x29d   :  { %4801 = vmatpush.bf16.msra.mxu1 %v10643_v54  ;;  %4829 = vmatpush.bf16.msra.mxu3 %v10659_v19  ;;  %v10640_v54 = vld [vmem:[#allocation11 + $0x860] sm:$0xff] }
 0x2a0   :  { %4502 = vmatpush.bf16.msra.mxu0 %v10631_v58  ;;  %4476 = vmatpush.bf16.msrb.mxu2 %v10613_v44 }
 0x2a1   :  { %4802 = vmatpush.bf16.msra.mxu1 %v10642_v60  ;;  %v4929_v60 = vsel %vm1791_vm0, 0.0, %v4919_v47 }
 0x2a4   :  { %4503 = vmatpush.bf16.msra.mxu0 %v10630_v57  ;;  %4477 = vmatpush.bf16.msrb.mxu2 %v10612_v11  ;;  %v10658_v57 = vld [vmem:[#allocation11 + $0x8f0] sm:$0xff] }
 0x2a5   :  { %4830 = vmatpush.bf16.msra.mxu3 %v10658_v57  ;;  %4803 = vmatpush.bf16.msra.mxu1 %v10641_v2  ;;  %v10891_v2 = vpack.i.bf16 %v11526_v26, %v11522_v18 }
 0x2a8   :  { %4504 = vmatpush.bf16.msra.mxu0 %v10629_v5  ;;  %4815 = vmatpush.bf16.msra.mxu2 %v10651_v34  ;;  %v4902_v5 = vsel %vm1739_vm7, %v4892_v49, 0.0 }
 0x2a9   :  { %4804 = vmatpush.bf16.msra.mxu1 %v10640_v54  ;;  %v10644_v54 = vld [vmem:[#allocation11 + $0x880] sm:$0xff] }
 0x2ac   :  { %4505 = vmatpush.bf16.msra.mxu0 %v10628_v9  ;;  %4816 = vmatpush.bf16.msra.mxu2 %v10650_v45  ;;  %v4921_v9 = vrot.slane %v11520_v23, 7  ;;  %v10656_v45 = vld [vmem:[#allocation11 + $0x8e0] sm:$0xff] }
 0x2ad   :  { %4805 = vmatpush.bf16.msra.mxu1 %v10639_v48  ;;  %v10698_v48 = vld [vmem:[%s12528_s6 + $0xf0] sm:$0xff] }
 0x2ae   :  { %v4922_v41 = vsel %vm1791_vm0, %v4919_v47, %v4921_v9 }
 0x2b0   :  { %4843 = vmatpush.bf16.msrb.mxu0 %v10667_v46  ;;  %4817 = vmatpush.bf16.msra.mxu2 %v10649_v8 }
 0x2b4   :  { %4818 = vmatpush.bf16.msra.mxu2 %v10648_v42  ;;  %v10654_v42 = vld [vmem:[#allocation11 + $0x8d0] sm:$0xff] }
 0x2eb   :  { %v3782_v32 = vpop.f32.mrf.mxu0  ;;  %v3796_v53 = vpop.f32.mrf.mxu1 }
 0x2ec   :  { %v3783_v55 = vadd.f32 %v3782_v32, %v3532_v7 }
 0x2ee   :  { %v3797_v14 = vadd.f32 %v3796_v53, %v3783_v55  ;;  %v10666_v53 = vld [vmem:[#allocation11 + $0x930] sm:$0xff]  ;;  %v10866_v55 = vpack.i.bf16 %v11520_v23, %v11518_v17 }
 0x2ef   :  { %4844 = vmatpush.bf16.msrb.mxu0 %v10666_v53  ;;  %v10647_v53 = vld [vmem:[#allocation11 + $0x898] sm:$0xff] }
 0x2f0   :  { %10867 = vrot.lane.b32.xlu2 %v10866_v55, %s11197_s10  ;;  %4819 = vmatpush.bf16.msra.mxu2 %v10647_v53  ;;  %v10697_v53 = vld [vmem:[%s12528_s6 + $0xe8] sm:$0xff] }
 0x2f2   :  { %v3810_v0 = vpop.f32.mrf.mxu2  ;;  %v3824_v3 = vpop.f32.mrf.mxu3 }
 0x2f3   :  { %v3784_v50 = vpop.f32.mrf.mxu0  ;;  %v3798_v30 = vpop.f32.mrf.mxu1  ;;  %v3811_v15 = vadd.f32 %v3810_v0, %v3797_v14  ;;  %v4904_v14 = vrot.slane %v11522_v18, 6 }
 0x2f4   :  { %v3785_v35 = vadd.f32 %v3784_v50, %v3532_v7  ;;  %v4920_v7 = vrot.slane %v11522_v18, 7 }
 0x2f5   :  { %v3825_v20 = vadd.f32 %v3824_v3, %v3811_v15  ;;  %v4900_v3 = vsel %vm1738_vm6, %v4898_v52, 0.0  ;;  %v4914_v34 = vsel %vm1752_vm9, 0.0, %v4904_v14  ;;  %v4908_v46 = vsel %vm1752_vm9, %v4904_v14, %v4907_v28  ;;  %v10636_v28 = vld [vmem:[#allocation11 + $0x840] sm:$0xff] }
 0x2f6   :  { %v3799_v32 = vadd.f32 %v3798_v30, %v3785_v35  ;;  %v10871_v30 = vpack.i.bf16 %v4917_v6, %v4915_v1  ;;  %v4930_v12 = vsel %vm1791_vm0, 0.0, %v4920_v7  ;;  %v4918_v40 = vsel %vm12530_vm11, %v4908_v46, 0.0  ;;  %v10646_v1 = vld [vmem:[#allocation11 + $0x890] sm:$0xff]  ;;  %v10661_v46 = vld [vmem:[#allocation11 + $0x908] sm:$0xff] }
 0x2f7   :  { %v4932_v25 = vsel %vm1816_vm13, %v4930_v12, 0.0  ;;  %v4931_v52 = vsel %vm1816_vm13, %v4929_v60, 0.0  ;;  %4820 = vmatpush.bf16.msra.mxu2 %v10646_v1  ;;  %vm12532_vm11 = vcmp.ge.s32.totalorder %v11311_v38, 6  ;;  %v10682_v60 = vld [vmem:[%s12528_s6 + $0x70] sm:$0xff]  ;;  %v10695_v1 = vld [vmem:[%s12528_s6 + $0xd8] sm:$0xff] }
 0x2f8   :  { %10872 = vrot.lane.b32.xlu1 %v10871_v30, %s11196_s9  ;;  %v10637_v30 = vld [vmem:[#allocation11 + $0x848] sm:$0xff] }
 0x2fa   :  { %v3812_v4 = vpop.f32.mrf.mxu2  ;;  %v11515_v13 = vpop.f32.mrf.mxu3 }
 0x2fb   :  { %v3838_v27 = vpop.f32.mrf.mxu0  ;;  %v4111_v22 = vpop.f32.mrf.mxu1  ;;  %v3813_v0 = vadd.f32 %v3812_v4, %v3799_v32  ;;  %v4923_v4 = vrot.slane %v11526_v26, 7 }
 0x2fc   :  { %v4112_v36 = vadd.f32 %v4111_v22, %v3909_v16  ;;  %v11544_v58 = vadd.f32 %v3838_v27, %v3825_v20  ;;  %v10665_v27 = vld [vmem:[#allocation11 + $0x928] sm:$0xff]  ;;  %v4916_v20 = vsel %vm12531_vm10, %v4914_v34, 0.0  ;;  %vm11617_vm10 = vmpackc.low %vm12532_vm11, %vm4171_vm15  ;;  %v10662_v34 = vld [vmem:[#allocation11 + $0x910] sm:$0xff]  ;;  %vm4966_vm11 = vcmask 654336  }
 0x2fd   :  { %v10657_v22 = vld [vmem:[#allocation11 + $0x8e8] sm:$0xff]  ;;  %v4924_v24 = vsel %vm1791_vm0, %v4920_v7, %v4923_v4  ;;  %4845 = vmatpush.bf16.msrb.mxu0 %v10665_v27  ;;  %v10881_v32 = vpack.i.bf16 %v4918_v40, %v4916_v20  ;;  %v10652_v40 = vld [vmem:[#allocation11 + $0x8c0] sm:$0xff] }
 0x2fe   :  { %v3843_v10 = vmax.f32 %v11544_v58, 0.0  ;;  %v4934_v33 = vsel %vm1817_vm14, %v4924_v24, 0.0  ;;  %4831 = vmatpush.bf16.msra.mxu3 %v10657_v22  ;;  %v10653_v20 = vld [vmem:[#allocation11 + $0x8c8] sm:$0xff] }
 0x2ff   :  { %v10876_v43 = vpack.i.bf16 %v4934_v33, %v4932_v25  ;;  %10882 = vrot.lane.b32.xlu2 %v10881_v32, %s11196_s9  ;;  %v10663_v25 = vld [vmem:[#allocation11 + $0x918] sm:$0xff] }
 0x300   :  { %v10683_v33 = vld [vmem:[%s12528_s6 + $0x78] sm:$0xff] }
 0x301   :  { %4846 = vmatpush.bf16.msrb.mxu0 %v10664_v39  ;;  %10877 = vrot.lane.b32.xlu1 %v10876_v43, %s11198_s13  ;;  %v10673_v39 = vld [vmem:[%s12528_s6 + $0x28] sm:$0xff]  ;;  %v10699_v43 = vld [vmem:[%s12528_s6 + $0xf8] sm:$0xff] }
 0x302   :  { %v4125_v21 = vpop.f32.mrf.mxu2  ;;  %v4139_v50 = vpop.f32.mrf.mxu3  ;;  %4832 = vmatpush.bf16.msra.mxu3 %v10656_v45  ;;  %v10672_v45 = vld [vmem:[%s12528_s6 + $0x20] sm:$0xff]  ;;  %v10691_v32 = vld [vmem:[%s12528_s6 + $0xb8] sm:$0xff] }
 0x303   :  { %v11529_v62 = vpop.f32.mrf.mxu0  ;;  %v4126_v59 = vadd.f32 %v4125_v21, %v4112_v36  ;;  %v4113_v44 = vpop.f32.mrf.mxu1  ;;  %v10861_v21 = vpack.i.bf16 %v4902_v5, %v4900_v3 }
 0x304   :  { %v4114_v29 = vadd.f32 %v4113_v44, %v3909_v16  ;;  %v3827_v16 = vadd.f32 %v11515_v13, %v3813_v0  ;;  %v4933_v13 = vsel %vm1817_vm14, %v4922_v41, 0.0  ;;  %v10645_v44 = vld [vmem:[#allocation11 + $0x888] sm:$0xff]  ;;  %v10674_v41 = vld [vmem:[%s12528_s6 + $0x30] sm:$0xff] }
 0x305   :  { %v4140_v11 = vadd.f32 %v4139_v50, %v4126_v59  ;;  %10862 = vrot.lane.b32.xlu0 %v10861_v21, %s11195_s5  ;;  %v10886_v57 = vpack.i.bf16 %v4933_v13, %v4931_v52  ;;  %4821 = vmatpush.bf16.msra.mxu2 %v10645_v44  ;;  %v10679_v52 = vld [vmem:[%s12528_s6 + $0x58] sm:$0xff]  ;;  %v10690_v13 = vld [vmem:[%s12528_s6 + $0xb0] sm:$0xff]  ;;  %v11713_v44 = vld [vmem:[#allocation10] sm:$0xff] }
 0x306   :  { %v3841_v49 = vadd.f32 %v11529_v62, %v3827_v16  ;;  %v10638_v62 = vld [vmem:[#allocation11 + $0x850] sm:$0xff]  ;;  %4847 = vmatpush.bf16.msrb.mxu0 %v10663_v25 }
 0x307   :  { %4806 = vmatpush.bf16.msra.mxu1 %v10638_v62  ;;  %v10681_v16 = vld [vmem:[%s12528_s6 + $0x68] sm:$0xff] }
 0x308   :  { %v3844_v0 = vmax.f32 %v3841_v49, 0.0  ;;  %v10671_v49 = vld [vmem:[%s12528_s6 + $0x18] sm:$0xff]  ;;  %v10669_v62 = vld [vmem:[%s12528_s6 + $0x8] sm:$0xff] }
 0x309   :  { %10892 = vrot.lane.b32.xlu1 %v10891_v2, %s11197_s10  ;;  %4822 = vmatpush.bf16.msra.mxu2 %v10644_v54  ;;  %v10676_v2 = vld [vmem:[%s12528_s6 + $0x40] sm:$0xff] }
 0x30a   :  { %v4127_v15 = vpop.f32.mrf.mxu2  ;;  %v4141_v58 = vpop.f32.mrf.mxu3  ;;  %4848 = vmatpush.bf16.msrb.mxu0 %v10662_v34 }
 0x30b   :  { %v4128_v36 = vadd.f32 %v4127_v15, %v4114_v29  ;;  %4807 = vmatpush.bf16.msra.mxu1 %v10637_v30  ;;  %v10655_v29 = vld [vmem:[#allocation11 + $0x8d8] sm:$0xff] }
 0x30c   :  { %v4153_v35 = vpop.f32.mrf.mxu0  ;;  %4833 = vmatpush.bf16.msra.mxu3 %v10655_v29  ;;  %v10686_v30 = vld [vmem:[%s12528_s6 + $0x90] sm:$0xff] }
 0x30d   :  { %v4154_v31 = vadd.f32 %v4153_v35, %v4140_v11  ;;  %v4142_v59 = vadd.f32 %v4141_v58, %v4128_v36  ;;  %10887 = vrot.lane.b32.xlu0 %v10886_v57, %s11198_s13  ;;  %v10660_v36 = vld [vmem:[#allocation11 + $0x900] sm:$0xff]  ;;  %v10670_v58 = vld [vmem:[%s12528_s6 + $0x10] sm:$0xff] }
 0x30e   :  { %4849 = vmatpush.bf16.msrb.mxu0 %v10661_v46  ;;  %v10696_v57 = vld [vmem:[%s12528_s6 + $0xe0] sm:$0xff] }
 0x30f   :  { %v4158_v19 = vadd.f32 %v4154_v31, %v3843_v10  ;;  %4808 = vmatpush.bf16.msra.mxu1 %v10636_v28  ;;  %v10675_v31 = vld [vmem:[%s12528_s6 + $0x38] sm:$0xff] }
 0x310   :  { %4834 = vmatpush.bf16.msra.mxu3 %v10654_v42 }
 0x311   :  { %v11591_v61 = vmax.f32 %v4158_v19, 0.0  ;;  %v10680_v19 = vld [vmem:[%s12528_s6 + $0x60] sm:$0xff] }
 0x312   :  { %4850 = vmatpush.bf16.msrb.mxu0 %v10660_v36 }
 0x313   :  { %v4165_v3 = vrot.slane %v11591_v61, 2  ;;  %v4179_v5 = vrot.slane %v11591_v61, 4  ;;  %v4187_v7 = vrot.slane %v11591_v61, 6 }
 0x314   :  { %v4155_v63 = vpop.f32.mrf.mxu0  ;;  %4835 = vmatpush.bf16.msra.mxu3 %v10653_v20 }
 0x315   :  { %v4156_v50 = vadd.f32 %v4155_v63, %v4142_v59  ;;  %v4170_v27 = vsel %vm4164_vm8, 0.0, %v4165_v3  ;;  %v4184_v10 = vsel %vm1674_vm1, 0.0, %v4179_v5  ;;  %v4192_v11 = vsel %vm1752_vm9, 0.0, %v4187_v7  ;;  %v10678_v59 = vld [vmem:[%s12528_s6 + $0x50] sm:$0xff]  ;;  %v10689_v63 = vld [vmem:[%s12528_s6 + $0xa8] sm:$0xff] }
 0x317   :  { %v4159_v6 = vadd.f32 %v4156_v50, %v3844_v0  ;;  %v10677_v0 = vld [vmem:[%s12528_s6 + $0x48] sm:$0xff]  ;;  %v10688_v50 = vld [vmem:[%s12528_s6 + $0xa0] sm:$0xff] }
 0x318   :  { %4836 = vmatpush.bf16.msra.mxu3 %v10652_v40 }
 0x319   :  { %v11599_v8 = vmax.f32 %v4159_v6, 0.0  ;;  %v10668_v6 = vld [vmem:[%s12528_s6] sm:$0xff] }
 0x31b   :  { %v4166_v47 = vrot.slane %v11599_v8, 2  ;;  %v4180_v9 = vrot.slane %v11599_v8, 4  ;;  %v4188_v4 = vrot.slane %v11599_v8, 6  ;;  %v4262_v55 = vpack.c.bf16 %v11599_v8, %v11591_v61 }
 0x31d   :  { %4506 = vmatmul.bf16.vlgmr.msra.gmra.mxu0 %v4262_v55  ;;  %v4167_v12 = vsel %vm4164_vm8, %v4165_v3, %v4166_v47  ;;  %v4181_v22 = vsel %vm1674_vm1, %v4179_v5, %v4180_v9  ;;  %v4189_v15 = vsel %vm1752_vm9, %v4187_v7, %v4188_v4  ;;  %v10687_v3 = vld [vmem:[%s12528_s6 + $0x98] sm:$0xff]  ;;  %v10694_v5 = vld [vmem:[%s12528_s6 + $0xd0] sm:$0xff]  ;;  %v4263_v47 = vperm.slane %v11713_v44, 3  ;;  %v10693_v9 = vld [vmem:[%s12528_s6 + $0xc8] sm:$0xff] }
 0x31e   :  { %v9352_v35 = vpack.c.bf16 %v4167_v12, %v4170_v27  ;;  %v9355_v21 = vpack.c.bf16 %v4181_v22, %v4184_v10  ;;  %v9358_v24 = vpack.c.bf16 %v4189_v15, %v4192_v11  ;;  %5494 = vmatpush.bf16.msra.mxu0 %v10699_v43  ;;  %v10685_v4 = vld [vmem:[%s12528_s6 + $0x88] sm:$0xff]  ;;  %v10692_v27 = vld [vmem:[%s12528_s6 + $0xc0] sm:$0xff]  ;;  %v11728_v15 = vpop.permute.xlu0 %10857 }
 0x31f   :  { %v10684_v11 = vld [vmem:[%s12528_s6 + $0x80] sm:$0xff] }
 0x320   :  { %9353 = vmatmul.msk.bf16.vlgmr.msrb.gmra.mxu1 %vm11617_vm10, %v9352_v35  ;;  %9356 = vmatmul.msk.bf16.vlgmr.msrb.gmra.mxu2 %vm11336_vm4, %v9355_v21 }
 0x321   :  { %9359 = vmatmul.msk.bf16.vlgmr.msrb.gmra.mxu3 %vm11390_vm12, %v9358_v24  ;;  %5452 = vmatpush.bf16.msrb.mxu1 %v10675_v31 }
 0x322   :  { %5466 = vmatpush.bf16.msrb.mxu2 %v10683_v33  ;;  %5480 = vmatpush.bf16.msrb.mxu3 %v10691_v32  ;;  %v5121_v33 = vld [vmem:[%s12528_s6 + $0x1a0] sm:$0xf] }
 0x323   :  { %5495 = vmatpush.bf16.msra.mxu0 %v10698_v48  ;;  %v5339_v20 = vunpack.c.l.b16 %v5121_v33 }
 0x325   :  { %5453 = vmatpush.bf16.msrb.mxu1 %v10674_v41 }
 0x326   :  { %5467 = vmatpush.bf16.msrb.mxu2 %v10682_v60  ;;  %5481 = vmatpush.bf16.msrb.mxu3 %v10690_v13 }
 0x327   :  { %5496 = vmatpush.bf16.msra.mxu0 %v10697_v53 }
 0x329   :  { %5454 = vmatpush.bf16.msrb.mxu1 %v10673_v39 }
 0x32a   :  { %5468 = vmatpush.bf16.msrb.mxu2 %v10681_v16  ;;  %5482 = vmatpush.bf16.msrb.mxu3 %v10689_v63 }
 0x32b   :  { %5497 = vmatpush.bf16.msra.mxu0 %v10696_v57 }
 0x32d   :  { %5455 = vmatpush.bf16.msrb.mxu1 %v10672_v45  ;;  %v5392_v45 = vpack.c.b16 %v5339_v20, %v5339_v20  ;;  %v10704_v20 = vld [vmem:[%s12528_s6 + $0x120] sm:$0xff] }
 0x32e   :  { %5469 = vmatpush.bf16.msrb.mxu2 %v10680_v19  ;;  %5483 = vmatpush.bf16.msrb.mxu3 %v10688_v50 }
 0x32f   :  { %5498 = vmatpush.bf16.msra.mxu0 %v10695_v1 }
 0x331   :  { %5456 = vmatpush.bf16.msrb.mxu1 %v10671_v49 }
 0x332   :  { %5470 = vmatpush.bf16.msrb.mxu2 %v10679_v52  ;;  %5484 = vmatpush.bf16.msrb.mxu3 %v10687_v3 }
 0x333   :  { %5499 = vmatpush.bf16.msra.mxu0 %v10694_v5 }
 0x335   :  { %5457 = vmatpush.bf16.msrb.mxu1 %v10670_v58 }
 0x336   :  { %5471 = vmatpush.bf16.msrb.mxu2 %v10678_v59  ;;  %5485 = vmatpush.bf16.msrb.mxu3 %v10686_v30 }
 0x337   :  { %5500 = vmatpush.bf16.msra.mxu0 %v10693_v9  ;;  %v4875_v9 = vrot.slane %v11526_v26, 4 }
 0x339   :  { %5458 = vmatpush.bf16.msrb.mxu1 %v10669_v62  ;;  %v10707_v62 = vld [vmem:[%s12528_s6 + $0x138] sm:$0xff] }
 0x33a   :  { %5472 = vmatpush.bf16.msrb.mxu2 %v10677_v0  ;;  %5486 = vmatpush.bf16.msrb.mxu3 %v10685_v4 }
 0x33b   :  { %5501 = vmatpush.bf16.msra.mxu0 %v10692_v27  ;;  %v10706_v27 = vld [vmem:[%s12528_s6 + $0x130] sm:$0xff] }
 0x33d   :  { %5459 = vmatpush.bf16.msrb.mxu1 %v10668_v6  ;;  %v10715_v6 = vld [vmem:[%s12528_s6 + $0x178] sm:$0xff] }
 0x33e   :  { %5473 = vmatpush.bf16.msrb.mxu2 %v10676_v2  ;;  %5487 = vmatpush.bf16.msrb.mxu3 %v10684_v11 }
 0x34a   :  { %v11730_v29 = vpop.permute.xlu2 %10867 }
 0x359   :  { %v10883_v53 = vpop.permute.xlu2 %10882 }
 0x35a   :  { %v10885_v3 = vunpack.i.h.bf16 %v10883_v53  ;;  %v10884_v5 = vunpack.i.l.bf16 %v10883_v53  ;;  %v10711_v53 = vld [vmem:[%s12528_s6 + $0x158] sm:$0xff] }
 0x36a   :  { %v10873_v2 = vpop.permute.xlu1 %10872 }
 0x36b   :  { %v10875_v4 = vunpack.i.h.bf16 %v10873_v2 }
 0x36d   :  { %v4968_v11 = vsel %vm4966_vm11, %v10875_v4, %v10885_v3 }
 0x377   :  { %v11735_v60 = vpop.permute.xlu0 %10862 }
 0x37f   :  { %v11749_v30 = vpop.permute.xlu0 %10887 }
 0x380   :  { %v10890_v26 = vunpack.i.h.bf16 %v11749_v30  ;;  %v10889_v14 = vunpack.i.l.bf16 %v11749_v30 }
 0x39a   :  { %v4507_v35 = vpop.f32.mrf.mxu0 }
 0x39d   :  { %v4465_v7 = vpop.f32.mrf.mxu1 }
 0x39e   :  { %v4466_v55 = vadd.f32 %v4465_v7, %v4263_v47  ;;  %v5450_v7 = vsel %vm1674_vm1, %v5392_v45, 0 }
 0x3a2   :  { %v4509_v46 = vpop.f32.mrf.mxu0 }
 0x3a3   :  { %v4479_v10 = vpop.f32.mrf.mxu2 }
 0x3a4   :  { %v4480_v12 = vadd.f32 %v4479_v10, %v4466_v55  ;;  %v4493_v22 = vpop.f32.mrf.mxu3  ;;  %v10874_v55 = vunpack.i.l.bf16 %v10873_v2  ;;  %v10869_v2 = vunpack.i.l.bf16 %v11730_v29 }
 0x3a5   :  { %v4467_v24 = vpop.f32.mrf.mxu1 }
 0x3a6   :  { %v4494_v21 = vadd.f32 %v4493_v22, %v4480_v12  ;;  %v4468_v28 = vadd.f32 %v4467_v24, %v4263_v47  ;;  %v4872_v47 = vrot.slane %v11522_v18, 4  ;;  %v10714_v18 = vld [vmem:[%s12528_s6 + $0x170] sm:$0xff]  ;;  %v4967_v10 = vsel %vm4966_vm11, %v10874_v55, %v10884_v5 }
 0x3a7   :  { %v10860_v22 = vunpack.i.h.bf16 %v11728_v15 }
 0x3a8   :  { %v4508_v25 = vadd.f32 %v4507_v35, %v4494_v21  ;;  %v4876_v12 = vsel %vm1674_vm1, %v4872_v47, %v4875_v9  ;;  %v10859_v35 = vunpack.i.l.bf16 %v11728_v15  ;;  %v10864_v21 = vunpack.i.l.bf16 %v11735_v60 }
 0x3a9   :  { %v4882_v24 = vsel %vm1674_vm1, 0.0, %v4872_v47  ;;  %v10708_v47 = vld [vmem:[%s12528_s6 + $0x140] sm:$0xff] }
 0x3aa   :  { %v4512_v34 = vmax.f32 %v4508_v25, 0.0  ;;  %v10865_v25 = vunpack.i.h.bf16 %v11735_v60 }
 0x3ab   :  { %v4481_v54 = vpop.f32.mrf.mxu2 }
 0x3ac   :  { %v4482_v31 = vadd.f32 %v4481_v54, %v4468_v28  ;;  %v4495_v42 = vpop.f32.mrf.mxu3  ;;  %v4516_v16 = vrot.slane %v4512_v34, 2  ;;  %v4524_v36 = vrot.slane %v4512_v34, 4  ;;  %v4532_v43 = vrot.slane %v4512_v34, 6  ;;  %v10705_v28 = vld [vmem:[%s12528_s6 + $0x128] sm:$0xff] }
 0x3ad   :  { %v4871_v54 = vrot.slane %v11518_v17, 4  ;;  %v10718_v17 = vld [vmem:[%s12528_s6 + $0x190] sm:$0xff] }
 0x3ae   :  { %v4496_v41 = vadd.f32 %v4495_v42, %v4482_v31  ;;  %v4521_v52 = vsel %vm4164_vm8, 0.0, %v4516_v16  ;;  %v4529_v13 = vsel %vm1674_vm1, 0.0, %v4524_v36  ;;  %v4537_v58 = vsel %vm1752_vm9, 0.0, %v4532_v43 }
 0x3af   :  { %v4873_v31 = vrot.slane %v11520_v23, 4  ;;  %v4884_v23 = vsel %vm1699_vm2, %v4882_v24, 0.0  ;;  %v4886_v42 = vsel %vm1700_vm3, %v4876_v12, 0.0 }
 0x3b0   :  { %v4510_v39 = vadd.f32 %v4509_v46, %v4496_v41 }
 0x3b2   :  { %v4513_v40 = vmax.f32 %v4510_v39, 0.0  ;;  %v4874_v39 = vsel %vm1674_vm1, %v4871_v54, %v4873_v31  ;;  %v10738_v31 = vld [vmem:[%s12528_s6 + $0x238] sm:$0xff] }
 0x3b4   :  { %v4517_v19 = vrot.slane %v4513_v40, 2  ;;  %v4525_v32 = vrot.slane %v4513_v40, 4  ;;  %v4533_v48 = vrot.slane %v4513_v40, 6  ;;  %v4607_v49 = vpack.c.bf16 %v4513_v40, %v4512_v34  ;;  %v10713_v34 = vld [vmem:[%s12528_s6 + $0x168] sm:$0xff] }
 0x3b6   :  { %v4518_v59 = vsel %vm4164_vm8, %v4516_v16, %v4517_v19  ;;  %v4526_v63 = vsel %vm1674_vm1, %v4524_v36, %v4525_v32  ;;  %v4534_v57 = vsel %vm1752_vm9, %v4532_v43, %v4533_v48  ;;  %4851 = vmatmul.bf16.vlgmr.msrb.gmra.mxu0 %v4607_v49  ;;  %v4881_v16 = vsel %vm1674_vm1, 0.0, %v4871_v54  ;;  %v10712_v36 = vld [vmem:[%s12528_s6 + $0x160] sm:$0xff]  ;;  %v10717_v43 = vld [vmem:[%s12528_s6 + $0x188] sm:$0xff]  ;;  %v10878_v19 = vpop.permute.xlu1 %10877 }
 0x3b7   :  { %v9489_v0 = vpack.c.bf16 %v4518_v59, %v4521_v52  ;;  %v9492_v50 = vpack.c.bf16 %v4526_v63, %v4529_v13  ;;  %v9495_v1 = vpack.c.bf16 %v4534_v57, %v4537_v58  ;;  %v9706_v49 = vpack.c.bf16 %v4874_v39, %v4881_v16  ;;  %v10703_v52 = vld [vmem:[%s12528_s6 + $0x118] sm:$0xff]  ;;  %v10716_v58 = vld [vmem:[%s12528_s6 + $0x180] sm:$0xff]  ;;  %v10702_v63 = vld [vmem:[%s12528_s6 + $0x110] sm:$0xff] }
 0x3b8   :  { %v10710_v57 = vld [vmem:[%s12528_s6 + $0x150] sm:$0xff]  ;;  %v10736_v39 = vld [vmem:[%s12528_s6 + $0x228] sm:$0xff]  ;;  %v5129_v16 = vperm.slane %v11713_v44, 5 }
 0x3b9   :  { %9490 = vmatmul.msk.bf16.vlgmr.msra.gmra.mxu1 %vm11617_vm10, %v9489_v0  ;;  %9493 = vmatmul.msk.bf16.vlgmr.msra.gmra.mxu2 %vm11336_vm4, %v9492_v50  ;;  %vm4947_vm10 = vcmask 326656   ;;  %v10709_v0 = vld [vmem:[%s12528_s6 + $0x148] sm:$0xff]  ;;  %v10880_v50 = vunpack.i.h.bf16 %v10878_v19 }
 0x3ba   :  { %9496 = vmatmul.msk.bf16.vlgmr.msra.gmra.mxu3 %vm11390_vm12, %v9495_v1  ;;  %5508 = vmatpush.bf16.msra.mxu1 %v10707_v62  ;;  %vm4985_vm12 = vcmask 982016   ;;  %v4948_v41 = vsel %vm4947_vm10, %v10859_v35, %v10864_v21  ;;  %v4949_v60 = vsel %vm4947_vm10, %v10860_v22, %v10865_v25  ;;  %v5010_v40 = vsel %vm4947_vm10, %v4886_v42, %v10860_v22  ;;  %v10739_v21 = vld [vmem:[%s12528_s6 + $0x240] sm:$0xff] }
 0x3bb   :  { %5522 = vmatpush.bf16.msra.mxu2 %v10715_v6  ;;  %5539 = vmatpush.bf16.msra.mxu3 %v5450_v7  ;;  %v5014_v15 = vsel %vm4985_vm12, %v4968_v11, %v10890_v26  ;;  %v5013_v33 = vsel %vm4985_vm12, %v4967_v10, %v10889_v14  ;;  %v5009_v45 = vsel %vm4947_vm10, %v4884_v23, %v10859_v35  ;;  %v10879_v1 = vunpack.i.l.bf16 %v10878_v19  ;;  %v10700_v7 = vld [vmem:[%s12528_s6 + $0x100] sm:$0xff]  ;;  %v10737_v23 = vld [vmem:[%s12528_s6 + $0x230] sm:$0xff] }
 0x3bc   :  { %v5125_v46 = vpack.c.bf16 %v5014_v15, %v5013_v33  ;;  %v5011_v32 = vsel %vm4966_vm11, %v4948_v41, %v10874_v55  ;;  %v5012_v48 = vsel %vm4966_vm11, %v4949_v60, %v10875_v4  ;;  %v5123_v13 = vpack.c.bf16 %v5010_v40, %v5009_v45 }
 0x3bd   :  { %v5124_v59 = vpack.c.bf16 %v5012_v48, %v5011_v32  ;;  %v10870_v6 = vunpack.i.h.bf16 %v11730_v29  ;;  %v4986_v9 = vsel %vm4985_vm12, %v10889_v14, %v10879_v1  ;;  %v4987_v29 = vsel %vm4985_vm12, %v10890_v26, %v10880_v50 }
 0x3be   :  { %5509 = vmatpush.bf16.msra.mxu1 %v10706_v27  ;;  %v10893_v62 = vpop.permute.xlu1 %10892  ;;  %vm5445_vm11 = vcmask 588800   ;;  %v4608_v26 = vperm.slane %v11713_v44, 4  ;;  %vm5602_vm12 = vcmask 523264  }
 0x3bf   :  { %5523 = vmatpush.bf16.msra.mxu2 %v10714_v18  ;;  %5540 = vmatpush.bf16.msra.mxu3 %v10719_v51  ;;  %v10895_v3 = vunpack.i.h.bf16 %v10893_v62  ;;  %v10894_v5 = vunpack.i.l.bf16 %v10893_v62  ;;  %v5126_v51 = vpack.c.bf16 %v4987_v29, %v4986_v9  ;;  %v10746_v62 = vld [vmem:[%s12528_s6 + $0x278] sm:$0xff]  ;;  %v10724_v29 = vld [vmem:[%s12528_s6 + $0x1c8] sm:$0xff] }
 0x3c2   :  { %5510 = vmatpush.bf16.msra.mxu1 %v10705_v28 }
 0x3c3   :  { %5524 = vmatpush.bf16.msra.mxu2 %v10713_v34  ;;  %5541 = vmatpush.bf16.msra.mxu3 %v10718_v17 }
 0x3c6   :  { %5502 = vmatmul.bf16.vlgmr.msra.gmra.mxu0 %v5125_v46  ;;  %5511 = vmatpush.bf16.msra.mxu1 %v10704_v20 }
 0x3c7   :  { %5525 = vmatpush.bf16.msra.mxu2 %v10712_v36  ;;  %5542 = vmatpush.bf16.msra.mxu3 %v10717_v43 }
 0x3c9   :  { %9707 = vmatmul.msk.bf16.vlgmr.msrb.gmra.mxu1 %vm11336_vm4, %v9706_v49  ;;  %5474 = vmatmul.bf16.vlgmr.msrb.gmra.mxu2 %v5123_v13  ;;  %vm5002_vm4 = vcmask 261120  }
 0x3ca   :  { %5488 = vmatmul.bf16.vlgmr.msrb.gmra.mxu3 %v5124_v59  ;;  %5512 = vmatpush.bf16.msra.mxu1 %v10703_v52  ;;  %v5016_v4 = vsel %vm5002_vm4, %v10880_v50, %v10870_v6  ;;  %v5015_v55 = vsel %vm5002_vm4, %v10879_v1, %v10869_v2  ;;  %v5004_v27 = vsel %vm5002_vm4, %v10870_v6, %v10895_v3  ;;  %v10725_v6 = vld [vmem:[%s12528_s6 + $0x1d0] sm:$0xff] }
 0x3cb   :  { %5526 = vmatpush.bf16.msra.mxu2 %v10711_v53  ;;  %5543 = vmatpush.bf16.msra.mxu3 %v10716_v58  ;;  %v5003_v18 = vsel %vm5002_vm4, %v10869_v2, %v10894_v5  ;;  %v5127_v10 = vpack.c.bf16 %v5016_v4, %v5015_v55  ;;  %v10727_v58 = vld [vmem:[%s12528_s6 + $0x1e0] sm:$0xff]  ;;  %v10745_v5 = vld [vmem:[%s12528_s6 + $0x270] sm:$0xff] }
 0x3cc   :  { %v5128_v11 = vpack.c.bf16 %v5004_v27, %v5003_v18  ;;  %v10744_v27 = vld [vmem:[%s12528_s6 + $0x268] sm:$0xff] }
 0x3ce   :  { %5513 = vmatpush.bf16.msra.mxu1 %v10702_v63 }
 0x3cf   :  { %5527 = vmatpush.bf16.msra.mxu2 %v10710_v57  ;;  %5774 = vmatpush.bf16.msrb.mxu3 %v10727_v58  ;;  %v10733_v58 = vld [vmem:[%s12528_s6 + $0x210] sm:$0xff] }
 0x3d2   :  { %5514 = vmatpush.bf16.msra.mxu1 %v10701_v56  ;;  %v10735_v56 = vld [vmem:[%s12528_s6 + $0x220] sm:$0xff] }
 0x3d3   :  { %5528 = vmatpush.bf16.msra.mxu2 %v10709_v0  ;;  %5788 = vmatpush.bf16.msrb.mxu0 %v10735_v56  ;;  %v10731_v56 = vld [vmem:[%s12528_s6 + $0x200] sm:$0xff] }
 0x3d6   :  { %5515 = vmatpush.bf16.msra.mxu1 %v10700_v7 }
 0x3d7   :  { %5529 = vmatpush.bf16.msra.mxu2 %v10708_v47 }
 0x3d9   :  { %5516 = vmatmul.bf16.vlgmr.msra.gmra.mxu1 %v5126_v51 }
 0x3da   :  { %5530 = vmatmul.bf16.vlgmr.msra.gmra.mxu2 %v5127_v10  ;;  %9708 = vmatmul.msk.bf16.vlgmr.msra.gmra.mxu3 %vm5445_vm11, %v5128_v11  ;;  %v10723_v11 = vld [vmem:[%s12528_s6 + $0x1c0] sm:$0xff] }
 0x3db   :  { %5806 = vmatpush.bf16.msrb.mxu1 %v10739_v21 }
 0x3df   :  { %5807 = vmatpush.bf16.msrb.mxu1 %v10738_v31 }
 0x3e3   :  { %5808 = vmatpush.bf16.msrb.mxu1 %v10737_v23 }
 0x3e7   :  { %5809 = vmatpush.bf16.msrb.mxu1 %v10736_v39 }
 0x433   :  { %v4852_v24 = vpop.f32.mrf.mxu0 }
 0x436   :  { %v4810_v30 = vpop.f32.mrf.mxu1 }
 0x437   :  { %v4811_v14 = vadd.f32 %v4810_v30, %v4608_v26 }
 0x43b   :  { %v4854_v46 = vpop.f32.mrf.mxu0 }
 0x43c   :  { %v4824_v12 = vpop.f32.mrf.mxu2 }
 0x43d   :  { %v4825_v22 = vadd.f32 %v4824_v12, %v4811_v14  ;;  %v4838_v35 = vpop.f32.mrf.mxu3 }
 0x43e   :  { %v4812_v25 = vpop.f32.mrf.mxu1 }
 0x43f   :  { %v4839_v28 = vadd.f32 %v4838_v35, %v4825_v22  ;;  %v4813_v15 = vadd.f32 %v4812_v25, %v4608_v26  ;;  %v10722_v22 = vld [vmem:[%s12528_s6 + $0x1b8] sm:$0xff] }
 0x441   :  { %v4853_v54 = vadd.f32 %v4852_v24, %v4839_v28 }
 0x443   :  { %v4857_v41 = vmax.f32 %v4853_v54, 0.0  ;;  %v5503_v0 = vpop.f32.mrf.mxu0  ;;  %v10721_v54 = vld [vmem:[%s12528_s6 + $0x1b0] sm:$0xff] }
 0x444   :  { %v4826_v33 = vpop.f32.mrf.mxu2 }
 0x445   :  { %v4827_v34 = vadd.f32 %v4826_v33, %v4813_v15  ;;  %v4840_v17 = vpop.f32.mrf.mxu3  ;;  %v4859_v36 = vadd.f32 %v4857_v41, %v11591_v61  ;;  %v10747_v61 = vld [vmem:[%s12528_s6 + $0x280] sm:$0xff] }
 0x446   :  { %v5461_v42 = vpop.f32.mrf.mxu1  ;;  %5911 = vmatpush.bf16.msrb.mxu2 %v10747_v61  ;;  %v10732_v61 = vld [vmem:[%s12528_s6 + $0x208] sm:$0xff] }
 0x447   :  { %v4841_v60 = vadd.f32 %v4840_v17, %v4827_v34  ;;  %v5462_v32 = vadd.f32 %v5461_v42, %v5129_v16  ;;  %v4861_v49 = vmax.f32 %v4859_v36, 0.0 }
 0x449   :  { %v4855_v20 = vadd.f32 %v4854_v46, %v4841_v60 }
 0x44a   :  { %5912 = vmatpush.bf16.msrb.mxu2 %v10746_v62 }
 0x44b   :  { %v4858_v43 = vmax.f32 %v4855_v20, 0.0  ;;  %v5505_v51 = vpop.f32.mrf.mxu0 }
 0x44c   :  { %v5475_v40 = vpop.f32.mrf.mxu2 }
 0x44d   :  { %v4860_v45 = vadd.f32 %v4858_v43, %v11599_v8  ;;  %v5489_v19 = vpop.f32.mrf.mxu3  ;;  %v5476_v53 = vadd.f32 %v5475_v40, %v5462_v32  ;;  %v10726_v8 = vld [vmem:[%s12528_s6 + $0x1d8] sm:$0xff] }
 0x44e   :  { %v5463_v48 = vpop.f32.mrf.mxu1  ;;  %5775 = vmatpush.bf16.msrb.mxu3 %v10726_v8  ;;  %5913 = vmatpush.bf16.msrb.mxu2 %v10745_v5  ;;  %v10741_v8 = vld [vmem:[%s12528_s6 + $0x250] sm:$0xff]  ;;  %v10730_v5 = vld [vmem:[%s12528_s6 + $0x1f8] sm:$0xff] }
 0x44f   :  { %v4862_v52 = vmax.f32 %v4860_v45, 0.0  ;;  %v5490_v57 = vadd.f32 %v5489_v19, %v5476_v53  ;;  %v5464_v1 = vadd.f32 %v5463_v48, %v5129_v16  ;;  %v10743_v53 = vld [vmem:[%s12528_s6 + $0x260] sm:$0xff] }
 0x451   :  { %v11874_v13 = vpack.c.bf16 %v4862_v52, %v4861_v49  ;;  %v5504_v3 = vadd.f32 %v5503_v0, %v5490_v57  ;;  %v10720_v49 = vld [vmem:[%s12528_s6 + $0x1a8] sm:$0xff]  ;;  %v10734_v52 = vld [vmem:[%s12528_s6 + $0x218] sm:$0xff] }
 0x452   :  { %5776 = vmatpush.bf16.msrb.mxu3 %v10725_v6  ;;  %5914 = vmatpush.bf16.msrb.mxu2 %v10744_v27  ;;  %v10740_v0 = vld [vmem:[%s12528_s6 + $0x248] sm:$0xff]  ;;  %v10999_v6 = vld [vmem:[#allocation5] sm:$0xff] }
 0x453   :  { %5789 = vmatpush.bf16.msrb.mxu0 %v10734_v52 }
 0x454   :  { %v5477_v59 = vpop.f32.mrf.mxu2 }
 0x455   :  { %v5491_v63 = vpop.f32.mrf.mxu3  ;;  %v5478_v2 = vadd.f32 %v5477_v59, %v5464_v1  ;;  %v10742_v59 = vld [vmem:[%s12528_s6 + $0x258] sm:$0xff]  ;;  %v10749_v1 = vld [vmem:[%s12528_s6 + $0x290] sm:$0xff] }
 0x456   :  { %v5517_v50 = vpop.f32.mrf.mxu1  ;;  %5777 = vmatpush.bf16.msrb.mxu3 %v10724_v29  ;;  %5915 = vmatpush.bf16.msrb.mxu2 %v10743_v53  ;;  %v11002_v29 = vld [vmem:[#allocation5 + $0x18] sm:$0xff] }
 0x457   :  { %v5518_v7 = vadd.f32 %v5517_v50, %v5504_v3  ;;  %v5492_v4 = vadd.f32 %v5491_v63, %v5478_v2  ;;  %5790 = vmatpush.bf16.msrb.mxu0 %v10733_v58  ;;  %v5838_v63 = vld [vmem:[%s12528_s6 + $0x298] sm:$0xf]  ;;  %v11000_v2 = vld [vmem:[#allocation5 + $0x10] sm:$0xff] }
 0x458   :  { %v5883_v57 = vunpack.c.l.b16 %v5838_v63  ;;  %v5839_v3 = vpack.c.bf16 %v11000_v2, %v10999_v6  ;;  %v10761_v58 = vld [vmem:[%s12528_s6 + $0x2f8] sm:$0xff]  ;;  %v10759_v2 = vld [vmem:[%s12528_s6 + $0x2e8] sm:$0xff] }
 0x459   :  { %v5506_v30 = vadd.f32 %v5505_v51, %v5492_v4 }
 0x45a   :  { %5778 = vmatpush.bf16.msrb.mxu3 %v10723_v11  ;;  %5916 = vmatpush.bf16.msrb.mxu2 %v10742_v59  ;;  %v5894_v62 = vpack.c.b16 %v5883_v57, %v5883_v57 }
 0x45b   :  { %5791 = vmatpush.bf16.msrb.mxu0 %v10732_v61 }
 0x45c   :  { %v5909_v50 = vsel %vm1674_vm1, %v5894_v62, 0 }
 0x45d   :  { %v5531_v47 = vpop.f32.mrf.mxu2  ;;  %v5545_v9 = vpop.f32.mrf.mxu3  ;;  %5930 = vmatpush.bf16.msra.mxu1 %v5909_v50 }
 0x45e   :  { %v5532_v55 = vadd.f32 %v5531_v47, %v5518_v7  ;;  %v5519_v10 = vpop.f32.mrf.mxu1  ;;  %5779 = vmatpush.bf16.msrb.mxu3 %v10722_v22  ;;  %5917 = vmatpush.bf16.msrb.mxu2 %v10741_v8  ;;  %v10748_v7 = vld [vmem:[%s12528_s6 + $0x288] sm:$0xff]  ;;  %v10729_v47 = vld [vmem:[%s12528_s6 + $0x1f0] sm:$0xff] }
 0x45f   :  { %v5520_v14 = vadd.f32 %v5519_v10, %v5506_v30  ;;  %5792 = vmatpush.bf16.msrb.mxu0 %v10731_v56  ;;  %v10760_v56 = vld [vmem:[%s12528_s6 + $0x2f0] sm:$0xff] }
 0x460   :  { %v5546_v18 = vadd.f32 %v5545_v9, %v5532_v55  ;;  %v11001_v9 = vld [vmem:[#allocation5 + $0x8] sm:$0xff] }
 0x461   :  { %5931 = vmatpush.bf16.msra.mxu1 %v10749_v1  ;;  %v5840_v4 = vpack.c.bf16 %v11002_v29, %v11001_v9  ;;  %v10728_v55 = vld [vmem:[%s12528_s6 + $0x1e8] sm:$0xff] }
 0x462   :  { %v11906_v26 = vmax.f32 %v5546_v18, 0.0  ;;  %5780 = vmatpush.bf16.msrb.mxu3 %v10721_v54  ;;  %5918 = vmatpush.bf16.msrb.mxu2 %v10740_v0 }
 0x463   :  { %5793 = vmatpush.bf16.msrb.mxu0 %v10730_v5 }
 0x464   :  { %v5578_v24 = vrot.slane %v11906_v26, 7  ;;  %v5562_v28 = vrot.slane %v11906_v26, 5  ;;  %v5554_v33 = vrot.slane %v11906_v26, 4  ;;  %v5570_v34 = vrot.slane %v11906_v26, 6 }
 0x465   :  { %v5533_v12 = vpop.f32.mrf.mxu2  ;;  %v5547_v21 = vpop.f32.mrf.mxu3  ;;  %5919 = vmatmul.bf16.vlgmr.msrb.gmra.mxu2 %v5839_v3  ;;  %5932 = vmatpush.bf16.msra.mxu1 %v10748_v7 }
 0x466   :  { %v5534_v35 = vadd.f32 %v5533_v12, %v5520_v14  ;;  %v5583_v15 = vsel %vm1791_vm0, 0.0, %v5578_v24  ;;  %v5567_v46 = vsel %vm1713_vm5, 0.0, %v5562_v28  ;;  %5781 = vmatpush.bf16.msrb.mxu3 %v10720_v49  ;;  %v5559_v27 = vsel %vm1674_vm1, 0.0, %v5554_v33 }
 0x467   :  { %v5584_v36 = vsel %vm1816_vm13, %v5583_v15, 0.0  ;;  %v5568_v19 = vsel %vm1738_vm6, %v5567_v46, 0.0  ;;  %5794 = vmatpush.bf16.msrb.mxu0 %v10729_v47  ;;  %v5560_v11 = vsel %vm1699_vm2, %v5559_v27, 0.0  ;;  %v10757_v27 = vld [vmem:[%s12528_s6 + $0x2d8] sm:$0xff]  ;;  %vm12547_vm13 = vcmp.ge.s32.totalorder %v11311_v38, 6 }
 0x468   :  { %v5548_v25 = vadd.f32 %v5547_v21, %v5534_v35  ;;  %v5575_v35 = vsel %vm1752_vm9, 0.0, %v5570_v34 }
 0x46a   :  { %v5551_v31 = vmax.f32 %v5548_v25, 0.0  ;;  %6118 = vmatpush.bf16.msra.mxu3 %v10757_v27 }
 0x46b   :  { %5795 = vmatpush.bf16.msrb.mxu0 %v10728_v55 }
 0x46c   :  { %v5555_v17 = vrot.slane %v5551_v31, 4  ;;  %v5571_v23 = vrot.slane %v5551_v31, 6  ;;  %v5649_v42 = vpack.c.bf16 %v5551_v31, %v11906_v26  ;;  %v5579_v41 = vrot.slane %v5551_v31, 7 }
 0x46d   :  { %v5563_v60 = vrot.slane %v5551_v31, 5 }
 0x46e   :  { %9789 = vmatmul.msk.bf16.vlgmr.msrb.gmra.mxu1 %vm5602_vm12, %v5649_v42  ;;  %v5580_v20 = vsel %vm1791_vm0, %v5578_v24, %v5579_v41  ;;  %v5556_v39 = vsel %vm1674_vm1, %v5554_v33, %v5555_v17  ;;  %v11929_v16 = vsel %vm1752_vm9, %v5570_v34, %v5571_v23  ;;  %vm12543_vm0 = vcmp.ge.s32.totalorder %v11309_v37, 2  ;;  %v10765_v34 = vld [vmem:[%s12528_s6 + $0x318] sm:$0xff]  ;;  %v10812_v37 = vld [vmem:[#allocation11 + $0x970] sm:$0xff] }
 0x46f   :  { %v5585_v43 = vsel %vm1817_vm14, %v5580_v20, 0.0  ;;  %v5564_v40 = vsel %vm1713_vm5, %v5562_v28, %v5563_v60  ;;  %v5561_v30 = vsel %vm1700_vm3, %v5556_v39, 0.0  ;;  %v5576_v28 = vsel %vm12543_vm0, %v5575_v35, 0.0  ;;  %6132 = vmatpush.bf16.msra.mxu0 %v10765_v34  ;;  %v10764_v60 = vld [vmem:[%s12528_s6 + $0x310] sm:$0xff]  ;;  %vm12545_vm6 = vmmov %vm12543_vm0 }
 0x470   :  { %v10901_v45 = vpack.i.bf16 %v5585_v43, %v5584_v36  ;;  %v5569_v32 = vsel %vm1739_vm7, %v5564_v40, 0.0  ;;  %vm12544_vm5 = vcmp.ge.s32.totalorder %v11311_v38, 2  ;;  %v5650_v42 = vperm.slane %v11713_v44, 6  ;;  %vm12548_vm14 = vmmov %vm12543_vm0  ;;  %v10810_v38 = vld [vmem:[#allocation11 + $0x960] sm:$0xff] }
 0x471   :  { %v10896_v48 = vpack.i.bf16 %v5569_v32, %v5568_v19  ;;  %v5577_v54 = vsel %vm12544_vm5, %v11929_v16, 0.0  ;;  %v5841_v41 = vperm.slane %v11713_v44, 7  ;;  %v10763_v16 = vld [vmem:[%s12528_s6 + $0x308] sm:$0xff]  ;;  %v10762_v44 = vld [vmem:[%s12528_s6 + $0x300] sm:$0xff]  ;;  %vm12546_vm7 = vmmov %vm12544_vm5  ;;  %vm7411_vm0 = vcmask 785408  }
 0x472   :  { %10902 = vrot.lane.b32.xlu0 %v10901_v45, %s11193_s4 }
 0x473   :  { %10897 = vrot.lane.b32.xlu2 %v10896_v48, %s11193_s4  ;;  %6133 = vmatpush.bf16.msra.mxu0 %v10764_v60 }
 0x477   :  { %6134 = vmatpush.bf16.msra.mxu0 %v10763_v16 }
 0x47b   :  { %6135 = vmatpush.bf16.msra.mxu0 %v10762_v44  ;;  %v10773_v44 = vld [vmem:[%s12528_s6 + $0x358] sm:$0xff] }
 0x47c   :  { %6323 = vmatpush.bf16.msrb.mxu1 %v10773_v44  ;;  %v10789_v44 = vld [vmem:[%s12528_s6 + $0x3d8] sm:$0xff] }
 0x47e   :  { %9830 = vmatmul.msk.bf16.vlgmr.msra.gmra.mxu1 %vm4947_vm10, %v5840_v4  ;;  %vm12549_vm10 = vmmov %vm12544_vm5 }
 0x47f   :  { %6136 = vmatpush.bf16.msra.mxu0 %v10761_v58 }
 0x483   :  { %6137 = vmatpush.bf16.msra.mxu0 %v10760_v56 }
 0x487   :  { %6138 = vmatpush.bf16.msra.mxu0 %v10759_v2  ;;  %v10768_v2 = vld [vmem:[%s12528_s6 + $0x330] sm:$0xff] }
 0x4cd   :  { %v10898_v18 = vpop.permute.xlu2 %10897 }
 0x4ce   :  { %v10900_v51 = vunpack.i.h.bf16 %v10898_v18  ;;  %v10899_v10 = vunpack.i.l.bf16 %v10898_v18  ;;  %v10758_v18 = vld [vmem:[%s12528_s6 + $0x2e0] sm:$0xff] }
 0x4cf   :  { %6139 = vmatpush.bf16.msra.mxu0 %v10758_v18 }
 0x4d0   :  { %v5603_v14 = vsel %vm5602_vm12, %v5560_v11, %v10899_v10  ;;  %v5604_v12 = vsel %vm5602_vm12, %v5561_v30, %v10900_v51  ;;  %v10756_v51 = vld [vmem:[%s12528_s6 + $0x2d0] sm:$0xff]  ;;  %v10755_v10 = vld [vmem:[%s12528_s6 + $0x2c8] sm:$0xff]  ;;  %v10754_v11 = vld [vmem:[%s12528_s6 + $0x2c0] sm:$0xff] }
 0x4d1   :  { %v5647_v22 = vpack.c.bf16 %v5604_v12, %v5603_v14  ;;  %6119 = vmatpush.bf16.msra.mxu3 %v10756_v51  ;;  %v10753_v30 = vld [vmem:[%s12528_s6 + $0x2b8] sm:$0xff]  ;;  %v10752_v14 = vld [vmem:[%s12528_s6 + $0x2b0] sm:$0xff]  ;;  %v10751_v12 = vld [vmem:[%s12528_s6 + $0x2a8] sm:$0xff] }
 0x4d3   :  { %5782 = vmatmul.bf16.vlgmr.msrb.gmra.mxu3 %v5647_v22 }
 0x4d5   :  { %6120 = vmatpush.bf16.msra.mxu3 %v10755_v10 }
 0x4d9   :  { %6121 = vmatpush.bf16.msra.mxu3 %v10754_v11 }
 0x4dd   :  { %6122 = vmatpush.bf16.msra.mxu3 %v10753_v30 }
 0x4e1   :  { %6123 = vmatpush.bf16.msra.mxu3 %v10752_v14 }
 0x4e4   :  { %v10903_v21 = vpop.permute.xlu0 %10902 }
 0x4e5   :  { %v10905_v24 = vunpack.i.h.bf16 %v10903_v21  ;;  %v10904_v25 = vunpack.i.l.bf16 %v10903_v21  ;;  %6124 = vmatpush.bf16.msra.mxu3 %v10751_v12  ;;  %v10750_v21 = vld [vmem:[%s12528_s6 + $0x2a0] sm:$0xff] }
 0x4e7   :  { %v5605_v31 = vsel %vm5602_vm12, %v5576_v28, %v10904_v25  ;;  %v5606_v15 = vsel %vm5602_vm12, %v5577_v54, %v10905_v24 }
 0x4e8   :  { %v5648_v33 = vpack.c.bf16 %v5606_v15, %v5605_v31  ;;  %v5920_v46 = vpop.f32.mrf.mxu2 }
 0x4e9   :  { %v5921_v39 = vadd.f32 %v5920_v46, %v5841_v41  ;;  %6125 = vmatpush.bf16.msra.mxu3 %v10750_v21 }
 0x4ea   :  { %5796 = vmatmul.bf16.vlgmr.msrb.gmra.mxu0 %v5648_v33 }
 0x4eb   :  { %v5811_v17 = vpop.f32.mrf.mxu1 }
 0x4ed   :  { %6441 = vmatpush.bf16.msrb.mxu3 %v10789_v44  ;;  %v10824_v44 = vld [vmem:[#allocation11 + $0x9b0] sm:$0xff] }
 0x4f0   :  { %v5922_v49 = vpop.f32.mrf.mxu2 }
 0x4f1   :  { %v5923_v61 = vadd.f32 %v5922_v49, %v5841_v41  ;;  %v12106_v49 = vld [vmem:[#allocation10 + $0x8] sm:$0xff] }
 0x4f2   :  { %v6021_v58 = vperm.slane %v12106_v49, 0 }
 0x4f3   :  { %v5813_v26 = vpop.f32.mrf.mxu1 }
 0x4fb   :  { %v5934_v36 = vpop.f32.mrf.mxu1 }
 0x4fc   :  { %v5935_v45 = vadd.f32 %v5934_v36, %v5921_v39 }
 0x503   :  { %v5936_v8 = vpop.f32.mrf.mxu1 }
 0x504   :  { %v5937_v0 = vadd.f32 %v5936_v8, %v5923_v61  ;;  %v10770_v61 = vld [vmem:[%s12528_s6 + $0x340] sm:$0xff] }
 0x556   :  { %v5783_v23 = vpop.f32.mrf.mxu3 }
 0x557   :  { %v5784_v20 = vadd.f32 %v5783_v23, %v5650_v42 }
 0x55e   :  { %v5785_v32 = vpop.f32.mrf.mxu3 }
 0x55f   :  { %v5786_v52 = vadd.f32 %v5785_v32, %v5650_v42  ;;  %v10780_v32 = vld [vmem:[%s12528_s6 + $0x390] sm:$0xff] }
 0x567   :  { %v5797_v43 = vpop.f32.mrf.mxu0 }
 0x568   :  { %v5798_v40 = vadd.f32 %v5797_v43, %v5784_v20 }
 0x56a   :  { %v5812_v19 = vadd.f32 %v5811_v17, %v5798_v40 }
 0x56c   :  { %v5816_v48 = vmax.f32 %v5812_v19, 0.0  ;;  %v10781_v19 = vld [vmem:[%s12528_s6 + $0x398] sm:$0xff] }
 0x56d   :  { %6337 = vmatpush.bf16.msra.mxu2 %v10781_v19 }
 0x56e   :  { %v5939_v53 = vadd.f32 %v5935_v45, %v5816_v48  ;;  %v10772_v48 = vld [vmem:[%s12528_s6 + $0x350] sm:$0xff] }
 0x56f   :  { %v5799_v59 = vpop.f32.mrf.mxu0  ;;  %6324 = vmatpush.bf16.msrb.mxu1 %v10772_v48  ;;  %v10787_v48 = vld [vmem:[%s12528_s6 + $0x3c8] sm:$0xff] }
 0x570   :  { %v5800_v63 = vadd.f32 %v5799_v59, %v5786_v52  ;;  %v12025_v57 = vmax.f32 %v5939_v53, 0.0  ;;  %v10779_v52 = vld [vmem:[%s12528_s6 + $0x388] sm:$0xff]  ;;  %v10778_v59 = vld [vmem:[%s12528_s6 + $0x380] sm:$0xff] }
 0x571   :  { %6338 = vmatpush.bf16.msra.mxu2 %v10780_v32  ;;  %v10771_v53 = vld [vmem:[%s12528_s6 + $0x348] sm:$0xff]  ;;  %v10788_v32 = vld [vmem:[%s12528_s6 + $0x3d0] sm:$0xff] }
 0x572   :  { %v5814_v62 = vadd.f32 %v5813_v26, %v5800_v63  ;;  %v5953_v6 = vrot.slane %v12025_v57, 4  ;;  %v5961_v35 = vrot.slane %v12025_v57, 6  ;;  %v5945_v42 = vrot.slane %v12025_v57, 2  ;;  %6442 = vmatpush.bf16.msrb.mxu3 %v10788_v32  ;;  %v10823_v32 = vld [vmem:[#allocation11 + $0x9a8] sm:$0xff] }
 0x573   :  { %6325 = vmatpush.bf16.msrb.mxu1 %v10771_v53  ;;  %v10786_v53 = vld [vmem:[%s12528_s6 + $0x3c0] sm:$0xff] }
 0x574   :  { %v5817_v50 = vmax.f32 %v5814_v62, 0.0  ;;  %v5958_v47 = vsel %vm1674_vm1, 0.0, %v5953_v6  ;;  %v5966_v25 = vsel %vm1752_vm9, 0.0, %v5961_v35  ;;  %v5950_v60 = vsel %vm4164_vm8, 0.0, %v5945_v42 }
 0x575   :  { %v5959_v29 = vsel %vm1699_vm2, %v5958_v47, 0.0  ;;  %v5967_v15 = vsel %vm12545_vm6, %v5966_v25, 0.0  ;;  %v5951_v16 = vsel %vm4171_vm15, %v5950_v60, 0.0  ;;  %6339 = vmatpush.bf16.msra.mxu2 %v10779_v52  ;;  %v6226_v52 = vperm.slane %v12106_v49, 1 }
 0x576   :  { %v5940_v1 = vadd.f32 %v5937_v0, %v5817_v50  ;;  %v10777_v0 = vld [vmem:[%s12528_s6 + $0x378] sm:$0xff]  ;;  %6443 = vmatpush.bf16.msrb.mxu3 %v10787_v48 }
 0x577   :  { %6326 = vmatpush.bf16.msrb.mxu1 %v10770_v61  ;;  %v10769_v50 = vld [vmem:[%s12528_s6 + $0x338] sm:$0xff] }
 0x578   :  { %v12034_v3 = vmax.f32 %v5940_v1, 0.0  ;;  %v10822_v48 = vld [vmem:[#allocation11 + $0x9a0] sm:$0xff] }
 0x579   :  { %6340 = vmatpush.bf16.msra.mxu2 %v10778_v59 }
 0x57a   :  { %v10911_v5 = vpack.i.bf16 %v12034_v3, %v12025_v57  ;;  %v5954_v7 = vrot.slane %v12034_v3, 4  ;;  %v5962_v22 = vrot.slane %v12034_v3, 6  ;;  %v5946_v23 = vrot.slane %v12034_v3, 2  ;;  %6444 = vmatpush.bf16.msrb.mxu3 %v10786_v53  ;;  %v10800_v53 = vld [vmem:[%s12528_s6 + $0x430] sm:$0xff] }
 0x57b   :  { %6327 = vmatpush.bf16.msrb.mxu1 %v10769_v50 }
 0x57c   :  { %10912 = vrot.lane.b32.xlu2 %v10911_v5, %s11193_s4  ;;  %v5955_v9 = vsel %vm1674_vm1, %v5953_v6, %v5954_v7  ;;  %v5963_v24 = vsel %vm1752_vm9, %v5961_v35, %v5962_v22  ;;  %v5947_v41 = vsel %vm4164_vm8, %v5945_v42, %v5946_v23  ;;  %v10776_v6 = vld [vmem:[%s12528_s6 + $0x370] sm:$0xff] }
 0x57d   :  { %v5960_v4 = vsel %vm1700_vm3, %v5955_v9, 0.0  ;;  %v5968_v33 = vsel %vm12546_vm7, %v5963_v24, 0.0  ;;  %v5952_v36 = vsel %vm12547_vm13, %v5947_v41, 0.0  ;;  %6341 = vmatpush.bf16.msra.mxu2 %v10777_v0 }
 0x57e   :  { %v10906_v55 = vpack.i.bf16 %v5960_v4, %v5959_v29  ;;  %v10775_v4 = vld [vmem:[%s12528_s6 + $0x368] sm:$0xff] }
 0x57f   :  { %6328 = vmatpush.bf16.msrb.mxu1 %v10768_v2  ;;  %v10783_v2 = vld [vmem:[%s12528_s6 + $0x3a8] sm:$0xff] }
 0x580   :  { %10907 = vrot.lane.b32.xlu1 %v10906_v55, %s11193_s4 }
 0x581   :  { %6342 = vmatpush.bf16.msra.mxu2 %v10776_v6 }
 0x585   :  { %6343 = vmatpush.bf16.msra.mxu2 %v10775_v4 }
 0x5d6   :  { %v10913_v28 = vpop.permute.xlu2 %10912 }
 0x5d7   :  { %v10915_v54 = vunpack.i.h.bf16 %v10913_v28  ;;  %v10914_v31 = vunpack.i.l.bf16 %v10913_v28  ;;  %v10767_v28 = vld [vmem:[%s12528_s6 + $0x328] sm:$0xff] }
 0x5d8   :  { %6329 = vmatpush.bf16.msrb.mxu1 %v10767_v28  ;;  %v10794_v28 = vld [vmem:[%s12528_s6 + $0x400] sm:$0xff] }
 0x5d9   :  { %v5985_v17 = vsel %vm5602_vm12, %v5967_v15, %v10914_v31  ;;  %v5986_v26 = vsel %vm5602_vm12, %v5968_v33, %v10915_v54  ;;  %v10774_v54 = vld [vmem:[%s12528_s6 + $0x360] sm:$0xff] }
 0x5da   :  { %v6020_v34 = vpack.c.bf16 %v5986_v26, %v5985_v17  ;;  %6344 = vmatpush.bf16.msra.mxu2 %v10774_v54  ;;  %v10766_v31 = vld [vmem:[%s12528_s6 + $0x320] sm:$0xff]  ;;  %v10793_v54 = vld [vmem:[%s12528_s6 + $0x3f8] sm:$0xff] }
 0x5dc   :  { %6140 = vmatmul.bf16.vlgmr.msra.gmra.mxu0 %v6020_v34  ;;  %6330 = vmatpush.bf16.msrb.mxu1 %v10766_v31 }
 0x5f2   :  { %v10908_v46 = vpop.permute.xlu1 %10907 }
 0x5f3   :  { %v10910_v20 = vunpack.i.h.bf16 %v10908_v46  ;;  %v10909_v39 = vunpack.i.l.bf16 %v10908_v46 }
 0x5f5   :  { %v5983_v43 = vsel %vm5602_vm12, %v5951_v16, %v10909_v39  ;;  %v5984_v40 = vsel %vm5602_vm12, %v5952_v36, %v10910_v20 }
 0x5f6   :  { %v6019_v45 = vpack.c.bf16 %v5984_v40, %v5983_v43 }
 0x5f8   :  { %6126 = vmatmul.bf16.vlgmr.msra.gmra.mxu3 %v6019_v45 }
 0x659   :  { %v6141_v63 = vpop.f32.mrf.mxu0 }
 0x661   :  { %v6143_v47 = vpop.f32.mrf.mxu0 }
 0x67b   :  { %v6127_v8 = vpop.f32.mrf.mxu3 }
 0x67c   :  { %v6128_v62 = vadd.f32 %v6127_v8, %v6021_v58 }
 0x67e   :  { %v6142_v56 = vadd.f32 %v6141_v63, %v6128_v62  ;;  %v10785_v63 = vld [vmem:[%s12528_s6 + $0x3b8] sm:$0xff]  ;;  %v10784_v62 = vld [vmem:[%s12528_s6 + $0x3b0] sm:$0xff] }
 0x67f   :  { %6445 = vmatpush.bf16.msrb.mxu3 %v10785_v63 }
 0x680   :  { %v6146_v1 = vmax.f32 %v6142_v56, 0.0 }
 0x682   :  { %v6158_v9 = vrot.slane %v6146_v1, 4  ;;  %v6150_v27 = vrot.slane %v6146_v1, 2  ;;  %v6166_v18 = vrot.slane %v6146_v1, 6 }
 0x683   :  { %v6129_v5 = vpop.f32.mrf.mxu3  ;;  %6446 = vmatpush.bf16.msrb.mxu3 %v10784_v62 }
 0x684   :  { %v6130_v7 = vadd.f32 %v6129_v5, %v6021_v58  ;;  %v6163_v51 = vsel %vm1674_vm1, 0.0, %v6158_v9  ;;  %v6171_v15 = vsel %vm1752_vm9, 0.0, %v6166_v18  ;;  %v6155_v60 = vsel %vm4164_vm8, 0.0, %v6150_v27 }
 0x685   :  { %v6164_v21 = vsel %vm1699_vm2, %v6163_v51, 0.0  ;;  %v6172_v34 = vsel %vm12548_vm14, %v6171_v15, 0.0  ;;  %v6156_v36 = vsel %vm4171_vm15, %v6155_v60, 0.0  ;;  %v6392_v15 = vperm.slane %v12106_v49, 2  ;;  %v10829_v60 = vld [vmem:[#allocation11 + $0x9d8] sm:$0xff] }
 0x686   :  { %v6144_v29 = vadd.f32 %v6143_v47, %v6130_v7 }
 0x687   :  { %6447 = vmatpush.bf16.msrb.mxu3 %v10783_v2  ;;  %v10813_v2 = vld [vmem:[#allocation11 + $0x978] sm:$0xff] }
 0x688   :  { %v6147_v55 = vmax.f32 %v6144_v29, 0.0 }
 0x68a   :  { %v6151_v10 = vrot.slane %v6147_v55, 2  ;;  %v6167_v11 = vrot.slane %v6147_v55, 6  ;;  %v10916_v30 = vpack.i.bf16 %v6147_v55, %v6146_v1  ;;  %v6159_v14 = vrot.slane %v6147_v55, 4  ;;  %v10782_v55 = vld [vmem:[%s12528_s6 + $0x3a0] sm:$0xff] }
 0x68b   :  { %6448 = vmatpush.bf16.msrb.mxu3 %v10782_v55  ;;  %v10806_v55 = vld [vmem:[#allocation11 + $0x940] sm:$0xff] }
 0x68c   :  { %10917 = vrot.lane.b32.xlu0 %v10916_v30, %s11193_s4  ;;  %v6160_v12 = vsel %vm1674_vm1, %v6158_v9, %v6159_v14  ;;  %v6168_v22 = vsel %vm1752_vm9, %v6166_v18, %v6167_v11  ;;  %v6152_v35 = vsel %vm4164_vm8, %v6150_v27, %v6151_v10  ;;  %vm12550_vm9 = vmmov %vm12547_vm13 }
 0x68d   :  { %v6165_v24 = vsel %vm1700_vm3, %v6160_v12, 0.0  ;;  %v6173_v23 = vsel %vm12549_vm10, %v6168_v22, 0.0  ;;  %v6157_v43 = vsel %vm12550_vm9, %v6152_v35, 0.0 }
 0x68e   :  { %v10921_v25 = vpack.i.bf16 %v6165_v24, %v6164_v21  ;;  %v10797_v21 = vld [vmem:[%s12528_s6 + $0x418] sm:$0xff]  ;;  %v10796_v24 = vld [vmem:[%s12528_s6 + $0x410] sm:$0xff] }
 0x68f   :  { %6541 = vmatpush.bf16.msrb.mxu0 %v10797_v21 }
 0x690   :  { %10922 = vrot.lane.b32.xlu1 %v10921_v25, %s11193_s4  ;;  %v10795_v25 = vld [vmem:[%s12528_s6 + $0x408] sm:$0xff] }
 0x693   :  { %6542 = vmatpush.bf16.msrb.mxu0 %v10796_v24  ;;  %v10804_v24 = vld [vmem:[%s12528_s6 + $0x450] sm:$0xff] }
 0x697   :  { %6543 = vmatpush.bf16.msrb.mxu0 %v10795_v25  ;;  %v10803_v25 = vld [vmem:[%s12528_s6 + $0x448] sm:$0xff] }
 0x69b   :  { %6544 = vmatpush.bf16.msrb.mxu0 %v10794_v28  ;;  %v6570_v28 = vperm.slane %v12106_v49, 4 }
 0x69f   :  { %6545 = vmatpush.bf16.msrb.mxu0 %v10793_v54 }
 0x6fe   :  { %v10918_v33 = vpop.permute.xlu0 %10917 }
 0x6ff   :  { %v10920_v17 = vunpack.i.h.bf16 %v10918_v33  ;;  %v10919_v26 = vunpack.i.l.bf16 %v10918_v33  ;;  %v10792_v33 = vld [vmem:[%s12528_s6 + $0x3f0] sm:$0xff] }
 0x700   :  { %6546 = vmatpush.bf16.msrb.mxu0 %v10792_v33 }
 0x701   :  { %v6190_v42 = vsel %vm5602_vm12, %v6172_v34, %v10919_v26  ;;  %v6191_v41 = vsel %vm5602_vm12, %v6173_v23, %v10920_v17  ;;  %v10791_v26 = vld [vmem:[%s12528_s6 + $0x3e8] sm:$0xff] }
 0x702   :  { %v6225_v46 = vpack.c.bf16 %v6191_v41, %v6190_v42  ;;  %v10923_v20 = vpop.permute.xlu1 %10922  ;;  %v10790_v41 = vld [vmem:[%s12528_s6 + $0x3e0] sm:$0xff] }
 0x703   :  { %v10925_v39 = vunpack.i.h.bf16 %v10923_v20  ;;  %v10924_v16 = vunpack.i.l.bf16 %v10923_v20 }
 0x704   :  { %6345 = vmatmul.bf16.vlgmr.msra.gmra.mxu2 %v6225_v46  ;;  %6547 = vmatpush.bf16.msrb.mxu0 %v10791_v26  ;;  %v6688_v26 = vperm.slane %v12106_v49, 6 }
 0x705   :  { %v6188_v40 = vsel %vm5602_vm12, %v6156_v36, %v10924_v16  ;;  %v6189_v45 = vsel %vm5602_vm12, %v6157_v43, %v10925_v39  ;;  %v10828_v36 = vld [vmem:[#allocation11 + $0x9d0] sm:$0xff] }
 0x706   :  { %v6224_v19 = vpack.c.bf16 %v6189_v45, %v6188_v40  ;;  %v10827_v40 = vld [vmem:[#allocation11 + $0x9c8] sm:$0xff]  ;;  %v10826_v45 = vld [vmem:[#allocation11 + $0x9c0] sm:$0xff] }
 0x708   :  { %6331 = vmatmul.bf16.vlgmr.msrb.gmra.mxu1 %v6224_v19  ;;  %6548 = vmatpush.bf16.msrb.mxu0 %v10790_v41  ;;  %v10825_v19 = vld [vmem:[#allocation11 + $0x9b8] sm:$0xff] }
 0x70c   :  { %7415 = vmatpush.bf16.msra.mxu0 %v10829_v60 }
 0x710   :  { %7416 = vmatpush.bf16.msra.mxu0 %v10828_v36  ;;  %v10815_v36 = vld [vmem:[%s12528_s6 + $0x468] sm:$0xff] }
 0x714   :  { %7417 = vmatpush.bf16.msra.mxu0 %v10827_v40 }
 0x718   :  { %7418 = vmatpush.bf16.msra.mxu0 %v10826_v45 }
 0x71c   :  { %7419 = vmatpush.bf16.msra.mxu0 %v10825_v19 }
 0x720   :  { %7420 = vmatpush.bf16.msra.mxu0 %v10824_v44  ;;  %v6623_v44 = vperm.slane %v12106_v49, 5 }
 0x724   :  { %7421 = vmatpush.bf16.msra.mxu0 %v10823_v32 }
 0x728   :  { %7422 = vmatpush.bf16.msra.mxu0 %v10822_v48 }
 0x785   :  { %v6332_v58 = vpop.f32.mrf.mxu1 }
 0x786   :  { %v6333_v59 = vadd.f32 %v6332_v58, %v6226_v52  ;;  %v10799_v58 = vld [vmem:[%s12528_s6 + $0x428] sm:$0xff] }
 0x787   :  { %v6346_v61 = vpop.f32.mrf.mxu2 }
 0x788   :  { %v6347_v8 = vadd.f32 %v6346_v61, %v6333_v59 }
 0x78a   :  { %v6351_v0 = vmax.f32 %v6347_v8, 0.0 }
 0x78c   :  { %v6353_v5 = vadd.f32 %v6351_v0, %v12025_v57 }
 0x78d   :  { %v6334_v56 = vpop.f32.mrf.mxu1 }
 0x78e   :  { %v6335_v50 = vadd.f32 %v6334_v56, %v6226_v52  ;;  %v12193_v9 = vmax.f32 %v6353_v5, 0.0  ;;  %v10801_v52 = vld [vmem:[%s12528_s6 + $0x438] sm:$0xff]  ;;  %v10811_v5 = vld [vmem:[#allocation11 + $0x968] sm:$0xff] }
 0x78f   :  { %v6348_v1 = vpop.f32.mrf.mxu2  ;;  %6602 = vmatpush.bf16.msra.mxu1 %v10801_v52 }
 0x790   :  { %v6349_v6 = vadd.f32 %v6348_v1, %v6335_v50  ;;  %v6359_v57 = vrot.slane %v12193_v9, 4 }
 0x792   :  { %v6352_v7 = vmax.f32 %v6349_v6, 0.0  ;;  %v6364_v18 = vsel %vm1674_vm1, 0.0, %v6359_v57  ;;  %v10798_v6 = vld [vmem:[%s12528_s6 + $0x420] sm:$0xff] }
 0x793   :  { %v6365_v30 = vsel %vm1699_vm2, %v6364_v18, 0.0  ;;  %6603 = vmatpush.bf16.msra.mxu1 %v10800_v53  ;;  %v10805_v18 = vld [vmem:[%s12528_s6 + $0x458] sm:$0xff] }
 0x794   :  { %v6354_v47 = vadd.f32 %v6352_v7, %v12034_v3  ;;  %v10809_v7 = vld [vmem:[#allocation11 + $0x958] sm:$0xff]  ;;  %6655 = vmatpush.bf16.msrb.mxu2 %v10805_v18 }
 0x796   :  { %v12195_v29 = vmax.f32 %v6354_v47, 0.0  ;;  %v10808_v47 = vld [vmem:[#allocation11 + $0x950] sm:$0xff] }
 0x797   :  { %6604 = vmatpush.bf16.msra.mxu1 %v10799_v58 }
 0x798   :  { %v10926_v4 = vpack.i.bf16 %v12195_v29, %v12193_v9  ;;  %v6360_v27 = vrot.slane %v12195_v29, 4  ;;  %6656 = vmatpush.bf16.msrb.mxu2 %v10804_v24 }
 0x79a   :  { %10927 = vrot.lane.b32.xlu2 %v10926_v4, %s11193_s4  ;;  %v6361_v3 = vsel %vm1674_vm1, %v6359_v57, %v6360_v27  ;;  %v10807_v4 = vld [vmem:[#allocation11 + $0x948] sm:$0xff]  ;;  %v6492_v57 = vperm.slane %v12106_v49, 3 }
 0x79b   :  { %v6366_v14 = vsel %vm1700_vm3, %v6361_v3, 0.0  ;;  %6605 = vmatpush.bf16.msra.mxu1 %v10798_v6  ;;  %v10818_v6 = vld [vmem:[#allocation11 + $0x980] sm:$0xff] }
 0x79c   :  { %6657 = vmatpush.bf16.msrb.mxu2 %v10803_v25 }
 0x79f   :  { %6737 = vmatpush.bf16.msrb.mxu1 %v10813_v2  ;;  %v6760_v2 = vperm.slane %v12106_v49, 7 }
 0x7a3   :  { %6738 = vmatpush.bf16.msrb.mxu1 %v10812_v37 }
 0x7a7   :  { %6739 = vmatpush.bf16.msrb.mxu1 %v10811_v5 }
 0x7ab   :  { %6740 = vmatpush.bf16.msrb.mxu1 %v10810_v38 }
 0x7af   :  { %6741 = vmatpush.bf16.msrb.mxu1 %v10809_v7 }
 0x7b3   :  { %6742 = vmatpush.bf16.msrb.mxu1 %v10808_v47 }
 0x7b7   :  { %6743 = vmatpush.bf16.msrb.mxu1 %v10807_v4 }
 0x7bb   :  { %6744 = vmatpush.bf16.msrb.mxu1 %v10806_v55 }
 0x7f4   :  { %v10928_v51 = vpop.permute.xlu2 %10927 }
 0x7f5   :  { %v10930_v10 = vunpack.i.h.bf16 %v10928_v51  ;;  %v10929_v11 = vunpack.i.l.bf16 %v10928_v51 }
 0x7f7   :  { %v6373_v12 = vsel %vm5602_vm12, %v6365_v30, %v10929_v11  ;;  %v6374_v22 = vsel %vm5602_vm12, %v6366_v14, %v10930_v10 }
 0x7f8   :  { %v6391_v35 = vpack.c.bf16 %v6374_v22, %v6373_v12 }
 0x7fa   :  { %6449 = vmatmul.bf16.vlgmr.msrb.gmra.mxu3 %v6391_v35 }
 0x87d   :  { %v6450_v31 = vpop.f32.mrf.mxu3 }
 0x87e   :  { %v6451_v17 = vadd.f32 %v6450_v31, %v6392_v15 }
 0x880   :  { %v6455_v23 = vmax.f32 %v6451_v17, 0.0 }
 0x882   :  { %v6459_v20 = vrot.slane %v6455_v23, 4 }
 0x884   :  { %v6464_v59 = vsel %vm1674_vm1, 0.0, %v6459_v20 }
 0x885   :  { %v6452_v34 = vpop.f32.mrf.mxu3  ;;  %v6465_v62 = vsel %vm1699_vm2, %v6464_v59, 0.0 }
 0x886   :  { %v6453_v42 = vadd.f32 %v6452_v34, %v6392_v15 }
 0x888   :  { %v6456_v46 = vmax.f32 %v6453_v42, 0.0 }
 0x88a   :  { %v6460_v39 = vrot.slane %v6456_v46, 4  ;;  %v10931_v16 = vpack.i.bf16 %v6456_v46, %v6455_v23 }
 0x88c   :  { %v6461_v43 = vsel %vm1674_vm1, %v6459_v20, %v6460_v39  ;;  %10932 = vrot.lane.b32.xlu0 %v10931_v16, %s11193_s4  ;;  %v10817_v39 = vld [vmem:[%s12528_s6 + $0x478] sm:$0xff]  ;;  %v10816_v16 = vld [vmem:[%s12528_s6 + $0x470] sm:$0xff] }
 0x88d   :  { %v6466_v56 = vsel %vm1700_vm3, %v6461_v43, 0.0  ;;  %v10814_v43 = vld [vmem:[%s12528_s6 + $0x460] sm:$0xff] }
 0x8fe   :  { %v10933_v61 = vpop.permute.xlu0 %10932 }
 0x8ff   :  { %v10935_v63 = vunpack.i.h.bf16 %v10933_v61  ;;  %v10934_v8 = vunpack.i.l.bf16 %v10933_v61 }
 0x901   :  { %v6473_v0 = vsel %vm5602_vm12, %v6465_v62, %v10934_v8  ;;  %v6474_v50 = vsel %vm5602_vm12, %v6466_v56, %v10935_v63 }
 0x902   :  { %v6491_v1 = vpack.c.bf16 %v6474_v50, %v6473_v0  ;;  %v10821_v0 = vld [vmem:[#allocation11 + $0x998] sm:$0xff]  ;;  %v10820_v50 = vld [vmem:[#allocation11 + $0x990] sm:$0xff] }
 0x903   :  { %6843 = vmatpush.bf16.msra.mxu3 %v10821_v0 }
 0x904   :  { %6549 = vmatmul.bf16.vlgmr.msrb.gmra.mxu0 %v6491_v1  ;;  %v10819_v1 = vld [vmem:[#allocation11 + $0x988] sm:$0xff] }
 0x907   :  { %6844 = vmatpush.bf16.msra.mxu3 %v10820_v50 }
 0x90b   :  { %6845 = vmatpush.bf16.msra.mxu3 %v10819_v1 }
 0x90f   :  { %6846 = vmatpush.bf16.msra.mxu3 %v10818_v6 }
 0x914   :  { %7423 = vmatmul.bf16.vlgmr.msra.gmra.mxu0 %v11874_v13 }
 0x981   :  { %v6550_v27 = vpop.f32.mrf.mxu0 }
 0x982   :  { %v6551_v3 = vadd.f32 %v6550_v27, %v6492_v57  ;;  %v12317_v27 = vld [vmem:[#allocation10 + $0x10] sm:$0xf] }
 0x984   :  { %v6555_v51 = vmax.f32 %v6551_v3, 0.0  ;;  %v6811_v3 = vperm.slane %v12317_v27, 0 }
 0x986   :  { %v6557_v30 = vadd.f32 %v6555_v51, %v12193_v9  ;;  %v10802_v9 = vld [vmem:[%s12528_s6 + $0x440] sm:$0xff]  ;;  %s11200_s6 = smov [#allocation13]  }
 0x987   :  { %6658 = vmatpush.bf16.msrb.mxu2 %v10802_v9 }
 0x988   :  { %v6559_v22 = vmax.f32 %v6557_v30, 0.0 }
 0x989   :  { %v6552_v10 = vpop.f32.mrf.mxu0 }
 0x98a   :  { %v6553_v11 = vadd.f32 %v6552_v10, %v6492_v57 }
 0x98b   :  { %6792 = vmatpush.bf16.msra.mxu2 %v10817_v39 }
 0x98c   :  { %v6556_v14 = vmax.f32 %v6553_v11, 0.0 }
 0x98e   :  { %v6558_v12 = vadd.f32 %v6556_v14, %v12195_v29 }
 0x98f   :  { %6793 = vmatpush.bf16.msra.mxu2 %v10816_v16 }
 0x990   :  { %v6560_v35 = vmax.f32 %v6558_v12, 0.0 }
 0x992   :  { %v6569_v21 = vpack.c.bf16 %v6560_v35, %v6559_v22 }
 0x993   :  { %6794 = vmatpush.bf16.msra.mxu2 %v10815_v36 }
 0x994   :  { %10039 = vmatmul.msk.bf16.vlgmr.msra.gmra.mxu1 %vm5602_vm12, %v6569_v21 }
 0x997   :  { %6795 = vmatpush.bf16.msra.mxu2 %v10814_v43 }
 0x9a4   :  { %6745 = vmatmul.bf16.vlgmr.msrb.gmra.mxu1 %v11874_v13 }
 0xa11   :  { %v6607_v29 = vpop.f32.mrf.mxu1 }
 0xa12   :  { %v6608_v54 = vadd.f32 %v6607_v29, %v6570_v28 }
 0xa14   :  { %v6612_v15 = vmax.f32 %v6608_v54, 0.0 }
 0xa19   :  { %v6609_v13 = vpop.f32.mrf.mxu1 }
 0xa1a   :  { %v6610_v31 = vadd.f32 %v6609_v13, %v6570_v28 }
 0xa1c   :  { %v6613_v33 = vmax.f32 %v6610_v31, 0.0 }
 0xa1e   :  { %v6622_v17 = vpack.c.bf16 %v6613_v33, %v6612_v15 }
 0xa20   :  { %10056 = vmatmul.msk.bf16.vlgmr.msrb.gmra.mxu2 %vm5602_vm12, %v6622_v17 }
 0xa21   :  { %v6746_v34 = vpop.f32.mrf.mxu1 }
 0xa22   :  { %v12280_v23 = vadd.f32 %v6746_v34, %v6688_v26 }
 0xa24   :  { %6855 = vrot.lane.b32.xlu2 %v12280_v23, %s11199_s18 }
 0xa29   :  { %v6748_v42 = vpop.f32.mrf.mxu1 }
 0xa2a   :  { %v12284_v41 = vadd.f32 %v6748_v42, %v6688_v26 }
 0xa2c   :  { %6857 = vrot.lane.b32.xlu0 %v12284_v41, %s11199_s18 }
 0xa7e   :  { %v6856_v60 = vpop.permute.xlu2 %6855 }
 0xa7f   :  { %v6861_v46 = vmul.f32 %v6856_v60, %v12280_v23 }
 0xa81   :  { %v6863_v20 = vsel %vm5002_vm4, %v6861_v46, 0.0 }
 0xa82   :  { %6864 = vadd.xlane.f32.xlu0 %v6863_v20 }
 0xa9e   :  { %v6858_v40 = vpop.permute.xlu0 %6857 }
 0xa9f   :  { %v6862_v45 = vmul.f32 %v6858_v40, %v12284_v41 }
 0xaa1   :  { %v6866_v19 = vsel %vm5002_vm4, %v6862_v45, 0.0 }
 0xaa2   :  { %6867 = vadd.xlane.f32.xlu1 %v6866_v19 }
 0xaa3   :  { %v6660_v32 = vpop.f32.mrf.mxu2 }
 0xaa4   :  { %v6661_v48 = vadd.f32 %v6660_v32, %v6623_v44 }
 0xaa6   :  { %v6665_v52 = vmax.f32 %v6661_v48, 0.0 }
 0xaa8   :  { %v6667_v59 = vadd.f32 %v6665_v52, %v6559_v22 }
 0xaaa   :  { %v6669_v8 = vmax.f32 %v6667_v59, 0.0 }
 0xaab   :  { %v6662_v53 = vpop.f32.mrf.mxu2 }
 0xaac   :  { %v6663_v58 = vadd.f32 %v6662_v53, %v6623_v44 }
 0xaae   :  { %v6666_v61 = vmax.f32 %v6663_v58, 0.0 }
 0xab0   :  { %v6668_v63 = vadd.f32 %v6666_v61, %v6560_v35 }
 0xab2   :  { %v6670_v62 = vmax.f32 %v6668_v63, 0.0 }
 0xab4   :  { %v6759_v56 = vpack.c.bf16 %v6670_v62, %v6669_v8 }
 0xab6   :  { %10105 = vmatmul.msk.bf16.vlgmr.msra.gmra.mxu2 %vm5602_vm12, %v6759_v56 }
 0xaf5   :  { %v6865_v9 = vpop.xlane.xlu0 %6864 }
 0xb15   :  { %v12352_v15 = vpop.xlane.xlu1 %6867 }
 0xb39   :  { %v6797_v37 = vpop.f32.mrf.mxu2 }
 0xb3a   :  { %v6798_v5 = vadd.f32 %v6797_v37, %v6760_v2 }
 0xb3c   :  { %v6929_v38 = vmul.f32 %v6798_v5, %v12280_v23  ;;  %v6899_v57 = vmul.f32 %v6856_v60, %v6798_v5 }
 0xb3e   :  { %6933 = vrot.lane.b32.xlu0 %v6929_v38, %s11199_s18  ;;  %v6901_v49 = vsel %vm5002_vm4, %v6899_v57, 0.0  ;;  %v6869_v38 = vmul.f32 0.17677669, %v6865_v9 }
 0xb41   :  { %v6799_v7 = vpop.f32.mrf.mxu2 }
 0xb42   :  { %v12309_v47 = vadd.f32 %v6799_v7, %v6760_v2 }
 0xb44   :  { %v6810_v4 = vpack.c.bf16 %v12309_v47, %v6798_v5  ;;  %v6930_v55 = vmul.f32 %v12309_v47, %v12284_v41  ;;  %v6900_v35 = vmul.f32 %v6858_v40, %v12309_v47 }
 0xb46   :  { %10122 = vmatmul.msk.bf16.vlgmr.msra.gmra.mxu3 %vm5602_vm12, %v6810_v4  ;;  %6935 = vrot.lane.b32.xlu1 %v6930_v55, %s11199_s18  ;;  %v6904_v21 = vsel %vm5002_vm4, %v6900_v35, 0.0 }
 0xb68   :  { %6902 = vadd.xlane.f32.xlu0 %v6901_v49 }
 0xbb0   :  { %v6934_v29 = vpop.permute.xlu0 %6933 }
 0xbb1   :  { %v6939_v53 = vsel %vm5002_vm4, %v6934_v29, 0.0 }
 0xbb8   :  { %v6936_v34 = vpop.permute.xlu1 %6935 }
 0xbb9   :  { %v6942_v19 = vsel %vm5002_vm4, %v6936_v34, 0.0 }
 0xbc9   :  { %v6848_v18 = vpop.f32.mrf.mxu3 }
 0xbca   :  { %v12320_v51 = vadd.f32 %v6848_v18, %v6811_v3 }
 0xbcc   :  { %6947 = vrot.lane.b32.xlu1 %v12320_v51, %s11197_s10  ;;  %6971 = vrot.lane.b32.xlu0 %v12320_v51, %s11199_s18  ;;  %v6871_v10 = vmul.f32 %v12320_v51, %v12280_v23  ;;  %v6909_v24 = vmul.f32 %v12320_v51, %v6798_v5 }
 0xbce   :  { %v6873_v11 = vsel %vm5002_vm4, %v6871_v10, 0.0  ;;  %v6911_v25 = vsel %vm5002_vm4, %v6909_v24, 0.0 }
 0xbcf   :  { %6874 = vadd.xlane.f32.xlu2 %v6873_v11 }
 0xbd1   :  { %v6850_v30 = vpop.f32.mrf.mxu3 }
 0xbd2   :  { %v12331_v14 = vadd.f32 %v6850_v30, %v6811_v3 }
 0xbd4   :  { %6883 = vrot.lane.b32.xlu1 %v12320_v51, %s11193_s4  ;;  %v6910_v12 = vmul.f32 %v12331_v14, %v12309_v47  ;;  %v6872_v26 = vmul.f32 %v12331_v14, %v12284_v41 }
 0xbd6   :  { %v6914_v22 = vsel %vm5002_vm4, %v6910_v12, 0.0  ;;  %v6876_v42 = vsel %vm5002_vm4, %v6872_v26, 0.0 }
 0xbdb   :  { %v12346_v28 = vpop.xlane.xlu0 %6902 }
 0xbdc   :  { %6973 = vrot.lane.b32.xlu1 %v12331_v14, %s11199_s18  ;;  %v6907_v12 = vmul.f32 0.17677669, %v12346_v28 }
 0xbe7   :  { %6949 = vrot.lane.b32.xlu2 %v12331_v14, %s11197_s10 }
 0xbf6   :  { %6915 = vadd.xlane.f32.xlu0 %v6914_v22 }
 0xc06   :  { %6905 = vadd.xlane.f32.xlu1 %v6904_v21 }
 0xc10   :  { %6912 = vadd.xlane.f32.xlu2 %v6911_v25 }
 0xc28   :  { %6885 = vrot.lane.b32.xlu2 %v12331_v14, %s11193_s4 }
 0xc3e   :  { %v12348_v54 = vpop.permute.xlu0 %6971  ;;  %v12362_v60 = vpop.permute.xlu1 %6947 }
 0xc3f   :  { %v6977_v13 = vmul.f32 %v12348_v54, %v6798_v5  ;;  %v6953_v39 = vmul.f32 %v12362_v60, %v6798_v5 }
 0xc41   :  { %6981 = vrot.lane.b32.xlu1 %v6977_v13, %s11199_s18 }
 0xc42   :  { %v6875_v31 = vpop.xlane.xlu2 %6874 }
 0xc46   :  { %v6884_v46 = vpop.permute.xlu1 %6883 }
 0xc47   :  { %v6889_v20 = vmul.f32 %v6884_v46, %v12280_v23  ;;  %v6919_v40 = vmul.f32 %v6884_v46, %v6798_v5  ;;  %v6879_v5 = vmul.f32 0.17677669, %v6875_v31 }
 0xc49   :  { %v6891_v16 = vsel %vm5002_vm4, %v6889_v20, 0.0  ;;  %v6921_v45 = vsel %vm5002_vm4, %v6919_v40, 0.0 }
 0xc4a   :  { %v12354_v33 = vpop.permute.xlu2 %6949 }
 0xc4b   :  { %v6954_v17 = vmul.f32 %v12354_v33, %v12309_v47 }
 0xc4d   :  { %6959 = vrot.lane.b32.xlu0 %v6954_v17, %s11199_s18 }
 0xc4e   :  { %v12368_v36 = vpop.permute.xlu1 %6973 }
 0xc4f   :  { %v6978_v43 = vmul.f32 %v12368_v36, %v12309_v47 }
 0xc51   :  { %6877 = vadd.xlane.f32.xlu2 %v6876_v42 }
 0xc69   :  { %6957 = vrot.lane.b32.xlu2 %v6953_v39, %s11199_s18  ;;  %v6916_v62 = vpop.xlane.xlu0 %6915 }
 0xc6b   :  { %6892 = vadd.xlane.f32.xlu1 %v6891_v16 }
 0xc71   :  { %6983 = vrot.lane.b32.xlu2 %v6978_v43, %s11199_s18 }
 0xc77   :  { %6922 = vadd.xlane.f32.xlu0 %v6921_v45 }
 0xc79   :  { %v6906_v61 = vpop.xlane.xlu1 %6905 }
 0xc7f   :  { %6943 = vadd.xlane.f32.xlu0 %v6942_v19 }
 0xc83   :  { %v6913_v44 = vpop.xlane.xlu2 %6912 }
 0xc84   :  { %v6917_v11 = vmul.f32 0.17677669, %v6913_v44 }
 0xc86   :  { %v7053_v35 = vmax.f32 %v6907_v12, %v6917_v11 }
 0xc8b   :  { %v6886_v32 = vpop.permute.xlu2 %6885 }
 0xc8c   :  { %v6920_v48 = vmul.f32 %v6886_v32, %v12309_v47  ;;  %v6890_v58 = vmul.f32 %v6886_v32, %v12284_v41  ;;  %v6995_v47 = vmax.f32 %v6869_v38, %v6879_v5 }
 0xc8e   :  { %v6924_v52 = vsel %vm5002_vm4, %v6920_v48, 0.0  ;;  %v6894_v59 = vsel %vm5002_vm4, %v6890_v58, 0.0  ;;  %v6908_v48 = vmul.f32 0.17677669, %v6906_v61 }
 0xc8f   :  { %6925 = vadd.xlane.f32.xlu1 %v6924_v52  ;;  %v6918_v52 = vmul.f32 0.17677669, %v6916_v62 }
 0xc91   :  { %v7054_v58 = vmax.f32 %v6908_v48, %v6918_v52 }
 0xc9a   :  { %6940 = vadd.xlane.f32.xlu2 %v6939_v53 }
 0xca2   :  { %6895 = vadd.xlane.f32.xlu2 %v6894_v59 }
 0xcb3   :  { %v6982_v63 = vpop.permute.xlu1 %6981 }
 0xcb4   :  { %v6987_v8 = vsel %vm5002_vm4, %v6982_v63, 0.0 }
 0xcb5   :  { %6988 = vadd.xlane.f32.xlu0 %v6987_v8 }
 0xcbf   :  { %v6960_v56 = vpop.permute.xlu0 %6959 }
 0xcc0   :  { %v6966_v0 = vsel %vm5002_vm4, %v6960_v56, 0.0 }
 0xcc1   :  { %6967 = vadd.xlane.f32.xlu2 %v6966_v0 }
 0xcc4   :  { %v12382_v50 = vpop.xlane.xlu2 %6877 }
 0xcc5   :  { %v6880_v61 = vmul.f32 0.17677669, %v12382_v50 }
 0xccc   :  { %v6958_v1 = vpop.permute.xlu2 %6957 }
 0xccd   :  { %v6963_v6 = vsel %vm5002_vm4, %v6958_v1, 0.0 }
 0xcce   :  { %6964 = vadd.xlane.f32.xlu1 %v6963_v6 }
 0xcd4   :  { %v6984_v2 = vpop.permute.xlu2 %6983 }
 0xcd5   :  { %v6990_v37 = vsel %vm5002_vm4, %v6984_v2, 0.0 }
 0xcd6   :  { %6991 = vadd.xlane.f32.xlu1 %v6990_v37 }
 0xcde   :  { %v6893_v7 = vpop.xlane.xlu1 %6892 }
 0xcdf   :  { %v6897_v4 = vmul.f32 0.17677669, %v6893_v7 }
 0xce1   :  { %v6997_v55 = vmax.f32 %v6995_v47, %v6897_v4  ;;  %v6870_v47 = vmul.f32 0.17677669, %v12352_v15 }
 0xce3   :  { %v6999_v57 = vsub.f32 %v6869_v38, %v6997_v55  ;;  %v7005_v49 = vsub.f32 %v6879_v5, %v6997_v55  ;;  %v7011_v3 = vsub.f32 %v6897_v4, %v6997_v55 }
 0xce5   :  { %v7001_v18 = vmul.f32 1.442695, %v6999_v57  ;;  %v7007_v10 = vmul.f32 1.442695, %v7005_v49  ;;  %v7013_v30 = vmul.f32 1.442695, %v7011_v3  ;;  %v6996_v49 = vmax.f32 %v6870_v47, %v6880_v61 }
 0xce7   :  { %10946 = vpow2.f32 %v7001_v18 }
 0xce8   :  { %10948 = vpow2.f32 %v7007_v10 }
 0xce9   :  { %10950 = vpow2.f32 %v7013_v30 }
 0xcea   :  { %v6923_v22 = vpop.xlane.xlu0 %6922 }
 0xceb   :  { %v6927_v21 = vmul.f32 0.17677669, %v6923_v22 }
 0xced   :  { %v12387_v24 = vpop.eup %10946  ;;  %v7055_v25 = vmax.f32 %v7053_v35, %v6927_v21 }
 0xcee   :  { %v10949_v9 = vpop.eup %10948 }
 0xcef   :  { %v7057_v29 = vsub.f32 %v6907_v12, %v7055_v25  ;;  %v7063_v13 = vsub.f32 %v6917_v11, %v7055_v25  ;;  %v7069_v31 = vsub.f32 %v6927_v21, %v7055_v25  ;;  %v7025_v17 = vmul.f32 %v10949_v9, %v12320_v51  ;;  %v10951_v34 = vpop.eup %10950 }
 0xcf0   :  { %v7017_v26 = vadd.f32 %v10949_v9, %v12387_v24  ;;  %v7037_v39 = vmul.f32 %v10951_v34, %v12320_v51 }
 0xcf1   :  { %v7059_v42 = vmul.f32 1.442695, %v7057_v29  ;;  %v7065_v46 = vmul.f32 1.442695, %v7063_v13  ;;  %v7071_v20 = vmul.f32 1.442695, %v7069_v31  ;;  %7029 = vrot.lane.b32.xlu2 %v7025_v17, %s11197_s10 }
 0xcf2   :  { %v12392_v28 = vadd.f32 %v10951_v34, %v7017_v26  ;;  %v6944_v17 = vpop.xlane.xlu0 %6943 }
 0xcf3   :  { %10952 = vpow2.f32 %v7059_v42 }
 0xcf4   :  { %10954 = vpow2.f32 %v7065_v46 }
 0xcf5   :  { %10956 = vpow2.f32 %v7071_v20 }
 0xcf9   :  { %v12395_v16 = vpop.eup %10952  ;;  %7041 = vrot.lane.b32.xlu2 %v7037_v39, %s11199_s18 }
 0xcfa   :  { %v10955_v43 = vpop.eup %10954 }
 0xcfb   :  { %v10957_v40 = vpop.eup %10956  ;;  %v7075_v45 = vadd.f32 %v10955_v43, %v12395_v16  ;;  %v7083_v19 = vmul.f32 %v10955_v43, %v12320_v51 }
 0xcfc   :  { %v7095_v44 = vmul.f32 %v10957_v40, %v12320_v51 }
 0xcfd   :  { %v12401_v32 = vadd.f32 %v10957_v40, %v7075_v45  ;;  %7087 = vrot.lane.b32.xlu1 %v7083_v19, %s11197_s10 }
 0xcfe   :  { %7099 = vrot.lane.b32.xlu0 %v7095_v44, %s11199_s18 }
 0xd02   :  { %v6926_v53 = vpop.xlane.xlu1 %6925 }
 0xd03   :  { %v6928_v59 = vmul.f32 0.17677669, %v6926_v53 }
 0xd05   :  { %v7056_v63 = vmax.f32 %v7054_v58, %v6928_v59 }
 0xd07   :  { %v7058_v8 = vsub.f32 %v6908_v48, %v7056_v63  ;;  %v7064_v56 = vsub.f32 %v6918_v52, %v7056_v63  ;;  %v7070_v0 = vsub.f32 %v6928_v59, %v7056_v63  ;;  %v6946_v52 = vmul.f32 0.17677669, %v6944_v17 }
 0xd09   :  { %v7061_v1 = vmul.f32 1.442695, %v7058_v8  ;;  %v7067_v6 = vmul.f32 1.442695, %v7064_v56  ;;  %v7073_v2 = vmul.f32 1.442695, %v7070_v0 }
 0xd0b   :  { %10958 = vpow2.f32 %v7061_v1 }
 0xd0c   :  { %10960 = vpow2.f32 %v7067_v6 }
 0xd0d   :  { %10962 = vpow2.f32 %v7073_v2  ;;  %v6941_v37 = vpop.xlane.xlu2 %6940 }
 0xd0e   :  { %v6945_v42 = vmul.f32 0.17677669, %v6941_v37 }
 0xd11   :  { %v12405_v5 = vpop.eup %10958 }
 0xd12   :  { %v10961_v38 = vpop.eup %10960 }
 0xd13   :  { %v10963_v62 = vpop.eup %10962  ;;  %v7076_v7 = vadd.f32 %v10961_v38, %v12405_v5  ;;  %v7084_v31 = vmul.f32 %v10961_v38, %v12331_v14  ;;  %v7023_v38 = vmul.f32 %v12387_v24, %v12280_v23 }
 0xd14   :  { %v7096_v4 = vmul.f32 %v10963_v62, %v12331_v14 }
 0xd15   :  { %v12411_v55 = vadd.f32 %v10963_v62, %v7076_v7  ;;  %v6896_v57 = vpop.xlane.xlu2 %6895 }
 0xd16   :  { %7101 = vrot.lane.b32.xlu2 %v7096_v4, %s11199_s18  ;;  %v6898_v3 = vmul.f32 0.17677669, %v6896_v57 }
 0xd18   :  { %v6998_v18 = vmax.f32 %v6996_v49, %v6898_v3 }
 0xd1a   :  { %v7000_v10 = vsub.f32 %v6870_v47, %v6998_v18  ;;  %v7006_v11 = vsub.f32 %v6880_v61, %v6998_v18  ;;  %v7012_v30 = vsub.f32 %v6898_v3, %v6998_v18 }
 0xd1c   :  { %v7003_v12 = vmul.f32 1.442695, %v7000_v10  ;;  %v7009_v50 = vmul.f32 1.442695, %v7006_v11  ;;  %v7015_v22 = vmul.f32 1.442695, %v7012_v30 }
 0xd1e   :  { %10964 = vpow2.f32 %v7003_v12 }
 0xd1f   :  { %10966 = vpow2.f32 %v7009_v50 }
 0xd20   :  { %10968 = vpow2.f32 %v7015_v22 }
 0xd24   :  { %v12414_v15 = vpop.eup %10964 }
 0xd25   :  { %v10967_v35 = vpop.eup %10966 }
 0xd26   :  { %v10969_v21 = vpop.eup %10968  ;;  %v7018_v25 = vadd.f32 %v10967_v35, %v12414_v15  ;;  %v7026_v9 = vmul.f32 %v10967_v35, %v12331_v14 }
 0xd27   :  { %v7038_v29 = vmul.f32 %v10969_v21, %v12331_v14 }
 0xd28   :  { %v12419_v13 = vadd.f32 %v10969_v21, %v7018_v25  ;;  %7031 = vrot.lane.b32.xlu0 %v7026_v9, %s11197_s10  ;;  %v6989_v26 = vpop.xlane.xlu0 %6988 }
 0xd29   :  { %7043 = vrot.lane.b32.xlu1 %v7038_v29, %s11199_s18  ;;  %v6993_v39 = vmul.f32 0.17677669, %v6989_v26  ;;  %v7081_v29 = vmul.f32 %v12395_v16, %v12280_v23  ;;  %v7082_v16 = vmul.f32 %v12405_v5, %v12284_v41 }
 0xd30   :  { %7089 = vrot.lane.b32.xlu0 %v7084_v31, %s11197_s10 }
 0xd34   :  { %v6968_v20 = vpop.xlane.xlu2 %6967 }
 0xd35   :  { %v6970_v45 = vmul.f32 0.17677669, %v6968_v20 }
 0xd37   :  { %v7112_v8 = vmax.f32 %v6946_v52, %v6970_v45 }
 0xd41   :  { %v6965_v34 = vpop.xlane.xlu1 %6964 }
 0xd42   :  { %v6969_v46 = vmul.f32 0.17677669, %v6965_v34 }
 0xd44   :  { %v7111_v43 = vmax.f32 %v6945_v42, %v6969_v46 }
 0xd46   :  { %v7113_v40 = vmax.f32 %v7111_v43, %v6993_v39 }
 0xd48   :  { %v7115_v19 = vsub.f32 %v6945_v42, %v7113_v40  ;;  %v7121_v44 = vsub.f32 %v6969_v46, %v7113_v40  ;;  %v7127_v48 = vsub.f32 %v6993_v39, %v7113_v40 }
 0xd49   :  { %v6992_v53 = vpop.xlane.xlu1 %6991 }
 0xd4a   :  { %v7117_v58 = vmul.f32 1.442695, %v7115_v19  ;;  %v7123_v59 = vmul.f32 1.442695, %v7121_v44  ;;  %v7129_v63 = vmul.f32 1.442695, %v7127_v48 }
 0xd4b   :  { %v6994_v56 = vmul.f32 0.17677669, %v6992_v53  ;;  %v7030_v0 = vpop.permute.xlu2 %7029 }
 0xd4c   :  { %10970 = vpow2.f32 %v7123_v59  ;;  %v7035_v4 = vadd.f32 %v7030_v0, %v7023_v38 }
 0xd4d   :  { %10972 = vpow2.f32 %v7129_v63  ;;  %v7114_v1 = vmax.f32 %v7112_v8, %v6994_v56 }
 0xd4e   :  { %10974 = vpow2.f32 %v7117_v58 }
 0xd4f   :  { %v7116_v6 = vsub.f32 %v6946_v52, %v7114_v1  ;;  %v7122_v2 = vsub.f32 %v6970_v45, %v7114_v1  ;;  %v7128_v37 = vsub.f32 %v6994_v56, %v7114_v1  ;;  %10976 = vrcp.f32 %v12392_v28 }
 0xd51   :  { %v7119_v61 = vmul.f32 1.442695, %v7116_v6  ;;  %v7125_v62 = vmul.f32 1.442695, %v7122_v2  ;;  %v7131_v7 = vmul.f32 1.442695, %v7128_v37 }
 0xd52   :  { %v10971_v47 = vpop.eup %10970 }
 0xd53   :  { %v10973_v57 = vpop.eup %10972  ;;  %10978 = vpow2.f32 %v7119_v61  ;;  %v7042_v49 = vpop.permute.xlu2 %7041  ;;  %v7141_v3 = vmul.f32 %v10971_v47, %v12320_v51 }
 0xd54   :  { %v10975_v18 = vpop.eup %10974  ;;  %10980 = vpow2.f32 %v7125_v62  ;;  %v7047_v10 = vadd.f32 %v7042_v49, %v7035_v4  ;;  %v7153_v11 = vmul.f32 %v10973_v57, %v12320_v51 }
 0xd55   :  { %v10977_v30 = vpop.eup %10976  ;;  %10982 = vpow2.f32 %v7131_v7  ;;  %7145 = vrot.lane.b32.xlu1 %v7141_v3, %s11197_s10  ;;  %v7133_v24 = vadd.f32 %v10975_v18, %v10971_v47 }
 0xd56   :  { %v7049_v28 = vmul.f32 %v10977_v30, %v7047_v10  ;;  %7157 = vrot.lane.b32.xlu2 %v7153_v11, %s11199_s18  ;;  %10984 = vrcp.f32 %v12401_v32 }
 0xd57   :  { %v7135_v12 = vadd.f32 %v10973_v57, %v7133_v24  ;;  %10986 = vrcp.f32 %v12419_v13 }
 0xd58   :  { %10988 = vrcp.f32 %v12411_v55  ;;  %v7051_v55 = vadd.f32 %v7049_v28, %v12280_v23 }
 0xd59   :  { %v10979_v50 = vpop.eup %10978  ;;  %10990 = vrcp.f32 %v7135_v12 }
 0xd5a   :  { %v10981_v22 = vpop.eup %10980  ;;  %v7140_v5 = vmul.f32 %v10979_v50, %v12284_v41 }
 0xd5b   :  { %v10983_v35 = vpop.eup %10982  ;;  %v7142_v21 = vmul.f32 %v10981_v22, %v12331_v14  ;;  %v7134_v25 = vadd.f32 %v10981_v22, %v10979_v50 }
 0xd5c   :  { %v7154_v9 = vmul.f32 %v10983_v35, %v12331_v14  ;;  %v10985_v42 = vpop.eup %10984  ;;  %v7024_v14 = vmul.f32 %v12414_v15, %v12284_v41  ;;  %v7139_v15 = vmul.f32 %v10975_v18, %v12280_v23 }
 0xd5d   :  { %7147 = vrot.lane.b32.xlu0 %v7142_v21, %s11197_s10  ;;  %v7136_v51 = vadd.f32 %v10983_v35, %v7134_v25  ;;  %v10987_v45 = vpop.eup %10986 }
 0xd5e   :  { %7159 = vrot.lane.b32.xlu1 %v7154_v9, %s11199_s18  ;;  %v10989_v53 = vpop.eup %10988 }
 0xd5f   :  { %v10991_v0 = vpop.eup %10990  ;;  %10992 = vrcp.f32 %v7136_v51 }
 0xd6f   :  { %v7088_v31 = vpop.permute.xlu1 %7087 }
 0xd70   :  { %v7093_v17 = vadd.f32 %v7088_v31, %v7081_v29  ;;  %v7100_v26 = vpop.permute.xlu0 %7099  ;;  %v7102_v48 = vpop.permute.xlu2 %7101 }
 0xd72   :  { %v7105_v34 = vadd.f32 %v7100_v26, %v7093_v17 }
 0xd74   :  { %v7107_v46 = vmul.f32 %v10985_v42, %v7105_v34 }
 0xd76   :  { %v7109_v56 = vadd.f32 %v7107_v46, %v12362_v60  ;;  %v10993_v60 = vpop.eup %10992  ;;  %v12484_v46 = vperm.slane %v12317_v27, 2 }
 0xd78   :  { %v7169_v2 = vadd.f32 %v7109_v56, %v7051_v55 }
 0xd9a   :  { %v7032_v20 = vpop.permute.xlu0 %7031 }
 0xd9b   :  { %v7036_v39 = vadd.f32 %v7032_v20, %v7024_v14  ;;  %v7044_v43 = vpop.permute.xlu1 %7043 }
 0xd9d   :  { %v7048_v40 = vadd.f32 %v7044_v43, %v7036_v39  ;;  %v12490_v39 = vperm.slane %v12317_v27, 3 }
 0xd9f   :  { %v7050_v32 = vmul.f32 %v10987_v45, %v7048_v40 }
 0xda1   :  { %v7052_v23 = vadd.f32 %v7050_v32, %v12284_v41 }
 0xda2   :  { %v7090_v19 = vpop.permute.xlu0 %7089 }
 0xda3   :  { %v7094_v44 = vadd.f32 %v7090_v19, %v7082_v16  ;;  %v10835_v19 = vld [vmem:[#allocation11 + $0xa08] sm:$0xff] }
 0xda4   :  { %7431 = vmatpush.bf16.msrb.mxu2 %v10835_v19 }
 0xda5   :  { %v7106_v52 = vadd.f32 %v7102_v48, %v7094_v44 }
 0xda7   :  { %v7108_v13 = vmul.f32 %v10989_v53, %v7106_v52  ;;  %v10834_v52 = vld [vmem:[#allocation11 + $0xa00] sm:$0xff] }
 0xda8   :  { %7432 = vmatpush.bf16.msrb.mxu2 %v10834_v52 }
 0xda9   :  { %v7110_v47 = vadd.f32 %v7108_v13, %v12354_v33 }
 0xdab   :  { %v7170_v49 = vadd.f32 %v7110_v47, %v7052_v23 }
 0xdb0   :  { %v7158_v63 = vpop.permute.xlu2 %7157 }
 0xdc7   :  { %v7146_v58 = vpop.permute.xlu1 %7145 }
 0xdc8   :  { %v7151_v59 = vadd.f32 %v7146_v58, %v7139_v15  ;;  %v10833_v58 = vld [vmem:[#allocation11 + $0x9f8] sm:$0xff] }
 0xdc9   :  { %7433 = vmatpush.bf16.msrb.mxu2 %v10833_v58 }
 0xdca   :  { %v7163_v8 = vadd.f32 %v7158_v63, %v7151_v59 }
 0xdcc   :  { %v7165_v1 = vmul.f32 %v10991_v0, %v7163_v8  ;;  %v10832_v8 = vld [vmem:[#allocation11 + $0x9f0] sm:$0xff] }
 0xdcd   :  { %7434 = vmatpush.bf16.msrb.mxu2 %v10832_v8 }
 0xdce   :  { %v7167_v6 = vadd.f32 %v7165_v1, %v12348_v54 }
 0xdcf   :  { %v7148_v37 = vpop.permute.xlu0 %7147 }
 0xdd0   :  { %v7152_v38 = vadd.f32 %v7148_v37, %v7140_v5  ;;  %v7160_v61 = vpop.permute.xlu1 %7159  ;;  %v7171_v62 = vadd.f32 %v7169_v2, %v7167_v6  ;;  %v10831_v5 = vld [vmem:[#allocation11 + $0x9e8] sm:$0xff] }
 0xdd1   :  { %7435 = vmatpush.bf16.msrb.mxu2 %v10831_v5 }
 0xdd2   :  { %v7164_v7 = vadd.f32 %v7160_v61, %v7152_v38  ;;  %7175 = vrot.lane.b32.xlu0 %v7171_v62, %s11193_s4 }
 0xdd4   :  { %v7166_v4 = vmul.f32 %v10993_v60, %v7164_v7 }
 0xdd6   :  { %v7168_v57 = vadd.f32 %v7166_v4, %v12368_v36 }
 0xdd8   :  { %v7172_v3 = vadd.f32 %v7170_v49, %v7168_v57 }
 0xdda   :  { %7177 = vrot.lane.b32.xlu2 %v7172_v3, %s11193_s4 }
 0xe34   :  { %v7178_v54 = vpop.permute.xlu2 %7177 }
 0xe35   :  { %v7184_v18 = vsel %vm5002_vm4, %v7178_v54, 0.0 }
 0xe36   :  { %7185 = vadd.xlane.f32.xlu0 %v7184_v18 }
 0xe44   :  { %v7176_v10 = vpop.permute.xlu0 %7175 }
 0xe45   :  { %v7181_v11 = vsel %vm5002_vm4, %v7176_v10, 0.0 }
 0xe46   :  { %7182 = vadd.xlane.f32.xlu1 %v7181_v11 }
 0xe4a   :  { %7247 = vrot.lane.b32.xlu0 %v12484_v46, %s11193_s4 }
 0xe52   :  { %7266 = vrot.lane.b32.xlu0 %v12490_v39, %s11197_s10 }
 0xea9   :  { %v7186_v30 = vpop.xlane.xlu0 %7185 }
 0xeaa   :  { %v7188_v24 = vmul.f32 0.010416667, %v7186_v30 }
 0xeac   :  { %v12463_v50 = vsub.f32 %v7052_v23, %v7188_v24  ;;  %v12465_v22 = vsub.f32 %v7110_v47, %v7188_v24  ;;  %v12477_v17 = vsub.f32 %v7168_v57, %v7188_v24 }
 0xeae   :  { %v7192_v29 = vmul.f32 %v12463_v50, %v12463_v50  ;;  %v7196_v31 = vmul.f32 %v12465_v22, %v12465_v22  ;;  %v7202_v34 = vmul.f32 %v12477_v17, %v12477_v17 }
 0xeb0   :  { %v7198_v26 = vadd.f32 %v7196_v31, %v7192_v29 }
 0xeb2   :  { %v7204_v42 = vadd.f32 %v7202_v34, %v7198_v26 }
 0xeb9   :  { %v7183_v33 = vpop.xlane.xlu1 %7182 }
 0xeba   :  { %v7187_v28 = vmul.f32 0.010416667, %v7183_v33 }
 0xebc   :  { %v12457_v12 = vsub.f32 %v7051_v55, %v7187_v28  ;;  %v12459_v41 = vsub.f32 %v7109_v56, %v7187_v28  ;;  %v12461_v36 = vsub.f32 %v7167_v6, %v7187_v28  ;;  %v7248_v2 = vpop.permute.xlu0 %7247 }
 0xebe   :  { %v7191_v35 = vmul.f32 %v12457_v12, %v12457_v12  ;;  %v7195_v21 = vmul.f32 %v12459_v41, %v12459_v41  ;;  %v7201_v9 = vmul.f32 %v12461_v36, %v12461_v36 }
 0xec0   :  { %v7197_v25 = vadd.f32 %v7195_v21, %v7191_v35 }
 0xec2   :  { %v7203_v51 = vadd.f32 %v7201_v9, %v7197_v25 }
 0xec4   :  { %7207 = vrot.lane.b32.xlu2 %v7203_v51, %s11193_s4  ;;  %v7267_v49 = vpop.permute.xlu0 %7266 }
 0xecc   :  { %7209 = vrot.lane.b32.xlu2 %v7204_v42, %s11193_s4 }
 0xf1e   :  { %v7208_v14 = vpop.permute.xlu2 %7207 }
 0xf1f   :  { %v7213_v20 = vsel %vm5002_vm4, %v7208_v14, 0.0 }
 0xf20   :  { %7214 = vadd.xlane.f32.xlu2 %v7213_v20 }
 0xf26   :  { %v7210_v43 = vpop.permute.xlu2 %7209 }
 0xf27   :  { %v7216_v40 = vsel %vm5002_vm4, %v7210_v43, 0.0 }
 0xf28   :  { %7217 = vadd.xlane.f32.xlu1 %v7216_v40  ;;  %v7424_v40 = vpop.f32.mrf.mxu0 }
 0xf38   :  { %7254 = vrot.lane.b32.xlu2 %v12490_v39, %s11193_s4 }
 0xf41   :  { %7261 = vrot.lane.b32.xlu1 %v12484_v46, %s11197_s10 }
 0xf93   :  { %v7215_v45 = vpop.xlane.xlu2 %7214 }
 0xf94   :  { %v7219_v32 = vmul.f32 0.010416667, %v7215_v45  ;;  %v7326_v45 = vperm.slane %v12317_v27, 1 }
 0xf96   :  { %v7221_v16 = vadd.f32 1e-05, %v7219_v32  ;;  %v7425_v32 = vadd.f32 %v7424_v40, %v7326_v45 }
 0xf98   :  { %10994 = vrsqrt.f32 %v7221_v16  ;;  %vm7229_vm2 = vweird.f32 %v7221_v16 }
 0xf9b   :  { %v7218_v44 = vpop.xlane.xlu1 %7217  ;;  %v7255_v3 = vpop.permute.xlu2 %7254 }
 0xf9c   :  { %v7220_v48 = vmul.f32 0.010416667, %v7218_v44  ;;  %v7426_v44 = vpop.f32.mrf.mxu0 }
 0xf9e   :  { %v10995_v53 = vpop.eup %10994  ;;  %v7222_v13 = vadd.f32 1e-05, %v7220_v48 }
 0xf9f   :  { %v7224_v15 = vmul.f32 %v10995_v53, %v7221_v16  ;;  %vm7230_vm1 = vweird.f32 %v10995_v53 }
 0xfa0   :  { %10996 = vrsqrt.f32 %v7222_v13  ;;  %vm7231_vm3 = vmor %vm7229_vm2, %vm7230_vm1  ;;  %vm7239_vm15 = vweird.f32 %v7222_v13 }
 0xfa1   :  { %v7225_v59 = vmul.f32 %v10995_v53, %v7224_v15 }
 0xfa3   :  { %v7226_v63 = vmul.f32 0.5, %v7225_v59 }
 0xfa5   :  { %v7227_v56 = vsub.f32 1.5, %v7226_v63 }
 0xfa6   :  { %v10997_v0 = vpop.eup %10996 }
 0xfa7   :  { %v7234_v55 = vmul.f32 %v10997_v0, %v7222_v13  ;;  %v7228_v1 = vmul.f32 %v10995_v53, %v7227_v56  ;;  %vm7240_vm8 = vweird.f32 %v10997_v0 }
 0xfa8   :  { %vm7241_vm11 = vmor %vm7239_vm15, %vm7240_vm8 }
 0xfa9   :  { %v7235_v6 = vmul.f32 %v10997_v0, %v7234_v55  ;;  %v7232_v38 = vsel %vm7231_vm3, %v10995_v53, %v7228_v1 }
 0xfaa   :  { %v7243_v62 = vmul.f32 %v7232_v38, %v12457_v12  ;;  %v7259_v57 = vmul.f32 %v7232_v38, %v12459_v41  ;;  %v7271_v41 = vmul.f32 %v7232_v38, %v12461_v36 }
 0xfab   :  { %v7236_v37 = vmul.f32 0.5, %v7235_v6 }
 0xfac   :  { %v7250_v4 = vmul.f32 %v7248_v2, %v7243_v62  ;;  %v7273_v21 = vmul.f32 %v7271_v41, %v12484_v46 }
 0xfad   :  { %v7237_v61 = vsub.f32 1.5, %v7236_v37 }
 0xfae   :  { %v7257_v30 = vadd.f32 %v7255_v3, %v7250_v4  ;;  %v7275_v42 = vadd.f32 %v7273_v21, %v12490_v39 }
 0xfaf   :  { %v7238_v7 = vmul.f32 %v10997_v0, %v7237_v61 }
 0xfb1   :  { %v7242_v47 = vsel %vm7241_vm11, %v10997_v0, %v7238_v7 }
 0xfb2   :  { %v7244_v60 = vmul.f32 %v7242_v47, %v12463_v50  ;;  %v7260_v23 = vmul.f32 %v7242_v47, %v12465_v22  ;;  %v10830_v50 = vld [vmem:[#allocation11 + $0x9e0] sm:$0xff]  ;;  %v7272_v22 = vmul.f32 %v7242_v47, %v12477_v17 }
 0xfb3   :  { %v7262_v54 = vpop.permute.xlu1 %7261  ;;  %7436 = vmatpush.bf16.msrb.mxu2 %v10830_v50 }
 0xfb4   :  { %v7251_v18 = vmul.f32 %v7248_v2, %v7244_v60  ;;  %v7264_v10 = vmul.f32 %v7262_v54, %v7259_v57  ;;  %v7265_v11 = vmul.f32 %v7262_v54, %v7260_v23  ;;  %v7274_v25 = vmul.f32 %v7272_v22, %v12484_v46 }
 0xfb6   :  { %v7258_v33 = vadd.f32 %v7255_v3, %v7251_v18  ;;  %v7269_v24 = vadd.f32 %v7267_v49, %v7264_v10  ;;  %v7270_v28 = vadd.f32 %v7267_v49, %v7265_v11  ;;  %v7276_v14 = vadd.f32 %v7274_v25, %v12490_v39 }
 0xfb7   :  { %v7427_v39 = vadd.f32 %v7426_v44, %v7326_v45 }
 0xfb8   :  { %v10941_v12 = vpack.i.bf16 %v7270_v28, %v7269_v24  ;;  %v10936_v35 = vpack.i.bf16 %v7258_v33, %v7257_v30 }
 0xfba   :  { %10942 = vrot.lane.b32.xlu1 %v10941_v12, %s11199_s18  ;;  %10937 = vrot.lane.b32.xlu0 %v10936_v35, %s11193_s4  ;;  %s7449_s4 = sshll.u32 %s11200_s6, 4  ;;  %s7450_s4 = int_to_ptr.vmem [resolvable:$true] %s7449_s4 }
0x102c   :  { %v10943_v9 = vpop.permute.xlu1 %10942  ;;  %v10938_v51 = vpop.permute.xlu0 %10937 }
0x102d   :  { %v10945_v29 = vunpack.i.h.bf16 %v10943_v9  ;;  %v10944_v31 = vunpack.i.l.bf16 %v10943_v9  ;;  %v10940_v26 = vunpack.i.h.bf16 %v10938_v51  ;;  %v10939_v34 = vunpack.i.l.bf16 %v10938_v51 }
0x102f   :  { %v7294_v20 = vsel %vm5002_vm4, %v10940_v26, %v10945_v29  ;;  %v7293_v36 = vsel %vm5002_vm4, %v10939_v34, %v10944_v31 }
0x1030   :  { %v7296_v17 = vsel %vm5602_vm12, %v7294_v20, %v7276_v14  ;;  %v7295_v43 = vsel %vm5602_vm12, %v7293_v36, %v7275_v42 }
0x1031   :  { %v7325_v46 = vpack.c.bf16 %v7296_v17, %v7295_v43 }
0x1033   :  { %10179 = vmatmul.msk.bf16.vlgmr.msrb.gmra.mxu2 %vm7411_vm0, %v7325_v46 }
0x10b6   :  { %v7438_v16 = vpop.f32.mrf.mxu2 }
0x10b7   :  { %v7439_v19 = vadd.f32 %v7438_v16, %v7425_v32 }
0x10b9   :  { %7443 = vst [vmem:[#allocation13] sm:$0xff] %v7439_v19 }
0x10be   :  { %v7440_v48 = vpop.f32.mrf.mxu2 }
0x10bf   :  { %v7441_v52 = vadd.f32 %v7440_v48, %v7427_v39 }
0x10c1   :  { %7444 = vst [vmem:[#allocation13 + $0x8] sm:$0xff] %v7441_v52 }
0x10c2   :  { %7457 = dma.vmem_to_hbm [thread:$0]  %s7450_s4, 256, %s7452_s26, [#allocation4], %s11190_s29, %s11190_s29, %s11191_s30  }
0x10c3   :  { %11179 = dma.done.wait [#allocation4], 256  }
0x10c4   :  { %11180 = vsyncadd [#allocation4], 4294967040 }
0x10c5   :  { %7462 = vsyncpa [#allocation3], 1 }
0x10c6   :  { %7463 = vsyncpa [#allocation6], 1 }
0x10c7   :  { %7464 = vsyncpa [#allocation9], 1 }
0x10c8   :  { %7465 = vsyncpa [#allocation12], 1 }
0x10c9   :  { %7466 = vsyncpa [#allocation4], 1 }

</bundles_post_ra>
